<compile_context>
chip_gen: v7x
topology: tpu7x:2x2x1
jax: 0.10.0
libtpu: 0.0.40
codegen_flags: <defaults>
</compile_context>

<pallas_src>
import numpy as np
from functools import partial

import jax
import jax.numpy as jnp
from jax.experimental import pallas as pl
from jax.experimental.pallas import tpu as pltpu


# ---------------------------------------------------------------------------
# PyTorch-exact bilinear resize as a dense (n_out, n_in) matrix.
# ---------------------------------------------------------------------------
def _resize_matrix_1d(n_in, n_out, align_corners):
    out_idx = np.arange(n_out, dtype=np.float64)
    if align_corners:
        scale = 0.0 if n_out <= 1 else (n_in - 1) / (n_out - 1)
        src = out_idx * scale
    else:
        scale = n_in / n_out
        src = np.maximum((out_idx + 0.5) * scale - 0.5, 0.0)
    i0 = np.clip(np.floor(src).astype(np.int64), 0, n_in - 1)
    i1 = np.minimum(i0 + 1, n_in - 1)
    w1 = src - i0
    w0 = 1.0 - w1
    R = np.zeros((n_out, n_in), dtype=np.float64)
    R[np.arange(n_out), i0] += w0
    R[np.arange(n_out), i1] += w1
    return R


def _resize_matrix_2d(h_in, w_in, h_out, w_out, align_corners):
    return np.kron(_resize_matrix_1d(h_in, h_out, align_corners),
                   _resize_matrix_1d(w_in, w_out, align_corners))


# ---------------------------------------------------------------------------
# Fold one convfuse1 spatial tap into an already-composed resize matrix:
#   out[tap][p, o] = Rt[(y+dy)*W + (x+dx), p]   (0 for out-of-range taps),
# where o = y*W + x runs over the final (h, w) grid.
# ---------------------------------------------------------------------------
def _shifted_resize_T(Rt, H, W):
    HW, K = Rt.shape
    assert HW == H * W
    out = np.zeros((9, K, HW), dtype=np.float64)
    for kh in range(3):
        for kw in range(3):
            tap = kh * 3 + kw
            dy, dx = kh - 1, kw - 1
            M = np.zeros((HW, K), dtype=np.float64)
            for y in range(H):
                ys = y + dy
                if not 0 <= ys < H:
                    continue
                for x in range(W):
                    xs = x + dx
                    if 0 <= xs < W:
                        M[y * W + x, :] = Rt[ys * W + xs, :]
            out[tap] = M.T
    return out


# ---------------------------------------------------------------------------
# Deterministic parameter init (shapes from EDGAuX.__init__); BN pre-folded
# to per-channel scale/shift (eval mode).
# ---------------------------------------------------------------------------
def init_params(key, enc=(64, 128, 256, 512), num_classes=6):
    ks = jax.random.split(key, 10)
    eps = 1e-5

    def conv_w(k, kh, kw, cin, cout):
        std = (2.0 / (kh * kw * cin)) ** 0.5
        return std * jax.random.normal(k, (kh, kw, cin, cout), jnp.float32)

    def bn(k, c):
        k1, k2, k3, k4 = jax.random.split(k, 4)
        gamma = 1.0 + 0.1 * jax.random.normal(k1, (c,), jnp.float32)
        beta = 0.1 * jax.random.normal(k2, (c,), jnp.float32)
        mean = 0.1 * jax.random.normal(k3, (c,), jnp.float32)
        var = jax.random.uniform(k4, (c,), jnp.float32, minval=0.5, maxval=1.5)
        scale = gamma / jnp.sqrt(var + eps)
        shift = beta - mean * scale
        return scale, shift

    p = {}
    p["w1"] = conv_w(ks[0], 3, 3, enc[1], enc[0]); p["s1"], p["b1"] = bn(ks[1], enc[0])
    p["w2"] = conv_w(ks[2], 3, 3, enc[2], enc[0]); p["s2"], p["b2"] = bn(ks[3], enc[0])
    p["w3"] = conv_w(ks[4], 3, 3, enc[3], enc[0]); p["s3"], p["b3"] = bn(ks[5], enc[0])
    p["wfuse"] = conv_w(ks[6], 1, 1, enc[0] * 3, enc[0])[0, 0]      # (192, 64)
    p["wfuse1"] = conv_w(ks[7], 3, 3, enc[0], num_classes)          # (3,3,64,6)
    p["wedg"] = conv_w(ks[8], 1, 1, num_classes, 1)[0, 0]           # (6, 1)
    return p


# ---------------------------------------------------------------------------
# Host-side (one-time) folding of the linear graph into constant matrices.
# ---------------------------------------------------------------------------
def build_fused_params(p, in_hw=((8, 8), (4, 4), (2, 2)), h=32, w=32,
                       num_classes=6):
    assert num_classes <= 8
    (H2, W2), (H3, W3), (H4, W4) = in_hw
    Hm, Wm = 2 * H2, 2 * W2                       # spatial size after up2/4/8
    assert (Hm, Wm) == (4 * H3, 4 * W3) == (8 * H4, 8 * W4)

    w_br = [np.asarray(p["w1"]), np.asarray(p["w2"]), np.asarray(p["w3"])]
    s_br = [np.asarray(p["s1"]), np.asarray(p["s2"]), np.asarray(p["s3"])]
    b_br = [np.asarray(p["b1"]), np.asarray(p["b2"]), np.asarray(p["b3"])]
    wfuse = np.asarray(p["wfuse"])                # (192, 64)
    wfuse1 = np.asarray(p["wfuse1"])              # (3, 3, 64, nc)
    cm = wfuse.shape[1]                           # 64 mid channels

    Rf = _resize_matrix_2d(Hm, Wm, h, w, align_corners=False)   # (h*w, Hm*Wm)

    wrow, rmat, shifts = [], [], []
    for i, (Hi, Wi) in enumerate(in_hw):
        wi = w_br[i].astype(np.float64)           # (3,3,Cin,64) HWIO
        cin = wi.shape[2]
        # Stacked conv weights (Cout, 9*Cin), rows contract against the
        # wrapper-side im2col'd activations; folded-BN scale included.
        wr = np.transpose(wi, (3, 0, 1, 2)).reshape(cm, 9 * cin)
        wr = wr * s_br[i].astype(np.float64)[:, None]
        wrow.append(jnp.asarray(wr, jnp.bfloat16))
        # Composed resize (align_corners up_i -> final interpolate) with each
        # convfuse1 tap's spatial shift on the (h, w) grid baked in.
        Ri = _resize_matrix_2d(Hi, Wi, Hm, Wm, align_corners=True)
        Rt = Rf @ Ri                               # (h*w, Hi*Wi)
        rmat.append(jnp.asarray(_shifted_resize_T(Rt, h, w), jnp.bfloat16))
        shifts.append(b_br[i].astype(np.float64))

    # (convfuse branch-slice) @ (convfuse1 tap) folded weights, class rows
    # padded to 8 so per-tap row slices of pcl stay sublane-tile aligned.
    afold = np.zeros((3, 9 * 8, cm), dtype=np.float64)
    for i in range(3):
        Wi = wfuse[i * cm:(i + 1) * cm, :].astype(np.float64)    # (64, 64)
        for kh in range(3):
            for kw in range(3):
                tap = kh * 3 + kw
                A = Wi @ wfuse1[kh, kw].astype(np.float64)       # (64, nc)
                afold[i, tap * 8:tap * 8 + num_classes, :] = A.T

    arrays = {
        "wrow": wrow,                                       # bf16 (64, 9*Cin_i)
        "r": rmat,                                          # bf16 (9, Hi*Wi, h*w)
        "shift": jnp.asarray(np.stack(shifts)[:, :, None], jnp.float32),
        "afold": jnp.asarray(afold, jnp.bfloat16),          # (3, 72, 64)
        "wedg": jnp.asarray(np.asarray(p["wedg"]), jnp.float32),   # (6, 1)
    }
    return {"h": h, "w": w, "num_classes": num_classes, "arrays": arrays}


# ---------------------------------------------------------------------------
# Wrapper-side im2col (pure 0/1 gather; layout plumbing, not compute).
#   (B, C, H, W) -> (B, 9*C, H*W), rows ordered (tap, cin), tap = kh*3 + kw,
#   zero padding baked in.
# ---------------------------------------------------------------------------
def _im2col_nchw(x):
    B, C, H, W = x.shape
    xp = jnp.pad(x, ((0, 0), (0, 0), (1, 1), (1, 1)))
    taps = [xp[:, :, kh:kh + H, kw:kw + W]
            for kh in range(3) for kw in range(3)]
    return jnp.stack(taps, axis=1).reshape(B, 9 * C, H * W)


# ---------------------------------------------------------------------------
# The single fused Pallas kernel (one grid step per batch element).
# ---------------------------------------------------------------------------
def _edgaux_kernel(x2_ref, x3_ref, x4_ref,
                   w2_ref, w3_ref, w4_ref,
                   shift_ref, afold_ref,
                   r2_ref, r3_ref, r4_ref, wedg_ref,
                   feat_ref, few_ref):
    n_cls, hw_out = feat_ref.shape
    cb = afold_ref.shape[1] // 9                  # padded class block (8)

    acc = jnp.zeros((cb, hw_out), jnp.float32)    # tiny (8, 1024) accumulator

    def branch(i, x_ref, w_ref, r_ref, acc):
        # Fused 3x3 Conv + BN: ONE bf16 MXU matmul per branch (im2col'd
        # input), f32 accumulation.
        pre = jnp.dot(w_ref[...], x_ref[...],
                      preferred_element_type=jnp.float32)
        e = jnp.clip(pre + shift_ref[i], 0.0, 6.0).astype(jnp.bfloat16)
        # Folded (convfuse slice) x (convfuse1 tap) channel weights.
        pcl = jnp.dot(afold_ref[i], e, preferred_element_type=jnp.float32)
        # Composed up_i -> interpolate -> conv-tap-shift resize matrices.
        # (Kept per-tap: consolidating to one (8, 9*HW) @ (9*HW, 1024) call
        # needs a sublane->lane rearrangement of pcl, skipped for safety.)
        for tap in range(9):
            lhs = pcl[tap * cb:(tap + 1) * cb, :].astype(jnp.bfloat16)
            acc = acc + jnp.dot(lhs, r_ref[tap],
                                preferred_element_type=jnp.float32)
        return acc

    acc = branch(0, x2_ref, w2_ref, r2_ref, acc)
    acc = branch(1, x3_ref, w3_ref, r3_ref, acc)
    acc = branch(2, x4_ref, w4_ref, r4_ref, acc)

    # Numerically stable sigmoid heads (exact divide, no exp overflow).
    logits = acc[0:n_cls, :]
    z = jnp.exp(-jnp.abs(logits))
    feat = jnp.where(logits >= 0.0, 1.0, z) / (1.0 + z)
    feat_ref[...] = feat.astype(feat_ref.dtype)

    few_logit = jnp.sum(feat * wedg_ref[...], axis=0, keepdims=True)
    zz = jnp.exp(-jnp.abs(few_logit))
    few = jnp.where(few_logit >= 0.0, 1.0, zz) / (1.0 + zz)
    few_ref[...] = few.astype(few_ref.dtype)


@partial(jax.jit, static_argnames=("h", "w", "num_classes"))
def _edgaux_impl(arrs, x2, x3, x4, *, h, w, num_classes):
    B = x2.shape[0]
    hwo = h * w
    out_dtype = x2.dtype

    xim2 = _im2col_nchw(x2).astype(jnp.bfloat16)   # (B, 9*128, 64)
    xim3 = _im2col_nchw(x3).astype(jnp.bfloat16)   # (B, 9*256, 16)
    xim4 = _im2col_nchw(x4).astype(jnp.bfloat16)   # (B, 9*512, 4)

    w2, w3, w4 = arrs["wrow"]
    r2, r3, r4 = arrs["r"]
    shift, afold, wedg = arrs["shift"], arrs["afold"], arrs["wedg"]

    batch3 = lambda b: (b, 0, 0)
    const2 = lambda b: (0, 0)
    const3 = lambda b: (0, 0, 0)

    feat_flat, few_flat = pl.pallas_call(
        _edgaux_kernel,
        out_shape=(jax.ShapeDtypeStruct((B, num_classes, hwo), out_dtype),
                   jax.ShapeDtypeStruct((B, 1, hwo), out_dtype)),
        grid=(B,),
        in_specs=[
            pl.BlockSpec((None,) + xim2.shape[1:], batch3),
            pl.BlockSpec((None,) + xim3.shape[1:], batch3),
            pl.BlockSpec((None,) + xim4.shape[1:], batch3),
            pl.BlockSpec(w2.shape, const2),
            pl.BlockSpec(w3.shape, const2),
            pl.BlockSpec(w4.shape, const2),
            pl.BlockSpec(shift.shape, const3),
            pl.BlockSpec(afold.shape, const3),
            pl.BlockSpec(r2.shape, const3),
            pl.BlockSpec(r3.shape, const3),
            pl.BlockSpec(r4.shape, const3),
            pl.BlockSpec(wedg.shape, const2),
        ],
        out_specs=(pl.BlockSpec((None, num_classes, hwo), batch3),
                   pl.BlockSpec((None, 1, hwo), batch3)),
        compiler_params=pltpu.CompilerParams(
            dimension_semantics=("parallel",),
            vmem_limit_bytes=32 * 1024 * 1024),
    )(xim2, xim3, xim4, w2, w3, w4, shift, afold, r2, r3, r4, wedg)

    return (feat_flat.reshape(B, num_classes, h, w),
            few_flat.reshape(B, 1, h, w))


# ---------------------------------------------------------------------------
# EDGAuX.forward  (x1 is unused by the reference forward).
# TODO(synk): nn.Dropout(0.1) is identity in eval mode; training-mode RNG
#             dropout mask is not implemented.
# ---------------------------------------------------------------------------
def edgaux_forward(fp, x1, x2, x3, x4, h, w):
    del x1
    assert (h, w) == (fp["h"], fp["w"]), "fused params built for another size"
    return _edgaux_impl(fp["arrays"], x2, x3, x4,
                        h=h, w=w, num_classes=fp["num_classes"])


# ---------------------------------------------------------------------------
# Pure-JAX (XLA) reference of EDGAuX.forward (eval mode) for validation.
# ---------------------------------------------------------------------------
def _reference_forward(p, x2, x3, x4, h, w):
    def conv_bn_relu6(x, wgt, scale, shift):
        y = jax.lax.conv_general_dilated(
            x, wgt, window_strides=(1, 1), padding="SAME",
            dimension_numbers=("NCHW", "HWIO", "NCHW"))
        y = y * scale[None, :, None, None] + shift[None, :, None, None]
        return jnp.clip(y, 0.0, 6.0)

    def resize(x, h_out, w_out, align):
        B, C, H, W = x.shape
        R = jnp.asarray(_resize_matrix_2d(H, W, h_out, w_out, align),
                        jnp.float32)
        y = jnp.einsum("pq,bcq->bcp", R, x.reshape(B, C, H * W))
        return y.reshape(B, C, h_out, w_out)

    e2 = conv_bn_relu6(x2, p["w1"], p["s1"], p["b1"])
    e3 = conv_bn_relu6(x3, p["w2"], p["s2"], p["b2"])
    e4 = conv_bn_relu6(x4, p["w3"], p["s3"], p["b3"])
    Hm, Wm = 2 * e2.shape[2], 2 * e2.shape[3]
    feat = jnp.concatenate([resize(e2, Hm, Wm, True),
                            resize(e3, Hm, Wm, True),
                            resize(e4, Hm, Wm, True)], axis=1)
    feat = jnp.einsum("bchw,cd->bdhw", feat, p["wfuse"])
    feat = resize(feat, h, w, False)
    feat = jax.lax.conv_general_dilated(
        feat, p["wfuse1"], window_strides=(1, 1), padding="SAME",
        dimension_numbers=("NCHW", "HWIO", "NCHW"))
    feat = jax.nn.sigmoid(feat)
    few = jax.nn.sigmoid(jnp.einsum("bchw,cd->bdhw", feat, p["wedg"]))
    return feat, few


if __name__ == "__main__":
    key = jax.random.PRNGKey(0)
    k_in, k_par = jax.random.split(key)
    kx = jax.random.split(k_in, 4)

    B = 2
    enc = (64, 128, 256, 512)
    num_classes = 6
    h = w = 32

    # NCHW inputs (PyTorch convention); spatial sizes so up2/up4/up8 align.
    x1 = jax.random.normal(kx[0], (B, enc[0], 16, 16), jnp.float32)  # unused
    x2 = jax.random.normal(kx[1], (B, enc[1], 8, 8), jnp.float32)
    x3 = jax.random.normal(kx[2], (B, enc[2], 4, 4), jnp.float32)
    x4 = jax.random.normal(kx[3], (B, enc[3], 2, 2), jnp.float32)

    params = init_params(k_par, enc, num_classes)
    fused = build_fused_params(params, in_hw=((8, 8), (4, 4), (2, 2)),
                               h=h, w=w, num_classes=num_classes)

    feat, few = edgaux_forward(fused, x1, x2, x3, x4, h, w)
    jax.block_until_ready((feat, few))

    assert feat.shape == (B, num_classes, h, w), feat.shape
    assert few.shape == (B, 1, h, w), few.shape
    assert bool(jnp.isfinite(feat).all()) and bool(jnp.isfinite(few).all())

    # Validate the algebraic fusion (and bf16 operands) against pure-JAX ref.
    with jax.default_matmul_precision("highest"):
        ref_feat, ref_few = _reference_forward(params, x2, x3, x4, h, w)
    np.testing.assert_allclose(np.asarray(feat), np.asarray(ref_feat),
                               atol=5e-2, rtol=0)
    np.testing.assert_allclose(np.asarray(few), np.asarray(ref_few),
                               atol=5e-2, rtol=0)

    print("KERNEL_OK")
</pallas_src>

<mosaic_0001>
module attributes {stable_mosaic.version = 11 : i64} {
  func.func @_edgaux_kernel(%arg0: i32, %arg1: memref<1x1152x64xbf16, #tpu.memory_space<vmem>>, %arg2: memref<1x2304x16xbf16, #tpu.memory_space<vmem>>, %arg3: memref<1x4608x4xbf16, #tpu.memory_space<vmem>>, %arg4: memref<64x1152xbf16, #tpu.memory_space<vmem>>, %arg5: memref<64x2304xbf16, #tpu.memory_space<vmem>>, %arg6: memref<64x4608xbf16, #tpu.memory_space<vmem>>, %arg7: memref<3x64x1xf32, #tpu.memory_space<vmem>>, %arg8: memref<3x72x64xbf16, #tpu.memory_space<vmem>>, %arg9: memref<9x64x1024xbf16, #tpu.memory_space<vmem>>, %arg10: memref<9x16x1024xbf16, #tpu.memory_space<vmem>>, %arg11: memref<9x4x1024xbf16, #tpu.memory_space<vmem>>, %arg12: memref<6x1xf32, #tpu.memory_space<vmem>>, %arg13: memref<1x6x1024xf32, #tpu.memory_space<vmem>>, %arg14: memref<1x1x1024xf32, #tpu.memory_space<vmem>>) attributes {dimension_semantics = [#tpu.dimension_semantics<parallel>], iteration_bounds = array<i64: 2>, scalar_prefetch = 0 : i64, scratch_operands = 0 : i64, tpu.core_type = #tpu.core_type<tc>, window_params = [{transform_indices = @transform_0, window_bounds = array<i64: 1, 1152, 64>}, {transform_indices = @transform_1, window_bounds = array<i64: 1, 2304, 16>}, {transform_indices = @transform_2, window_bounds = array<i64: 1, 4608, 4>}, {pipeline_mode = #tpu.pipeline_mode<synchronous>, transform_indices = @transform_3, window_bounds = array<i64: 64, 1152>}, {pipeline_mode = #tpu.pipeline_mode<synchronous>, transform_indices = @transform_4, window_bounds = array<i64: 64, 2304>}, {pipeline_mode = #tpu.pipeline_mode<synchronous>, transform_indices = @transform_5, window_bounds = array<i64: 64, 4608>}, {pipeline_mode = #tpu.pipeline_mode<synchronous>, transform_indices = @transform_6, window_bounds = array<i64: 3, 64, 1>}, {pipeline_mode = #tpu.pipeline_mode<synchronous>, transform_indices = @transform_7, window_bounds = array<i64: 3, 72, 64>}, {pipeline_mode = #tpu.pipeline_mode<synchronous>, transform_indices = @transform_8, window_bounds = array<i64: 9, 64, 1024>}, {pipeline_mode = #tpu.pipeline_mode<synchronous>, transform_indices = @transform_9, window_bounds = array<i64: 9, 16, 1024>}, {pipeline_mode = #tpu.pipeline_mode<synchronous>, transform_indices = @transform_10, window_bounds = array<i64: 9, 4, 1024>}, {pipeline_mode = #tpu.pipeline_mode<synchronous>, transform_indices = @transform_11, window_bounds = array<i64: 6, 1>}, {transform_indices = @transform_12, window_bounds = array<i64: 1, 6, 1024>}, {transform_indices = @transform_13, window_bounds = array<i64: 1, 1, 1024>}]} {
    %cst = arith.constant 0.000000e+00 : f32
    %0 = vector.broadcast %cst : f32 to vector<8x1024xf32>
    %c0 = arith.constant 0 : index
    %c0_0 = arith.constant 0 : index
    %1 = vector.load %arg4[%c0, %c0_0] : memref<64x1152xbf16, #tpu.memory_space<vmem>>, vector<64x1152xbf16>
    %c0_1 = arith.constant 0 : index
    %c0_2 = arith.constant 0 : index
    %c0_3 = arith.constant 0 : index
    %2 = vector.load %arg1[%c0_1, %c0_2, %c0_3] : memref<1x1152x64xbf16, #tpu.memory_space<vmem>>, vector<1x1152x64xbf16>
    %3 = vector.shape_cast %2 : vector<1x1152x64xbf16> to vector<1152x64xbf16>
    %cst_4 = arith.constant dense<0.000000e+00> : vector<64x64xf32>
    %4 = tpu.matmul %1, %3, %cst_4 {dimension_numbers = #tpu.dot_dimension_numbers<[1], [0], [0], [1], [0, 0, 1, 1], [], []>} : vector<64x1152xbf16>, vector<1152x64xbf16>, vector<64x64xf32> -> vector<64x64xf32>
    %c0_5 = arith.constant 0 : index
    %c0_6 = arith.constant 0 : index
    %c0_7 = arith.constant 0 : index
    %5 = vector.load %arg7[%c0_5, %c0_6, %c0_7] : memref<3x64x1xf32, #tpu.memory_space<vmem>>, vector<1x64x1xf32>
    %6 = vector.shape_cast %5 : vector<1x64x1xf32> to vector<64x1xf32>
    %7 = vector.broadcast %6 : vector<64x1xf32> to vector<64x64xf32>
    %8 = arith.addf %4, %7 : vector<64x64xf32>
    %cst_8 = arith.constant 0.000000e+00 : f32
    %cst_9 = arith.constant 6.000000e+00 : f32
    %9 = vector.broadcast %cst_8 : f32 to vector<64x64xf32>
    %10 = arith.maximumf %9, %8 : vector<64x64xf32>
    %11 = vector.broadcast %cst_9 : f32 to vector<64x64xf32>
    %12 = arith.minimumf %11, %10 : vector<64x64xf32>
    %13 = arith.truncf %12 : vector<64x64xf32> to vector<64x64xbf16>
    %c0_10 = arith.constant 0 : index
    %c0_11 = arith.constant 0 : index
    %c0_12 = arith.constant 0 : index
    %14 = vector.load %arg8[%c0_10, %c0_11, %c0_12] : memref<3x72x64xbf16, #tpu.memory_space<vmem>>, vector<1x72x64xbf16>
    %15 = vector.shape_cast %14 : vector<1x72x64xbf16> to vector<72x64xbf16>
    %cst_13 = arith.constant dense<0.000000e+00> : vector<72x64xf32>
    %16 = tpu.matmul %15, %13, %cst_13 {dimension_numbers = #tpu.dot_dimension_numbers<[1], [0], [0], [1], [0, 0, 1, 1], [], []>} : vector<72x64xbf16>, vector<64x64xbf16>, vector<72x64xf32> -> vector<72x64xf32>
    %17 = vector.extract_strided_slice %16 {offsets = [0, 0], sizes = [8, 64], strides = [1, 1]} : vector<72x64xf32> to vector<8x64xf32>
    %18 = arith.truncf %17 : vector<8x64xf32> to vector<8x64xbf16>
    %c0_14 = arith.constant 0 : index
    %c0_15 = arith.constant 0 : index
    %c0_16 = arith.constant 0 : index
    %19 = vector.load %arg9[%c0_14, %c0_15, %c0_16] : memref<9x64x1024xbf16, #tpu.memory_space<vmem>>, vector<1x64x1024xbf16>
    %20 = vector.shape_cast %19 : vector<1x64x1024xbf16> to vector<64x1024xbf16>
    %cst_17 = arith.constant dense<0.000000e+00> : vector<8x1024xf32>
    %21 = tpu.matmul %18, %20, %cst_17 {dimension_numbers = #tpu.dot_dimension_numbers<[1], [0], [0], [1], [0, 0, 1, 1], [], []>} : vector<8x64xbf16>, vector<64x1024xbf16>, vector<8x1024xf32> -> vector<8x1024xf32>
    %22 = arith.addf %0, %21 : vector<8x1024xf32>
    %23 = vector.extract_strided_slice %16 {offsets = [8, 0], sizes = [8, 64], strides = [1, 1]} : vector<72x64xf32> to vector<8x64xf32>
    %24 = arith.truncf %23 : vector<8x64xf32> to vector<8x64xbf16>
    %c1 = arith.constant 1 : index
    %c0_18 = arith.constant 0 : index
    %c0_19 = arith.constant 0 : index
    %25 = vector.load %arg9[%c1, %c0_18, %c0_19] : memref<9x64x1024xbf16, #tpu.memory_space<vmem>>, vector<1x64x1024xbf16>
    %26 = vector.shape_cast %25 : vector<1x64x1024xbf16> to vector<64x1024xbf16>
    %cst_20 = arith.constant dense<0.000000e+00> : vector<8x1024xf32>
    %27 = tpu.matmul %24, %26, %cst_20 {dimension_numbers = #tpu.dot_dimension_numbers<[1], [0], [0], [1], [0, 0, 1, 1], [], []>} : vector<8x64xbf16>, vector<64x1024xbf16>, vector<8x1024xf32> -> vector<8x1024xf32>
    %28 = arith.addf %22, %27 : vector<8x1024xf32>
    %29 = vector.extract_strided_slice %16 {offsets = [16, 0], sizes = [8, 64], strides = [1, 1]} : vector<72x64xf32> to vector<8x64xf32>
    %30 = arith.truncf %29 : vector<8x64xf32> to vector<8x64xbf16>
    %c2 = arith.constant 2 : index
    %c0_21 = arith.constant 0 : index
    %c0_22 = arith.constant 0 : index
    %31 = vector.load %arg9[%c2, %c0_21, %c0_22] : memref<9x64x1024xbf16, #tpu.memory_space<vmem>>, vector<1x64x1024xbf16>
    %32 = vector.shape_cast %31 : vector<1x64x1024xbf16> to vector<64x1024xbf16>
    %cst_23 = arith.constant dense<0.000000e+00> : vector<8x1024xf32>
    %33 = tpu.matmul %30, %32, %cst_23 {dimension_numbers = #tpu.dot_dimension_numbers<[1], [0], [0], [1], [0, 0, 1, 1], [], []>} : vector<8x64xbf16>, vector<64x1024xbf16>, vector<8x1024xf32> -> vector<8x1024xf32>
    %34 = arith.addf %28, %33 : vector<8x1024xf32>
    %35 = vector.extract_strided_slice %16 {offsets = [24, 0], sizes = [8, 64], strides = [1, 1]} : vector<72x64xf32> to vector<8x64xf32>
    %36 = arith.truncf %35 : vector<8x64xf32> to vector<8x64xbf16>
    %c3 = arith.constant 3 : index
    %c0_24 = arith.constant 0 : index
    %c0_25 = arith.constant 0 : index
    %37 = vector.load %arg9[%c3, %c0_24, %c0_25] : memref<9x64x1024xbf16, #tpu.memory_space<vmem>>, vector<1x64x1024xbf16>
    %38 = vector.shape_cast %37 : vector<1x64x1024xbf16> to vector<64x1024xbf16>
    %cst_26 = arith.constant dense<0.000000e+00> : vector<8x1024xf32>
    %39 = tpu.matmul %36, %38, %cst_26 {dimension_numbers = #tpu.dot_dimension_numbers<[1], [0], [0], [1], [0, 0, 1, 1], [], []>} : vector<8x64xbf16>, vector<64x1024xbf16>, vector<8x1024xf32> -> vector<8x1024xf32>
    %40 = arith.addf %34, %39 : vector<8x1024xf32>
    %41 = vector.extract_strided_slice %16 {offsets = [32, 0], sizes = [8, 64], strides = [1, 1]} : vector<72x64xf32> to vector<8x64xf32>
    %42 = arith.truncf %41 : vector<8x64xf32> to vector<8x64xbf16>
    %c4 = arith.constant 4 : index
    %c0_27 = arith.constant 0 : index
    %c0_28 = arith.constant 0 : index
    %43 = vector.load %arg9[%c4, %c0_27, %c0_28] : memref<9x64x1024xbf16, #tpu.memory_space<vmem>>, vector<1x64x1024xbf16>
    %44 = vector.shape_cast %43 : vector<1x64x1024xbf16> to vector<64x1024xbf16>
    %cst_29 = arith.constant dense<0.000000e+00> : vector<8x1024xf32>
    %45 = tpu.matmul %42, %44, %cst_29 {dimension_numbers = #tpu.dot_dimension_numbers<[1], [0], [0], [1], [0, 0, 1, 1], [], []>} : vector<8x64xbf16>, vector<64x1024xbf16>, vector<8x1024xf32> -> vector<8x1024xf32>
    %46 = arith.addf %40, %45 : vector<8x1024xf32>
    %47 = vector.extract_strided_slice %16 {offsets = [40, 0], sizes = [8, 64], strides = [1, 1]} : vector<72x64xf32> to vector<8x64xf32>
    %48 = arith.truncf %47 : vector<8x64xf32> to vector<8x64xbf16>
    %c5 = arith.constant 5 : index
    %c0_30 = arith.constant 0 : index
    %c0_31 = arith.constant 0 : index
    %49 = vector.load %arg9[%c5, %c0_30, %c0_31] : memref<9x64x1024xbf16, #tpu.memory_space<vmem>>, vector<1x64x1024xbf16>
    %50 = vector.shape_cast %49 : vector<1x64x1024xbf16> to vector<64x1024xbf16>
    %cst_32 = arith.constant dense<0.000000e+00> : vector<8x1024xf32>
    %51 = tpu.matmul %48, %50, %cst_32 {dimension_numbers = #tpu.dot_dimension_numbers<[1], [0], [0], [1], [0, 0, 1, 1], [], []>} : vector<8x64xbf16>, vector<64x1024xbf16>, vector<8x1024xf32> -> vector<8x1024xf32>
    %52 = arith.addf %46, %51 : vector<8x1024xf32>
    %53 = vector.extract_strided_slice %16 {offsets = [48, 0], sizes = [8, 64], strides = [1, 1]} : vector<72x64xf32> to vector<8x64xf32>
    %54 = arith.truncf %53 : vector<8x64xf32> to vector<8x64xbf16>
    %c6 = arith.constant 6 : index
    %c0_33 = arith.constant 0 : index
    %c0_34 = arith.constant 0 : index
    %55 = vector.load %arg9[%c6, %c0_33, %c0_34] : memref<9x64x1024xbf16, #tpu.memory_space<vmem>>, vector<1x64x1024xbf16>
    %56 = vector.shape_cast %55 : vector<1x64x1024xbf16> to vector<64x1024xbf16>
    %cst_35 = arith.constant dense<0.000000e+00> : vector<8x1024xf32>
    %57 = tpu.matmul %54, %56, %cst_35 {dimension_numbers = #tpu.dot_dimension_numbers<[1], [0], [0], [1], [0, 0, 1, 1], [], []>} : vector<8x64xbf16>, vector<64x1024xbf16>, vector<8x1024xf32> -> vector<8x1024xf32>
    %58 = arith.addf %52, %57 : vector<8x1024xf32>
    %59 = vector.extract_strided_slice %16 {offsets = [56, 0], sizes = [8, 64], strides = [1, 1]} : vector<72x64xf32> to vector<8x64xf32>
    %60 = arith.truncf %59 : vector<8x64xf32> to vector<8x64xbf16>
    %c7 = arith.constant 7 : index
    %c0_36 = arith.constant 0 : index
    %c0_37 = arith.constant 0 : index
    %61 = vector.load %arg9[%c7, %c0_36, %c0_37] : memref<9x64x1024xbf16, #tpu.memory_space<vmem>>, vector<1x64x1024xbf16>
    %62 = vector.shape_cast %61 : vector<1x64x1024xbf16> to vector<64x1024xbf16>
    %cst_38 = arith.constant dense<0.000000e+00> : vector<8x1024xf32>
    %63 = tpu.matmul %60, %62, %cst_38 {dimension_numbers = #tpu.dot_dimension_numbers<[1], [0], [0], [1], [0, 0, 1, 1], [], []>} : vector<8x64xbf16>, vector<64x1024xbf16>, vector<8x1024xf32> -> vector<8x1024xf32>
    %64 = arith.addf %58, %63 : vector<8x1024xf32>
    %65 = vector.extract_strided_slice %16 {offsets = [64, 0], sizes = [8, 64], strides = [1, 1]} : vector<72x64xf32> to vector<8x64xf32>
    %66 = arith.truncf %65 : vector<8x64xf32> to vector<8x64xbf16>
    %c8 = arith.constant 8 : index
    %c0_39 = arith.constant 0 : index
    %c0_40 = arith.constant 0 : index
    %67 = vector.load %arg9[%c8, %c0_39, %c0_40] : memref<9x64x1024xbf16, #tpu.memory_space<vmem>>, vector<1x64x1024xbf16>
    %68 = vector.shape_cast %67 : vector<1x64x1024xbf16> to vector<64x1024xbf16>
    %cst_41 = arith.constant dense<0.000000e+00> : vector<8x1024xf32>
    %69 = tpu.matmul %66, %68, %cst_41 {dimension_numbers = #tpu.dot_dimension_numbers<[1], [0], [0], [1], [0, 0, 1, 1], [], []>} : vector<8x64xbf16>, vector<64x1024xbf16>, vector<8x1024xf32> -> vector<8x1024xf32>
    %70 = arith.addf %64, %69 : vector<8x1024xf32>
    %c0_42 = arith.constant 0 : index
    %c0_43 = arith.constant 0 : index
    %71 = vector.load %arg5[%c0_42, %c0_43] : memref<64x2304xbf16, #tpu.memory_space<vmem>>, vector<64x2304xbf16>
    %c0_44 = arith.constant 0 : index
    %c0_45 = arith.constant 0 : index
    %c0_46 = arith.constant 0 : index
    %72 = vector.load %arg2[%c0_44, %c0_45, %c0_46] : memref<1x2304x16xbf16, #tpu.memory_space<vmem>>, vector<1x2304x16xbf16>
    %73 = vector.shape_cast %72 : vector<1x2304x16xbf16> to vector<2304x16xbf16>
    %cst_47 = arith.constant dense<0.000000e+00> : vector<64x16xf32>
    %74 = tpu.matmul %71, %73, %cst_47 {dimension_numbers = #tpu.dot_dimension_numbers<[1], [0], [0], [1], [0, 0, 1, 1], [], []>} : vector<64x2304xbf16>, vector<2304x16xbf16>, vector<64x16xf32> -> vector<64x16xf32>
    %c1_48 = arith.constant 1 : index
    %c0_49 = arith.constant 0 : index
    %c0_50 = arith.constant 0 : index
    %75 = vector.load %arg7[%c1_48, %c0_49, %c0_50] : memref<3x64x1xf32, #tpu.memory_space<vmem>>, vector<1x64x1xf32>
    %76 = vector.shape_cast %75 : vector<1x64x1xf32> to vector<64x1xf32>
    %77 = vector.broadcast %76 : vector<64x1xf32> to vector<64x16xf32>
    %78 = arith.addf %74, %77 : vector<64x16xf32>
    %cst_51 = arith.constant 0.000000e+00 : f32
    %cst_52 = arith.constant 6.000000e+00 : f32
    %79 = vector.broadcast %cst_51 : f32 to vector<64x16xf32>
    %80 = arith.maximumf %79, %78 : vector<64x16xf32>
    %81 = vector.broadcast %cst_52 : f32 to vector<64x16xf32>
    %82 = arith.minimumf %81, %80 : vector<64x16xf32>
    %83 = arith.truncf %82 : vector<64x16xf32> to vector<64x16xbf16>
    %c1_53 = arith.constant 1 : index
    %c0_54 = arith.constant 0 : index
    %c0_55 = arith.constant 0 : index
    %84 = vector.load %arg8[%c1_53, %c0_54, %c0_55] : memref<3x72x64xbf16, #tpu.memory_space<vmem>>, vector<1x72x64xbf16>
    %85 = vector.shape_cast %84 : vector<1x72x64xbf16> to vector<72x64xbf16>
    %cst_56 = arith.constant dense<0.000000e+00> : vector<72x16xf32>
    %86 = tpu.matmul %85, %83, %cst_56 {dimension_numbers = #tpu.dot_dimension_numbers<[1], [0], [0], [1], [0, 0, 1, 1], [], []>} : vector<72x64xbf16>, vector<64x16xbf16>, vector<72x16xf32> -> vector<72x16xf32>
    %87 = vector.extract_strided_slice %86 {offsets = [0, 0], sizes = [8, 16], strides = [1, 1]} : vector<72x16xf32> to vector<8x16xf32>
    %88 = arith.truncf %87 : vector<8x16xf32> to vector<8x16xbf16>
    %c0_57 = arith.constant 0 : index
    %c0_58 = arith.constant 0 : index
    %c0_59 = arith.constant 0 : index
    %89 = vector.load %arg10[%c0_57, %c0_58, %c0_59] : memref<9x16x1024xbf16, #tpu.memory_space<vmem>>, vector<1x16x1024xbf16>
    %90 = vector.shape_cast %89 : vector<1x16x1024xbf16> to vector<16x1024xbf16>
    %cst_60 = arith.constant dense<0.000000e+00> : vector<8x1024xf32>
    %91 = tpu.matmul %88, %90, %cst_60 {dimension_numbers = #tpu.dot_dimension_numbers<[1], [0], [0], [1], [0, 0, 1, 1], [], []>} : vector<8x16xbf16>, vector<16x1024xbf16>, vector<8x1024xf32> -> vector<8x1024xf32>
    %92 = arith.addf %70, %91 : vector<8x1024xf32>
    %93 = vector.extract_strided_slice %86 {offsets = [8, 0], sizes = [8, 16], strides = [1, 1]} : vector<72x16xf32> to vector<8x16xf32>
    %94 = arith.truncf %93 : vector<8x16xf32> to vector<8x16xbf16>
    %c1_61 = arith.constant 1 : index
    %c0_62 = arith.constant 0 : index
    %c0_63 = arith.constant 0 : index
    %95 = vector.load %arg10[%c1_61, %c0_62, %c0_63] : memref<9x16x1024xbf16, #tpu.memory_space<vmem>>, vector<1x16x1024xbf16>
    %96 = vector.shape_cast %95 : vector<1x16x1024xbf16> to vector<16x1024xbf16>
    %cst_64 = arith.constant dense<0.000000e+00> : vector<8x1024xf32>
    %97 = tpu.matmul %94, %96, %cst_64 {dimension_numbers = #tpu.dot_dimension_numbers<[1], [0], [0], [1], [0, 0, 1, 1], [], []>} : vector<8x16xbf16>, vector<16x1024xbf16>, vector<8x1024xf32> -> vector<8x1024xf32>
    %98 = arith.addf %92, %97 : vector<8x1024xf32>
    %99 = vector.extract_strided_slice %86 {offsets = [16, 0], sizes = [8, 16], strides = [1, 1]} : vector<72x16xf32> to vector<8x16xf32>
    %100 = arith.truncf %99 : vector<8x16xf32> to vector<8x16xbf16>
    %c2_65 = arith.constant 2 : index
    %c0_66 = arith.constant 0 : index
    %c0_67 = arith.constant 0 : index
    %101 = vector.load %arg10[%c2_65, %c0_66, %c0_67] : memref<9x16x1024xbf16, #tpu.memory_space<vmem>>, vector<1x16x1024xbf16>
    %102 = vector.shape_cast %101 : vector<1x16x1024xbf16> to vector<16x1024xbf16>
    %cst_68 = arith.constant dense<0.000000e+00> : vector<8x1024xf32>
    %103 = tpu.matmul %100, %102, %cst_68 {dimension_numbers = #tpu.dot_dimension_numbers<[1], [0], [0], [1], [0, 0, 1, 1], [], []>} : vector<8x16xbf16>, vector<16x1024xbf16>, vector<8x1024xf32> -> vector<8x1024xf32>
    %104 = arith.addf %98, %103 : vector<8x1024xf32>
    %105 = vector.extract_strided_slice %86 {offsets = [24, 0], sizes = [8, 16], strides = [1, 1]} : vector<72x16xf32> to vector<8x16xf32>
    %106 = arith.truncf %105 : vector<8x16xf32> to vector<8x16xbf16>
    %c3_69 = arith.constant 3 : index
    %c0_70 = arith.constant 0 : index
    %c0_71 = arith.constant 0 : index
    %107 = vector.load %arg10[%c3_69, %c0_70, %c0_71] : memref<9x16x1024xbf16, #tpu.memory_space<vmem>>, vector<1x16x1024xbf16>
    %108 = vector.shape_cast %107 : vector<1x16x1024xbf16> to vector<16x1024xbf16>
    %cst_72 = arith.constant dense<0.000000e+00> : vector<8x1024xf32>
    %109 = tpu.matmul %106, %108, %cst_72 {dimension_numbers = #tpu.dot_dimension_numbers<[1], [0], [0], [1], [0, 0, 1, 1], [], []>} : vector<8x16xbf16>, vector<16x1024xbf16>, vector<8x1024xf32> -> vector<8x1024xf32>
    %110 = arith.addf %104, %109 : vector<8x1024xf32>
    %111 = vector.extract_strided_slice %86 {offsets = [32, 0], sizes = [8, 16], strides = [1, 1]} : vector<72x16xf32> to vector<8x16xf32>
    %112 = arith.truncf %111 : vector<8x16xf32> to vector<8x16xbf16>
    %c4_73 = arith.constant 4 : index
    %c0_74 = arith.constant 0 : index
    %c0_75 = arith.constant 0 : index
    %113 = vector.load %arg10[%c4_73, %c0_74, %c0_75] : memref<9x16x1024xbf16, #tpu.memory_space<vmem>>, vector<1x16x1024xbf16>
    %114 = vector.shape_cast %113 : vector<1x16x1024xbf16> to vector<16x1024xbf16>
    %cst_76 = arith.constant dense<0.000000e+00> : vector<8x1024xf32>
    %115 = tpu.matmul %112, %114, %cst_76 {dimension_numbers = #tpu.dot_dimension_numbers<[1], [0], [0], [1], [0, 0, 1, 1], [], []>} : vector<8x16xbf16>, vector<16x1024xbf16>, vector<8x1024xf32> -> vector<8x1024xf32>
    %116 = arith.addf %110, %115 : vector<8x1024xf32>
    %117 = vector.extract_strided_slice %86 {offsets = [40, 0], sizes = [8, 16], strides = [1, 1]} : vector<72x16xf32> to vector<8x16xf32>
    %118 = arith.truncf %117 : vector<8x16xf32> to vector<8x16xbf16>
    %c5_77 = arith.constant 5 : index
    %c0_78 = arith.constant 0 : index
    %c0_79 = arith.constant 0 : index
    %119 = vector.load %arg10[%c5_77, %c0_78, %c0_79] : memref<9x16x1024xbf16, #tpu.memory_space<vmem>>, vector<1x16x1024xbf16>
    %120 = vector.shape_cast %119 : vector<1x16x1024xbf16> to vector<16x1024xbf16>
    %cst_80 = arith.constant dense<0.000000e+00> : vector<8x1024xf32>
    %121 = tpu.matmul %118, %120, %cst_80 {dimension_numbers = #tpu.dot_dimension_numbers<[1], [0], [0], [1], [0, 0, 1, 1], [], []>} : vector<8x16xbf16>, vector<16x1024xbf16>, vector<8x1024xf32> -> vector<8x1024xf32>
    %122 = arith.addf %116, %121 : vector<8x1024xf32>
    %123 = vector.extract_strided_slice %86 {offsets = [48, 0], sizes = [8, 16], strides = [1, 1]} : vector<72x16xf32> to vector<8x16xf32>
    %124 = arith.truncf %123 : vector<8x16xf32> to vector<8x16xbf16>
    %c6_81 = arith.constant 6 : index
    %c0_82 = arith.constant 0 : index
    %c0_83 = arith.constant 0 : index
    %125 = vector.load %arg10[%c6_81, %c0_82, %c0_83] : memref<9x16x1024xbf16, #tpu.memory_space<vmem>>, vector<1x16x1024xbf16>
    %126 = vector.shape_cast %125 : vector<1x16x1024xbf16> to vector<16x1024xbf16>
    %cst_84 = arith.constant dense<0.000000e+00> : vector<8x1024xf32>
    %127 = tpu.matmul %124, %126, %cst_84 {dimension_numbers = #tpu.dot_dimension_numbers<[1], [0], [0], [1], [0, 0, 1, 1], [], []>} : vector<8x16xbf16>, vector<16x1024xbf16>, vector<8x1024xf32> -> vector<8x1024xf32>
    %128 = arith.addf %122, %127 : vector<8x1024xf32>
    %129 = vector.extract_strided_slice %86 {offsets = [56, 0], sizes = [8, 16], strides = [1, 1]} : vector<72x16xf32> to vector<8x16xf32>
    %130 = arith.truncf %129 : vector<8x16xf32> to vector<8x16xbf16>
    %c7_85 = arith.constant 7 : index
    %c0_86 = arith.constant 0 : index
    %c0_87 = arith.constant 0 : index
    %131 = vector.load %arg10[%c7_85, %c0_86, %c0_87] : memref<9x16x1024xbf16, #tpu.memory_space<vmem>>, vector<1x16x1024xbf16>
    %132 = vector.shape_cast %131 : vector<1x16x1024xbf16> to vector<16x1024xbf16>
    %cst_88 = arith.constant dense<0.000000e+00> : vector<8x1024xf32>
    %133 = tpu.matmul %130, %132, %cst_88 {dimension_numbers = #tpu.dot_dimension_numbers<[1], [0], [0], [1], [0, 0, 1, 1], [], []>} : vector<8x16xbf16>, vector<16x1024xbf16>, vector<8x1024xf32> -> vector<8x1024xf32>
    %134 = arith.addf %128, %133 : vector<8x1024xf32>
    %135 = vector.extract_strided_slice %86 {offsets = [64, 0], sizes = [8, 16], strides = [1, 1]} : vector<72x16xf32> to vector<8x16xf32>
    %136 = arith.truncf %135 : vector<8x16xf32> to vector<8x16xbf16>
    %c8_89 = arith.constant 8 : index
    %c0_90 = arith.constant 0 : index
    %c0_91 = arith.constant 0 : index
    %137 = vector.load %arg10[%c8_89, %c0_90, %c0_91] : memref<9x16x1024xbf16, #tpu.memory_space<vmem>>, vector<1x16x1024xbf16>
    %138 = vector.shape_cast %137 : vector<1x16x1024xbf16> to vector<16x1024xbf16>
    %cst_92 = arith.constant dense<0.000000e+00> : vector<8x1024xf32>
    %139 = tpu.matmul %136, %138, %cst_92 {dimension_numbers = #tpu.dot_dimension_numbers<[1], [0], [0], [1], [0, 0, 1, 1], [], []>} : vector<8x16xbf16>, vector<16x1024xbf16>, vector<8x1024xf32> -> vector<8x1024xf32>
    %140 = arith.addf %134, %139 : vector<8x1024xf32>
    %c0_93 = arith.constant 0 : index
    %c0_94 = arith.constant 0 : index
    %141 = vector.load %arg6[%c0_93, %c0_94] : memref<64x4608xbf16, #tpu.memory_space<vmem>>, vector<64x4608xbf16>
    %c0_95 = arith.constant 0 : index
    %c0_96 = arith.constant 0 : index
    %c0_97 = arith.constant 0 : index
    %142 = vector.load %arg3[%c0_95, %c0_96, %c0_97] : memref<1x4608x4xbf16, #tpu.memory_space<vmem>>, vector<1x4608x4xbf16>
    %143 = vector.shape_cast %142 : vector<1x4608x4xbf16> to vector<4608x4xbf16>
    %cst_98 = arith.constant dense<0.000000e+00> : vector<64x4xf32>
    %144 = tpu.matmul %141, %143, %cst_98 {dimension_numbers = #tpu.dot_dimension_numbers<[1], [0], [0], [1], [0, 0, 1, 1], [], []>} : vector<64x4608xbf16>, vector<4608x4xbf16>, vector<64x4xf32> -> vector<64x4xf32>
    %c2_99 = arith.constant 2 : index
    %c0_100 = arith.constant 0 : index
    %c0_101 = arith.constant 0 : index
    %145 = vector.load %arg7[%c2_99, %c0_100, %c0_101] : memref<3x64x1xf32, #tpu.memory_space<vmem>>, vector<1x64x1xf32>
    %146 = vector.shape_cast %145 : vector<1x64x1xf32> to vector<64x1xf32>
    %147 = vector.broadcast %146 : vector<64x1xf32> to vector<64x4xf32>
    %148 = arith.addf %144, %147 : vector<64x4xf32>
    %cst_102 = arith.constant 0.000000e+00 : f32
    %cst_103 = arith.constant 6.000000e+00 : f32
    %149 = vector.broadcast %cst_102 : f32 to vector<64x4xf32>
    %150 = arith.maximumf %149, %148 : vector<64x4xf32>
    %151 = vector.broadcast %cst_103 : f32 to vector<64x4xf32>
    %152 = arith.minimumf %151, %150 : vector<64x4xf32>
    %153 = arith.truncf %152 : vector<64x4xf32> to vector<64x4xbf16>
    %c2_104 = arith.constant 2 : index
    %c0_105 = arith.constant 0 : index
    %c0_106 = arith.constant 0 : index
    %154 = vector.load %arg8[%c2_104, %c0_105, %c0_106] : memref<3x72x64xbf16, #tpu.memory_space<vmem>>, vector<1x72x64xbf16>
    %155 = vector.shape_cast %154 : vector<1x72x64xbf16> to vector<72x64xbf16>
    %cst_107 = arith.constant dense<0.000000e+00> : vector<72x4xf32>
    %156 = tpu.matmul %155, %153, %cst_107 {dimension_numbers = #tpu.dot_dimension_numbers<[1], [0], [0], [1], [0, 0, 1, 1], [], []>} : vector<72x64xbf16>, vector<64x4xbf16>, vector<72x4xf32> -> vector<72x4xf32>
    %157 = vector.extract_strided_slice %156 {offsets = [0, 0], sizes = [8, 4], strides = [1, 1]} : vector<72x4xf32> to vector<8x4xf32>
    %158 = arith.truncf %157 : vector<8x4xf32> to vector<8x4xbf16>
    %c0_108 = arith.constant 0 : index
    %c0_109 = arith.constant 0 : index
    %c0_110 = arith.constant 0 : index
    %159 = vector.load %arg11[%c0_108, %c0_109, %c0_110] : memref<9x4x1024xbf16, #tpu.memory_space<vmem>>, vector<1x4x1024xbf16>
    %160 = vector.shape_cast %159 : vector<1x4x1024xbf16> to vector<4x1024xbf16>
    %cst_111 = arith.constant dense<0.000000e+00> : vector<8x1024xf32>
    %161 = tpu.matmul %158, %160, %cst_111 {dimension_numbers = #tpu.dot_dimension_numbers<[1], [0], [0], [1], [0, 0, 1, 1], [], []>} : vector<8x4xbf16>, vector<4x1024xbf16>, vector<8x1024xf32> -> vector<8x1024xf32>
    %162 = arith.addf %140, %161 : vector<8x1024xf32>
    %163 = vector.extract_strided_slice %156 {offsets = [8, 0], sizes = [8, 4], strides = [1, 1]} : vector<72x4xf32> to vector<8x4xf32>
    %164 = arith.truncf %163 : vector<8x4xf32> to vector<8x4xbf16>
    %c1_112 = arith.constant 1 : index
    %c0_113 = arith.constant 0 : index
    %c0_114 = arith.constant 0 : index
    %165 = vector.load %arg11[%c1_112, %c0_113, %c0_114] : memref<9x4x1024xbf16, #tpu.memory_space<vmem>>, vector<1x4x1024xbf16>
    %166 = vector.shape_cast %165 : vector<1x4x1024xbf16> to vector<4x1024xbf16>
    %cst_115 = arith.constant dense<0.000000e+00> : vector<8x1024xf32>
    %167 = tpu.matmul %164, %166, %cst_115 {dimension_numbers = #tpu.dot_dimension_numbers<[1], [0], [0], [1], [0, 0, 1, 1], [], []>} : vector<8x4xbf16>, vector<4x1024xbf16>, vector<8x1024xf32> -> vector<8x1024xf32>
    %168 = arith.addf %162, %167 : vector<8x1024xf32>
    %169 = vector.extract_strided_slice %156 {offsets = [16, 0], sizes = [8, 4], strides = [1, 1]} : vector<72x4xf32> to vector<8x4xf32>
    %170 = arith.truncf %169 : vector<8x4xf32> to vector<8x4xbf16>
    %c2_116 = arith.constant 2 : index
    %c0_117 = arith.constant 0 : index
    %c0_118 = arith.constant 0 : index
    %171 = vector.load %arg11[%c2_116, %c0_117, %c0_118] : memref<9x4x1024xbf16, #tpu.memory_space<vmem>>, vector<1x4x1024xbf16>
    %172 = vector.shape_cast %171 : vector<1x4x1024xbf16> to vector<4x1024xbf16>
    %cst_119 = arith.constant dense<0.000000e+00> : vector<8x1024xf32>
    %173 = tpu.matmul %170, %172, %cst_119 {dimension_numbers = #tpu.dot_dimension_numbers<[1], [0], [0], [1], [0, 0, 1, 1], [], []>} : vector<8x4xbf16>, vector<4x1024xbf16>, vector<8x1024xf32> -> vector<8x1024xf32>
    %174 = arith.addf %168, %173 : vector<8x1024xf32>
    %175 = vector.extract_strided_slice %156 {offsets = [24, 0], sizes = [8, 4], strides = [1, 1]} : vector<72x4xf32> to vector<8x4xf32>
    %176 = arith.truncf %175 : vector<8x4xf32> to vector<8x4xbf16>
    %c3_120 = arith.constant 3 : index
    %c0_121 = arith.constant 0 : index
    %c0_122 = arith.constant 0 : index
    %177 = vector.load %arg11[%c3_120, %c0_121, %c0_122] : memref<9x4x1024xbf16, #tpu.memory_space<vmem>>, vector<1x4x1024xbf16>
    %178 = vector.shape_cast %177 : vector<1x4x1024xbf16> to vector<4x1024xbf16>
    %cst_123 = arith.constant dense<0.000000e+00> : vector<8x1024xf32>
    %179 = tpu.matmul %176, %178, %cst_123 {dimension_numbers = #tpu.dot_dimension_numbers<[1], [0], [0], [1], [0, 0, 1, 1], [], []>} : vector<8x4xbf16>, vector<4x1024xbf16>, vector<8x1024xf32> -> vector<8x1024xf32>
    %180 = arith.addf %174, %179 : vector<8x1024xf32>
    %181 = vector.extract_strided_slice %156 {offsets = [32, 0], sizes = [8, 4], strides = [1, 1]} : vector<72x4xf32> to vector<8x4xf32>
    %182 = arith.truncf %181 : vector<8x4xf32> to vector<8x4xbf16>
    %c4_124 = arith.constant 4 : index
    %c0_125 = arith.constant 0 : index
    %c0_126 = arith.constant 0 : index
    %183 = vector.load %arg11[%c4_124, %c0_125, %c0_126] : memref<9x4x1024xbf16, #tpu.memory_space<vmem>>, vector<1x4x1024xbf16>
    %184 = vector.shape_cast %183 : vector<1x4x1024xbf16> to vector<4x1024xbf16>
    %cst_127 = arith.constant dense<0.000000e+00> : vector<8x1024xf32>
    %185 = tpu.matmul %182, %184, %cst_127 {dimension_numbers = #tpu.dot_dimension_numbers<[1], [0], [0], [1], [0, 0, 1, 1], [], []>} : vector<8x4xbf16>, vector<4x1024xbf16>, vector<8x1024xf32> -> vector<8x1024xf32>
    %186 = arith.addf %180, %185 : vector<8x1024xf32>
    %187 = vector.extract_strided_slice %156 {offsets = [40, 0], sizes = [8, 4], strides = [1, 1]} : vector<72x4xf32> to vector<8x4xf32>
    %188 = arith.truncf %187 : vector<8x4xf32> to vector<8x4xbf16>
    %c5_128 = arith.constant 5 : index
    %c0_129 = arith.constant 0 : index
    %c0_130 = arith.constant 0 : index
    %189 = vector.load %arg11[%c5_128, %c0_129, %c0_130] : memref<9x4x1024xbf16, #tpu.memory_space<vmem>>, vector<1x4x1024xbf16>
    %190 = vector.shape_cast %189 : vector<1x4x1024xbf16> to vector<4x1024xbf16>
    %cst_131 = arith.constant dense<0.000000e+00> : vector<8x1024xf32>
    %191 = tpu.matmul %188, %190, %cst_131 {dimension_numbers = #tpu.dot_dimension_numbers<[1], [0], [0], [1], [0, 0, 1, 1], [], []>} : vector<8x4xbf16>, vector<4x1024xbf16>, vector<8x1024xf32> -> vector<8x1024xf32>
    %192 = arith.addf %186, %191 : vector<8x1024xf32>
    %193 = vector.extract_strided_slice %156 {offsets = [48, 0], sizes = [8, 4], strides = [1, 1]} : vector<72x4xf32> to vector<8x4xf32>
    %194 = arith.truncf %193 : vector<8x4xf32> to vector<8x4xbf16>
    %c6_132 = arith.constant 6 : index
    %c0_133 = arith.constant 0 : index
    %c0_134 = arith.constant 0 : index
    %195 = vector.load %arg11[%c6_132, %c0_133, %c0_134] : memref<9x4x1024xbf16, #tpu.memory_space<vmem>>, vector<1x4x1024xbf16>
    %196 = vector.shape_cast %195 : vector<1x4x1024xbf16> to vector<4x1024xbf16>
    %cst_135 = arith.constant dense<0.000000e+00> : vector<8x1024xf32>
    %197 = tpu.matmul %194, %196, %cst_135 {dimension_numbers = #tpu.dot_dimension_numbers<[1], [0], [0], [1], [0, 0, 1, 1], [], []>} : vector<8x4xbf16>, vector<4x1024xbf16>, vector<8x1024xf32> -> vector<8x1024xf32>
    %198 = arith.addf %192, %197 : vector<8x1024xf32>
    %199 = vector.extract_strided_slice %156 {offsets = [56, 0], sizes = [8, 4], strides = [1, 1]} : vector<72x4xf32> to vector<8x4xf32>
    %200 = arith.truncf %199 : vector<8x4xf32> to vector<8x4xbf16>
    %c7_136 = arith.constant 7 : index
    %c0_137 = arith.constant 0 : index
    %c0_138 = arith.constant 0 : index
    %201 = vector.load %arg11[%c7_136, %c0_137, %c0_138] : memref<9x4x1024xbf16, #tpu.memory_space<vmem>>, vector<1x4x1024xbf16>
    %202 = vector.shape_cast %201 : vector<1x4x1024xbf16> to vector<4x1024xbf16>
    %cst_139 = arith.constant dense<0.000000e+00> : vector<8x1024xf32>
    %203 = tpu.matmul %200, %202, %cst_139 {dimension_numbers = #tpu.dot_dimension_numbers<[1], [0], [0], [1], [0, 0, 1, 1], [], []>} : vector<8x4xbf16>, vector<4x1024xbf16>, vector<8x1024xf32> -> vector<8x1024xf32>
    %204 = arith.addf %198, %203 : vector<8x1024xf32>
    %205 = vector.extract_strided_slice %156 {offsets = [64, 0], sizes = [8, 4], strides = [1, 1]} : vector<72x4xf32> to vector<8x4xf32>
    %206 = arith.truncf %205 : vector<8x4xf32> to vector<8x4xbf16>
    %c8_140 = arith.constant 8 : index
    %c0_141 = arith.constant 0 : index
    %c0_142 = arith.constant 0 : index
    %207 = vector.load %arg11[%c8_140, %c0_141, %c0_142] : memref<9x4x1024xbf16, #tpu.memory_space<vmem>>, vector<1x4x1024xbf16>
    %208 = vector.shape_cast %207 : vector<1x4x1024xbf16> to vector<4x1024xbf16>
    %cst_143 = arith.constant dense<0.000000e+00> : vector<8x1024xf32>
    %209 = tpu.matmul %206, %208, %cst_143 {dimension_numbers = #tpu.dot_dimension_numbers<[1], [0], [0], [1], [0, 0, 1, 1], [], []>} : vector<8x4xbf16>, vector<4x1024xbf16>, vector<8x1024xf32> -> vector<8x1024xf32>
    %210 = arith.addf %204, %209 : vector<8x1024xf32>
    %211 = vector.extract_strided_slice %210 {offsets = [0, 0], sizes = [6, 1024], strides = [1, 1]} : vector<8x1024xf32> to vector<6x1024xf32>
    %212 = math.absf %211 : vector<6x1024xf32>
    %cst_144 = arith.constant 0.000000e+00 : f32
    %213 = vector.broadcast %cst_144 : f32 to vector<6x1024xf32>
    %214 = arith.subf %213, %212 : vector<6x1024xf32>
    %215 = math.exp %214 : vector<6x1024xf32>
    %cst_145 = arith.constant 0.000000e+00 : f32
    %216 = vector.broadcast %cst_145 : f32 to vector<6x1024xf32>
    %217 = arith.cmpf oge, %211, %216 : vector<6x1024xf32>
    %cst_146 = arith.constant 1.000000e+00 : f32
    %218 = vector.broadcast %cst_146 : f32 to vector<6x1024xf32>
    %219 = arith.select %217, %218, %215 : vector<6x1024xi1>, vector<6x1024xf32>
    %cst_147 = arith.constant 1.000000e+00 : f32
    %220 = vector.broadcast %cst_147 : f32 to vector<6x1024xf32>
    %221 = arith.addf %220, %215 : vector<6x1024xf32>
    %222 = arith.divf %219, %221 : vector<6x1024xf32>
    %c0_148 = arith.constant 0 : index
    %c0_149 = arith.constant 0 : index
    %c0_150 = arith.constant 0 : index
    %223 = vector.load %arg13[%c0_148, %c0_149, %c0_150] : memref<1x6x1024xf32, #tpu.memory_space<vmem>>, vector<1x6x1024xf32>
    %224 = vector.shape_cast %223 : vector<1x6x1024xf32> to vector<6x1024xf32>
    %225 = vector.shape_cast %222 : vector<6x1024xf32> to vector<1x6x1024xf32>
    tpu.vector_store %arg13[%c0_148, %c0_149, %c0_150], %225 {strides = array<i32>} : memref<1x6x1024xf32, #tpu.memory_space<vmem>>, vector<1x6x1024xf32>,
    %c0_151 = arith.constant 0 : index
    %c0_152 = arith.constant 0 : index
    %226 = vector.load %arg12[%c0_151, %c0_152] : memref<6x1xf32, #tpu.memory_space<vmem>>, vector<6x1xf32>
    %227 = vector.broadcast %226 : vector<6x1xf32> to vector<6x1024xf32>
    %228 = arith.mulf %222, %227 : vector<6x1024xf32>
    %cst_153 = arith.constant dense<0.000000e+00> : vector<1024xf32>
    %229 = vector.multi_reduction <add>, %228, %cst_153 [0] : vector<6x1024xf32> to vector<1024xf32>
    %230 = vector.shape_cast %229 : vector<1024xf32> to vector<1x1024xf32>
    %231 = math.absf %230 : vector<1x1024xf32>
    %cst_154 = arith.constant 0.000000e+00 : f32
    %232 = vector.broadcast %cst_154 : f32 to vector<1x1024xf32>
    %233 = arith.subf %232, %231 : vector<1x1024xf32>
    %234 = math.exp %233 : vector<1x1024xf32>
    %cst_155 = arith.constant 0.000000e+00 : f32
    %235 = vector.broadcast %cst_155 : f32 to vector<1x1024xf32>
    %236 = arith.cmpf oge, %230, %235 : vector<1x1024xf32>
    %cst_156 = arith.constant 1.000000e+00 : f32
    %237 = vector.broadcast %cst_156 : f32 to vector<1x1024xf32>
    %238 = arith.select %236, %237, %234 : vector<1x1024xi1>, vector<1x1024xf32>
    %cst_157 = arith.constant 1.000000e+00 : f32
    %239 = vector.broadcast %cst_157 : f32 to vector<1x1024xf32>
    %240 = arith.addf %239, %234 : vector<1x1024xf32>
    %241 = arith.divf %238, %240 : vector<1x1024xf32>
    %c0_158 = arith.constant 0 : index
    %c0_159 = arith.constant 0 : index
    %c0_160 = arith.constant 0 : index
    %242 = vector.load %arg14[%c0_158, %c0_159, %c0_160] : memref<1x1x1024xf32, #tpu.memory_space<vmem>>, vector<1x1x1024xf32>
    %243 = vector.shape_cast %242 : vector<1x1x1024xf32> to vector<1x1024xf32>
    %244 = vector.shape_cast %241 : vector<1x1024xf32> to vector<1x1x1024xf32>
    tpu.vector_store %arg14[%c0_158, %c0_159, %c0_160], %244 {strides = array<i32>} : memref<1x1x1024xf32, #tpu.memory_space<vmem>>, vector<1x1x1024xf32>,
    return
  }
  func.func @transform_0(%arg0: i32) -> (i32, i32, i32) {
    %c0_i32 = arith.constant 0 : i32
    %c0_i32_0 = arith.constant 0 : i32
    %c0_i32_1 = arith.constant 0 : i32
    return %arg0, %c0_i32, %c0_i32_0 : i32, i32, i32
  }
  func.func @transform_1(%arg0: i32) -> (i32, i32, i32) {
    %c0_i32 = arith.constant 0 : i32
    %c0_i32_0 = arith.constant 0 : i32
    %c0_i32_1 = arith.constant 0 : i32
    return %arg0, %c0_i32, %c0_i32_0 : i32, i32, i32
  }
  func.func @transform_2(%arg0: i32) -> (i32, i32, i32) {
    %c0_i32 = arith.constant 0 : i32
    %c0_i32_0 = arith.constant 0 : i32
    %c0_i32_1 = arith.constant 0 : i32
    return %arg0, %c0_i32, %c0_i32_0 : i32, i32, i32
  }
  func.func @transform_3(%arg0: i32) -> (i32, i32) {
    %c0_i32 = arith.constant 0 : i32
    %c0_i32_0 = arith.constant 0 : i32
    %c0_i32_1 = arith.constant 0 : i32
    return %c0_i32, %c0_i32_0 : i32, i32
  }
  func.func @transform_4(%arg0: i32) -> (i32, i32) {
    %c0_i32 = arith.constant 0 : i32
    %c0_i32_0 = arith.constant 0 : i32
    %c0_i32_1 = arith.constant 0 : i32
    return %c0_i32, %c0_i32_0 : i32, i32
  }
  func.func @transform_5(%arg0: i32) -> (i32, i32) {
    %c0_i32 = arith.constant 0 : i32
    %c0_i32_0 = arith.constant 0 : i32
    %c0_i32_1 = arith.constant 0 : i32
    return %c0_i32, %c0_i32_0 : i32, i32
  }
  func.func @transform_6(%arg0: i32) -> (i32, i32, i32) {
    %c0_i32 = arith.constant 0 : i32
    %c0_i32_0 = arith.constant 0 : i32
    %c0_i32_1 = arith.constant 0 : i32
    %c0_i32_2 = arith.constant 0 : i32
    return %c0_i32, %c0_i32_0, %c0_i32_1 : i32, i32, i32
  }
  func.func @transform_7(%arg0: i32) -> (i32, i32, i32) {
    %c0_i32 = arith.constant 0 : i32
    %c0_i32_0 = arith.constant 0 : i32
    %c0_i32_1 = arith.constant 0 : i32
    %c0_i32_2 = arith.constant 0 : i32
    return %c0_i32, %c0_i32_0, %c0_i32_1 : i32, i32, i32
  }
  func.func @transform_8(%arg0: i32) -> (i32, i32, i32) {
    %c0_i32 = arith.constant 0 : i32
    %c0_i32_0 = arith.constant 0 : i32
    %c0_i32_1 = arith.constant 0 : i32
    %c0_i32_2 = arith.constant 0 : i32
    return %c0_i32, %c0_i32_0, %c0_i32_1 : i32, i32, i32
  }
  func.func @transform_9(%arg0: i32) -> (i32, i32, i32) {
    %c0_i32 = arith.constant 0 : i32
    %c0_i32_0 = arith.constant 0 : i32
    %c0_i32_1 = arith.constant 0 : i32
    %c0_i32_2 = arith.constant 0 : i32
    return %c0_i32, %c0_i32_0, %c0_i32_1 : i32, i32, i32
  }
  func.func @transform_10(%arg0: i32) -> (i32, i32, i32) {
    %c0_i32 = arith.constant 0 : i32
    %c0_i32_0 = arith.constant 0 : i32
    %c0_i32_1 = arith.constant 0 : i32
    %c0_i32_2 = arith.constant 0 : i32
    return %c0_i32, %c0_i32_0, %c0_i32_1 : i32, i32, i32
  }
  func.func @transform_11(%arg0: i32) -> (i32, i32) {
    %c0_i32 = arith.constant 0 : i32
    %c0_i32_0 = arith.constant 0 : i32
    %c0_i32_1 = arith.constant 0 : i32
    return %c0_i32, %c0_i32_0 : i32, i32
  }
  func.func @transform_12(%arg0: i32) -> (i32, i32, i32) {
    %c0_i32 = arith.constant 0 : i32
    %c0_i32_0 = arith.constant 0 : i32
    %c0_i32_1 = arith.constant 0 : i32
    return %arg0, %c0_i32, %c0_i32_0 : i32, i32, i32
  }
  func.func @transform_13(%arg0: i32) -> (i32, i32, i32) {
    %c0_i32 = arith.constant 0 : i32
    %c0_i32_0 = arith.constant 0 : i32
    %c0_i32_1 = arith.constant 0 : i32
    return %arg0, %c0_i32, %c0_i32_0 : i32, i32, i32
  }
}

</mosaic_0001>

<bundles_post_ra>
// kernel: _edgaux_impl.1
= control target key start
LH: loop header
LB: loop body
LE: loop exit
PB: predicated region body
PF: predicated region fallthrough
CT: control target
= control target key end

     0   :  { %s21119_s25 = smov 0   ;;  %s24565_s0 = inlined_call_operand.vmem [shape: bf16[2,1152,64], index: 0, kind: input, shape index: {}]   ;;  %s24566_s1 = inlined_call_operand.vmem [shape: bf16[2,2304,16], index: 1, kind: input, shape index: {}]   ;;  %s24567_s2 = inlined_call_operand.vmem [shape: bf16[2,4608,4], index: 2, kind: input, shape index: {}]   ;;  %s24568_s3 = inlined_call_operand.vmem [shape: bf16[64,1152], index: 3, kind: input, shape index: {}]   ;;  %s24569_s4 = inlined_call_operand.vmem [shape: bf16[64,2304], index: 4, kind: input, shape index: {}]   ;;  %s24570_s5 = inlined_call_operand.vmem [shape: bf16[64,4608], index: 5, kind: input, shape index: {}]   ;;  %s24571_s6 = inlined_call_operand.vmem [shape: f32[3,64,1], index: 6, kind: input, shape index: {}]   ;;  %s24572_s7 = inlined_call_operand.vmem [shape: bf16[3,72,64], index: 7, kind: input, shape index: {}]   ;;  %s24573_s8 = inlined_call_operand.vmem [shape: bf16[9,64,1024], index: 8, kind: input, shape index: {}]   ;;  %s24574_s9 = inlined_call_operand.vmem [shape: bf16[9,16,1024], index: 9, kind: input, shape index: {}]   ;;  %s24575_s10 = inlined_call_operand.vmem [shape: bf16[9,4,1024], index: 10, kind: input, shape index: {}]   ;;  %s24576_s11 = inlined_call_operand.vmem [shape: f32[6,1], index: 11, kind: input, shape index: {}]   ;;  %s24577_s12 = inlined_call_operand.vmem [shape: f32[2,6,1024], index: 12, kind: output, shape index: {0}]   ;;  %s24578_s13 = inlined_call_operand.vmem [shape: f32[2,1,1024], index: 13, kind: output, shape index: {1}]  }
   0x1 LB: > { %s16564_s26 = sadd.s32 4294967295, %s21042_s25   ;;  %p16568_p0 = scmp.ge.s32.totalorder %s21042_s25, 1  ;;  %s21042_s25 = sphi %s21119_s25, %s24_s25  }
   0x2   : > { %p410_p1 = scmp.lt.s32.totalorder %s21042_s25, 3 }
   0x4   : > { %p411_p2 = pnand %p16568_p0, %p410_p1 }
   0x5   : > { %p468_p3 = scmp.lt.s32.totalorder (!%p411_p2), %s16564_s26, 1  ;;  %v20093_v0 = vld [vmem:[%s24568_s3 + $0x4] ss:$36 sps:$4 sm:$0xff] (!%p411_p2)   ;;  %v21044_v1 = vmov (!%p411_p2), 0   ;;  %v20096_v2 = vld [vmem:[%s24568_s3 + $0xc] ss:$36 sps:$4 sm:$0xff] (!%p411_p2)  }
   0x6   : > { %414 = sbr.rel (%p411_p2) target bundleno = 2879 (0xb3f), region = 68  ;;  %20057 = vset.pattern.permute.xlu0 (!%p411_p2), %v21044_v1  ;;  %20058 = vset.pattern.permute.xlu1 (!%p411_p2), %v21044_v1  ;;  %v20091_v33 = vld [vmem:[%s24568_s3] ss:$36 sps:$4 sm:$0xff] (!%p411_p2)   ;;  %v20094_v35 = vld [vmem:[%s24568_s3 + $0x8] ss:$36 sps:$4 sm:$0xff] (!%p411_p2)   ;;  %vm21046_vm0 = vmmov (!%p411_p2), 0  }
   0x7   : > { %1373 = vmatprep.mubr.bf16.mxu0 (!%p411_p2), %v20093_v0  ;;  %1438 = vmatprep.mubr.bf16.mxu1 (!%p411_p2), %v20096_v2  ;;  %v20105_v37 = vld [vmem:[%s24568_s3 + $0x4c] ss:$36 sps:$4 sm:$0xff] (!%p411_p2)   ;;  %v20107_v39 = vld [vmem:[%s24568_s3 + $0x54] ss:$36 sps:$4 sm:$0xff] (!%p411_p2)   ;;  %v20121_v58 = vld [vmem:[%s24568_s3 + $0x9c] ss:$36 sps:$4 sm:$0xff] (!%p411_p2)  }
   0x8   : > { %v20109_v45 = vld [vmem:[%s24568_s3 + $0x48] ss:$36 sps:$4 sm:$0xff] (!%p411_p2)   ;;  %v20110_v47 = vld [vmem:[%s24568_s3 + $0x50] ss:$36 sps:$4 sm:$0xff] (!%p411_p2)   ;;  %v20124_v60 = vld [vmem:[%s24568_s3 + $0x98] ss:$36 sps:$4 sm:$0xff] (!%p411_p2)  }
   0x9   : > { %v20119_v49 = vld [vmem:[%s24568_s3 + $0x94] ss:$36 sps:$4 sm:$0xff] (!%p411_p2)   ;;  %vm1718_vm1 = vcmask (!%p411_p2), 523264   ;;  %vm7517_vm2 = vcmask (!%p411_p2), 130048   ;;  %vm14063_vm3 = vcmask (!%p411_p2), 1041408   ;;  %vm14059_vm4 = vcmask (!%p411_p2), 31744  }
   0xa   : > { %v20123_v59 = vld [vmem:[%s24568_s3 + $0x90] ss:$36 sps:$4 sm:$0xff] (!%p411_p2)   ;;  %vm16266_vm7 = vcmask (!%p411_p2), 1045504  }
   0xd   : > { %s24580_s26 = smov (!%p468_p3, %s16564_s26), 1 }
   0xe   : > { %s20041_s14 = smul.u32 576, %s24580_s26  ;;  %s18237_s24 = sshll.u32 %s24580_s26, 6 }
   0xf   : > { %s20042_s18 = smul.u32 1152, %s24580_s26  ;;  %s16574_s29 = sshll.u32 %s24580_s26, 3 }
  0x10   : > { %s21141_s17 = scalar_lea.vmem %s24565_s0, %s20041_s14  ;;  %s20043_s28 = smul.u32 2304, %s24580_s26 }
  0x11   : > { %v20059_v3 = vld [vmem:[%s21141_s17 + $0x40] sm:$0xff]   ;;  %v20063_v7 = vld [vmem:[%s21141_s17 + $0x48] sm:$0xff]   ;;  %v20067_v11 = vld [vmem:[%s21141_s17 + $0x50] sm:$0xff]   ;;  %s21340_s15 = scalar_lea.vmem %s24566_s1, %s20042_s18  ;;  %s491_s19 = scalar_lea.vmem %s24578_s13, %s16574_s29 }
  0x12   : > { %v20060_v4 = vld [vmem:[%s21141_s17 + $0xc0] sm:$0xff]   ;;  %18238 = vmatprep.subr.bf16.mxu0 %v20059_v3  ;;  %v20064_v8 = vld [vmem:[%s21141_s17 + $0xc8] sm:$0xff]   ;;  %v20068_v12 = vld [vmem:[%s21141_s17 + $0xd0] sm:$0xff]   ;;  %s21406_s14 = scalar_lea.vmem %s24567_s2, %s20043_s28  ;;  %s24496_s28 = scalar_lea.vmem %s24577_s12, %s18237_s24 }
  0x13   : > { %v20061_v5 = vld [vmem:[%s21141_s17] sm:$0xff]   ;;  %18278 = vmatprep.subr.bf16.mxu1 %v20060_v4  ;;  %v20065_v9 = vld [vmem:[%s21141_s17 + $0x8] sm:$0xff]   ;;  %v20069_v13 = vld [vmem:[%s21141_s17 + $0x10] sm:$0xff]  }
  0x14   : > { %v20062_v6 = vld [vmem:[%s21141_s17 + $0x80] sm:$0xff]   ;;  %18239 = vmatpush3.bf16.msra.mxu0 %v20061_v5  ;;  %v20066_v10 = vld [vmem:[%s21141_s17 + $0x88] sm:$0xff]   ;;  %v20070_v14 = vld [vmem:[%s21141_s17 + $0x90] sm:$0xff]  }
  0x15   : > { %18279 = vmatpush3.bf16.msra.mxu1 %v20062_v6  ;;  %18240 = vmatprep.subr.bf16.mxu0 %v20063_v7  ;;  %v20071_v15 = vld [vmem:[%s21141_s17 + $0x58] sm:$0xff]   ;;  %v20075_v19 = vld [vmem:[%s21141_s17 + $0x60] sm:$0xff]   ;;  %v20079_v23 = vld [vmem:[%s21141_s17 + $0x68] sm:$0xff]  }
  0x16   : > { %18280 = vmatprep.subr.bf16.mxu1 %v20064_v8  ;;  %v20072_v16 = vld [vmem:[%s21141_s17 + $0xd8] sm:$0xff]   ;;  %v20076_v20 = vld [vmem:[%s21141_s17 + $0xe0] sm:$0xff]   ;;  %v20080_v24 = vld [vmem:[%s21141_s17 + $0xe8] sm:$0xff]  }
  0x17   : > { %v20073_v17 = vld [vmem:[%s21141_s17 + $0x18] sm:$0xff]   ;;  %v20077_v21 = vld [vmem:[%s21141_s17 + $0x20] sm:$0xff]   ;;  %v20081_v25 = vld [vmem:[%s21141_s17 + $0x28] sm:$0xff]  }
  0x18   : > { %18241 = vmatpush3.bf16.msra.mxu0 %v20065_v9  ;;  %v20074_v18 = vld [vmem:[%s21141_s17 + $0x98] sm:$0xff]   ;;  %v20078_v22 = vld [vmem:[%s21141_s17 + $0xa0] sm:$0xff]   ;;  %v20082_v26 = vld [vmem:[%s21141_s17 + $0xa8] sm:$0xff]  }
  0x19   : > { %18281 = vmatpush3.bf16.msra.mxu1 %v20066_v10  ;;  %18242 = vmatprep.subr.bf16.mxu0 %v20067_v11  ;;  %v20083_v27 = vld [vmem:[%s21141_s17 + $0x70] sm:$0xff]   ;;  %v20087_v31 = vld [vmem:[%s21141_s17 + $0x78] sm:$0xff]   ;;  %v20097_v38 = vld [vmem:[%s21141_s17 + $0x140] sm:$0xff]  }
  0x1a   : > { %18282 = vmatprep.subr.bf16.mxu1 %v20068_v12  ;;  %v20084_v28 = vld [vmem:[%s21141_s17 + $0xf0] sm:$0xff]   ;;  %v20088_v32 = vld [vmem:[%s21141_s17 + $0xf8] sm:$0xff]   ;;  %v20098_v40 = vld [vmem:[%s21141_s17 + $0x1c0] sm:$0xff]  }
  0x1b   : > { %v20085_v29 = vld [vmem:[%s21141_s17 + $0x30] sm:$0xff]   ;;  %v20089_v34 = vld [vmem:[%s21141_s17 + $0x38] sm:$0xff]   ;;  %v20099_v41 = vld [vmem:[%s21141_s17 + $0x100] sm:$0xff]  }
  0x1c   : > { %18243 = vmatpush3.bf16.msra.mxu0 %v20069_v13  ;;  %v20086_v30 = vld [vmem:[%s21141_s17 + $0xb0] sm:$0xff]   ;;  %v20090_v36 = vld [vmem:[%s21141_s17 + $0xb8] sm:$0xff]   ;;  %v20100_v42 = vld [vmem:[%s21141_s17 + $0x180] sm:$0xff]  }
  0x1d   : > { %18283 = vmatpush3.bf16.msra.mxu1 %v20070_v14  ;;  %18244 = vmatprep.subr.bf16.mxu0 %v20071_v15  ;;  %v20101_v43 = vld [vmem:[%s21141_s17 + $0x148] sm:$0xff]   ;;  %v20111_v50 = vld [vmem:[%s21141_s17 + $0x150] sm:$0xff]   ;;  %v20115_v54 = vld [vmem:[%s21141_s17 + $0x158] sm:$0xff]  }
  0x1e   : > { %18284 = vmatprep.subr.bf16.mxu1 %v20072_v16  ;;  %v20102_v44 = vld [vmem:[%s21141_s17 + $0x1c8] sm:$0xff]   ;;  %v20112_v51 = vld [vmem:[%s21141_s17 + $0x1d0] sm:$0xff]   ;;  %v20116_v55 = vld [vmem:[%s21141_s17 + $0x1d8] sm:$0xff]  }
  0x1f   : > { %v20103_v46 = vld [vmem:[%s21141_s17 + $0x108] sm:$0xff]   ;;  %v20113_v52 = vld [vmem:[%s21141_s17 + $0x110] sm:$0xff]   ;;  %v20117_v56 = vld [vmem:[%s21141_s17 + $0x118] sm:$0xff]  }
  0x20   : > { %18245 = vmatpush3.bf16.msra.mxu0 %v20073_v17  ;;  %v20104_v48 = vld [vmem:[%s21141_s17 + $0x188] sm:$0xff]   ;;  %v20114_v53 = vld [vmem:[%s21141_s17 + $0x190] sm:$0xff]   ;;  %v20118_v57 = vld [vmem:[%s21141_s17 + $0x198] sm:$0xff]  }
  0x21   : > { %18285 = vmatpush3.bf16.msra.mxu1 %v20074_v18  ;;  %18246 = vmatprep.subr.bf16.mxu0 %v20075_v19  ;;  %v20125_v61 = vld [vmem:[%s21141_s17 + $0x160] sm:$0xff]   ;;  %v20129_v2 = vld [vmem:[%s21141_s17 + $0x168] sm:$0xff]   ;;  %v20137_v8 = vld [vmem:[%s24568_s3 + $0xd8] ss:$36 sps:$4 sm:$0xff]  }
  0x22   : > { %18286 = vmatprep.subr.bf16.mxu1 %v20076_v20  ;;  %v20126_v62 = vld [vmem:[%s21141_s17 + $0x1e0] sm:$0xff]   ;;  %v20130_v3 = vld [vmem:[%s21141_s17 + $0x1e8] sm:$0xff]   ;;  %v20139_v10 = vld [vmem:[%s21141_s17 + $0x170] sm:$0xff]  }
  0x23   : > { %v20127_v63 = vld [vmem:[%s21141_s17 + $0x120] sm:$0xff]   ;;  %v20131_v4 = vld [vmem:[%s21141_s17 + $0x128] sm:$0xff]   ;;  %v20140_v11 = vld [vmem:[%s21141_s17 + $0x1f0] sm:$0xff]  }
  0x24   : > { %18247 = vmatpush3.bf16.msra.mxu0 %v20077_v21  ;;  %v20128_v0 = vld [vmem:[%s21141_s17 + $0x1a0] sm:$0xff]   ;;  %v20132_v5 = vld [vmem:[%s21141_s17 + $0x1a8] sm:$0xff]   ;;  %v20141_v12 = vld [vmem:[%s21141_s17 + $0x130] sm:$0xff]  }
  0x25   : > { %18287 = vmatpush3.bf16.msra.mxu1 %v20078_v22  ;;  %18248 = vmatprep.subr.bf16.mxu0 %v20079_v23  ;;  %v20133_v6 = vld [vmem:[%s24568_s3 + $0xdc] ss:$36 sps:$4 sm:$0xff]   ;;  %v20135_v7 = vld [vmem:[%s24568_s3 + $0xe4] ss:$36 sps:$4 sm:$0xff]   ;;  %v20142_v13 = vld [vmem:[%s21141_s17 + $0x1b0] sm:$0xff]  }
  0x26   : > { %18288 = vmatprep.subr.bf16.mxu1 %v20080_v24  ;;  %v20138_v9 = vld [vmem:[%s24568_s3 + $0xe0] ss:$36 sps:$4 sm:$0xff]   ;;  %v20143_v14 = vld [vmem:[%s21141_s17 + $0x178] sm:$0xff]   ;;  %v20147_v18 = vld [vmem:[%s24568_s3 + $0x10] ss:$36 sps:$4 sm:$0xff]  }
  0x27   : > { %v20144_v15 = vld [vmem:[%s21141_s17 + $0x1f8] sm:$0xff]   ;;  %v20153_v22 = vld [vmem:[%s21141_s17 + $0x200] sm:$0xff]   ;;  %v20154_v23 = vld [vmem:[%s21141_s17 + $0x208] sm:$0xff]  }
  0x28   : > { %18249 = vmatpush3.bf16.msra.mxu0 %v20081_v25  ;;  %v20145_v16 = vld [vmem:[%s21141_s17 + $0x138] sm:$0xff]   ;;  %v20157_v25 = vld [vmem:[%s24568_s3 + $0x64] ss:$36 sps:$4 sm:$0xff]  }
  0x29   : > { %18289 = vmatpush3.bf16.msra.mxu1 %v20082_v26  ;;  %18250 = vmatprep.subr.bf16.mxu0 %v20083_v27  ;;  %v20146_v17 = vld [vmem:[%s21141_s17 + $0x1b8] sm:$0xff]   ;;  %v20161_v27 = vld [vmem:[%s21141_s17 + $0x210] sm:$0xff]  }
  0x2a   : > { %18290 = vmatprep.subr.bf16.mxu1 %v20084_v28  ;;  %v20149_v19 = vld [vmem:[%s24568_s3 + $0x14] ss:$36 sps:$4 sm:$0xff]   ;;  %v20152_v21 = vld [vmem:[%s24568_s3 + $0x1c] ss:$36 sps:$4 sm:$0xff]  }
  0x2b   : > { %v20150_v20 = vld [vmem:[%s24568_s3 + $0x18] ss:$36 sps:$4 sm:$0xff]   ;;  %v20160_v28 = vld [vmem:[%s24568_s3 + $0x60] ss:$36 sps:$4 sm:$0xff]  }
  0x2c   : > { %18251 = vmatpush3.bf16.msra.mxu0 %v20085_v29  ;;  %v20155_v24 = vld [vmem:[%s24568_s3 + $0x5c] ss:$36 sps:$4 sm:$0xff]   ;;  %v20163_v29 = vld [vmem:[%s24568_s3 + $0xa4] ss:$36 sps:$4 sm:$0xff]  }
  0x2d   : > { %18291 = vmatpush3.bf16.msra.mxu1 %v20086_v30  ;;  %18252 = vmatprep.subr.bf16.mxu0 %v20087_v31  ;;  %v20159_v26 = vld [vmem:[%s24568_s3 + $0x58] ss:$36 sps:$4 sm:$0xff]   ;;  %v20165_v30 = vld [vmem:[%s24568_s3 + $0xac] ss:$36 sps:$4 sm:$0xff]  }
  0x2e   : > { %18292 = vmatprep.subr.bf16.mxu1 %v20088_v32  ;;  %v20162_v31 = vld [vmem:[%s21141_s17 + $0x218] sm:$0xff]   ;;  %v20167_v32 = vld [vmem:[%s24568_s3 + $0xa0] ss:$36 sps:$4 sm:$0xff]  }
  0x30   : > { %18253 = vmatpush3.bf16.msra.mxu0 %v20089_v34  ;;  %v20171_v34 = vld [vmem:[%s24568_s3 + $0xec] ss:$36 sps:$4 sm:$0xff]  }
  0x31   : > { %18293 = vmatpush3.bf16.msra.mxu1 %v20090_v36  ;;  %18318 = vmatprep.subr.bf16.mxu0 %v20097_v38  ;;  %v20173_v36 = vld [vmem:[%s24568_s3 + $0xf4] ss:$36 sps:$4 sm:$0xff]   ;;  %v677_v38 = vld [vmem:[%s24571_s6] sm:$0xff] }
  0x32   : > { %18358 = vmatprep.subr.bf16.mxu1 %v20098_v40  ;;  %v20177_v40 = vld [vmem:[%s21141_s17 + $0x230] sm:$0xff]   ;;  %687 = vperm.xlu0 %20057, %v677_v38  }
  0x33   : > { %1374 = vmatmul.mubr.bf16.vlgmr.msra.gmra.mrb[0].mxu0 %v20091_v33  ;;  %v20169_v33 = vld [vmem:[%s21141_s17 + $0x220] sm:$0xff]  }
  0x34   : > { %1439 = vmatmul.mubr.bf16.vlgmr.msra.gmra.mrb[0].mxu1 %v20094_v35  ;;  %18319 = vmatpush3.bf16.msra.mxu0 %v20099_v41  ;;  %v20168_v35 = vld [vmem:[%s24568_s3 + $0xa8] ss:$36 sps:$4 sm:$0xff]   ;;  %v679_v41 = vld [vmem:[%s24571_s6 + $0x10] sm:$0xff] }
  0x35   : > { %18359 = vmatpush3.bf16.msra.mxu1 %v20100_v42  ;;  %1381 = vmatprep.mubr.bf16.mxu0 %v20105_v37  ;;  %v20170_v37 = vld [vmem:[%s21141_s17 + $0x228] sm:$0xff]   ;;  %v20176_v42 = vld [vmem:[%s24568_s3 + $0xf0] ss:$36 sps:$4 sm:$0xff]  }
  0x36   : > { %18320 = vmatprep.subr.bf16.mxu0 %v20101_v43  ;;  %1446 = vmatprep.mubr.bf16.mxu1 %v20107_v39  ;;  %v20175_v39 = vld [vmem:[%s24568_s3 + $0xe8] ss:$36 sps:$4 sm:$0xff]  }
  0x37   : > { %18360 = vmatprep.subr.bf16.mxu1 %v20102_v44  ;;  %697 = vperm.xlu1 %20058, %v679_v41   ;;  %v678_v43 = vld [vmem:[%s24571_s6 + $0x8] sm:$0xff]  ;;  %v680_v44 = vld [vmem:[%s24571_s6 + $0x18] sm:$0xff] }
  0x38   : > { %18321 = vmatpush3.bf16.msra.mxu0 %v20103_v46  ;;  %v20178_v46 = vld [vmem:[%s21141_s17 + $0x238] sm:$0xff]   ;;  %692 = vperm.xlu0 %20057, %v678_v43  }
  0x39   : > { %18361 = vmatpush3.bf16.msra.mxu1 %v20104_v48  ;;  %18322 = vmatprep.subr.bf16.mxu0 %v20111_v50  ;;  %v682_v48 = vld [vmem:[%s24571_s6 + $0x28] sm:$0xff]  ;;  %v683_v50 = vld [vmem:[%s24571_s6 + $0x30] sm:$0xff] }
  0x3a   : > { %18362 = vmatprep.subr.bf16.mxu1 %v20112_v51  ;;  %v684_v51 = vld [vmem:[%s24571_s6 + $0x38] sm:$0xff] }
  0x3b   : > { %1382 = vmatmul.mubr.bf16.gmra.mrb[4].mxu0 %v20109_v45  ;;  %v20179_v45 = vld [vmem:[%s24568_s3 + $0x20] ss:$36 sps:$4 sm:$0xff]   ;;  %702 = vperm.xlu1 %20058, %v680_v44  }
  0x3c   : > { %1447 = vmatmul.mubr.bf16.gmra.mrb[4].mxu1 %v20110_v47  ;;  %18323 = vmatpush3.bf16.msra.mxu0 %v20113_v52  ;;  %v681_v47 = vld [vmem:[%s24571_s6 + $0x20] sm:$0xff]  ;;  %v20181_v52 = vld [vmem:[%s24568_s3 + $0xb0] ss:$36 sps:$4 sm:$0xff]  }
  0x3d   : > { %18363 = vmatpush3.bf16.msra.mxu1 %v20114_v53  ;;  %1389 = vmatprep.mubr.bf16.mxu0 %v20119_v49  ;;  %v20180_v49 = vld [vmem:[%s24568_s3 + $0x68] ss:$36 sps:$4 sm:$0xff]   ;;  %v17273_v53 = vld [vmem:[%s24571_s6 + $0x40] sm:$0xff] }
  0x3e   : > { %18324 = vmatprep.subr.bf16.mxu0 %v20115_v54  ;;  %18364 = vmatprep.subr.bf16.mxu1 %v20116_v55  ;;  %v17274_v54 = vld [vmem:[%s24571_s6 + $0x48] sm:$0xff]  ;;  %v20182_v55 = vld [vmem:[%s24568_s3 + $0xf8] ss:$36 sps:$4 sm:$0xff]  }
  0x3f   : > { %1454 = vmatprep.mubr.bf16.mxu1 %v20121_v58  ;;  %707 = vperm.xlu0 %20057, %v681_v47   ;;  %v17277_v58 = vld [vmem:[%s24571_s6 + $0x60] sm:$0xff] }
  0x40   : > { %18325 = vmatpush3.bf16.msra.mxu0 %v20117_v56  ;;  %712 = vperm.xlu1 %20058, %v682_v48   ;;  %v17275_v56 = vld [vmem:[%s24571_s6 + $0x50] sm:$0xff] }
  0x41   : > { %18365 = vmatpush3.bf16.msra.mxu1 %v20118_v57  ;;  %18326 = vmatprep.subr.bf16.mxu0 %v20125_v61  ;;  %v17276_v57 = vld [vmem:[%s24571_s6 + $0x58] sm:$0xff] }
  0x42   : > { %18366 = vmatprep.subr.bf16.mxu1 %v20126_v62  ;;  %v17280_v61 = vld [vmem:[%s24571_s6 + $0x78] sm:$0xff]  ;;  %v17688_v62 = vld [vmem:[%s24571_s6 + $0x80] sm:$0xff] }
  0x43   : > { %1390 = vmatmul.mubr.bf16.gmra.mrb[8].mxu0 %v20123_v59  ;;  %717 = vperm.xlu0 %20057, %v683_v50   ;;  %v17278_v59 = vld [vmem:[%s24571_s6 + $0x68] sm:$0xff] }
  0x44   : > { %1455 = vmatmul.mubr.bf16.gmra.mrb[8].mxu1 %v20124_v60  ;;  %18327 = vmatpush3.bf16.msra.mxu0 %v20127_v63  ;;  %v17279_v60 = vld [vmem:[%s24571_s6 + $0x70] sm:$0xff]  ;;  %v17689_v63 = vld [vmem:[%s24571_s6 + $0x88] sm:$0xff] }
  0x45   : > { %18367 = vmatpush3.bf16.msra.mxu1 %v20128_v0  ;;  %18328 = vmatprep.subr.bf16.mxu0 %v20129_v2  ;;  %v17690_v0 = vld [vmem:[%s24571_s6 + $0x90] sm:$0xff]  ;;  %v17691_v2 = vld [vmem:[%s24571_s6 + $0x98] sm:$0xff] }
  0x46   : > { %18368 = vmatprep.subr.bf16.mxu1 %v20130_v3  ;;  %1397 = vmatprep.mubr.bf16.mxu0 %v20133_v6  ;;  %v17692_v3 = vld [vmem:[%s24571_s6 + $0xa0] sm:$0xff]  ;;  %v17695_v6 = vld [vmem:[%s24571_s6 + $0xb8] sm:$0xff] }
  0x47   : > { %1462 = vmatprep.mubr.bf16.mxu1 %v20135_v7  ;;  %722 = vperm.xlu1 %20058, %v684_v51   ;;  %v16252_v7 = vld [vmem:[%s24576_s11] sm:$0x3f] }
  0x48   : > { %18329 = vmatpush3.bf16.msra.mxu0 %v20131_v4  ;;  %5481 = vperm.xlu0 %20057, %v17273_v53   ;;  %v17693_v4 = vld [vmem:[%s24571_s6 + $0xa8] sm:$0xff] }
  0x49   : > { %18369 = vmatpush3.bf16.msra.mxu1 %v20132_v5  ;;  %18330 = vmatprep.subr.bf16.mxu0 %v20139_v10  ;;  %v17694_v5 = vld [vmem:[%s24571_s6 + $0xb0] sm:$0xff] }
  0x4a   : > { %18370 = vmatprep.subr.bf16.mxu1 %v20140_v11 }
  0x4b   : > { %1398 = vmatmul.mubr.bf16.gmra.mrb[12].mxu0 %v20137_v8  ;;  %5486 = vperm.xlu1 %20058, %v17274_v54   ;;  %v21045_v8 = vmov 0.0  }
  0x4c   : > { %1463 = vmatmul.mubr.bf16.gmra.mrb[12].mxu1 %v20138_v9  ;;  %18331 = vmatpush3.bf16.msra.mxu0 %v20141_v12 }
  0x4d   : > { %18371 = vmatpush3.bf16.msra.mxu1 %v20142_v13  ;;  %18332 = vmatprep.subr.bf16.mxu0 %v20143_v14 }
  0x4e   : > { %18372 = vmatprep.subr.bf16.mxu1 %v20144_v15  ;;  %1503 = vmatprep.mubr.bf16.mxu0 %v20149_v19  ;;  %v16697_v19 = vld [vmem:[%s24573_s8 + $0x120] sm:$0xff] }
  0x4f   : > { %1568 = vmatprep.mubr.bf16.mxu1 %v20152_v21  ;;  %5491 = vperm.xlu0 %20057, %v17275_v56  }
  0x50   : > { %18333 = vmatpush3.bf16.msra.mxu0 %v20145_v16  ;;  %5496 = vperm.xlu1 %20058, %v17276_v57  }
  0x51   : > { %18373 = vmatpush3.bf16.msra.mxu1 %v20146_v17 }
  0x52   : > { %19517 = vmatprep.subr.bf16.mxu1 %v20153_v22 }
  0x53   : > { %1504 = vmatmul.mubr.bf16.vlgmr.msra.gmra.mrb[16].mxu0 %v20147_v18  ;;  %5501 = vperm.xlu0 %20057, %v17277_v58   ;;  %v16693_v18 = vld [vmem:[%s24573_s8 + $0x100] sm:$0xff] }
  0x54   : > { %1569 = vmatmul.mubr.bf16.vlgmr.msra.gmra.mrb[16].mxu1 %v20150_v20  ;;  %1511 = vmatprep.mubr.bf16.mxu0 %v20155_v24  ;;  %v16701_v24 = vld [vmem:[%s24573_s8 + $0x140] sm:$0xff] }
  0x55   : > { %19518 = vmatpush3.bf16.msra.mxu1 %v20153_v22  ;;  %1576 = vmatprep.mubr.bf16.mxu1 %v20157_v25 }
  0x56   : > { %19519 = vmatprep.subr.bf16.mxu1 %v20154_v23  ;;  %5506 = vperm.xlu1 %20058, %v17278_v59  }
  0x57   : > { %5511 = vperm.xlu0 %20057, %v17279_v60  }
  0x59   : > { %19520 = vmatpush3.bf16.msra.mxu1 %v20154_v23  ;;  %v16725_v23 = vcombine.low %v16693_v18, %v16697_v19 }
  0x5a   : > { %19521 = vmatprep.subr.bf16.mxu1 %v20161_v27  ;;  %5516 = vperm.xlu1 %20058, %v17280_v61  }
  0x5b   : > { %1512 = vmatmul.mubr.bf16.gmra.mrb[20].mxu0 %v20159_v26  ;;  %10224 = vperm.xlu0 %20057, %v17688_v62  }
  0x5c   : > { %1519 = vmatprep.mubr.bf16.mxu0 %v20163_v29  ;;  %1577 = vmatmul.mubr.bf16.gmra.mrb[20].mxu1 %v20160_v28  ;;  %v16726_v28 = vcombine.high %v16693_v18, %v16697_v19  ;;  %v16705_v29 = vld [vmem:[%s24573_s8 + $0x160] sm:$0xff] }
  0x5d   : > { %19522 = vmatpush3.bf16.msra.mxu1 %v20161_v27  ;;  %1584 = vmatprep.mubr.bf16.mxu1 %v20165_v30 }
  0x5e   : > { %19523 = vmatprep.subr.bf16.mxu1 %v20162_v31  ;;  %10229 = vperm.xlu1 %20058, %v17689_v63  }
  0x5f   : > { %10234 = vperm.xlu0 %20057, %v17690_v0   ;;  %2036 = vmatprep.subr.bf16.mxu0 %v16726_v28 }
  0x60   : > { %2037 = vmatpush1.bf16.msra.mxu0 %v16725_v23 }
  0x61   : > { %19524 = vmatpush3.bf16.msra.mxu1 %v20162_v31  ;;  %v16734_v31 = vcombine.high %v16701_v24, %v16705_v29 }
  0x62   : > { %19525 = vmatprep.subr.bf16.mxu1 %v20169_v33  ;;  %10239 = vperm.xlu1 %20058, %v17691_v2  }
  0x63   : > { %1520 = vmatmul.mubr.bf16.gmra.mrb[24].mxu0 %v20167_v32  ;;  %10244 = vperm.xlu0 %20057, %v17692_v3   ;;  %v16709_v32 = vld [vmem:[%s24573_s8 + $0x180] sm:$0xff] }
  0x64   : > { %1527 = vmatprep.mubr.bf16.mxu0 %v20171_v34  ;;  %1585 = vmatmul.mubr.bf16.gmra.mrb[24].mxu1 %v20168_v35 }
  0x65   : > { %19526 = vmatpush3.bf16.msra.mxu1 %v20169_v33  ;;  %1592 = vmatprep.mubr.bf16.mxu1 %v20173_v36  ;;  %v16713_v33 = vld [vmem:[%s24573_s8 + $0x1a0] sm:$0xff]  ;;  %v16733_v36 = vcombine.low %v16701_v24, %v16705_v29 }
  0x66   : > { %19527 = vmatprep.subr.bf16.mxu1 %v20170_v37  ;;  %10249 = vperm.xlu1 %20058, %v17693_v4  }
  0x67   : > { %10254 = vperm.xlu0 %20057, %v17694_v5   ;;  %2038 = vmatprep.subr.bf16.mxu0 %v16734_v31 }
  0x68   : > { %2039 = vmatpush1.bf16.msra.mxu0 %v16733_v36 }
  0x69   : > { %19528 = vmatpush3.bf16.msra.mxu1 %v20170_v37 }
  0x6a   : > { %19529 = vmatprep.subr.bf16.mxu1 %v20177_v40  ;;  %10259 = vperm.xlu1 %20058, %v17695_v6  }
  0x6b   : > { %1528 = vmatmul.mubr.bf16.gmra.mrb[28].mxu0 %v20175_v39  ;;  %16255 = vperm.xlu0 %20057, %v16252_v7  }
  0x6c   : > { %1593 = vmatmul.mubr.bf16.gmra.mrb[28].mxu1 %v20176_v42  ;;  %2068 = vmatprep.mubr.bf16.mxu0 %v21044_v1 }
  0x6d   : > { %19530 = vmatpush3.bf16.msra.mxu1 %v20177_v40  ;;  %19533 = vmatprep.mubr.bf16.mxu1 %v20179_v45  ;;  %v16742_v40 = vcombine.high %v16709_v32, %v16713_v33 }
  0x6e   : > { %19531 = vmatprep.subr.bf16.mxu1 %v20178_v46 }
  0x6f   : > { %2040 = vmatprep.subr.bf16.mxu0 %v16742_v40 }
  0x71   : > { %19532 = vmatpush3.bf16.msra.mxu1 %v20178_v46 }
  0x72   : > { %19541 = vmatprep.subr.bf16.mxu1 %v21045_v8 }
  0x74   : > { %19534 = vmatmul.mubr.bf16.vlgmr.msra.gmra.mrb[32].mxu1 %v20180_v49  ;;  %v16741_v49 = vcombine.low %v16709_v32, %v16713_v33 }
  0x75   : > { %19537 = vmatprep.mubr.bf16.mxu1 %v20181_v52 }
  0x76   : > { %2041 = vmatpush1.bf16.msra.mxu0 %v16741_v49 }
  0x7c   : > { %19538 = vmatmul.mubr.bf16.gmra.mrb[36].mxu1 %v20182_v55 }
  0x7d   : > { %19549 = vmatprep.mubr.msk.bf16.mxu1 %vm21046_vm0, %v21045_v8 }
  0xb1   : > { %v688_v9 = vpop.permute.xlu0 %687 }
  0xb6   : > { %v698_v10 = vpop.permute.xlu1 %697 }
  0xb7   : > { %v693_v12 = vpop.permute.xlu0 %692 }
  0xba   : > { %v703_v39 = vpop.permute.xlu1 %702 }
  0xbe   : > { %v708_v56 = vpop.permute.xlu0 %707 }
  0xbf   : > { %v713_v59 = vpop.permute.xlu1 %712 }
 0x106   : > { %v18254_v11 = vpop.f32.mrb[0].mxu0 }
 0x107   : > { %v18294_v13 = vpop.f32.mrb[0].mxu1  ;;  %v18255_v14 = vpop.f32.mrb[1].mxu0 }
 0x108   : > { %v18256_v15 = vadd.f32 %v18255_v14, %v18254_v11  ;;  %v18295_v16 = vpop.f32.mrb[1].mxu1  ;;  %v18257_v17 = vpop.f32.mrb[2].mxu0 }
 0x109   : > { %v18296_v20 = vadd.f32 %v18295_v16, %v18294_v13  ;;  %v18297_v21 = vpop.f32.mrb[2].mxu1  ;;  %v18258_v22 = vpop.f32.mrb[3].mxu0 }
 0x10a   : > { %v1376_v25 = vadd.f32 %v18256_v15, %v688_v9  ;;  %v18259_v26 = vadd.f32 %v18258_v22, %v18257_v17  ;;  %v18298_v27 = vpop.f32.mrb[3].mxu1  ;;  %v718_v13 = vpop.permute.xlu0 %717 }
 0x10b   : > { %v18299_v30 = vadd.f32 %v18298_v27, %v18297_v21  ;;  %v723_v27 = vpop.permute.xlu1 %722 }
 0x10c   : > { %v1379_v34 = vadd.f32 %v18259_v26, %v693_v12  ;;  %v21426_v35 = vadd.f32 %v18296_v20, %v1376_v25 }
 0x10e   : > { %v21428_v37 = vadd.f32 %v18299_v30, %v1379_v34  ;;  %v18260_v38 = vpop.f32.mrb[4].mxu0 }
 0x10f   : > { %v18300_v41 = vpop.f32.mrb[4].mxu1  ;;  %v18261_v42 = vpop.f32.mrb[5].mxu0 }
 0x110   : > { %v18262_v43 = vadd.f32 %v18261_v42, %v18260_v38  ;;  %v18301_v44 = vpop.f32.mrb[5].mxu1  ;;  %v18263_v45 = vpop.f32.mrb[6].mxu0 }
 0x111   : > { %v18302_v46 = vadd.f32 %v18301_v44, %v18300_v41  ;;  %v18303_v47 = vpop.f32.mrb[6].mxu1  ;;  %v18264_v48 = vpop.f32.mrb[7].mxu0 }
 0x112   : > { %v1384_v50 = vadd.f32 %v18262_v43, %v698_v10  ;;  %v18265_v51 = vadd.f32 %v18264_v48, %v18263_v45  ;;  %v18304_v52 = vpop.f32.mrb[7].mxu1 }
 0x113   : > { %v18305_v53 = vadd.f32 %v18304_v52, %v18303_v47 }
 0x114   : > { %v1387_v54 = vadd.f32 %v18265_v51, %v703_v39  ;;  %v1449_v55 = vadd.f32 %v18302_v46, %v1384_v50 }
 0x116   : > { %v21430_v57 = vadd.f32 %v18305_v53, %v1387_v54  ;;  %v18266_v58 = vpop.f32.mrb[8].mxu0 }
 0x117   : > { %v18306_v60 = vpop.f32.mrb[8].mxu1  ;;  %v18267_v61 = vpop.f32.mrb[9].mxu0 }
 0x118   : > { %v18268_v62 = vadd.f32 %v18267_v61, %v18266_v58  ;;  %v18307_v63 = vpop.f32.mrb[9].mxu1  ;;  %v18269_v0 = vpop.f32.mrb[10].mxu0 }
 0x119   : > { %v18308_v2 = vadd.f32 %v18307_v63, %v18306_v60  ;;  %v18309_v3 = vpop.f32.mrb[10].mxu1  ;;  %v18270_v4 = vpop.f32.mrb[11].mxu0 }
 0x11a   : > { %v1392_v5 = vadd.f32 %v18268_v62, %v708_v56  ;;  %v18271_v6 = vadd.f32 %v18270_v4, %v18269_v0  ;;  %v18310_v7 = vpop.f32.mrb[11].mxu1 }
 0x11b   : > { %v18311_v9 = vadd.f32 %v18310_v7, %v18309_v3 }
 0x11c   : > { %v1395_v10 = vadd.f32 %v18271_v6, %v713_v59  ;;  %v1457_v11 = vadd.f32 %v18308_v2, %v1392_v5 }
 0x11e   : > { %v21432_v12 = vadd.f32 %v18311_v9, %v1395_v10  ;;  %v18272_v14 = vpop.f32.mrb[12].mxu0 }
 0x11f   : > { %v18312_v15 = vpop.f32.mrb[12].mxu1  ;;  %v18273_v16 = vpop.f32.mrb[13].mxu0 }
 0x120   : > { %v18313_v17 = vpop.f32.mrb[13].mxu1  ;;  %v18274_v18 = vadd.f32 %v18273_v16, %v18272_v14  ;;  %v18275_v20 = vpop.f32.mrb[14].mxu0 }
 0x121   : > { %v18314_v19 = vadd.f32 %v18313_v17, %v18312_v15  ;;  %v18315_v21 = vpop.f32.mrb[14].mxu1  ;;  %v18276_v22 = vpop.f32.mrb[15].mxu0 }
 0x122   : > { %v18316_v23 = vpop.f32.mrb[15].mxu1  ;;  %v1400_v24 = vadd.f32 %v18274_v18, %v718_v13  ;;  %v18277_v25 = vadd.f32 %v18276_v22, %v18275_v20 }
 0x123   : > { %v18317_v26 = vadd.f32 %v18316_v23, %v18315_v21 }
 0x124   : > { %v1403_v28 = vadd.f32 %v18277_v25, %v723_v27  ;;  %v1465_v29 = vadd.f32 %v18314_v19, %v1400_v24 }
 0x126   : > { %v1468_v30 = vadd.f32 %v18317_v26, %v1403_v28  ;;  %v18334_v31 = vpop.f32.mrb[16].mxu0 }
 0x127   : > { %v18335_v32 = vpop.f32.mrb[17].mxu0  ;;  %v18374_v33 = vpop.f32.mrb[16].mxu1 }
 0x128   : > { %v18336_v34 = vadd.f32 %v18335_v32, %v18334_v31  ;;  %v18337_v36 = vpop.f32.mrb[18].mxu0  ;;  %v18375_v38 = vpop.f32.mrb[17].mxu1 }
 0x129   : > { %v18338_v39 = vpop.f32.mrb[19].mxu0  ;;  %v18376_v41 = vadd.f32 %v18375_v38, %v18374_v33  ;;  %v18377_v42 = vpop.f32.mrb[18].mxu1 }
 0x12a   : > { %v1506_v40 = vadd.f32 %v18336_v34, %v21426_v35  ;;  %v18339_v43 = vadd.f32 %v18338_v39, %v18337_v36  ;;  %v18378_v44 = vpop.f32.mrb[19].mxu1 }
 0x12b   : > { %v18379_v46 = vadd.f32 %v18378_v44, %v18377_v42 }
 0x12c   : > { %v1509_v45 = vadd.f32 %v18339_v43, %v21428_v37  ;;  %v1571_v47 = vadd.f32 %v18376_v41, %v1506_v40 }
 0x12e   : > { %v18340_v48 = vpop.f32.mrb[20].mxu0  ;;  %v1574_v49 = vadd.f32 %v18379_v46, %v1509_v45 }
 0x12f   : > { %v18341_v50 = vpop.f32.mrb[21].mxu0  ;;  %v18380_v51 = vpop.f32.mrb[20].mxu1 }
 0x130   : > { %v18342_v52 = vadd.f32 %v18341_v50, %v18340_v48  ;;  %v18343_v53 = vpop.f32.mrb[22].mxu0  ;;  %v18381_v54 = vpop.f32.mrb[21].mxu1 }
 0x131   : > { %v18344_v56 = vpop.f32.mrb[23].mxu0  ;;  %v18382_v59 = vadd.f32 %v18381_v54, %v18380_v51  ;;  %v18383_v60 = vpop.f32.mrb[22].mxu1 }
 0x132   : > { %v1514_v58 = vadd.f32 %v18342_v52, %v1449_v55  ;;  %v18345_v35 = vadd.f32 %v18344_v56, %v18343_v53  ;;  %v18384_v61 = vpop.f32.mrb[23].mxu1 }
 0x133   : > { %v18385_v63 = vadd.f32 %v18384_v61, %v18383_v60 }
 0x134   : > { %v1517_v62 = vadd.f32 %v18345_v35, %v21430_v57  ;;  %v1579_v0 = vadd.f32 %v18382_v59, %v1514_v58 }
 0x136   : > { %v18346_v37 = vpop.f32.mrb[24].mxu0  ;;  %v1582_v2 = vadd.f32 %v18385_v63, %v1517_v62 }
 0x137   : > { %v18347_v3 = vpop.f32.mrb[25].mxu0  ;;  %v18386_v4 = vpop.f32.mrb[24].mxu1 }
 0x138   : > { %v18348_v5 = vadd.f32 %v18347_v3, %v18346_v37  ;;  %v18349_v6 = vpop.f32.mrb[26].mxu0  ;;  %v18387_v7 = vpop.f32.mrb[25].mxu1 }
 0x139   : > { %v18350_v9 = vpop.f32.mrb[27].mxu0  ;;  %v18388_v13 = vadd.f32 %v18387_v7, %v18386_v4  ;;  %v18389_v14 = vpop.f32.mrb[26].mxu1  ;;  %v16699_v7 = vld [vmem:[%s24573_s8 + $0x130] sm:$0xff] }
 0x13a   : > { %v1522_v10 = vadd.f32 %v18348_v5, %v1457_v11  ;;  %v18351_v55 = vadd.f32 %v18350_v9, %v18349_v6  ;;  %v18390_v15 = vpop.f32.mrb[27].mxu1  ;;  %v16695_v6 = vld [vmem:[%s24573_s8 + $0x110] sm:$0xff] }
 0x13b   : > { %v18391_v17 = vadd.f32 %v18390_v15, %v18389_v14  ;;  %v16707_v14 = vld [vmem:[%s24573_s8 + $0x170] sm:$0xff]  ;;  %v16730_v15 = vcombine.high %v16695_v6, %v16699_v7 }
 0x13c   : > { %v1525_v16 = vadd.f32 %v18351_v55, %v21432_v12  ;;  %v1587_v18 = vadd.f32 %v18388_v13, %v1522_v10  ;;  %v16703_v13 = vld [vmem:[%s24573_s8 + $0x150] sm:$0xff]  ;;  %v20183_v55 = vld [vmem:[%s24572_s7] sm:$0xff]  }
 0x13e   : > { %v18352_v57 = vpop.f32.mrb[28].mxu0  ;;  %v1590_v19 = vadd.f32 %v18391_v17, %v1525_v16  ;;  %v16729_v16 = vcombine.low %v16695_v6, %v16699_v7  ;;  %v16711_v17 = vld [vmem:[%s24573_s8 + $0x190] sm:$0xff] }
 0x13f   : > { %v18353_v20 = vpop.f32.mrb[29].mxu0  ;;  %v18392_v21 = vpop.f32.mrb[28].mxu1 }
 0x140   : > { %v18354_v22 = vadd.f32 %v18353_v20, %v18352_v57  ;;  %v18355_v23 = vpop.f32.mrb[30].mxu0  ;;  %v18393_v24 = vpop.f32.mrb[29].mxu1  ;;  %v16738_v57 = vcombine.high %v16703_v13, %v16707_v14  ;;  %v16719_v20 = vld [vmem:[%s24573_s8 + $0x1d0] sm:$0xff] }
 0x141   : > { %v18356_v25 = vpop.f32.mrb[31].mxu0  ;;  %v18394_v27 = vadd.f32 %v18393_v24, %v18392_v21  ;;  %v18395_v28 = vpop.f32.mrb[30].mxu1  ;;  %v16723_v21 = vld [vmem:[%s24573_s8 + $0x1f0] sm:$0xff] }
 0x142   : > { %v1530_v26 = vadd.f32 %v18354_v22, %v1465_v29  ;;  %v18357_v11 = vadd.f32 %v18356_v25, %v18355_v23  ;;  %v18396_v31 = vpop.f32.mrb[31].mxu1  ;;  %v20184_v22 = vld [vmem:[%s24572_s7 + $0x8] sm:$0xff]   ;;  %v16754_v25 = vcombine.high %v16719_v20, %v16723_v21 }
 0x143   : > { %v18397_v33 = vadd.f32 %v18396_v31, %v18395_v28  ;;  %v20186_v28 = vld [vmem:[%s24572_s7 + $0x18] sm:$0xff]   ;;  %v16717_v31 = vld [vmem:[%s24573_s8 + $0x1c0] sm:$0xff] }
 0x144   : > { %v1533_v32 = vadd.f32 %v18357_v11, %v1468_v30  ;;  %v1595_v34 = vadd.f32 %v18394_v27, %v1530_v26  ;;  %v16753_v26 = vcombine.low %v16719_v20, %v16723_v21  ;;  %v20185_v27 = vld [vmem:[%s24572_s7 + $0x10] sm:$0xff]   ;;  %v20187_v11 = vld [vmem:[%s24572_s7 + $0x20] ss:$0 sps:$4 sm:$0xff]   ;;  %v16708_v20 = vld [vmem:[%s24573_s8 + $0x178] sm:$0xff] }
 0x145   : > { %v16807_v21 = vld [vmem:[%s24573_s8 + $0x250] sm:$0xff] }
 0x146   : > { %v1598_v36 = vadd.f32 %v18397_v33, %v1533_v32  ;;  %v16721_v32 = vld [vmem:[%s24573_s8 + $0x1e0] sm:$0xff] }
 0x147   : > { %v19535_v12 = vpop.f32.mrb[32].mxu1  ;;  %v16750_v33 = vcombine.high %v16717_v31, %v16721_v32 }
 0x148   : > { %v1644_v38 = vadd.f32 %v19535_v12, %v1579_v0  ;;  %v1635_v39 = vpop.f32.mrb[33].mxu1  ;;  %v16698_v12 = vld [vmem:[%s24573_s8 + $0x128] sm:$0xff] }
 0x149   : > { %v1636_v40 = vadd.f32 %v1635_v39, %v1571_v47  ;;  %v19536_v41 = vpop.f32.mrb[34].mxu1  ;;  %2042 = vmatprep.subr.bf16.mxu0 %v16750_v33 }
 0x14a   : > { %v1668_v42 = vmax.f32 %v1644_v38, 0.0  ;;  %v1647_v43 = vadd.f32 %v19536_v41, %v1582_v2  ;;  %v1638_v44 = vpop.f32.mrb[35].mxu1  ;;  %v1809_v38 = vld [vmem:[%s24573_s8 + $0x10] sm:$0xff] }
 0x14b   : > { %v1666_v45 = vmax.f32 %v1636_v40, 0.0  ;;  %v1639_v46 = vadd.f32 %v1638_v44, %v1574_v49  ;;  %v1813_v40 = vld [vmem:[%s24573_s8 + $0x30] sm:$0xff]  ;;  %v16702_v44 = vld [vmem:[%s24573_s8 + $0x148] sm:$0xff] }
 0x14c   : > { %v1676_v48 = vmin.f32 %v1668_v42, 6.0  ;;  %v1669_v29 = vmax.f32 %v1647_v43, 0.0  ;;  %v16765_v42 = vcombine.low %v1809_v38, %v1813_v40  ;;  %v16766_v43 = vcombine.high %v1809_v38, %v1813_v40 }
 0x14d   : > { %v1674_v50 = vmin.f32 %v1666_v45, 6.0  ;;  %v1667_v51 = vmax.f32 %v1639_v46, 0.0  ;;  %v16706_v46 = vld [vmem:[%s24573_s8 + $0x168] sm:$0xff] }
 0x14e   : > { %v1677_v52 = vmin.f32 %v1669_v29, 6.0  ;;  %v1821_v29 = vld [vmem:[%s24573_s8 + $0x70] sm:$0xff] }
 0x14f   : > { %v1675_v53 = vmin.f32 %v1667_v51, 6.0  ;;  %v19539_v30 = vpop.f32.mrb[36].mxu1 }
 0x150   : > { %v1683_v54 = vpack.c.bf16 %v1677_v52, %v1676_v48  ;;  %v1660_v56 = vadd.f32 %v19539_v30, %v1595_v34  ;;  %v1651_v58 = vpop.f32.mrb[37].mxu1  ;;  %v16749_v34 = vcombine.low %v16717_v31, %v16721_v32  ;;  %v1817_v48 = vld [vmem:[%s24573_s8 + $0x50] sm:$0xff]  ;;  %v16736_v30 = vcombine.high %v16702_v44, %v16706_v46  ;;  %v16712_v32 = vld [vmem:[%s24573_s8 + $0x198] sm:$0xff] }
 0x151   : > { %v1682_v59 = vpack.c.bf16 %v1675_v53, %v1674_v50  ;;  %v1652_v60 = vadd.f32 %v1651_v58, %v1587_v18  ;;  %v19540_v35 = vpop.f32.mrb[38].mxu1  ;;  %v16715_v18 = vld [vmem:[%s24573_s8 + $0x1b0] sm:$0xff]  ;;  %v16714_v58 = vld [vmem:[%s24573_s8 + $0x1a8] sm:$0xff] }
 0x152   : > { %v1672_v47 = vmax.f32 %v1660_v56, 0.0  ;;  %v1663_v61 = vadd.f32 %v19540_v35, %v1598_v36  ;;  %v1654_v62 = vpop.f32.mrb[39].mxu1  ;;  %v16746_v23 = vcombine.high %v16711_v17, %v16715_v18  ;;  %v16745_v24 = vcombine.low %v16711_v17, %v16715_v18  ;;  %2043 = vmatpush1.bf16.msra.mxu0 %v16749_v34  ;;  %v16694_v36 = vld [vmem:[%s24573_s8 + $0x108] sm:$0xff]  ;;  %v16716_v34 = vld [vmem:[%s24573_s8 + $0x1b8] sm:$0xff] }
 0x153   : > { %v1670_v63 = vmax.f32 %v1652_v60, 0.0  ;;  %v1655_v0 = vadd.f32 %v1654_v62, %v1590_v19  ;;  %19542 = vmatpush3.bf16.msra.mxu1 %v1682_v59  ;;  %v16737_v19 = vcombine.low %v16703_v13, %v16707_v14  ;;  %v16728_v39 = vcombine.high %v16694_v36, %v16698_v12  ;;  %v16710_v56 = vld [vmem:[%s24573_s8 + $0x188] sm:$0xff]  ;;  %v1825_v59 = vld [vmem:[%s24573_s8 + $0x90] sm:$0xff]  ;;  %v16700_v14 = vld [vmem:[%s24573_s8 + $0x138] sm:$0xff] }
 0x154   : > { %v1680_v49 = vmin.f32 %v1672_v47, 6.0  ;;  %v1673_v37 = vmax.f32 %v1663_v61, 0.0  ;;  %19543 = vmatprep.subr.bf16.mxu1 %v21045_v8  ;;  %v16727_v41 = vcombine.low %v16694_v36, %v16698_v12  ;;  %v1829_v60 = vld [vmem:[%s24573_s8 + $0xb0] sm:$0xff]  ;;  %v16735_v35 = vcombine.low %v16702_v44, %v16706_v46 }
 0x155   : > { %v1678_v2 = vmin.f32 %v1670_v63, 6.0  ;;  %v1671_v3 = vmax.f32 %v1655_v0, 0.0  ;;  %2077 = vmatprep.subr.bf16.mxu0 %v16728_v39  ;;  %v16773_v47 = vcombine.low %v1817_v48, %v1821_v29  ;;  %v16744_v61 = vcombine.high %v16710_v56, %v16714_v58  ;;  %v16718_v63 = vld [vmem:[%s24573_s8 + $0x1c8] sm:$0xff]  ;;  %v16815_v36 = vld [vmem:[%s24573_s8 + $0x290] sm:$0xff] }
 0x156   : > { %v1681_v4 = vmin.f32 %v1673_v37, 6.0  ;;  %v16782_v62 = vcombine.high %v1825_v59, %v1829_v60  ;;  %v16722_v0 = vld [vmem:[%s24573_s8 + $0x1e8] sm:$0xff]  ;;  %v1837_v37 = vld [vmem:[%s24573_s8 + $0xf0] sm:$0xff]  ;;  %v16748_v40 = vcombine.high %v16712_v32, %v16716_v34 }
 0x157   : > { %v1679_v5 = vmin.f32 %v1671_v3, 6.0  ;;  %19544 = vmatpush3.bf16.msra.mxu1 %v1683_v54  ;;  %v16774_v54 = vcombine.high %v1817_v48, %v1821_v29  ;;  %v16752_v7 = vcombine.high %v16718_v63, %v16722_v0  ;;  %v16819_v12 = vld [vmem:[%s24573_s8 + $0x2b0] sm:$0xff]  ;;  %v16747_v29 = vcombine.low %v16712_v32, %v16716_v34  ;;  %v1808_v32 = vld [vmem:[%s24573_s8 + $0x8] sm:$0xff] }
 0x158   : > { %v1685_v9 = vpack.c.bf16 %v1681_v4, %v1680_v49  ;;  %19545 = vmatprep.subr.bf16.mxu1 %v21045_v8  ;;  %v1833_v49 = vld [vmem:[%s24573_s8 + $0xd0] sm:$0xff]  ;;  %v16743_v4 = vcombine.low %v16710_v56, %v16714_v58  ;;  %v1811_v58 = vld [vmem:[%s24573_s8 + $0x20] sm:$0xff] }
 0x159   : > { %v1684_v10 = vpack.c.bf16 %v1679_v5, %v1678_v2  ;;  %v16781_v5 = vcombine.low %v1825_v59, %v1829_v60  ;;  %v16789_v17 = vcombine.low %v1833_v49, %v1837_v37  ;;  %v16823_v44 = vld [vmem:[%s24573_s8 + $0x2d0] sm:$0xff] }
 0x15a   : > { %v16867_v59 = vld [vmem:[%s24573_s8 + $0x310] sm:$0xff] }
 0x15b   : > { %19546 = vmatpush3.bf16.msra.mxu1 %v1684_v10  ;;  %v16696_v10 = vld [vmem:[%s24573_s8 + $0x118] sm:$0xff]  ;;  %v16871_v60 = vld [vmem:[%s24573_s8 + $0x330] sm:$0xff] }
 0x15c   : > { %19547 = vmatprep.subr.bf16.mxu1 %v21045_v8  ;;  %v16732_v18 = vcombine.high %v16696_v10, %v16700_v14  ;;  %v16935_v34 = vld [vmem:[%s24573_s8 + $0x410] sm:$0xff] }
 0x15f   : > { %19548 = vmatpush3.bf16.msra.mxu1 %v1685_v9  ;;  %v16790_v9 = vcombine.high %v1833_v49, %v1837_v37  ;;  %v16875_v49 = vld [vmem:[%s24573_s8 + $0x350] sm:$0xff] }
 0x160   : > { %2118 = vmatprep.subr.bf16.mxu1 %v16730_v15  ;;  %v16803_v15 = vld [vmem:[%s24573_s8 + $0x230] sm:$0xff] }
 0x161   : > { %v16879_v37 = vld [vmem:[%s24573_s8 + $0x370] sm:$0xff] }
 0x162   : > { %19550 = vmatmul.mubr.msk.bf16.vlgmr.msra.gmra.mrb[40].mxu1 %vm1718_vm1, %v20183_v55  ;;  %v16799_v55 = vld [vmem:[%s24573_s8 + $0x210] sm:$0xff] }
 0x163   : > { %19553 = vmatprep.mubr.msk.bf16.mxu1 %vm21046_vm0, %v21045_v8  ;;  %2119 = vmatpush1.bf16.msra.mxu1 %v16729_v16  ;;  %v16751_v16 = vcombine.low %v16718_v63, %v16722_v0  ;;  %v1815_v63 = vld [vmem:[%s24573_s8 + $0x40] sm:$0xff] }
 0x164   : > { %2120 = vmatprep.subr.bf16.mxu1 %v16738_v57  ;;  %v16834_v57 = vcombine.high %v16799_v55, %v16803_v15  ;;  %v1819_v0 = vld [vmem:[%s24573_s8 + $0x60] sm:$0xff] }
 0x167   : > { %2121 = vmatpush1.bf16.msra.mxu1 %v16737_v19  ;;  %v16704_v19 = vld [vmem:[%s24573_s8 + $0x158] sm:$0xff] }
 0x168   : > { %2122 = vmatprep.subr.bf16.mxu1 %v16746_v23  ;;  %v16739_v38 = vcombine.low %v16704_v19, %v16708_v20 }
 0x16a   : > { %19554 = vmatmul.mubr.msk.bf16.gmra.mrb[44].mxu1 %vm1718_vm1, %v20184_v22  ;;  %v16811_v22 = vld [vmem:[%s24573_s8 + $0x270] sm:$0xff] }
 0x16b   : > { %19557 = vmatprep.mubr.msk.bf16.mxu1 %vm21046_vm0, %v21045_v8  ;;  %2123 = vmatpush1.bf16.msra.mxu1 %v16745_v24  ;;  %v16842_v31 = vcombine.high %v16807_v21, %v16811_v22  ;;  %v16841_v39 = vcombine.low %v16807_v21, %v16811_v22  ;;  %v1831_v21 = vld [vmem:[%s24573_s8 + $0xc0] sm:$0xff] }
 0x16c   : > { %2124 = vmatprep.subr.bf16.mxu1 %v16754_v25  ;;  %v16731_v25 = vcombine.low %v16696_v10, %v16700_v14  ;;  %v16910_v14 = vcombine.high %v16875_v49, %v16879_v37  ;;  %v1835_v22 = vld [vmem:[%s24573_s8 + $0xe0] sm:$0xff] }
 0x16f   : > { %2125 = vmatpush1.bf16.msra.mxu1 %v16753_v26  ;;  %v16833_v26 = vcombine.low %v16799_v55, %v16803_v15  ;;  %v1823_v55 = vld [vmem:[%s24573_s8 + $0x80] sm:$0xff] }
 0x170   : > { %2445 = vmatprep.subr.bf16.mxu1 %v16766_v43  ;;  %v16724_v43 = vld [vmem:[%s24573_s8 + $0x1f8] sm:$0xff] }
 0x172   : > { %19558 = vmatmul.mubr.msk.bf16.gmra.mrb[48].mxu1 %vm1718_vm1, %v20185_v27 }
 0x173   : > { %19561 = vmatprep.mubr.msk.bf16.mxu1 %vm21046_vm0, %v21045_v8 }
 0x17a   : > { %19562 = vmatmul.mubr.msk.bf16.gmra.mrb[52].mxu1 %vm1718_vm1, %v20186_v28 }
 0x17b   : > { %19565 = vmatprep.mubr.msk.bf16.mxu1 %vm21046_vm0, %v21045_v8 }
 0x182   : > { %19566 = vmatmul.mubr.msk.bf16.gmra.mrb[56].mxu1 %vm1718_vm1, %v20187_v11  ;;  %v16740_v11 = vcombine.high %v16704_v19, %v16708_v20 }
 0x183   : > { %2150 = vmatprep.mubr.bf16.mxu1 %v21044_v1 }
 0x235   : > { %v21515_v45 = vpop.f32.mrb[40].mxu1 }
 0x236   : > { %v19551_v50 = vpop.f32.mrb[41].mxu1  ;;  %v21592_v28 = vpack.c.bf16 %v21515_v45, %v21515_v45  ;;  %v16827_v45 = vld [vmem:[%s24573_s8 + $0x2f0] sm:$0xff] }
 0x237   : > { %v1771_v51 = vpop.f32.mrb[42].mxu1  ;;  %v16849_v50 = vcombine.low %v16815_v36, %v16819_v12 }
 0x238   : > { %v21526_v52 = vpack.c.bf16 %v1771_v51, %v1771_v51  ;;  %v19552_v53 = vpop.f32.mrb[43].mxu1 }
 0x23a   : > { %16757 = vmatmul.mubr.msk.bf16.vlgmr.msra.gmra.mrb[32].mxu0 %vm1718_vm1, %v21526_v52  ;;  %16759 = vmatmul.mubr.msk.bf16.vlgmr.msra.gmra.mrb[60].mxu1 %vm1718_vm1, %v21526_v52 }
 0x23b   : > { %2078 = vmatpush1.bf16.msra.mxu0 %v16727_v41  ;;  %2446 = vmatpush1.bf16.msra.mxu1 %v16765_v42  ;;  %v16850_v41 = vcombine.high %v16815_v36, %v16819_v12  ;;  %v16720_v42 = vld [vmem:[%s24573_s8 + $0x1d8] sm:$0xff]  ;;  %v16939_v36 = vld [vmem:[%s24573_s8 + $0x430] sm:$0xff]  ;;  %v16785_v12 = vcombine.low %v1831_v21, %v1835_v22 }
 0x23c   : > { %2079 = vmatprep.subr.bf16.mxu0 %v16736_v30  ;;  %2447 = vmatprep.subr.bf16.mxu1 %v16774_v54  ;;  %v16756_v53 = vcombine.high %v16720_v42, %v16724_v43  ;;  %v16858_v30 = vcombine.high %v16823_v44, %v16827_v45  ;;  %v1807_v54 = vld [vmem:[%s24573_s8] sm:$0xff] }
 0x23d   : > { %2109 = vmatprep.mubr.bf16.mxu0 %v21044_v1  ;;  %2477 = vmatprep.mubr.bf16.mxu1 %v21044_v1  ;;  %v21558_v2 = vpop.f32.mrb[44].mxu1 }
 0x23e   : > { %v19555_v3 = vpop.f32.mrb[45].mxu1 }
 0x23f   : > { %2080 = vmatpush1.bf16.msra.mxu0 %v16735_v35  ;;  %2448 = vmatpush1.bf16.msra.mxu1 %v16773_v47  ;;  %v21560_v6 = vpop.f32.mrb[46].mxu1  ;;  %v16755_v35 = vcombine.low %v16720_v42, %v16724_v43  ;;  %v16857_v47 = vcombine.low %v16823_v44, %v16827_v45  ;;  %v1820_v42 = vld [vmem:[%s24573_s8 + $0x68] sm:$0xff]  ;;  %v16943_v43 = vld [vmem:[%s24573_s8 + $0x450] sm:$0xff] }
 0x240   : > { %2081 = vmatprep.subr.bf16.mxu0 %v16744_v61  ;;  %2449 = vmatprep.subr.bf16.mxu1 %v16782_v62  ;;  %v19556_v13 = vpop.f32.mrb[47].mxu1  ;;  %v16762_v61 = vcombine.high %v1807_v54, %v1811_v58  ;;  %v16902_v62 = vcombine.high %v16867_v59, %v16871_v60  ;;  %v16947_v44 = vld [vmem:[%s24573_s8 + $0x470] sm:$0xff] }
 0x241   : > { %v16770_v13 = vcombine.high %v1815_v63, %v1819_v0 }
 0x243   : > { %2082 = vmatpush1.bf16.msra.mxu0 %v16743_v4  ;;  %2450 = vmatpush1.bf16.msra.mxu1 %v16781_v5  ;;  %v21656_v4 = vpack.c.bf16 %v21558_v2, %v21558_v2  ;;  %v1827_v2 = vld [vmem:[%s24573_s8 + $0xa0] sm:$0xff] }
 0x244   : > { %2083 = vmatprep.subr.bf16.mxu0 %v16752_v7  ;;  %2451 = vmatprep.subr.bf16.mxu1 %v16790_v9  ;;  %v16761_v7 = vcombine.low %v1807_v54, %v1811_v58  ;;  %v16901_v9 = vcombine.low %v16867_v59, %v16871_v60  ;;  %v16778_v19 = vcombine.high %v1823_v55, %v1827_v2  ;;  %v1828_v54 = vld [vmem:[%s24573_s8 + $0xa8] sm:$0xff] }
 0x245   : > { %v21586_v23 = vpop.f32.mrb[48].mxu1  ;;  %v16977_v59 = vcombine.low %v16943_v43, %v16947_v44 }
 0x246   : > { %v19559_v24 = vpop.f32.mrb[49].mxu1 }
 0x247   : > { %2084 = vmatpush1.bf16.msra.mxu0 %v16751_v16  ;;  %2452 = vmatpush1.bf16.msra.mxu1 %v16789_v17  ;;  %v21588_v27 = vpop.f32.mrb[50].mxu1  ;;  %v16883_v16 = vld [vmem:[%s24573_s8 + $0x390] sm:$0xff] }
 0x248   : > { %2159 = vmatprep.subr.bf16.mxu0 %v16732_v18  ;;  %2806 = vmatprep.subr.bf16.mxu1 %v16834_v57  ;;  %v19560_v33 = vpop.f32.mrb[51].mxu1  ;;  %v16887_v17 = vld [vmem:[%s24573_s8 + $0x3b0] sm:$0xff]  ;;  %v16769_v18 = vcombine.low %v1815_v63, %v1819_v0  ;;  %v16909_v57 = vcombine.low %v16875_v49, %v16879_v37 }
 0x249   : > { %v16918_v20 = vcombine.high %v16883_v16, %v16887_v17  ;;  %v16895_v24 = vld [vmem:[%s24573_s8 + $0x3f0] sm:$0xff]  ;;  %v1812_v33 = vld [vmem:[%s24573_s8 + $0x28] sm:$0xff] }
 0x24a   : > { %16758 = vmatmul.mubr.msk.bf16.vlgmr.msra.gmra.mrb[36].mxu0 %vm1718_vm1, %v21526_v52  ;;  %16795 = vmatmul.mubr.msk.bf16.vlgmr.msra.gmra.mrb[60].mxu1 %vm1718_vm1, %v21592_v28  ;;  %v16763_v45 = vcombine.low %v1808_v32, %v1812_v33  ;;  %v16963_v63 = vld [vmem:[%s24573_s8 + $0x4f0] sm:$0xff] }
 0x24b   : > { %2160 = vmatpush1.bf16.msra.mxu0 %v16731_v25  ;;  %2807 = vmatpush1.bf16.msra.mxu1 %v16833_v26  ;;  %v16777_v25 = vcombine.low %v1823_v55, %v1827_v2  ;;  %v16917_v26 = vcombine.low %v16883_v16, %v16887_v17  ;;  %v1818_v16 = vld [vmem:[%s24573_s8 + $0x58] sm:$0xff] }
 0x24c   : > { %2161 = vmatprep.subr.bf16.mxu0 %v16740_v11  ;;  %2808 = vmatprep.subr.bf16.mxu1 %v16842_v31  ;;  %v16786_v11 = vcombine.high %v1831_v21, %v1835_v22  ;;  %v1822_v17 = vld [vmem:[%s24573_s8 + $0x78] sm:$0xff] }
 0x24d   : > { %2191 = vmatprep.mubr.bf16.mxu0 %v21044_v1  ;;  %2838 = vmatprep.mubr.bf16.mxu1 %v21044_v1  ;;  %v21624_v46 = vpop.f32.mrb[52].mxu1  ;;  %v16776_v22 = vcombine.high %v1818_v16, %v1822_v17 }
 0x24e   : > { %v19563_v48 = vpop.f32.mrb[53].mxu1 }
 0x24f   : > { %2162 = vmatpush1.bf16.msra.mxu0 %v16739_v38  ;;  %2809 = vmatpush1.bf16.msra.mxu1 %v16841_v39  ;;  %v21626_v51 = vpop.f32.mrb[54].mxu1  ;;  %v16764_v39 = vcombine.high %v1808_v32, %v1812_v33  ;;  %v16969_v48 = vcombine.low %v16935_v34, %v16939_v36 }
 0x250   : > { %2163 = vmatprep.subr.bf16.mxu0 %v16748_v40  ;;  %2810 = vmatprep.subr.bf16.mxu1 %v16850_v41  ;;  %v19564_v56 = vpop.f32.mrb[55].mxu1  ;;  %v16970_v40 = vcombine.high %v16935_v34, %v16939_v36  ;;  %v1816_v41 = vld [vmem:[%s24573_s8 + $0x48] sm:$0xff]  ;;  %v1834_v34 = vld [vmem:[%s24573_s8 + $0xd8] sm:$0xff] }
 0x251   : > { %v16951_v56 = vld [vmem:[%s24573_s8 + $0x490] sm:$0xff]  ;;  %v16771_v58 = vcombine.low %v1816_v41, %v1820_v42  ;;  %v1838_v36 = vld [vmem:[%s24573_s8 + $0xf8] sm:$0xff] }
 0x253   : > { %2164 = vmatpush1.bf16.msra.mxu0 %v16747_v29  ;;  %2811 = vmatpush1.bf16.msra.mxu1 %v16849_v50  ;;  %v21714_v29 = vpack.c.bf16 %v21560_v6, %v21560_v6  ;;  %v16772_v50 = vcombine.high %v1816_v41, %v1820_v42  ;;  %v16955_v6 = vld [vmem:[%s24573_s8 + $0x4b0] sm:$0xff]  ;;  %v16792_v41 = vcombine.high %v1834_v34, %v1838_v36 }
 0x254   : > { %2165 = vmatprep.subr.bf16.mxu0 %v16756_v53  ;;  %2812 = vmatprep.subr.bf16.mxu1 %v16858_v30  ;;  %v16978_v53 = vcombine.high %v16943_v43, %v16947_v44  ;;  %v1824_v30 = vld [vmem:[%s24573_s8 + $0x88] sm:$0xff]  ;;  %v16985_v49 = vcombine.low %v16951_v56, %v16955_v6  ;;  %v16797_v43 = vld [vmem:[%s24573_s8 + $0x200] sm:$0xff] }
 0x255   : > { %v21652_v3 = vpop.f32.mrb[56].mxu1  ;;  %v16780_v60 = vcombine.high %v1824_v30, %v1828_v54  ;;  %v16779_v0 = vcombine.low %v1824_v30, %v1828_v54  ;;  %v16801_v44 = vld [vmem:[%s24573_s8 + $0x220] sm:$0xff] }
 0x256   : > { %v19567_v5 = vpop.f32.mrb[57].mxu1  ;;  %v16830_v30 = vcombine.high %v16797_v43, %v16801_v44 }
 0x257   : > { %2166 = vmatpush1.bf16.msra.mxu0 %v16755_v35  ;;  %2813 = vmatpush1.bf16.msra.mxu1 %v16857_v47  ;;  %v1803_v10 = vpop.f32.mrb[58].mxu1  ;;  %v16986_v35 = vcombine.high %v16951_v56, %v16955_v6  ;;  %v1832_v47 = vld [vmem:[%s24573_s8 + $0xc8] sm:$0xff]  ;;  %v16805_v56 = vld [vmem:[%s24573_s8 + $0x240] sm:$0xff] }
 0x258   : > { %2363 = vmatprep.subr.bf16.mxu0 %v16762_v61  ;;  %3175 = vmatprep.subr.bf16.mxu1 %v16902_v62  ;;  %v19568_v15 = vpop.f32.mrb[59].mxu1  ;;  %v1836_v61 = vld [vmem:[%s24573_s8 + $0xe8] sm:$0xff]  ;;  %v16959_v62 = vld [vmem:[%s24573_s8 + $0x4d0] sm:$0xff]  ;;  %v16809_v6 = vld [vmem:[%s24573_s8 + $0x260] sm:$0xff] }
 0x259   : > { %v16788_v37 = vcombine.high %v1832_v47, %v1836_v61  ;;  %v16994_v5 = vcombine.high %v16959_v62, %v16963_v63  ;;  %v17003_v10 = vld [vmem:[%s24573_s8 + $0x510] sm:$0xff]  ;;  %v16993_v55 = vcombine.low %v16959_v62, %v16963_v63  ;;  %v16813_v63 = vld [vmem:[%s24573_s8 + $0x280] sm:$0xff] }
 0x25a   : > { %16760 = vmatmul.mubr.msk.bf16.vlgmr.msra.gmra.mrb[40].mxu0 %vm1718_vm1, %v21526_v52  ;;  %16863 = vmatmul.mubr.msk.bf16.vlgmr.msra.gmra.mrb[60].mxu1 %vm1718_vm1, %v21656_v4  ;;  %v16891_v52 = vld [vmem:[%s24573_s8 + $0x3d0] sm:$0xff] }
 0x25b   : > { %2364 = vmatpush1.bf16.msra.mxu0 %v16761_v7  ;;  %3176 = vmatpush1.bf16.msra.mxu1 %v16901_v9  ;;  %v16926_v31 = vcombine.high %v16891_v52, %v16895_v24  ;;  %v16925_v38 = vcombine.low %v16891_v52, %v16895_v24  ;;  %v1810_v7 = vld [vmem:[%s24573_s8 + $0x18] sm:$0xff] }
 0x25c   : > { %2365 = vmatprep.subr.bf16.mxu0 %v16770_v13  ;;  %3177 = vmatprep.subr.bf16.mxu1 %v16910_v14  ;;  %v1814_v9 = vld [vmem:[%s24573_s8 + $0x38] sm:$0xff]  ;;  %v17007_v13 = vld [vmem:[%s24573_s8 + $0x530] sm:$0xff]  ;;  %v16787_v14 = vcombine.low %v1832_v47, %v1836_v61  ;;  %v21830_v47 = vpack.c.bf16 %v21588_v27, %v21588_v27  ;;  %v16838_v61 = vcombine.high %v16805_v56, %v16809_v6 }
 0x25d   : > { %2395 = vmatprep.mubr.bf16.mxu0 %v21044_v1  ;;  %3207 = vmatprep.mubr.bf16.mxu1 %v21044_v1  ;;  %v16768_v15 = vcombine.high %v1810_v7, %v1814_v9  ;;  %v17038_v2 = vcombine.high %v17003_v10, %v17007_v13  ;;  %v17037_v21 = vcombine.low %v17003_v10, %v17007_v13  ;;  %v1826_v24 = vld [vmem:[%s24573_s8 + $0x98] sm:$0xff]  ;;  %v17091_v27 = vld [vmem:[%s24573_s8 + $0x6b0] sm:$0xff]  ;;  %v16821_v10 = vld [vmem:[%s24573_s8 + $0x2c0] sm:$0xff] }
 0x25e   : > { %v16825_v13 = vld [vmem:[%s24573_s8 + $0x2e0] sm:$0xff] }
 0x25f   : > { %2366 = vmatpush1.bf16.msra.mxu0 %v16769_v18  ;;  %3178 = vmatpush1.bf16.msra.mxu1 %v16909_v57  ;;  %v17011_v18 = vld [vmem:[%s24573_s8 + $0x550] sm:$0xff] }
 0x260   : > { %2367 = vmatprep.subr.bf16.mxu0 %v16778_v19  ;;  %3179 = vmatprep.subr.bf16.mxu1 %v16918_v20  ;;  %v17015_v57 = vld [vmem:[%s24573_s8 + $0x570] sm:$0xff]  ;;  %v21772_v19 = vpack.c.bf16 %v21586_v23, %v21586_v23  ;;  %v16767_v20 = vcombine.low %v1810_v7, %v1814_v9 }
 0x261   : > { %v17046_v52 = vcombine.high %v17011_v18, %v17015_v57  ;;  %v17019_v23 = vld [vmem:[%s24573_s8 + $0x590] sm:$0xff] }
 0x263   : > { %2368 = vmatpush1.bf16.msra.mxu0 %v16777_v25  ;;  %3180 = vmatpush1.bf16.msra.mxu1 %v16917_v26  ;;  %v1830_v25 = vld [vmem:[%s24573_s8 + $0xb8] sm:$0xff]  ;;  %v17023_v26 = vld [vmem:[%s24573_s8 + $0x5b0] sm:$0xff] }
 0x264   : > { %2369 = vmatprep.subr.bf16.mxu0 %v16786_v11  ;;  %3181 = vmatprep.subr.bf16.mxu1 %v16926_v31  ;;  %v16775_v11 = vcombine.low %v1818_v16, %v1822_v17  ;;  %v17045_v31 = vcombine.low %v17011_v18, %v17015_v57  ;;  %v16784_v32 = vcombine.high %v1826_v24, %v1830_v25  ;;  %v16798_v17 = vld [vmem:[%s24573_s8 + $0x208] sm:$0xff]  ;;  %v17139_v57 = vld [vmem:[%s24573_s8 + $0x710] sm:$0xff] }
 0x265   : > { %v17054_v33 = vcombine.high %v17019_v23, %v17023_v26  ;;  %v16802_v18 = vld [vmem:[%s24573_s8 + $0x228] sm:$0xff] }
 0x267   : > { %2370 = vmatpush1.bf16.msra.mxu0 %v16785_v12  ;;  %3182 = vmatpush1.bf16.msra.mxu1 %v16925_v38  ;;  %v17027_v12 = vld [vmem:[%s24573_s8 + $0x5d0] sm:$0xff] }
 0x268   : > { %2404 = vmatprep.subr.bf16.mxu0 %v16764_v39  ;;  %3544 = vmatprep.subr.bf16.mxu1 %v16970_v40  ;;  %v17031_v38 = vld [vmem:[%s24573_s8 + $0x5f0] sm:$0xff]  ;;  %v16783_v39 = vcombine.low %v1826_v24, %v1830_v25  ;;  %v17053_v40 = vcombine.low %v17019_v23, %v17023_v26  ;;  %v16806_v25 = vld [vmem:[%s24573_s8 + $0x248] sm:$0xff] }
 0x269   : > { %v17062_v42 = vcombine.high %v17027_v12, %v17031_v38  ;;  %v16810_v23 = vld [vmem:[%s24573_s8 + $0x268] sm:$0xff]  ;;  %v17147_v26 = vld [vmem:[%s24573_s8 + $0x750] sm:$0xff] }
 0x26a   : > { %16793 = vmatmul.mubr.msk.bf16.vlgmr.msra.gmra.mrb[32].mxu0 %vm1718_vm1, %v21592_v28  ;;  %16931 = vmatmul.mubr.msk.bf16.vlgmr.msra.gmra.mrb[60].mxu1 %vm1718_vm1, %v21714_v29 }
 0x26b   : > { %2405 = vmatpush1.bf16.msra.mxu0 %v16763_v45  ;;  %3545 = vmatpush1.bf16.msra.mxu1 %v16969_v48  ;;  %v17071_v45 = vld [vmem:[%s24573_s8 + $0x610] sm:$0xff] }
 0x26c   : > { %2406 = vmatprep.subr.bf16.mxu0 %v16772_v50  ;;  %3546 = vmatprep.subr.bf16.mxu1 %v16978_v53  ;;  %v17075_v48 = vld [vmem:[%s24573_s8 + $0x630] sm:$0xff]  ;;  %v16791_v50 = vcombine.low %v1834_v34, %v1838_v36  ;;  %v17061_v53 = vcombine.low %v17027_v12, %v17031_v38  ;;  %v16840_v34 = vcombine.high %v16806_v25, %v16810_v23  ;;  %v16814_v12 = vld [vmem:[%s24573_s8 + $0x288] sm:$0xff] }
 0x26d   : > { %2436 = vmatprep.mubr.bf16.mxu0 %v21044_v1  ;;  %3576 = vmatprep.mubr.bf16.mxu1 %v21044_v1  ;;  %v17106_v54 = vcombine.high %v17071_v45, %v17075_v48  ;;  %v16818_v38 = vld [vmem:[%s24573_s8 + $0x2a8] sm:$0xff] }
 0x26f   : > { %2407 = vmatpush1.bf16.msra.mxu0 %v16771_v58  ;;  %3547 = vmatpush1.bf16.msra.mxu1 %v16977_v59  ;;  %v17079_v58 = vld [vmem:[%s24573_s8 + $0x650] sm:$0xff] }
 0x270   : > { %2408 = vmatprep.subr.bf16.mxu0 %v16780_v60  ;;  %3548 = vmatprep.subr.bf16.mxu1 %v16986_v35  ;;  %v17083_v59 = vld [vmem:[%s24573_s8 + $0x670] sm:$0xff]  ;;  %v16829_v60 = vcombine.low %v16797_v43, %v16801_v44  ;;  %v17105_v35 = vcombine.low %v17071_v45, %v17075_v48  ;;  %v16822_v44 = vld [vmem:[%s24573_s8 + $0x2c8] sm:$0xff] }
 0x271   : > { %v17114_v62 = vcombine.high %v17079_v58, %v17083_v59  ;;  %v16826_v45 = vld [vmem:[%s24573_s8 + $0x2e8] sm:$0xff]  ;;  %v17163_v48 = vld [vmem:[%s24573_s8 + $0x7d0] sm:$0xff] }
 0x273   : > { %2409 = vmatpush1.bf16.msra.mxu0 %v16779_v0  ;;  %3549 = vmatpush1.bf16.msra.mxu1 %v16985_v49  ;;  %v16817_v0 = vld [vmem:[%s24573_s8 + $0x2a0] sm:$0xff]  ;;  %v17087_v49 = vld [vmem:[%s24573_s8 + $0x690] sm:$0xff] }
 0x274   : > { %2410 = vmatprep.subr.bf16.mxu0 %v16788_v37  ;;  %3550 = vmatprep.subr.bf16.mxu1 %v16994_v5  ;;  %v16837_v37 = vcombine.low %v16805_v56, %v16809_v6  ;;  %v17113_v5 = vcombine.low %v17079_v58, %v17083_v59  ;;  %v16846_v7 = vcombine.high %v16813_v63, %v16817_v0  ;;  %v16800_v6 = vld [vmem:[%s24573_s8 + $0x218] sm:$0xff]  ;;  %v17207_v59 = vld [vmem:[%s24573_s8 + $0x810] sm:$0xff] }
 0x275   : > { %v17122_v9 = vcombine.high %v17087_v49, %v17091_v27  ;;  %v16804_v58 = vld [vmem:[%s24573_s8 + $0x238] sm:$0xff] }
 0x277   : > { %2411 = vmatpush1.bf16.msra.mxu0 %v16787_v14  ;;  %3551 = vmatpush1.bf16.msra.mxu1 %v16993_v55  ;;  %v17099_v14 = vld [vmem:[%s24573_s8 + $0x6f0] sm:$0xff]  ;;  %v16845_v55 = vcombine.low %v16813_v63, %v16817_v0  ;;  %v16808_v0 = vld [vmem:[%s24573_s8 + $0x258] sm:$0xff] }
 0x278   : > { %2486 = vmatprep.subr.bf16.mxu0 %v16768_v15  ;;  %3913 = vmatprep.subr.bf16.mxu1 %v17038_v2  ;;  %v17121_v15 = vcombine.low %v17087_v49, %v17091_v27  ;;  %v16854_v2 = vcombine.high %v16821_v10, %v16825_v13  ;;  %v16812_v49 = vld [vmem:[%s24573_s8 + $0x278] sm:$0xff]  ;;  %v17215_v27 = vld [vmem:[%s24573_s8 + $0x850] sm:$0xff] }
 0x27a   : > { %16794 = vmatmul.mubr.msk.bf16.vlgmr.msra.gmra.mrb[36].mxu0 %vm1718_vm1, %v21592_v28  ;;  %16999 = vmatmul.mubr.msk.bf16.vlgmr.msra.gmra.mrb[60].mxu1 %vm1718_vm1, %v21772_v19 }
 0x27b   : > { %2487 = vmatpush1.bf16.msra.mxu0 %v16767_v20  ;;  %3914 = vmatpush1.bf16.msra.mxu1 %v17037_v21  ;;  %v17143_v20 = vld [vmem:[%s24573_s8 + $0x730] sm:$0xff]  ;;  %v16853_v21 = vcombine.low %v16821_v10, %v16825_v13  ;;  %v16844_v10 = vcombine.high %v16808_v0, %v16812_v49 }
 0x27c   : > { %2488 = vmatprep.subr.bf16.mxu0 %v16776_v22  ;;  %3915 = vmatprep.subr.bf16.mxu1 %v17046_v52  ;;  %v16832_v52 = vcombine.high %v16798_v17, %v16802_v18  ;;  %v17174_v24 = vcombine.high %v17139_v57, %v17143_v20 }
 0x27d   : > { %2518 = vmatprep.mubr.bf16.mxu0 %v21044_v1  ;;  %3945 = vmatprep.mubr.bf16.mxu1 %v21044_v1 }
 0x27f   : > { %2489 = vmatpush1.bf16.msra.mxu0 %v16775_v11  ;;  %3916 = vmatpush1.bf16.msra.mxu1 %v17045_v31  ;;  %v17151_v11 = vld [vmem:[%s24573_s8 + $0x770] sm:$0xff]  ;;  %v21888_v31 = vpack.c.bf16 %v21624_v46, %v21624_v46 }
 0x280   : > { %2490 = vmatprep.subr.bf16.mxu0 %v16784_v32  ;;  %3917 = vmatprep.subr.bf16.mxu1 %v17054_v33  ;;  %v16831_v32 = vcombine.low %v16798_v17, %v16802_v18  ;;  %v17173_v33 = vcombine.low %v17139_v57, %v17143_v20  ;;  %v17182_v36 = vcombine.high %v17147_v26, %v17151_v11  ;;  %v17155_v46 = vld [vmem:[%s24573_s8 + $0x790] sm:$0xff]  ;;  %v16824_v18 = vld [vmem:[%s24573_s8 + $0x2d8] sm:$0xff] }
 0x281   : > { %v16828_v57 = vld [vmem:[%s24573_s8 + $0x2f8] sm:$0xff]  ;;  %v17231_v20 = vld [vmem:[%s24573_s8 + $0x8d0] sm:$0xff] }
 0x283   : > { %2491 = vmatpush1.bf16.msra.mxu0 %v16783_v39  ;;  %3918 = vmatpush1.bf16.msra.mxu1 %v17053_v40  ;;  %v17159_v39 = vld [vmem:[%s24573_s8 + $0x7b0] sm:$0xff]  ;;  %v16839_v40 = vcombine.low %v16806_v25, %v16810_v23  ;;  %v16865_v23 = vld [vmem:[%s24573_s8 + $0x300] sm:$0xff] }
 0x284   : > { %2492 = vmatprep.subr.bf16.mxu0 %v16792_v41  ;;  %3919 = vmatprep.subr.bf16.mxu1 %v17062_v42  ;;  %v17181_v41 = vcombine.low %v17147_v26, %v17151_v11  ;;  %v16848_v42 = vcombine.high %v16814_v12, %v16818_v38  ;;  %v17190_v43 = vcombine.high %v17155_v46, %v17159_v39  ;;  %v16869_v26 = vld [vmem:[%s24573_s8 + $0x320] sm:$0xff] }
 0x285   : > { %v16859_v11 = vcombine.low %v16824_v18, %v16828_v57 }
 0x287   : > { %2493 = vmatpush1.bf16.msra.mxu0 %v16791_v50  ;;  %3920 = vmatpush1.bf16.msra.mxu1 %v17061_v53  ;;  %v17167_v50 = vld [vmem:[%s24573_s8 + $0x7f0] sm:$0xff]  ;;  %v16847_v53 = vcombine.low %v16814_v12, %v16818_v38  ;;  %v16877_v12 = vld [vmem:[%s24573_s8 + $0x360] sm:$0xff]  ;;  %v21993_v38 = vpack.c.bf16 %v21652_v3, %v21652_v3 }
 0x288   : > { %2724 = vmatprep.subr.bf16.mxu0 %v16830_v30  ;;  %4282 = vmatprep.subr.bf16.mxu1 %v17106_v54  ;;  %v17189_v30 = vcombine.low %v17155_v46, %v17159_v39  ;;  %v16856_v54 = vcombine.high %v16822_v44, %v16826_v45  ;;  %v17198_v56 = vcombine.high %v17163_v48, %v17167_v50  ;;  %v20189_v39 = vld [vmem:[%s21340_s15] sm:$0xff]  }
 0x289   : > { %v16897_v46 = vcombine.low %v16865_v23, %v16869_v26  ;;  %v20206_v3 = vld [vmem:[%s24569_s4 + $0x4] ss:$72 sps:$4 sm:$0xff]  }
 0x28a   : > { %16796 = vmatmul.mubr.msk.bf16.vlgmr.msra.gmra.mrb[40].mxu0 %vm1718_vm1, %v21592_v28  ;;  %17067 = vmatmul.mubr.msk.bf16.vlgmr.msra.gmra.mrb[60].mxu1 %vm1718_vm1, %v21830_v47  ;;  %v17095_v28 = vld [vmem:[%s24573_s8 + $0x6d0] sm:$0xff] }
 0x28b   : > { %2725 = vmatpush1.bf16.msra.mxu0 %v16829_v60  ;;  %4283 = vmatpush1.bf16.msra.mxu1 %v17105_v35  ;;  %v17130_v16 = vcombine.high %v17095_v28, %v17099_v14  ;;  %v17129_v22 = vcombine.low %v17095_v28, %v17099_v14  ;;  %v17211_v60 = vld [vmem:[%s24573_s8 + $0x830] sm:$0xff]  ;;  %v16855_v35 = vcombine.low %v16822_v44, %v16826_v45  ;;  %v16816_v28 = vld [vmem:[%s24573_s8 + $0x298] sm:$0xff]  ;;  %v20191_v45 = vld [vmem:[%s21340_s15 + $0x8] sm:$0xff]  }
 0x28c   : > { %2726 = vmatprep.subr.bf16.mxu0 %v16838_v61  ;;  %4284 = vmatprep.subr.bf16.mxu1 %v17114_v62  ;;  %v17197_v61 = vcombine.low %v17163_v48, %v17167_v50  ;;  %v16836_v62 = vcombine.high %v16800_v6, %v16804_v58  ;;  %v17242_v63 = vcombine.high %v17207_v59, %v17211_v60  ;;  %v16820_v14 = vld [vmem:[%s24573_s8 + $0x2b8] sm:$0xff]  ;;  %v20192_v50 = vld [vmem:[%s21340_s15 + $0x50] sm:$0xff]  }
 0x28d   : > { %2756 = vmatprep.mubr.bf16.mxu0 %v21044_v1  ;;  %4314 = vmatprep.mubr.bf16.mxu1 %v21044_v1 }
 0x28f   : > { %2727 = vmatpush1.bf16.msra.mxu0 %v16837_v37  ;;  %4285 = vmatpush1.bf16.msra.mxu1 %v17113_v5  ;;  %v17219_v37 = vld [vmem:[%s24573_s8 + $0x870] sm:$0xff]  ;;  %v16835_v5 = vcombine.low %v16800_v6, %v16804_v58  ;;  %v20194_v6 = vld [vmem:[%s21340_s15 + $0x58] sm:$0xff]   ;;  %v16866_v58 = vld [vmem:[%s24573_s8 + $0x308] sm:$0xff] }
 0x290   : > { %2728 = vmatprep.subr.bf16.mxu0 %v16846_v7  ;;  %4286 = vmatprep.subr.bf16.mxu1 %v17122_v9  ;;  %v17241_v7 = vcombine.low %v17207_v59, %v17211_v60  ;;  %v21946_v9 = vpack.c.bf16 %v21626_v51, %v21626_v51  ;;  %v17250_v13 = vcombine.high %v17215_v27, %v17219_v37  ;;  %v17227_v51 = vld [vmem:[%s24573_s8 + $0x8b0] sm:$0xff]  ;;  %v16870_v59 = vld [vmem:[%s24573_s8 + $0x328] sm:$0xff] }
 0x293   : > { %2729 = vmatpush1.bf16.msra.mxu0 %v16845_v55  ;;  %4287 = vmatpush1.bf16.msra.mxu1 %v17121_v15  ;;  %v17223_v55 = vld [vmem:[%s24573_s8 + $0x890] sm:$0xff]  ;;  %v16843_v15 = vcombine.low %v16808_v0, %v16812_v49  ;;  %v16878_v0 = vld [vmem:[%s24573_s8 + $0x368] sm:$0xff]  ;;  %v16899_v49 = vcombine.low %v16866_v58, %v16870_v59 }
 0x294   : > { %2730 = vmatprep.subr.bf16.mxu0 %v16854_v2  ;;  %4288 = vmatprep.subr.bf16.mxu1 %v17130_v16  ;;  %v17249_v2 = vcombine.low %v17215_v27, %v17219_v37  ;;  %v16852_v16 = vcombine.high %v16816_v28, %v16820_v14  ;;  %v17258_v17 = vcombine.high %v17223_v55, %v17227_v51  ;;  %v20197_v27 = vld [vmem:[%s21340_s15 + $0x20] sm:$0xff]  }
 0x297   : > { %2731 = vmatpush1.bf16.msra.mxu0 %v16853_v21  ;;  %4289 = vmatpush1.bf16.msra.mxu1 %v17129_v22  ;;  %v17235_v21 = vld [vmem:[%s24573_s8 + $0x8f0] sm:$0xff]  ;;  %v16851_v22 = vcombine.low %v16816_v28, %v16820_v14  ;;  %v20199_v28 = vld [vmem:[%s21340_s15 + $0x28] sm:$0xff]  }
 0x298   : > { %2765 = vmatprep.subr.bf16.mxu0 %v16832_v52  ;;  %4651 = vmatprep.subr.bf16.mxu1 %v17174_v24  ;;  %v17257_v52 = vcombine.low %v17223_v55, %v17227_v51  ;;  %v16860_v24 = vcombine.high %v16824_v18, %v16828_v57  ;;  %v17266_v25 = vcombine.high %v17231_v20, %v17235_v21  ;;  %v20200_v55 = vld [vmem:[%s21340_s15 + $0x70] sm:$0xff]   ;;  %v16890_v51 = vld [vmem:[%s24573_s8 + $0x3c8] sm:$0xff]  ;;  %v20202_v18 = vld [vmem:[%s21340_s15 + $0x78] sm:$0xff]  }
 0x299   : > { %v16868_v57 = vld [vmem:[%s24573_s8 + $0x318] sm:$0xff] }
 0x29a   : > { %16861 = vmatmul.mubr.msk.bf16.vlgmr.msra.gmra.mrb[32].mxu0 %vm1718_vm1, %v21656_v4  ;;  %17135 = vmatmul.mubr.msk.bf16.vlgmr.msra.gmra.mrb[60].mxu1 %vm1718_vm1, %v21888_v31 }
 0x29b   : > { %2766 = vmatpush1.bf16.msra.mxu0 %v16831_v32  ;;  %4652 = vmatpush1.bf16.msra.mxu1 %v17173_v33  ;;  %v17265_v32 = vcombine.low %v17231_v20, %v17235_v21  ;;  %v16898_v33 = vcombine.high %v16865_v23, %v16869_v26  ;;  %v16872_v20 = vld [vmem:[%s24573_s8 + $0x338] sm:$0xff]  ;;  %v20204_v26 = vld [vmem:[%s24569_s4] ss:$72 sps:$4 sm:$0xff]  }
 0x29c   : > { %2767 = vmatprep.subr.bf16.mxu0 %v16840_v34  ;;  %4653 = vmatprep.subr.bf16.mxu1 %v17182_v36  ;;  %v20188_v34 = vld [vmem:[%s21340_s15 + $0x40] sm:$0xff]   ;;  %v16880_v23 = vld [vmem:[%s24573_s8 + $0x378] sm:$0xff] }
 0x29d   : > { %2797 = vmatprep.mubr.bf16.mxu0 %v21044_v1  ;;  %4683 = vmatprep.mubr.bf16.mxu1 %v21044_v1  ;;  %v16873_v36 = vld [vmem:[%s24573_s8 + $0x340] sm:$0xff] }
 0x29e   : > { %v16905_v44 = vcombine.low %v16873_v36, %v16877_v12 }
 0x29f   : > { %2768 = vmatpush1.bf16.msra.mxu0 %v16839_v40  ;;  %4654 = vmatpush1.bf16.msra.mxu1 %v17181_v41  ;;  %v16906_v40 = vcombine.high %v16873_v36, %v16877_v12  ;;  %v20190_v41 = vld [vmem:[%s21340_s15 + $0x48] sm:$0xff]   ;;  %v20211_v36 = vld [vmem:[%s24569_s4 + $0x94] ss:$72 sps:$4 sm:$0xff]  }
 0x2a0   : > { %2769 = vmatprep.subr.bf16.mxu0 %v16848_v42  ;;  %4655 = vmatprep.subr.bf16.mxu1 %v17190_v43  ;;  %v16881_v42 = vld [vmem:[%s24573_s8 + $0x380] sm:$0xff]  ;;  %v16884_v12 = vld [vmem:[%s24573_s8 + $0x398] sm:$0xff] }
 0x2a1   : > { %v16885_v43 = vld [vmem:[%s24573_s8 + $0x3a0] sm:$0xff] }
 0x2a2   : > { %v16914_v48 = vcombine.high %v16881_v42, %v16885_v43 }
 0x2a3   : > { %2770 = vmatpush1.bf16.msra.mxu0 %v16847_v53  ;;  %4656 = vmatpush1.bf16.msra.mxu1 %v17189_v30  ;;  %v16889_v53 = vld [vmem:[%s24573_s8 + $0x3c0] sm:$0xff]  ;;  %v16913_v30 = vcombine.low %v16881_v42, %v16885_v43  ;;  %v20214_v42 = vld [vmem:[%s21340_s15 + $0xd0] sm:$0xff]   ;;  %v16892_v43 = vld [vmem:[%s24573_s8 + $0x3d8] sm:$0xff] }
 0x2a4   : > { %2771 = vmatprep.subr.bf16.mxu0 %v16856_v54  ;;  %4657 = vmatprep.subr.bf16.mxu1 %v17198_v56  ;;  %v20193_v54 = vld [vmem:[%s21340_s15 + $0x10] sm:$0xff]  }
 0x2a7   : > { %2772 = vmatpush1.bf16.msra.mxu0 %v16855_v35  ;;  %4658 = vmatpush1.bf16.msra.mxu1 %v17197_v61  ;;  %v20195_v35 = vld [vmem:[%s21340_s15 + $0x18] sm:$0xff]   ;;  %v16900_v61 = vcombine.high %v16866_v58, %v16870_v59  ;;  %v20221_v59 = vld [vmem:[%s21340_s15 + $0xe0] sm:$0xff]  }
 0x2a8   : > { %2847 = vmatprep.subr.bf16.mxu0 %v16836_v62  ;;  %5020 = vmatprep.subr.bf16.mxu1 %v17242_v63  ;;  %v20196_v62 = vld [vmem:[%s21340_s15 + $0x60] sm:$0xff]   ;;  %v16874_v63 = vld [vmem:[%s24573_s8 + $0x348] sm:$0xff] }
 0x2a9   : > { %v16908_v37 = vcombine.high %v16874_v63, %v16878_v0 }
 0x2aa   : > { %16862 = vmatmul.mubr.msk.bf16.vlgmr.msra.gmra.mrb[36].mxu0 %vm1718_vm1, %v21656_v4  ;;  %17203 = vmatmul.mubr.msk.bf16.vlgmr.msra.gmra.mrb[60].mxu1 %vm1718_vm1, %v21946_v9 }
 0x2ab   : > { %2848 = vmatpush1.bf16.msra.mxu0 %v16835_v5  ;;  %5021 = vmatpush1.bf16.msra.mxu1 %v17241_v7  ;;  %v20198_v5 = vld [vmem:[%s21340_s15 + $0x68] sm:$0xff]  }
 0x2ac   : > { %2849 = vmatprep.subr.bf16.mxu0 %v16844_v10  ;;  %5022 = vmatprep.subr.bf16.mxu1 %v17250_v13  ;;  %v16882_v7 = vld [vmem:[%s24573_s8 + $0x388] sm:$0xff]  ;;  %v16907_v13 = vcombine.low %v16874_v63, %v16878_v0  ;;  %v20222_v63 = vld [vmem:[%s21340_s15 + $0xa0] sm:$0xff]  }
 0x2ad   : > { %2879 = vmatprep.mubr.bf16.mxu0 %v21044_v1  ;;  %5052 = vmatprep.mubr.bf16.mxu1 %v21044_v1  ;;  %v16886_v10 = vld [vmem:[%s24573_s8 + $0x3a8] sm:$0xff] }
 0x2ae   : > { %v16916_v14 = vcombine.high %v16882_v7, %v16886_v10 }
 0x2af   : > { %2850 = vmatpush1.bf16.msra.mxu0 %v16843_v15  ;;  %5023 = vmatpush1.bf16.msra.mxu1 %v17249_v2  ;;  %v16894_v15 = vld [vmem:[%s24573_s8 + $0x3e8] sm:$0xff]  ;;  %v16915_v2 = vcombine.low %v16882_v7, %v16886_v10 }
 0x2b0   : > { %2851 = vmatprep.subr.bf16.mxu0 %v16852_v16  ;;  %5024 = vmatprep.subr.bf16.mxu1 %v17258_v17  ;;  %v20201_v16 = vld [vmem:[%s21340_s15 + $0x30] sm:$0xff]   ;;  %v16924_v17 = vcombine.high %v16890_v51, %v16894_v15  ;;  %v16923_v21 = vcombine.low %v16890_v51, %v16894_v15  ;;  %v20224_v10 = vld [vmem:[%s21340_s15 + $0xa8] sm:$0xff]  }
 0x2b1   : > { %v20229_v15 = vld [vmem:[%s21340_s15 + $0xb0] sm:$0xff]  }
 0x2b3   : > { %2852 = vmatpush1.bf16.msra.mxu0 %v16851_v22  ;;  %5025 = vmatpush1.bf16.msra.mxu1 %v17257_v52  ;;  %v20203_v22 = vld [vmem:[%s21340_s15 + $0x38] sm:$0xff]   ;;  %v16904_v52 = vcombine.high %v16868_v57, %v16872_v20 }
 0x2b4   : > { %2853 = vmatprep.subr.bf16.mxu0 %v16860_v24  ;;  %5026 = vmatprep.subr.bf16.mxu1 %v17266_v25  ;;  %v20207_v24 = vld [vmem:[%s21340_s15 + $0xc0] sm:$0xff]   ;;  %v16876_v25 = vld [vmem:[%s24573_s8 + $0x358] sm:$0xff] }
 0x2b7   : > { %2854 = vmatpush1.bf16.msra.mxu0 %v16859_v11  ;;  %5027 = vmatpush1.bf16.msra.mxu1 %v17265_v32  ;;  %v16903_v11 = vcombine.low %v16868_v57, %v16872_v20  ;;  %v20208_v32 = vld [vmem:[%s21340_s15 + $0x80] sm:$0xff]   ;;  %v16938_v57 = vld [vmem:[%s24573_s8 + $0x428] sm:$0xff] }
 0x2b8   : > { %3093 = vmatprep.subr.bf16.mxu0 %v16898_v33  ;;  %18419 = vmatprep.subr.bf16.mxu1 %v20188_v34  ;;  %v16912_v33 = vcombine.high %v16876_v25, %v16880_v23  ;;  %v20209_v34 = vld [vmem:[%s21340_s15 + $0xc8] sm:$0xff]  }
 0x2ba   : > { %16864 = vmatmul.mubr.msk.bf16.vlgmr.msra.gmra.mrb[40].mxu0 %vm1718_vm1, %v21656_v4  ;;  %17271 = vmatmul.mubr.msk.bf16.vlgmr.msra.gmra.mrb[60].mxu1 %vm1718_vm1, %v21993_v38  ;;  %v16893_v4 = vld [vmem:[%s24573_s8 + $0x3e0] sm:$0xff] }
 0x2bb   : > { %3094 = vmatpush1.bf16.msra.mxu0 %v16897_v46  ;;  %18420 = vmatpush3.bf16.msra.mxu1 %v20189_v39  ;;  %v16922_v56 = vcombine.high %v16889_v53, %v16893_v4  ;;  %v16921_v60 = vcombine.low %v16889_v53, %v16893_v4  ;;  %v16888_v46 = vld [vmem:[%s24573_s8 + $0x3b8] sm:$0xff]  ;;  %v16911_v39 = vcombine.low %v16876_v25, %v16880_v23  ;;  %v20218_v4 = vld [vmem:[%s24569_s4 + $0x124] ss:$72 sps:$4 sm:$0xff]   ;;  %v20232_v23 = vld [vmem:[%s24569_s4 + $0x8] ss:$72 sps:$4 sm:$0xff]  }
 0x2bc   : > { %3095 = vmatprep.subr.bf16.mxu0 %v16906_v40  ;;  %18421 = vmatprep.subr.bf16.mxu1 %v20190_v41  ;;  %v20210_v40 = vld [vmem:[%s21340_s15 + $0x88] sm:$0xff]   ;;  %v16920_v41 = vcombine.high %v16884_v12, %v16888_v46  ;;  %v20216_v53 = vld [vmem:[%s21340_s15 + $0xd8] sm:$0xff]  }
 0x2bd   : > { %3125 = vmatprep.mubr.bf16.mxu0 %v21044_v1  ;;  %6775 = vmatprep.mubr.bf16.mxu1 %v20206_v3  ;;  %v16896_v3 = vld [vmem:[%s24573_s8 + $0x3f8] sm:$0xff]  ;;  %v16946_v25 = vld [vmem:[%s24573_s8 + $0x468] sm:$0xff] }
 0x2bf   : > { %3096 = vmatpush1.bf16.msra.mxu0 %v16905_v44  ;;  %18422 = vmatpush3.bf16.msra.mxu1 %v20191_v45  ;;  %v20213_v44 = vld [vmem:[%s24569_s4 + $0x90] ss:$72 sps:$4 sm:$0xff]   ;;  %v16919_v45 = vcombine.low %v16884_v12, %v16888_v46  ;;  %v16954_v12 = vld [vmem:[%s24573_s8 + $0x4a8] sm:$0xff] }
 0x2c0   : > { %3097 = vmatprep.subr.bf16.mxu0 %v16914_v48  ;;  %18423 = vmatprep.subr.bf16.mxu1 %v20192_v50  ;;  %v20215_v48 = vld [vmem:[%s21340_s15 + $0x90] sm:$0xff]   ;;  %v16928_v50 = vcombine.high %v16892_v43, %v16896_v3 }
 0x2c3   : > { %3098 = vmatpush1.bf16.msra.mxu0 %v16913_v30  ;;  %18424 = vmatpush3.bf16.msra.mxu1 %v20193_v54  ;;  %v16933_v30 = vld [vmem:[%s24573_s8 + $0x400] sm:$0xff] }
 0x2c4   : > { %3099 = vmatprep.subr.bf16.mxu0 %v16922_v56  ;;  %18425 = vmatprep.subr.bf16.mxu1 %v20194_v6  ;;  %v16937_v54 = vld [vmem:[%s24573_s8 + $0x420] sm:$0xff]  ;;  %v16927_v56 = vcombine.low %v16892_v43, %v16896_v3  ;;  %v20217_v6 = vld [vmem:[%s21340_s15 + $0x98] sm:$0xff]   ;;  %v16962_v43 = vld [vmem:[%s24573_s8 + $0x4e8] sm:$0xff] }
 0x2c5   : > { %v16966_v58 = vcombine.high %v16933_v30, %v16937_v54  ;;  %v20241_v3 = vld [vmem:[%s24569_s4 + $0x98] ss:$72 sps:$4 sm:$0xff]  }
 0x2c7   : > { %3100 = vmatpush1.bf16.msra.mxu0 %v16921_v60  ;;  %18426 = vmatpush3.bf16.msra.mxu1 %v20195_v35  ;;  %v16941_v60 = vld [vmem:[%s24573_s8 + $0x440] sm:$0xff] }
 0x2c8   : > { %3134 = vmatprep.subr.bf16.mxu0 %v16900_v61  ;;  %18427 = vmatprep.subr.bf16.mxu1 %v20196_v62  ;;  %v16945_v35 = vld [vmem:[%s24573_s8 + $0x460] sm:$0xff]  ;;  %v16965_v62 = vcombine.low %v16933_v30, %v16937_v54  ;;  %v16940_v30 = vld [vmem:[%s24573_s8 + $0x438] sm:$0xff] }
 0x2c9   : > { %v20220_v61 = vld [vmem:[%s24569_s4 + $0x120] ss:$72 sps:$4 sm:$0xff]   ;;  %v16974_v0 = vcombine.high %v16941_v60, %v16945_v35  ;;  %v16973_v7 = vcombine.low %v16941_v60, %v16945_v35  ;;  %v16948_v60 = vld [vmem:[%s24573_s8 + $0x478] sm:$0xff] }
 0x2ca   : > { %16929 = vmatmul.mubr.msk.bf16.vlgmr.msra.gmra.mrb[32].mxu0 %vm1718_vm1, %v21714_v29  ;;  %v20248_v35 = vld [vmem:[%s24569_s4 + $0x128] ss:$72 sps:$4 sm:$0xff]  }
 0x2cb   : > { %3135 = vmatpush1.bf16.msra.mxu0 %v16899_v49  ;;  %18428 = vmatpush3.bf16.msra.mxu1 %v20197_v27  ;;  %v20223_v49 = vld [vmem:[%s21340_s15 + $0xe8] sm:$0xff]   ;;  %v20225_v27 = vld [vmem:[%s24569_s4 + $0x1b4] ss:$72 sps:$4 sm:$0xff]  }
 0x2cc   : > { %3136 = vmatprep.subr.bf16.mxu0 %v16908_v37  ;;  %18429 = vmatprep.subr.bf16.mxu1 %v20198_v5  ;;  %v16949_v37 = vld [vmem:[%s24573_s8 + $0x480] sm:$0xff] }
 0x2cd   : > { %3166 = vmatprep.mubr.bf16.mxu0 %v21044_v1  ;;  %v16953_v5 = vld [vmem:[%s24573_s8 + $0x4a0] sm:$0xff] }
 0x2ce   : > { %v16981_v51 = vcombine.low %v16949_v37, %v16953_v5 }
 0x2cf   : > { %3137 = vmatpush1.bf16.msra.mxu0 %v16907_v13  ;;  %18430 = vmatpush3.bf16.msra.mxu1 %v20199_v28  ;;  %v16982_v13 = vcombine.high %v16949_v37, %v16953_v5  ;;  %v20228_v28 = vld [vmem:[%s21340_s15 + $0xf0] sm:$0xff]   ;;  %v16956_v37 = vld [vmem:[%s24573_s8 + $0x4b8] sm:$0xff] }
 0x2d0   : > { %3138 = vmatprep.subr.bf16.mxu0 %v16916_v14  ;;  %18431 = vmatprep.subr.bf16.mxu1 %v20200_v55  ;;  %v16957_v14 = vld [vmem:[%s24573_s8 + $0x4c0] sm:$0xff]  ;;  %v20227_v55 = vld [vmem:[%s24569_s4 + $0x1b0] ss:$72 sps:$4 sm:$0xff]  }
 0x2d3   : > { %3139 = vmatpush1.bf16.msra.mxu0 %v16915_v2  ;;  %18432 = vmatpush3.bf16.msra.mxu1 %v20201_v16  ;;  %v20230_v16 = vld [vmem:[%s21340_s15 + $0xf8] sm:$0xff]  }
 0x2d4   : > { %3140 = vmatprep.subr.bf16.mxu0 %v16924_v17  ;;  %18433 = vmatprep.subr.bf16.mxu1 %v20202_v18  ;;  %v20234_v17 = vld [vmem:[%s24569_s4 + $0xc] ss:$72 sps:$4 sm:$0xff]  }
 0x2d5   : > { %v16934_v18 = vld [vmem:[%s24573_s8 + $0x408] sm:$0xff] }
 0x2d7   : > { %3141 = vmatpush1.bf16.msra.mxu0 %v16923_v21  ;;  %18434 = vmatpush3.bf16.msra.mxu1 %v20203_v22  ;;  %v20231_v21 = vld [vmem:[%s21340_s15 + $0xb8] sm:$0xff]   ;;  %v16968_v22 = vcombine.high %v16934_v18, %v16938_v57 }
 0x2d8   : > { %3216 = vmatprep.subr.bf16.mxu0 %v16904_v52  ;;  %18459 = vmatprep.subr.bf16.mxu1 %v20207_v24  ;;  %v20235_v52 = vld [vmem:[%s21340_s15 + $0x140] sm:$0xff]   ;;  %v16942_v24 = vld [vmem:[%s24573_s8 + $0x448] sm:$0xff] }
 0x2d9   : > { %v16975_v46 = vcombine.low %v16942_v24, %v16946_v25 }
 0x2da   : > { %16930 = vmatmul.mubr.msk.bf16.vlgmr.msra.gmra.mrb[36].mxu0 %vm1718_vm1, %v21714_v29  ;;  %6776 = vmatmul.mubr.bf16.vlgmr.msra.gmra.mrb[64].mxu1 %v20204_v26  ;;  %v16967_v26 = vcombine.low %v16934_v18, %v16938_v57  ;;  %v17005_v18 = vld [vmem:[%s24573_s8 + $0x520] sm:$0xff] }
 0x2db   : > { %3217 = vmatpush1.bf16.msra.mxu0 %v16903_v11  ;;  %18460 = vmatpush3.bf16.msra.mxu1 %v20208_v32  ;;  %v20236_v11 = vld [vmem:[%s21340_s15 + $0x100] sm:$0xff]   ;;  %v16976_v32 = vcombine.high %v16942_v24, %v16946_v25  ;;  %v20260_v25 = vld [vmem:[%s24569_s4 + $0x10] ss:$72 sps:$4 sm:$0xff]  }
 0x2dc   : > { %3218 = vmatprep.subr.bf16.mxu0 %v16912_v33  ;;  %18461 = vmatprep.subr.bf16.mxu1 %v20209_v34  ;;  %v20237_v33 = vld [vmem:[%s21340_s15 + $0x148] sm:$0xff]   ;;  %v20239_v34 = vld [vmem:[%s24569_s4 + $0x9c] ss:$72 sps:$4 sm:$0xff]  }
 0x2dd   : > { %6783 = vmatprep.mubr.bf16.mxu1 %v20211_v36  ;;  %3248 = vmatprep.mubr.bf16.mxu0 %v21044_v1  ;;  %v16950_v36 = vld [vmem:[%s24573_s8 + $0x488] sm:$0xff]  ;;  %v17013_v24 = vld [vmem:[%s24573_s8 + $0x560] sm:$0xff] }
 0x2df   : > { %3219 = vmatpush1.bf16.msra.mxu0 %v16911_v39  ;;  %18462 = vmatpush3.bf16.msra.mxu1 %v20210_v40  ;;  %v20238_v39 = vld [vmem:[%s21340_s15 + $0x108] sm:$0xff]   ;;  %v16984_v40 = vcombine.high %v16950_v36, %v16954_v12 }
 0x2e0   : > { %3220 = vmatprep.subr.bf16.mxu0 %v16920_v41  ;;  %18463 = vmatprep.subr.bf16.mxu1 %v20214_v42  ;;  %v20242_v41 = vld [vmem:[%s21340_s15 + $0x150] sm:$0xff]   ;;  %v16958_v42 = vld [vmem:[%s24573_s8 + $0x4c8] sm:$0xff] }
 0x2e1   : > { %v16991_v54 = vcombine.low %v16958_v42, %v16962_v43 }
 0x2e2   : > { %6784 = vmatmul.mubr.bf16.gmra.mrb[68].mxu1 %v20213_v44  ;;  %v16983_v44 = vcombine.low %v16950_v36, %v16954_v12  ;;  %v17021_v36 = vld [vmem:[%s24573_s8 + $0x5a0] sm:$0xff] }
 0x2e3   : > { %3221 = vmatpush1.bf16.msra.mxu0 %v16919_v45  ;;  %18464 = vmatpush3.bf16.msra.mxu1 %v20215_v48  ;;  %v20243_v45 = vld [vmem:[%s21340_s15 + $0x110] sm:$0xff]   ;;  %v16992_v48 = vcombine.high %v16958_v42, %v16962_v43  ;;  %v20269_v42 = vld [vmem:[%s24569_s4 + $0xa0] ss:$72 sps:$4 sm:$0xff]  }
 0x2e4   : > { %3222 = vmatprep.subr.bf16.mxu0 %v16928_v50  ;;  %18465 = vmatprep.subr.bf16.mxu1 %v20216_v53  ;;  %v20244_v50 = vld [vmem:[%s21340_s15 + $0x158] sm:$0xff]   ;;  %v20246_v53 = vld [vmem:[%s24569_s4 + $0x12c] ss:$72 sps:$4 sm:$0xff]  }
 0x2e5   : > { %6791 = vmatprep.mubr.bf16.mxu1 %v20218_v4  ;;  %v16936_v4 = vld [vmem:[%s24573_s8 + $0x418] sm:$0xff] }
 0x2e7   : > { %3223 = vmatpush1.bf16.msra.mxu0 %v16927_v56  ;;  %18466 = vmatpush3.bf16.msra.mxu1 %v20217_v6  ;;  %v20245_v56 = vld [vmem:[%s21340_s15 + $0x118] sm:$0xff]   ;;  %v16972_v6 = vcombine.high %v16936_v4, %v16940_v30 }
 0x2e8   : > { %3462 = vmatprep.subr.bf16.mxu0 %v16966_v58  ;;  %18467 = vmatprep.subr.bf16.mxu1 %v20221_v59  ;;  %v20249_v58 = vld [vmem:[%s21340_s15 + $0x160] sm:$0xff]   ;;  %v16944_v59 = vld [vmem:[%s24573_s8 + $0x458] sm:$0xff] }
 0x2e9   : > { %v16979_v5 = vcombine.low %v16944_v59, %v16948_v60 }
 0x2ea   : > { %16932 = vmatmul.mubr.msk.bf16.vlgmr.msra.gmra.mrb[40].mxu0 %vm1718_vm1, %v21714_v29  ;;  %6792 = vmatmul.mubr.bf16.gmra.mrb[72].mxu1 %v20220_v61  ;;  %v16961_v29 = vld [vmem:[%s24573_s8 + $0x4e0] sm:$0xff]  ;;  %v16971_v61 = vcombine.low %v16936_v4, %v16940_v30  ;;  %v20273_v30 = vld [vmem:[%s21340_s15 + $0x198] sm:$0xff]  }
 0x2eb   : > { %3463 = vmatpush1.bf16.msra.mxu0 %v16965_v62  ;;  %18468 = vmatpush3.bf16.msra.mxu1 %v20222_v63  ;;  %v16990_v2 = vcombine.high %v16957_v14, %v16961_v29  ;;  %v16989_v20 = vcombine.low %v16957_v14, %v16961_v29  ;;  %v20250_v62 = vld [vmem:[%s21340_s15 + $0x120] sm:$0xff]   ;;  %v16980_v63 = vcombine.high %v16944_v59, %v16948_v60  ;;  %v16964_v14 = vld [vmem:[%s24573_s8 + $0x4f8] sm:$0xff] }
 0x2ec   : > { %3464 = vmatprep.subr.bf16.mxu0 %v16974_v0  ;;  %18469 = vmatprep.subr.bf16.mxu1 %v20223_v49  ;;  %v20251_v0 = vld [vmem:[%s21340_s15 + $0x168] sm:$0xff]   ;;  %v20253_v49 = vld [vmem:[%s24569_s4 + $0x1bc] ss:$72 sps:$4 sm:$0xff]   ;;  %v20255_v29 = vld [vmem:[%s24569_s4 + $0x1b8] ss:$72 sps:$4 sm:$0xff]  }
 0x2ed   : > { %6799 = vmatprep.mubr.bf16.mxu1 %v20225_v27  ;;  %3494 = vmatprep.mubr.bf16.mxu0 %v21044_v1  ;;  %v16952_v27 = vld [vmem:[%s24573_s8 + $0x498] sm:$0xff] }
 0x2ee   : > { %v20276_v59 = vld [vmem:[%s24569_s4 + $0x130] ss:$72 sps:$4 sm:$0xff]  }
 0x2ef   : > { %3465 = vmatpush1.bf16.msra.mxu0 %v16973_v7  ;;  %18470 = vmatpush3.bf16.msra.mxu1 %v20224_v10  ;;  %v20252_v7 = vld [vmem:[%s21340_s15 + $0x128] sm:$0xff]   ;;  %v16988_v10 = vcombine.high %v16952_v27, %v16956_v37 }
 0x2f0   : > { %3466 = vmatprep.subr.bf16.mxu0 %v16982_v13  ;;  %18471 = vmatprep.subr.bf16.mxu1 %v20228_v28  ;;  %v20256_v13 = vld [vmem:[%s21340_s15 + $0x170] sm:$0xff]   ;;  %v16960_v28 = vld [vmem:[%s24573_s8 + $0x4d8] sm:$0xff] }
 0x2f1   : > { %v16995_v57 = vcombine.low %v16960_v28, %v16964_v14 }
 0x2f2   : > { %6800 = vmatmul.mubr.bf16.gmra.mrb[76].mxu1 %v20227_v55  ;;  %v16987_v55 = vcombine.low %v16952_v27, %v16956_v37  ;;  %v20280_v37 = vld [vmem:[%s21340_s15 + $0x1a8] sm:$0xff]  }
 0x2f3   : > { %3467 = vmatpush1.bf16.msra.mxu0 %v16981_v51  ;;  %18472 = vmatpush3.bf16.msra.mxu1 %v20229_v15  ;;  %v20257_v51 = vld [vmem:[%s21340_s15 + $0x130] sm:$0xff]   ;;  %v16996_v15 = vcombine.high %v16960_v28, %v16964_v14  ;;  %v20283_v28 = vld [vmem:[%s24569_s4 + $0x1c0] ss:$72 sps:$4 sm:$0xff]  }
 0x2f4   : > { %3468 = vmatprep.subr.bf16.mxu0 %v16990_v2  ;;  %18473 = vmatprep.subr.bf16.mxu1 %v20230_v16  ;;  %v20258_v2 = vld [vmem:[%s21340_s15 + $0x178] sm:$0xff]  }
 0x2f5   : > { %6840 = vmatprep.mubr.bf16.mxu1 %v20234_v17  ;;  %v20262_v16 = vld [vmem:[%s24569_s4 + $0x14] ss:$72 sps:$4 sm:$0xff]   ;;  %v17001_v17 = vld [vmem:[%s24573_s8 + $0x500] sm:$0xff] }
 0x2f7   : > { %3469 = vmatpush1.bf16.msra.mxu0 %v16989_v20  ;;  %18474 = vmatpush3.bf16.msra.mxu1 %v20231_v21  ;;  %v20259_v20 = vld [vmem:[%s21340_s15 + $0x138] sm:$0xff]   ;;  %v17034_v21 = vcombine.high %v17001_v17, %v17005_v18 }
 0x2f8   : > { %3503 = vmatprep.subr.bf16.mxu0 %v16968_v22  ;;  %18499 = vmatprep.subr.bf16.mxu1 %v20235_v52  ;;  %v20263_v22 = vld [vmem:[%s21340_s15 + $0x1c0] sm:$0xff]  }
 0x2f9   : > { %v17009_v52 = vld [vmem:[%s24573_s8 + $0x540] sm:$0xff] }
 0x2fa   : > { %16997 = vmatmul.mubr.msk.bf16.vlgmr.msra.gmra.mrb[32].mxu0 %vm1718_vm1, %v21772_v19  ;;  %6841 = vmatmul.mubr.bf16.vlgmr.msra.gmra.mrb[80].mxu1 %v20232_v23  ;;  %v17033_v23 = vcombine.low %v17001_v17, %v17005_v18  ;;  %v17041_v12 = vcombine.low %v17009_v52, %v17013_v24  ;;  %v20287_v18 = vld [vmem:[%s21340_s15 + $0x1b8] sm:$0xff]  }
 0x2fb   : > { %3504 = vmatpush1.bf16.msra.mxu0 %v16967_v26  ;;  %18500 = vmatpush3.bf16.msra.mxu1 %v20236_v11  ;;  %v20264_v26 = vld [vmem:[%s21340_s15 + $0x180] sm:$0xff]   ;;  %v17042_v11 = vcombine.high %v17009_v52, %v17013_v24 }
 0x2fc   : > { %3505 = vmatprep.subr.bf16.mxu0 %v16976_v32  ;;  %18501 = vmatprep.subr.bf16.mxu1 %v20237_v33  ;;  %v20265_v32 = vld [vmem:[%s21340_s15 + $0x1c8] sm:$0xff]   ;;  %v20288_v52 = vld [vmem:[%s24569_s4 + $0x18] ss:$72 sps:$4 sm:$0xff]  }
 0x2fd   : > { %6848 = vmatprep.mubr.bf16.mxu1 %v20239_v34  ;;  %3535 = vmatprep.mubr.bf16.mxu0 %v21044_v1  ;;  %v20267_v33 = vld [vmem:[%s24569_s4 + $0xa4] ss:$72 sps:$4 sm:$0xff]  }
 0x2fe   : > { %v17017_v34 = vld [vmem:[%s24573_s8 + $0x580] sm:$0xff] }
 0x2ff   : > { %3506 = vmatpush1.bf16.msra.mxu0 %v16975_v46  ;;  %18502 = vmatpush3.bf16.msra.mxu1 %v20238_v39  ;;  %v20266_v46 = vld [vmem:[%s21340_s15 + $0x188] sm:$0xff]   ;;  %v17050_v39 = vcombine.high %v17017_v34, %v17021_v36  ;;  %v17049_v43 = vcombine.low %v17017_v34, %v17021_v36 }
 0x300   : > { %3507 = vmatprep.subr.bf16.mxu0 %v16984_v40  ;;  %18503 = vmatprep.subr.bf16.mxu1 %v20242_v41  ;;  %v20270_v40 = vld [vmem:[%s21340_s15 + $0x1d0] sm:$0xff]   ;;  %v17025_v41 = vld [vmem:[%s24573_s8 + $0x5c0] sm:$0xff]  ;;  %v20294_v36 = vld [vmem:[%s21340_s15 + $0x208] sm:$0xff]  }
 0x302   : > { %6849 = vmatmul.mubr.bf16.gmra.mrb[84].mxu1 %v20241_v3  ;;  %v20271_v3 = vld [vmem:[%s21340_s15 + $0x190] sm:$0xff]  }
 0x303   : > { %3508 = vmatpush1.bf16.msra.mxu0 %v16983_v44  ;;  %18504 = vmatpush3.bf16.msra.mxu1 %v20243_v45  ;;  %v20272_v45 = vld [vmem:[%s21340_s15 + $0x1d8] sm:$0xff]  }
 0x304   : > { %3509 = vmatprep.subr.bf16.mxu0 %v16992_v48  ;;  %18505 = vmatprep.subr.bf16.mxu1 %v20244_v50  ;;  %v20274_v48 = vld [vmem:[%s24569_s4 + $0x134] ss:$72 sps:$4 sm:$0xff]   ;;  %v17002_v50 = vld [vmem:[%s24573_s8 + $0x508] sm:$0xff] }
 0x305   : > { %6856 = vmatprep.mubr.bf16.mxu1 %v20246_v53  ;;  %v17006_v53 = vld [vmem:[%s24573_s8 + $0x528] sm:$0xff] }
 0x306   : > { %v17035_v60 = vcombine.low %v17002_v50, %v17006_v53 }
 0x307   : > { %3510 = vmatpush1.bf16.msra.mxu0 %v16991_v54  ;;  %18506 = vmatpush3.bf16.msra.mxu1 %v20245_v56  ;;  %v17036_v54 = vcombine.high %v17002_v50, %v17006_v53  ;;  %v20277_v56 = vld [vmem:[%s21340_s15 + $0x1e0] sm:$0xff]   ;;  %v20301_v53 = vld [vmem:[%s21340_s15 + $0x218] sm:$0xff]  }
 0x308   : > { %3585 = vmatprep.subr.bf16.mxu0 %v16972_v6  ;;  %18507 = vmatprep.subr.bf16.mxu1 %v20249_v58  ;;  %v17010_v6 = vld [vmem:[%s24573_s8 + $0x548] sm:$0xff] }
 0x309   : > { %v17014_v58 = vld [vmem:[%s24573_s8 + $0x568] sm:$0xff] }
 0x30a   : > { %16998 = vmatmul.mubr.msk.bf16.vlgmr.msra.gmra.mrb[36].mxu0 %vm1718_vm1, %v21772_v19  ;;  %6857 = vmatmul.mubr.bf16.gmra.mrb[88].mxu1 %v20248_v35  ;;  %v20278_v35 = vld [vmem:[%s21340_s15 + $0x1a0] sm:$0xff]   ;;  %v17043_v27 = vcombine.low %v17010_v6, %v17014_v58 }
 0x30b   : > { %3586 = vmatpush1.bf16.msra.mxu0 %v16971_v61  ;;  %18508 = vmatpush3.bf16.msra.mxu1 %v20250_v62  ;;  %v17044_v61 = vcombine.high %v17010_v6, %v17014_v58  ;;  %v20279_v62 = vld [vmem:[%s21340_s15 + $0x1e8] sm:$0xff]   ;;  %v20304_v6 = vld [vmem:[%s24569_s4 + $0x138] ss:$72 sps:$4 sm:$0xff]  }
 0x30c   : > { %3587 = vmatprep.subr.bf16.mxu0 %v16980_v63  ;;  %18509 = vmatprep.subr.bf16.mxu1 %v20251_v0  ;;  %v20281_v63 = vld [vmem:[%s24569_s4 + $0x1c4] ss:$72 sps:$4 sm:$0xff]  }
 0x30d   : > { %6864 = vmatprep.mubr.bf16.mxu1 %v20253_v49  ;;  %3617 = vmatprep.mubr.bf16.mxu0 %v21044_v1  ;;  %v17018_v0 = vld [vmem:[%s24573_s8 + $0x588] sm:$0xff] }
 0x30e   : > { %v17022_v49 = vld [vmem:[%s24573_s8 + $0x5a8] sm:$0xff] }
 0x30f   : > { %3588 = vmatpush1.bf16.msra.mxu0 %v16979_v5  ;;  %18510 = vmatpush3.bf16.msra.mxu1 %v20252_v7  ;;  %v17052_v5 = vcombine.high %v17018_v0, %v17022_v49  ;;  %v20284_v7 = vld [vmem:[%s21340_s15 + $0x1f0] sm:$0xff]   ;;  %v17051_v14 = vcombine.low %v17018_v0, %v17022_v49  ;;  %v20308_v49 = vld [vmem:[%s21340_s15 + $0x228] sm:$0xff]  }
 0x310   : > { %3589 = vmatprep.subr.bf16.mxu0 %v16988_v10  ;;  %18511 = vmatprep.subr.bf16.mxu1 %v20256_v13  ;;  %v17026_v10 = vld [vmem:[%s24573_s8 + $0x5c8] sm:$0xff] }
 0x311   : > { %v17030_v13 = vld [vmem:[%s24573_s8 + $0x5e8] sm:$0xff] }
 0x312   : > { %6865 = vmatmul.mubr.bf16.gmra.mrb[92].mxu1 %v20255_v29  ;;  %v20285_v29 = vld [vmem:[%s21340_s15 + $0x1b0] sm:$0xff]   ;;  %v17059_v17 = vcombine.low %v17026_v10, %v17030_v13 }
 0x313   : > { %3590 = vmatpush1.bf16.msra.mxu0 %v16987_v55  ;;  %18512 = vmatpush3.bf16.msra.mxu1 %v20257_v51  ;;  %v17060_v55 = vcombine.high %v17026_v10, %v17030_v13  ;;  %v20286_v51 = vld [vmem:[%s21340_s15 + $0x1f8] sm:$0xff]   ;;  %v20313_v13 = vld [vmem:[%s21340_s15 + $0x230] sm:$0xff]  }
 0x314   : > { %3591 = vmatprep.subr.bf16.mxu0 %v16996_v15  ;;  %18513 = vmatprep.subr.bf16.mxu1 %v20258_v2  ;;  %v20290_v15 = vld [vmem:[%s24569_s4 + $0x1c] ss:$72 sps:$4 sm:$0xff]  }
 0x315   : > { %6905 = vmatprep.mubr.bf16.mxu1 %v20262_v16  ;;  %v17004_v2 = vld [vmem:[%s24573_s8 + $0x518] sm:$0xff] }
 0x316   : > { %v17008_v16 = vld [vmem:[%s24573_s8 + $0x538] sm:$0xff] }
 0x317   : > { %3592 = vmatpush1.bf16.msra.mxu0 %v16995_v57  ;;  %18514 = vmatpush3.bf16.msra.mxu1 %v20259_v20  ;;  %v17040_v57 = vcombine.high %v17004_v2, %v17008_v16  ;;  %v20291_v20 = vld [vmem:[%s21340_s15 + $0x240] sm:$0xff]   ;;  %v17039_v24 = vcombine.low %v17004_v2, %v17008_v16  ;;  %v20315_v2 = vld [vmem:[%s21340_s15 + $0x238] sm:$0xff]  }
 0x318   : > { %3831 = vmatprep.subr.bf16.mxu0 %v17034_v21  ;;  %18539 = vmatprep.subr.bf16.mxu1 %v20263_v22  ;;  %v17012_v21 = vld [vmem:[%s24573_s8 + $0x558] sm:$0xff] }
 0x319   : > { %v17016_v22 = vld [vmem:[%s24573_s8 + $0x578] sm:$0xff] }
 0x31a   : > { %17000 = vmatmul.mubr.msk.bf16.vlgmr.msra.gmra.mrb[40].mxu0 %vm1718_vm1, %v21772_v19  ;;  %6906 = vmatmul.mubr.bf16.vlgmr.msra.gmra.mrb[96].mxu1 %v20260_v25  ;;  %v17029_v19 = vld [vmem:[%s24573_s8 + $0x5e0] sm:$0xff]  ;;  %v17047_v34 = vcombine.low %v17012_v21, %v17016_v22 }
 0x31b   : > { %3832 = vmatpush1.bf16.msra.mxu0 %v17033_v23  ;;  %18540 = vmatpush3.bf16.msra.mxu1 %v20264_v26  ;;  %v17058_v44 = vcombine.high %v17025_v41, %v17029_v19  ;;  %v17057_v4 = vcombine.low %v17025_v41, %v17029_v19  ;;  %v20292_v25 = vld [vmem:[%s21340_s15 + $0x200] sm:$0xff]   ;;  %v17048_v23 = vcombine.high %v17012_v21, %v17016_v22  ;;  %v20293_v26 = vld [vmem:[%s21340_s15 + $0x248] sm:$0xff]  }
 0x31c   : > { %3833 = vmatprep.subr.bf16.mxu0 %v17042_v11  ;;  %18541 = vmatprep.subr.bf16.mxu1 %v20265_v32  ;;  %v20295_v11 = vld [vmem:[%s24569_s4 + $0xac] ss:$72 sps:$4 sm:$0xff]   ;;  %v17020_v32 = vld [vmem:[%s24573_s8 + $0x598] sm:$0xff]  ;;  %v20297_v41 = vld [vmem:[%s24569_s4 + $0xa8] ss:$72 sps:$4 sm:$0xff]  }
 0x31d   : > { %6913 = vmatprep.mubr.bf16.mxu1 %v20267_v33  ;;  %3863 = vmatprep.mubr.bf16.mxu0 %v21044_v1  ;;  %v17024_v33 = vld [vmem:[%s24573_s8 + $0x5b8] sm:$0xff]  ;;  %v20320_v22 = vld [vmem:[%s21340_s15 + $0x280] sm:$0xff]  }
 0x31e   : > { %v17055_v19 = vcombine.low %v17020_v32, %v17024_v33 }
 0x31f   : > { %3834 = vmatpush1.bf16.msra.mxu0 %v17041_v12  ;;  %18542 = vmatpush3.bf16.msra.mxu1 %v20266_v46  ;;  %v17056_v12 = vcombine.high %v17020_v32, %v17024_v33  ;;  %v20298_v46 = vld [vmem:[%s21340_s15 + $0x250] sm:$0xff]   ;;  %v20322_v32 = vld [vmem:[%s21340_s15 + $0x288] sm:$0xff]  }
 0x320   : > { %3835 = vmatprep.subr.bf16.mxu0 %v17050_v39  ;;  %18543 = vmatprep.subr.bf16.mxu1 %v20270_v40  ;;  %v17028_v39 = vld [vmem:[%s24573_s8 + $0x5d8] sm:$0xff] }
 0x321   : > { %v17032_v40 = vld [vmem:[%s24573_s8 + $0x5f8] sm:$0xff] }
 0x322   : > { %6914 = vmatmul.mubr.bf16.gmra.mrb[100].mxu1 %v20269_v42  ;;  %v20299_v42 = vld [vmem:[%s21340_s15 + $0x210] sm:$0xff]   ;;  %v17063_v50 = vcombine.low %v17028_v39, %v17032_v40 }
 0x323   : > { %3836 = vmatpush1.bf16.msra.mxu0 %v17049_v43  ;;  %18544 = vmatpush3.bf16.msra.mxu1 %v20271_v3  ;;  %v17064_v43 = vcombine.high %v17028_v39, %v17032_v40  ;;  %v20300_v3 = vld [vmem:[%s21340_s15 + $0x258] sm:$0xff]   ;;  %v20327_v40 = vld [vmem:[%s21340_s15 + $0x290] sm:$0xff]  }
 0x324   : > { %3837 = vmatprep.subr.bf16.mxu0 %v17058_v44  ;;  %18545 = vmatprep.subr.bf16.mxu1 %v20272_v45  ;;  %v20302_v44 = vld [vmem:[%s24569_s4 + $0x13c] ss:$72 sps:$4 sm:$0xff]  }
 0x325   : > { %6921 = vmatprep.mubr.bf16.mxu1 %v20274_v48  ;;  %v17069_v45 = vld [vmem:[%s24573_s8 + $0x600] sm:$0xff] }
 0x326   : > { %v17073_v48 = vld [vmem:[%s24573_s8 + $0x620] sm:$0xff] }
 0x327   : > { %3838 = vmatpush1.bf16.msra.mxu0 %v17057_v4  ;;  %18546 = vmatpush3.bf16.msra.mxu1 %v20273_v30  ;;  %v17102_v4 = vcombine.high %v17069_v45, %v17073_v48  ;;  %v20305_v30 = vld [vmem:[%s21340_s15 + $0x260] sm:$0xff]   ;;  %v17101_v58 = vcombine.low %v17069_v45, %v17073_v48  ;;  %v20329_v45 = vld [vmem:[%s21340_s15 + $0x298] sm:$0xff]  }
 0x328   : > { %3872 = vmatprep.subr.bf16.mxu0 %v17036_v54  ;;  %18547 = vmatprep.subr.bf16.mxu1 %v20277_v56  ;;  %v17077_v54 = vld [vmem:[%s24573_s8 + $0x640] sm:$0xff] }
 0x329   : > { %v17081_v56 = vld [vmem:[%s24573_s8 + $0x660] sm:$0xff] }
 0x32a   : > { %17065 = vmatmul.mubr.msk.bf16.vlgmr.msra.gmra.mrb[32].mxu0 %vm1718_vm1, %v21830_v47  ;;  %6922 = vmatmul.mubr.bf16.gmra.mrb[104].mxu1 %v20276_v59  ;;  %v20306_v59 = vld [vmem:[%s21340_s15 + $0x220] sm:$0xff]   ;;  %v17109_v0 = vcombine.low %v17077_v54, %v17081_v56 }
 0x32b   : > { %3873 = vmatpush1.bf16.msra.mxu0 %v17035_v60  ;;  %18548 = vmatpush3.bf16.msra.mxu1 %v20278_v35  ;;  %v17110_v60 = vcombine.high %v17077_v54, %v17081_v56  ;;  %v20307_v35 = vld [vmem:[%s21340_s15 + $0x268] sm:$0xff]   ;;  %v20334_v56 = vld [vmem:[%s21340_s15 + $0x2a0] sm:$0xff]  }
 0x32c   : > { %3874 = vmatprep.subr.bf16.mxu0 %v17044_v61  ;;  %18549 = vmatprep.subr.bf16.mxu1 %v20279_v62  ;;  %v20309_v61 = vld [vmem:[%s24569_s4 + $0x1cc] ss:$72 sps:$4 sm:$0xff]   ;;  %v17085_v62 = vld [vmem:[%s24573_s8 + $0x680] sm:$0xff] }
 0x32d   : > { %6929 = vmatprep.mubr.bf16.mxu1 %v20281_v63  ;;  %3904 = vmatprep.mubr.bf16.mxu0 %v21044_v1  ;;  %v17089_v63 = vld [vmem:[%s24573_s8 + $0x6a0] sm:$0xff] }
 0x32e   : > { %v17117_v10 = vcombine.low %v17085_v62, %v17089_v63 }
 0x32f   : > { %3875 = vmatpush1.bf16.msra.mxu0 %v17043_v27  ;;  %18550 = vmatpush3.bf16.msra.mxu1 %v20280_v37  ;;  %v17118_v27 = vcombine.high %v17085_v62, %v17089_v63  ;;  %v20312_v37 = vld [vmem:[%s21340_s15 + $0x270] sm:$0xff]   ;;  %v20336_v62 = vld [vmem:[%s21340_s15 + $0x2a8] sm:$0xff]  }
 0x330   : > { %3876 = vmatprep.subr.bf16.mxu0 %v17052_v5  ;;  %18551 = vmatprep.subr.bf16.mxu1 %v20284_v7  ;;  %v17093_v5 = vld [vmem:[%s24573_s8 + $0x6c0] sm:$0xff]  ;;  %v20311_v7 = vld [vmem:[%s24569_s4 + $0x1c8] ss:$72 sps:$4 sm:$0xff]  }
 0x332   : > { %6930 = vmatmul.mubr.bf16.gmra.mrb[108].mxu1 %v20283_v28 }
 0x333   : > { %3877 = vmatpush1.bf16.msra.mxu0 %v17051_v14  ;;  %18552 = vmatpush3.bf16.msra.mxu1 %v20285_v29  ;;  %v20314_v14 = vld [vmem:[%s21340_s15 + $0x278] sm:$0xff]   ;;  %v20318_v29 = vld [vmem:[%s24569_s4 + $0x24] ss:$72 sps:$4 sm:$0xff]  }
 0x334   : > { %3878 = vmatprep.subr.bf16.mxu0 %v17060_v55  ;;  %18553 = vmatprep.subr.bf16.mxu1 %v20286_v51  ;;  %v17070_v55 = vld [vmem:[%s24573_s8 + $0x608] sm:$0xff] }
 0x335   : > { %6970 = vmatprep.mubr.bf16.mxu1 %v20290_v15  ;;  %v17074_v51 = vld [vmem:[%s24573_s8 + $0x628] sm:$0xff] }
 0x336   : > { %v17104_v16 = vcombine.high %v17070_v55, %v17074_v51  ;;  %v17103_v21 = vcombine.low %v17070_v55, %v17074_v51  ;;  %v20343_v55 = vld [vmem:[%s21340_s15 + $0x2b8] sm:$0xff]  }
 0x337   : > { %3879 = vmatpush1.bf16.msra.mxu0 %v17059_v17  ;;  %18554 = vmatpush3.bf16.msra.mxu1 %v20287_v18  ;;  %v20319_v17 = vld [vmem:[%s21340_s15 + $0x2c0] sm:$0xff]   ;;  %v17078_v18 = vld [vmem:[%s24573_s8 + $0x648] sm:$0xff] }
 0x338   : > { %3954 = vmatprep.subr.bf16.mxu0 %v17040_v57  ;;  %18579 = vmatprep.subr.bf16.mxu1 %v20291_v20  ;;  %v17082_v57 = vld [vmem:[%s24573_s8 + $0x668] sm:$0xff] }
 0x339   : > { %v20316_v20 = vld [vmem:[%s24569_s4 + $0x20] ss:$72 sps:$4 sm:$0xff]  }
 0x33a   : > { %17066 = vmatmul.mubr.msk.bf16.vlgmr.msra.gmra.mrb[36].mxu0 %vm1718_vm1, %v21830_v47  ;;  %6971 = vmatmul.mubr.bf16.vlgmr.msra.gmra.mrb[112].mxu1 %v20288_v52  ;;  %v17112_v52 = vcombine.high %v17078_v18, %v17082_v57 }
 0x33b   : > { %3955 = vmatpush1.bf16.msra.mxu0 %v17039_v24  ;;  %18580 = vmatpush3.bf16.msra.mxu1 %v20292_v25  ;;  %v20321_v24 = vld [vmem:[%s21340_s15 + $0x2c8] sm:$0xff]   ;;  %v20323_v25 = vld [vmem:[%s24569_s4 + $0xb4] ss:$72 sps:$4 sm:$0xff]  }
 0x33c   : > { %3956 = vmatprep.subr.bf16.mxu0 %v17048_v23  ;;  %18581 = vmatprep.subr.bf16.mxu1 %v20293_v26  ;;  %v17086_v23 = vld [vmem:[%s24573_s8 + $0x688] sm:$0xff] }
 0x33d   : > { %6978 = vmatprep.mubr.bf16.mxu1 %v20295_v11  ;;  %3986 = vmatprep.mubr.bf16.mxu0 %v21044_v1  ;;  %v17090_v26 = vld [vmem:[%s24573_s8 + $0x6a8] sm:$0xff]  ;;  %v17111_v11 = vcombine.low %v17078_v18, %v17082_v57  ;;  %v20348_v57 = vld [vmem:[%s21340_s15 + $0x300] sm:$0xff]  }
 0x33e   : > { %v17120_v33 = vcombine.high %v17086_v23, %v17090_v26  ;;  %v17119_v39 = vcombine.low %v17086_v23, %v17090_v26  ;;  %v20350_v23 = vld [vmem:[%s21340_s15 + $0x308] sm:$0xff]  }
 0x33f   : > { %3957 = vmatpush1.bf16.msra.mxu0 %v17047_v34  ;;  %18582 = vmatpush3.bf16.msra.mxu1 %v20294_v36  ;;  %v20326_v34 = vld [vmem:[%s21340_s15 + $0x2d0] sm:$0xff]   ;;  %v17094_v36 = vld [vmem:[%s24573_s8 + $0x6c8] sm:$0xff] }
 0x340   : > { %3958 = vmatprep.subr.bf16.mxu0 %v17056_v12  ;;  %18583 = vmatprep.subr.bf16.mxu1 %v20298_v46  ;;  %v17098_v12 = vld [vmem:[%s24573_s8 + $0x6e8] sm:$0xff]  ;;  %v20325_v46 = vld [vmem:[%s24569_s4 + $0xb0] ss:$72 sps:$4 sm:$0xff]  }
 0x342   : > { %6979 = vmatmul.mubr.bf16.gmra.mrb[116].mxu1 %v20297_v41  ;;  %v17128_v41 = vcombine.high %v17094_v36, %v17098_v12 }
 0x343   : > { %3959 = vmatpush1.bf16.msra.mxu0 %v17055_v19  ;;  %18584 = vmatpush3.bf16.msra.mxu1 %v20299_v42  ;;  %v20328_v19 = vld [vmem:[%s21340_s15 + $0x2d8] sm:$0xff]   ;;  %v20330_v42 = vld [vmem:[%s24569_s4 + $0x144] ss:$72 sps:$4 sm:$0xff]  }
 0x344   : > { %3960 = vmatprep.subr.bf16.mxu0 %v17064_v43  ;;  %18585 = vmatprep.subr.bf16.mxu1 %v20300_v3  ;;  %v17072_v43 = vld [vmem:[%s24573_s8 + $0x618] sm:$0xff] }
 0x345   : > { %6986 = vmatprep.mubr.bf16.mxu1 %v20302_v44  ;;  %v17076_v3 = vld [vmem:[%s24573_s8 + $0x638] sm:$0xff]  ;;  %v17127_v44 = vcombine.low %v17094_v36, %v17098_v12  ;;  %v20355_v36 = vld [vmem:[%s21340_s15 + $0x310] sm:$0xff]  }
 0x346   : > { %v17108_v48 = vcombine.high %v17072_v43, %v17076_v3  ;;  %v17107_v54 = vcombine.low %v17072_v43, %v17076_v3  ;;  %v20361_v3 = vld [vmem:[%s21340_s15 + $0x360] sm:$0xff]  }
 0x347   : > { %3961 = vmatpush1.bf16.msra.mxu0 %v17063_v50  ;;  %18586 = vmatpush3.bf16.msra.mxu1 %v20301_v53  ;;  %v20333_v50 = vld [vmem:[%s21340_s15 + $0x2e0] sm:$0xff]   ;;  %v17080_v53 = vld [vmem:[%s24573_s8 + $0x658] sm:$0xff] }
 0x348   : > { %4200 = vmatprep.subr.bf16.mxu0 %v17102_v4  ;;  %18587 = vmatprep.subr.bf16.mxu1 %v20305_v30  ;;  %v17084_v4 = vld [vmem:[%s24573_s8 + $0x678] sm:$0xff]  ;;  %v20332_v30 = vld [vmem:[%s24569_s4 + $0x140] ss:$72 sps:$4 sm:$0xff]  }
 0x34a   : > { %17068 = vmatmul.mubr.msk.bf16.vlgmr.msra.gmra.mrb[40].mxu0 %vm1718_vm1, %v21830_v47  ;;  %6987 = vmatmul.mubr.bf16.gmra.mrb[120].mxu1 %v20304_v6  ;;  %v17097_v47 = vld [vmem:[%s24573_s8 + $0x6e0] sm:$0xff]  ;;  %v17116_v6 = vcombine.high %v17080_v53, %v17084_v4 }
 0x34b   : > { %4201 = vmatpush1.bf16.msra.mxu0 %v17101_v58  ;;  %18588 = vmatpush3.bf16.msra.mxu1 %v20306_v59  ;;  %v17126_v28 = vcombine.high %v17093_v5, %v17097_v47  ;;  %v17125_v15 = vcombine.low %v17093_v5, %v17097_v47  ;;  %v20335_v58 = vld [vmem:[%s21340_s15 + $0x2e8] sm:$0xff]   ;;  %v20337_v59 = vld [vmem:[%s24569_s4 + $0x1d4] ss:$72 sps:$4 sm:$0xff]  }
 0x34c   : > { %4202 = vmatprep.subr.bf16.mxu0 %v17110_v60  ;;  %18589 = vmatprep.subr.bf16.mxu1 %v20307_v35  ;;  %v17088_v60 = vld [vmem:[%s24573_s8 + $0x698] sm:$0xff]  ;;  %v20341_v47 = vld [vmem:[%s21340_s15 + $0x2b0] sm:$0xff]  }
 0x34d   : > { %6994 = vmatprep.mubr.bf16.mxu1 %v20309_v61  ;;  %4232 = vmatprep.mubr.bf16.mxu0 %v21044_v1  ;;  %v17092_v35 = vld [vmem:[%s24573_s8 + $0x6b8] sm:$0xff]  ;;  %v17115_v61 = vcombine.low %v17080_v53, %v17084_v4  ;;  %v20362_v53 = vld [vmem:[%s21340_s15 + $0x320] sm:$0xff]  }
 0x34e   : > { %v17124_v63 = vcombine.high %v17088_v60, %v17092_v35  ;;  %v17123_v5 = vcombine.low %v17088_v60, %v17092_v35  ;;  %v20368_v35 = vld [vmem:[%s21340_s15 + $0x370] sm:$0xff]  }
 0x34f   : > { %4203 = vmatpush1.bf16.msra.mxu0 %v17109_v0  ;;  %18590 = vmatpush3.bf16.msra.mxu1 %v20308_v49  ;;  %v20340_v0 = vld [vmem:[%s21340_s15 + $0x2f0] sm:$0xff]   ;;  %v17096_v49 = vld [vmem:[%s24573_s8 + $0x6d8] sm:$0xff] }
 0x350   : > { %4204 = vmatprep.subr.bf16.mxu0 %v17118_v27  ;;  %18591 = vmatprep.subr.bf16.mxu1 %v20312_v37  ;;  %v17100_v27 = vld [vmem:[%s24573_s8 + $0x6f8] sm:$0xff] }
 0x351   : > { %v20339_v37 = vld [vmem:[%s24569_s4 + $0x1d0] ss:$72 sps:$4 sm:$0xff]  }
 0x352   : > { %6995 = vmatmul.mubr.bf16.gmra.mrb[124].mxu1 %v20311_v7  ;;  %v17132_v7 = vcombine.high %v17096_v49, %v17100_v27 }
 0x353   : > { %4205 = vmatpush1.bf16.msra.mxu0 %v17117_v10  ;;  %18592 = vmatpush3.bf16.msra.mxu1 %v20313_v13  ;;  %v20342_v10 = vld [vmem:[%s21340_s15 + $0x2f8] sm:$0xff]   ;;  %v20346_v13 = vld [vmem:[%s24569_s4 + $0x2c] ss:$72 sps:$4 sm:$0xff]  }
 0x354   : > { %4206 = vmatprep.subr.bf16.mxu0 %v17126_v28  ;;  %18593 = vmatprep.subr.bf16.mxu1 %v20314_v14  ;;  %v17137_v28 = vld [vmem:[%s24573_s8 + $0x700] sm:$0xff] }
 0x355   : > { %7035 = vmatprep.mubr.bf16.mxu1 %v20318_v29  ;;  %v17141_v14 = vld [vmem:[%s24573_s8 + $0x720] sm:$0xff]  ;;  %v17131_v29 = vcombine.low %v17096_v49, %v17100_v27  ;;  %v20369_v49 = vld [vmem:[%s21340_s15 + $0x330] sm:$0xff]  }
 0x356   : > { %v17170_v51 = vcombine.high %v17137_v28, %v17141_v14  ;;  %v17169_v18 = vcombine.low %v17137_v28, %v17141_v14  ;;  %v20375_v14 = vld [vmem:[%s21340_s15 + $0x3c0] sm:$0xff]  }
 0x357   : > { %4207 = vmatpush1.bf16.msra.mxu0 %v17125_v15  ;;  %18594 = vmatpush3.bf16.msra.mxu1 %v20315_v2  ;;  %v20347_v15 = vld [vmem:[%s21340_s15 + $0x340] sm:$0xff]  }
 0x358   : > { %4241 = vmatprep.subr.bf16.mxu0 %v17104_v16  ;;  %18619 = vmatprep.subr.bf16.mxu1 %v20319_v17  ;;  %v17145_v2 = vld [vmem:[%s24573_s8 + $0x740] sm:$0xff]  ;;  %v20344_v17 = vld [vmem:[%s24569_s4 + $0x28] ss:$72 sps:$4 sm:$0xff]  }
 0x359   : > { %v17149_v16 = vld [vmem:[%s24573_s8 + $0x760] sm:$0xff] }
 0x35a   : > { %17133 = vmatmul.mubr.msk.bf16.vlgmr.msra.gmra.mrb[32].mxu0 %vm1718_vm1, %v21888_v31  ;;  %7036 = vmatmul.mubr.bf16.vlgmr.msra.gmra.mrb[128].mxu1 %v20316_v20  ;;  %v17178_v20 = vcombine.high %v17145_v2, %v17149_v16 }
 0x35b   : > { %4242 = vmatpush1.bf16.msra.mxu0 %v17103_v21  ;;  %18620 = vmatpush3.bf16.msra.mxu1 %v20320_v22  ;;  %v20349_v21 = vld [vmem:[%s21340_s15 + $0x348] sm:$0xff]   ;;  %v20351_v22 = vld [vmem:[%s24569_s4 + $0xbc] ss:$72 sps:$4 sm:$0xff]  }
 0x35c   : > { %4243 = vmatprep.subr.bf16.mxu0 %v17112_v52  ;;  %18621 = vmatprep.subr.bf16.mxu1 %v20321_v24  ;;  %v17153_v52 = vld [vmem:[%s24573_s8 + $0x780] sm:$0xff] }
 0x35d   : > { %7043 = vmatprep.mubr.bf16.mxu1 %v20323_v25  ;;  %4273 = vmatprep.mubr.bf16.mxu0 %v21044_v1  ;;  %v17157_v24 = vld [vmem:[%s24573_s8 + $0x7a0] sm:$0xff]  ;;  %v17177_v25 = vcombine.low %v17145_v2, %v17149_v16 }
 0x35e   : > { %v17186_v26 = vcombine.high %v17153_v52, %v17157_v24  ;;  %v20376_v2 = vld [vmem:[%s21340_s15 + $0x380] sm:$0xff]  }
 0x35f   : > { %4244 = vmatpush1.bf16.msra.mxu0 %v17111_v11  ;;  %18622 = vmatpush3.bf16.msra.mxu1 %v20322_v32  ;;  %v20354_v11 = vld [vmem:[%s21340_s15 + $0x350] sm:$0xff]   ;;  %v17161_v32 = vld [vmem:[%s24573_s8 + $0x7c0] sm:$0xff] }
 0x360   : > { %4245 = vmatprep.subr.bf16.mxu0 %v17120_v33  ;;  %18623 = vmatprep.subr.bf16.mxu1 %v20326_v34  ;;  %v20353_v33 = vld [vmem:[%s24569_s4 + $0xb8] ss:$72 sps:$4 sm:$0xff]   ;;  %v17185_v34 = vcombine.low %v17153_v52, %v17157_v24  ;;  %v20382_v24 = vld [vmem:[%s21340_s15 + $0x3d0] sm:$0xff]  }
 0x362   : > { %7044 = vmatmul.mubr.bf16.gmra.mrb[132].mxu1 %v20325_v46  ;;  %v20356_v46 = vld [vmem:[%s21340_s15 + $0x358] sm:$0xff]  }
 0x363   : > { %4246 = vmatpush1.bf16.msra.mxu0 %v17119_v39  ;;  %18624 = vmatpush3.bf16.msra.mxu1 %v20327_v40  ;;  %v20358_v39 = vld [vmem:[%s24569_s4 + $0x14c] ss:$72 sps:$4 sm:$0xff]  }
 0x364   : > { %4247 = vmatprep.subr.bf16.mxu0 %v17128_v41  ;;  %18625 = vmatprep.subr.bf16.mxu1 %v20328_v19  ;;  %v17138_v40 = vld [vmem:[%s24573_s8 + $0x708] sm:$0xff] }
 0x365   : > { %7051 = vmatprep.mubr.bf16.mxu1 %v20330_v42  ;;  %v17142_v41 = vld [vmem:[%s24573_s8 + $0x728] sm:$0xff]  ;;  %v20357_v42 = vld [vmem:[%s21340_s15 + $0x318] sm:$0xff]  }
 0x366   : > { %v17172_v43 = vcombine.high %v17138_v40, %v17142_v41 }
 0x367   : > { %4248 = vmatpush1.bf16.msra.mxu0 %v17127_v44  ;;  %18626 = vmatpush3.bf16.msra.mxu1 %v20329_v45  ;;  %v17146_v44 = vld [vmem:[%s24573_s8 + $0x748] sm:$0xff] }
 0x368   : > { %4323 = vmatprep.subr.bf16.mxu0 %v17108_v48  ;;  %18627 = vmatprep.subr.bf16.mxu1 %v20333_v50  ;;  %v17150_v45 = vld [vmem:[%s24573_s8 + $0x768] sm:$0xff]  ;;  %v17171_v50 = vcombine.low %v17138_v40, %v17142_v41  ;;  %v20389_v41 = vld [vmem:[%s21340_s15 + $0x3e0] sm:$0xff]  }
 0x369   : > { %v20360_v48 = vld [vmem:[%s24569_s4 + $0x148] ss:$72 sps:$4 sm:$0xff]   ;;  %v17180_v4 = vcombine.high %v17146_v44, %v17150_v45 }
 0x36a   : > { %17134 = vmatmul.mubr.msk.bf16.vlgmr.msra.gmra.mrb[36].mxu0 %vm1718_vm1, %v21888_v31  ;;  %7052 = vmatmul.mubr.bf16.gmra.mrb[136].mxu1 %v20332_v30  ;;  %v20363_v30 = vld [vmem:[%s21340_s15 + $0x368] sm:$0xff]  }
 0x36b   : > { %4324 = vmatpush1.bf16.msra.mxu0 %v17107_v54  ;;  %18628 = vmatpush3.bf16.msra.mxu1 %v20334_v56  ;;  %v20365_v54 = vld [vmem:[%s24569_s4 + $0x1dc] ss:$72 sps:$4 sm:$0xff]   ;;  %v17154_v56 = vld [vmem:[%s24573_s8 + $0x788] sm:$0xff] }
 0x36c   : > { %4325 = vmatprep.subr.bf16.mxu0 %v17116_v6  ;;  %18629 = vmatprep.subr.bf16.mxu1 %v20335_v58  ;;  %v17158_v6 = vld [vmem:[%s24573_s8 + $0x7a8] sm:$0xff]  ;;  %v17179_v58 = vcombine.low %v17146_v44, %v17150_v45  ;;  %v20390_v44 = vld [vmem:[%s21340_s15 + $0x3a0] sm:$0xff]  }
 0x36d   : > { %7059 = vmatprep.mubr.bf16.mxu1 %v20337_v59  ;;  %4355 = vmatprep.mubr.bf16.mxu0 %v21044_v1  ;;  %v20364_v59 = vld [vmem:[%s21340_s15 + $0x328] sm:$0xff]   ;;  %v17188_v60 = vcombine.high %v17154_v56, %v17158_v6 }
 0x36f   : > { %4326 = vmatpush1.bf16.msra.mxu0 %v17115_v61  ;;  %18630 = vmatpush3.bf16.msra.mxu1 %v20336_v62  ;;  %v17162_v61 = vld [vmem:[%s24573_s8 + $0x7c8] sm:$0xff] }
 0x370   : > { %4327 = vmatprep.subr.bf16.mxu0 %v17124_v63  ;;  %18631 = vmatprep.subr.bf16.mxu1 %v20340_v0  ;;  %v17166_v62 = vld [vmem:[%s24573_s8 + $0x7e8] sm:$0xff]  ;;  %v20367_v63 = vld [vmem:[%s24569_s4 + $0x1d8] ss:$72 sps:$4 sm:$0xff]   ;;  %v17187_v0 = vcombine.low %v17154_v56, %v17158_v6  ;;  %v20396_v6 = vld [vmem:[%s21340_s15 + $0x3f0] sm:$0xff]  }
 0x371   : > { %v17196_v27 = vcombine.high %v17162_v61, %v17166_v62 }
 0x372   : > { %7060 = vmatmul.mubr.bf16.gmra.mrb[140].mxu1 %v20339_v37  ;;  %v20370_v37 = vld [vmem:[%s21340_s15 + $0x378] sm:$0xff]  }
 0x373   : > { %4328 = vmatpush1.bf16.msra.mxu0 %v17123_v5  ;;  %18632 = vmatpush3.bf16.msra.mxu1 %v20341_v47  ;;  %v20374_v5 = vld [vmem:[%s24569_s4 + $0x34] ss:$72 sps:$4 sm:$0xff]  }
 0x374   : > { %4329 = vmatprep.subr.bf16.mxu0 %v17132_v7  ;;  %18633 = vmatprep.subr.bf16.mxu1 %v20342_v10  ;;  %v17140_v47 = vld [vmem:[%s24573_s8 + $0x718] sm:$0xff]  ;;  %v17195_v10 = vcombine.low %v17162_v61, %v17166_v62 }
 0x375   : > { %7100 = vmatprep.mubr.bf16.mxu1 %v20346_v13  ;;  %v17144_v7 = vld [vmem:[%s24573_s8 + $0x738] sm:$0xff] }
 0x376   : > { %v20371_v13 = vld [vmem:[%s21340_s15 + $0x338] sm:$0xff]   ;;  %v17176_v28 = vcombine.high %v17140_v47, %v17144_v7 }
 0x377   : > { %4330 = vmatpush1.bf16.msra.mxu0 %v17131_v29  ;;  %18634 = vmatpush3.bf16.msra.mxu1 %v20343_v55  ;;  %v17148_v29 = vld [vmem:[%s24573_s8 + $0x758] sm:$0xff] }
 0x378   : > { %4569 = vmatprep.subr.bf16.mxu0 %v17170_v51  ;;  %18659 = vmatprep.subr.bf16.mxu1 %v20347_v15  ;;  %v17152_v55 = vld [vmem:[%s24573_s8 + $0x778] sm:$0xff]  ;;  %v17175_v15 = vcombine.low %v17140_v47, %v17144_v7  ;;  %v17206_v7 = vld [vmem:[%s24573_s8 + $0x808] sm:$0xff] }
 0x379   : > { %v20372_v51 = vld [vmem:[%s24569_s4 + $0x30] ss:$72 sps:$4 sm:$0xff]   ;;  %v17184_v16 = vcombine.high %v17148_v29, %v17152_v55  ;;  %v20402_v47 = vld [vmem:[%s24569_s4 + $0x3c] ss:$72 sps:$4 sm:$0xff]  }
 0x37a   : > { %17136 = vmatmul.mubr.msk.bf16.vlgmr.msra.gmra.mrb[40].mxu0 %vm1718_vm1, %v21888_v31  ;;  %7101 = vmatmul.mubr.bf16.vlgmr.msra.gmra.mrb[144].mxu1 %v20344_v17  ;;  %v17165_v31 = vld [vmem:[%s24573_s8 + $0x7e0] sm:$0xff]  ;;  %v20377_v17 = vld [vmem:[%s21340_s15 + $0x3c8] sm:$0xff]  }
 0x37b   : > { %4570 = vmatpush1.bf16.msra.mxu0 %v17169_v18  ;;  %18660 = vmatpush3.bf16.msra.mxu1 %v20348_v57  ;;  %v17194_v12 = vcombine.high %v17161_v32, %v17165_v31  ;;  %v17193_v19 = vcombine.low %v17161_v32, %v17165_v31  ;;  %v20379_v18 = vld [vmem:[%s24569_s4 + $0xc4] ss:$72 sps:$4 sm:$0xff]   ;;  %v17156_v57 = vld [vmem:[%s24573_s8 + $0x798] sm:$0xff]  ;;  %v20383_v32 = vld [vmem:[%s21340_s15 + $0x390] sm:$0xff]  }
 0x37c   : > { %4571 = vmatprep.subr.bf16.mxu0 %v17178_v20  ;;  %18661 = vmatprep.subr.bf16.mxu1 %v20349_v21  ;;  %v17160_v20 = vld [vmem:[%s24573_s8 + $0x7b8] sm:$0xff]  ;;  %v17183_v21 = vcombine.low %v17148_v29, %v17152_v55  ;;  %v20403_v29 = vld [vmem:[%s21340_s15 + $0x440] sm:$0xff]  }
 0x37d   : > { %7108 = vmatprep.mubr.bf16.mxu1 %v20351_v22  ;;  %4601 = vmatprep.mubr.bf16.mxu0 %v21044_v1  ;;  %v20378_v22 = vld [vmem:[%s21340_s15 + $0x388] sm:$0xff]   ;;  %v17192_v52 = vcombine.high %v17156_v57, %v17160_v20 }
 0x37f   : > { %4572 = vmatpush1.bf16.msra.mxu0 %v17177_v25  ;;  %18662 = vmatpush3.bf16.msra.mxu1 %v20350_v23  ;;  %v17164_v25 = vld [vmem:[%s24573_s8 + $0x7d8] sm:$0xff] }
 0x380   : > { %4573 = vmatprep.subr.bf16.mxu0 %v17186_v26  ;;  %18663 = vmatprep.subr.bf16.mxu1 %v20354_v11  ;;  %v17168_v23 = vld [vmem:[%s24573_s8 + $0x7f8] sm:$0xff]  ;;  %v20381_v26 = vld [vmem:[%s24569_s4 + $0xc0] ss:$72 sps:$4 sm:$0xff]   ;;  %v17191_v11 = vcombine.low %v17156_v57, %v17160_v20 }
 0x381   : > { %v17200_v31 = vcombine.high %v17164_v25, %v17168_v23  ;;  %v20404_v20 = vld [vmem:[%s21340_s15 + $0x400] sm:$0xff]  }
 0x382   : > { %7109 = vmatmul.mubr.bf16.gmra.mrb[148].mxu1 %v20353_v33  ;;  %v20384_v33 = vld [vmem:[%s21340_s15 + $0x3d8] sm:$0xff]  }
 0x383   : > { %4574 = vmatpush1.bf16.msra.mxu0 %v17185_v34  ;;  %18664 = vmatpush3.bf16.msra.mxu1 %v20355_v36  ;;  %v20386_v34 = vld [vmem:[%s24569_s4 + $0x154] ss:$72 sps:$4 sm:$0xff]   ;;  %v17205_v36 = vld [vmem:[%s24573_s8 + $0x800] sm:$0xff] }
 0x384   : > { %4575 = vmatprep.subr.bf16.mxu0 %v17194_v12  ;;  %18665 = vmatprep.subr.bf16.mxu1 %v20356_v46  ;;  %v17209_v12 = vld [vmem:[%s24573_s8 + $0x820] sm:$0xff]  ;;  %v17199_v46 = vcombine.low %v17164_v25, %v17168_v23  ;;  %v20407_v25 = vld [vmem:[%s24569_s4 + $0xcc] ss:$72 sps:$4 sm:$0xff]  }
 0x385   : > { %7116 = vmatprep.mubr.bf16.mxu1 %v20358_v39  ;;  %v20385_v39 = vld [vmem:[%s21340_s15 + $0x398] sm:$0xff]   ;;  %v17238_v40 = vcombine.high %v17205_v36, %v17209_v12  ;;  %v17222_v23 = vld [vmem:[%s24573_s8 + $0x888] sm:$0xff] }
 0x387   : > { %4576 = vmatpush1.bf16.msra.mxu0 %v17193_v19  ;;  %18666 = vmatpush3.bf16.msra.mxu1 %v20357_v42  ;;  %v17213_v19 = vld [vmem:[%s24573_s8 + $0x840] sm:$0xff] }
 0x388   : > { %4610 = vmatprep.subr.bf16.mxu0 %v17172_v43  ;;  %18667 = vmatprep.subr.bf16.mxu1 %v20361_v3  ;;  %v17217_v42 = vld [vmem:[%s24573_s8 + $0x860] sm:$0xff]  ;;  %v20388_v43 = vld [vmem:[%s24569_s4 + $0x150] ss:$72 sps:$4 sm:$0xff]   ;;  %v17237_v3 = vcombine.low %v17205_v36, %v17209_v12  ;;  %v17230_v36 = vld [vmem:[%s24573_s8 + $0x8c8] sm:$0xff] }
 0x389   : > { %v17246_v45 = vcombine.high %v17213_v19, %v17217_v42  ;;  %v17234_v12 = vld [vmem:[%s24573_s8 + $0x8e8] sm:$0xff] }
 0x38a   : > { %17201 = vmatmul.mubr.msk.bf16.vlgmr.msra.gmra.mrb[32].mxu0 %vm1718_vm1, %v21946_v9  ;;  %7117 = vmatmul.mubr.bf16.gmra.mrb[152].mxu1 %v20360_v48  ;;  %v20391_v48 = vld [vmem:[%s21340_s15 + $0x3e8] sm:$0xff]  }
 0x38b   : > { %4611 = vmatpush1.bf16.msra.mxu0 %v17171_v50  ;;  %18668 = vmatpush3.bf16.msra.mxu1 %v20362_v53  ;;  %v20393_v50 = vld [vmem:[%s24569_s4 + $0x1e4] ss:$72 sps:$4 sm:$0xff]  }
 0x38c   : > { %4612 = vmatprep.subr.bf16.mxu0 %v17180_v4  ;;  %18669 = vmatprep.subr.bf16.mxu1 %v20363_v30  ;;  %v17221_v53 = vld [vmem:[%s24573_s8 + $0x880] sm:$0xff]  ;;  %v17245_v30 = vcombine.low %v17213_v19, %v17217_v42  ;;  %v20411_v42 = vld [vmem:[%s21340_s15 + $0x410] sm:$0xff]  }
 0x38d   : > { %7124 = vmatprep.mubr.bf16.mxu1 %v20365_v54  ;;  %4642 = vmatprep.mubr.bf16.mxu0 %v21044_v1  ;;  %v17225_v4 = vld [vmem:[%s24573_s8 + $0x8a0] sm:$0xff]  ;;  %v20392_v54 = vld [vmem:[%s21340_s15 + $0x3a8] sm:$0xff]  }
 0x38e   : > { %v17254_v56 = vcombine.high %v17221_v53, %v17225_v4 }
 0x38f   : > { %4613 = vmatpush1.bf16.msra.mxu0 %v17179_v58  ;;  %18670 = vmatpush3.bf16.msra.mxu1 %v20364_v59  ;;  %v17229_v59 = vld [vmem:[%s24573_s8 + $0x8c0] sm:$0xff] }
 0x390   : > { %4614 = vmatprep.subr.bf16.mxu0 %v17188_v60  ;;  %18671 = vmatprep.subr.bf16.mxu1 %v20368_v35  ;;  %v20395_v35 = vld [vmem:[%s24569_s4 + $0x1e0] ss:$72 sps:$4 sm:$0xff]  }
 0x392   : > { %7125 = vmatmul.mubr.bf16.gmra.mrb[156].mxu1 %v20367_v63  ;;  %v17253_v63 = vcombine.low %v17221_v53, %v17225_v4  ;;  %v17212_v53 = vld [vmem:[%s24573_s8 + $0x838] sm:$0xff]  ;;  %v17263_v4 = vcombine.low %v17230_v36, %v17234_v12 }
 0x393   : > { %4615 = vmatpush1.bf16.msra.mxu0 %v17187_v0  ;;  %18672 = vmatpush3.bf16.msra.mxu1 %v20369_v49  ;;  %v20397_v0 = vld [vmem:[%s21340_s15 + $0x3b0] sm:$0xff]  }
 0x394   : > { %4616 = vmatprep.subr.bf16.mxu0 %v17196_v27  ;;  %18673 = vmatprep.subr.bf16.mxu1 %v20370_v37  ;;  %v20398_v37 = vld [vmem:[%s21340_s15 + $0x3f8] sm:$0xff]  }
 0x395   : > { %7165 = vmatprep.mubr.bf16.mxu1 %v20374_v5 }
 0x397   : > { %4617 = vmatpush1.bf16.msra.mxu0 %v17195_v10  ;;  %18674 = vmatpush3.bf16.msra.mxu1 %v20371_v13  ;;  %v17210_v10 = vld [vmem:[%s24573_s8 + $0x828] sm:$0xff] }
 0x398   : > { %4692 = vmatprep.subr.bf16.mxu0 %v17176_v28  ;;  %18699 = vmatprep.subr.bf16.mxu1 %v20375_v14  ;;  %v20399_v28 = vld [vmem:[%s21340_s15 + $0x3b8] sm:$0xff]   ;;  %v17240_v14 = vcombine.high %v17206_v7, %v17210_v10  ;;  %v17239_v57 = vcombine.low %v17206_v7, %v17210_v10  ;;  %v20421_v7 = vld [vmem:[%s24569_s4 + $0x1ec] ss:$72 sps:$4 sm:$0xff]  }
 0x399   : > { %v17224_v10 = vld [vmem:[%s24573_s8 + $0x898] sm:$0xff] }
 0x39a   : > { %17202 = vmatmul.mubr.msk.bf16.vlgmr.msra.gmra.mrb[36].mxu0 %vm1718_vm1, %v21946_v9  ;;  %7166 = vmatmul.mubr.bf16.vlgmr.msra.gmra.mrb[160].mxu1 %v20372_v51  ;;  %v17214_v51 = vld [vmem:[%s24573_s8 + $0x848] sm:$0xff] }
 0x39b   : > { %4693 = vmatpush1.bf16.msra.mxu0 %v17175_v15  ;;  %18700 = vmatpush3.bf16.msra.mxu1 %v20376_v2  ;;  %v17218_v15 = vld [vmem:[%s24573_s8 + $0x868] sm:$0xff] }
 0x39c   : > { %4694 = vmatprep.subr.bf16.mxu0 %v17184_v16  ;;  %18701 = vmatprep.subr.bf16.mxu1 %v20377_v17  ;;  %v20400_v16 = vld [vmem:[%s24569_s4 + $0x38] ss:$72 sps:$4 sm:$0xff]  }
 0x39d   : > { %7173 = vmatprep.mubr.bf16.mxu1 %v20379_v18  ;;  %4724 = vmatprep.mubr.bf16.mxu0 %v21044_v1 }
 0x39f   : > { %4695 = vmatpush1.bf16.msra.mxu0 %v17183_v21  ;;  %18702 = vmatpush3.bf16.msra.mxu1 %v20378_v22  ;;  %v17248_v22 = vcombine.high %v17214_v51, %v17218_v15 }
 0x3a0   : > { %4696 = vmatprep.subr.bf16.mxu0 %v17192_v52  ;;  %18703 = vmatprep.subr.bf16.mxu1 %v20382_v24  ;;  %v20405_v52 = vld [vmem:[%s21340_s15 + $0x448] sm:$0xff]  }
 0x3a2   : > { %7174 = vmatmul.mubr.bf16.gmra.mrb[164].mxu1 %v20381_v26  ;;  %v17226_v26 = vld [vmem:[%s24573_s8 + $0x8a8] sm:$0xff] }
 0x3a3   : > { %4697 = vmatpush1.bf16.msra.mxu0 %v17191_v11  ;;  %18704 = vmatpush3.bf16.msra.mxu1 %v20383_v32  ;;  %v17247_v11 = vcombine.low %v17214_v51, %v17218_v15  ;;  %v20406_v32 = vld [vmem:[%s21340_s15 + $0x408] sm:$0xff]   ;;  %v17255_v19 = vcombine.low %v17222_v23, %v17226_v26  ;;  %v17232_v15 = vld [vmem:[%s24573_s8 + $0x8d8] sm:$0xff] }
 0x3a4   : > { %4698 = vmatprep.subr.bf16.mxu0 %v17200_v31  ;;  %18705 = vmatprep.subr.bf16.mxu1 %v20384_v33  ;;  %v17256_v31 = vcombine.high %v17222_v23, %v17226_v26  ;;  %v20410_v33 = vld [vmem:[%s21340_s15 + $0x450] sm:$0xff]   ;;  %v5487_v23 = vpop.permute.xlu1 %5486 }
 0x3a5   : > { %7181 = vmatprep.mubr.bf16.mxu1 %v20386_v34 }
 0x3a7   : > { %4699 = vmatpush1.bf16.msra.mxu0 %v17199_v46  ;;  %18706 = vmatpush3.bf16.msra.mxu1 %v20385_v39  ;;  %v20409_v39 = vld [vmem:[%s24569_s4 + $0xc8] ss:$72 sps:$4 sm:$0xff]  }
 0x3a8   : > { %4938 = vmatprep.subr.bf16.mxu0 %v17238_v40  ;;  %18707 = vmatprep.subr.bf16.mxu1 %v20389_v41 }
 0x3aa   : > { %17204 = vmatmul.mubr.msk.bf16.vlgmr.msra.gmra.mrb[40].mxu0 %vm1718_vm1, %v21946_v9  ;;  %7182 = vmatmul.mubr.bf16.gmra.mrb[168].mxu1 %v20388_v43  ;;  %v17233_v9 = vld [vmem:[%s24573_s8 + $0x8e0] sm:$0xff] }
 0x3ab   : > { %4939 = vmatpush1.bf16.msra.mxu0 %v17237_v3  ;;  %18708 = vmatpush3.bf16.msra.mxu1 %v20390_v44  ;;  %v17262_v27 = vcombine.high %v17229_v59, %v17233_v9  ;;  %v17261_v13 = vcombine.low %v17229_v59, %v17233_v9  ;;  %v17264_v3 = vcombine.high %v17230_v36, %v17234_v12  ;;  %v20412_v44 = vld [vmem:[%s21340_s15 + $0x458] sm:$0xff]  }
 0x3ac   : > { %4940 = vmatprep.subr.bf16.mxu0 %v17246_v45  ;;  %18709 = vmatprep.subr.bf16.mxu1 %v20391_v48  ;;  %v20414_v48 = vld [vmem:[%s24569_s4 + $0x15c] ss:$72 sps:$4 sm:$0xff]  }
 0x3ad   : > { %v18435_v58 = vpop.f32.mrb[64].mxu1  ;;  %7189 = vmatprep.mubr.bf16.mxu1 %v20393_v50  ;;  %4970 = vmatprep.mubr.bf16.mxu0 %v21044_v1  ;;  %v17208_v50 = vld [vmem:[%s24573_s8 + $0x818] sm:$0xff] }
 0x3ae   : > { %v18436_v60 = vpop.f32.mrb[65].mxu1  ;;  %v17220_v59 = vld [vmem:[%s24573_s8 + $0x878] sm:$0xff] }
 0x3af   : > { %v22709_v61 = vadd.f32 %v18436_v60, %v18435_v58  ;;  %4941 = vmatpush1.bf16.msra.mxu0 %v17245_v30  ;;  %v18438_v62 = vpop.f32.mrb[66].mxu1  ;;  %18710 = vmatpush3.bf16.msra.mxu1 %v20392_v54  ;;  %v20413_v30 = vld [vmem:[%s21340_s15 + $0x418] sm:$0xff]   ;;  %v17244_v54 = vcombine.high %v17208_v50, %v17212_v53 }
 0x3b0   : > { %v18439_v49 = vpop.f32.mrb[67].mxu1  ;;  %4942 = vmatprep.subr.bf16.mxu0 %v17254_v56  ;;  %18711 = vmatprep.subr.bf16.mxu1 %v20396_v6  ;;  %v20417_v56 = vld [vmem:[%s21340_s15 + $0x460] sm:$0xff]   ;;  %v17216_v58 = vld [vmem:[%s24573_s8 + $0x858] sm:$0xff] }
 0x3b1   : > { %v22713_v5 = vadd.f32 %v18439_v49, %v18438_v62  ;;  %v20416_v60 = vld [vmem:[%s24569_s4 + $0x158] ss:$72 sps:$4 sm:$0xff]  }
 0x3b2   : > { %7190 = vmatmul.mubr.bf16.gmra.mrb[172].mxu1 %v20395_v35 }
 0x3b3   : > { %4943 = vmatpush1.bf16.msra.mxu0 %v17253_v63  ;;  %18712 = vmatpush3.bf16.msra.mxu1 %v20397_v0  ;;  %v17243_v63 = vcombine.low %v17208_v50, %v17212_v53  ;;  %v20418_v0 = vld [vmem:[%s21340_s15 + $0x420] sm:$0xff]  }
 0x3b4   : > { %4944 = vmatprep.subr.bf16.mxu0 %v17262_v27  ;;  %18713 = vmatprep.subr.bf16.mxu1 %v20398_v37  ;;  %v17252_v27 = vcombine.high %v17216_v58, %v17220_v59  ;;  %v20419_v37 = vld [vmem:[%s21340_s15 + $0x468] sm:$0xff]  }
 0x3b5   : > { %v18441_v55 = vpop.f32.mrb[68].mxu1  ;;  %7230 = vmatprep.mubr.bf16.mxu1 %v20402_v47 }
 0x3b6   : > { %v18442_v2 = vpop.f32.mrb[69].mxu1 }
 0x3b7   : > { %v22735_v17 = vadd.f32 %v18442_v2, %v18441_v55  ;;  %4945 = vmatpush1.bf16.msra.mxu0 %v17261_v13  ;;  %v18444_v18 = vpop.f32.mrb[70].mxu1  ;;  %18714 = vmatpush3.bf16.msra.mxu1 %v20399_v28  ;;  %v17228_v13 = vld [vmem:[%s24573_s8 + $0x8b8] sm:$0xff]  ;;  %v17251_v28 = vcombine.low %v17216_v58, %v17220_v59  ;;  %v20424_v55 = vld [vmem:[%s21340_s15 + $0x470] sm:$0xff]  }
 0x3b8   : > { %v18445_v21 = vpop.f32.mrb[71].mxu1  ;;  %4979 = vmatprep.subr.bf16.mxu0 %v17240_v14  ;;  %18739 = vmatprep.subr.bf16.mxu1 %v20403_v29  ;;  %v20420_v14 = vld [vmem:[%s21340_s15 + $0x428] sm:$0xff]   ;;  %v17260_v29 = vcombine.high %v17224_v10, %v17228_v13  ;;  %v17236_v2 = vld [vmem:[%s24573_s8 + $0x8f8] sm:$0xff] }
 0x3b9   : > { %v22739_v24 = vadd.f32 %v18445_v21, %v18444_v18  ;;  %v17267_v12 = vcombine.low %v17232_v15, %v17236_v2  ;;  %v20433_v58 = vld [vmem:[%s24569_s4 + $0xd0] ss:$72 sps:$4 sm:$0xff]  }
 0x3ba   : > { %17269 = vmatmul.mubr.msk.bf16.vlgmr.msra.gmra.mrb[32].mxu0 %vm1718_vm1, %v21993_v38  ;;  %7231 = vmatmul.mubr.bf16.vlgmr.msra.gmra.mrb[176].mxu1 %v20400_v16  ;;  %v5482_v16 = vpop.permute.xlu0 %5481 }
 0x3bb   : > { %4980 = vmatpush1.bf16.msra.mxu0 %v17239_v57  ;;  %18740 = vmatpush3.bf16.msra.mxu1 %v20404_v20  ;;  %v20423_v57 = vld [vmem:[%s24569_s4 + $0x1e8] ss:$72 sps:$4 sm:$0xff]   ;;  %v6778_v20 = vadd.f32 %v22709_v61, %v5482_v16  ;;  %v20430_v61 = vld [vmem:[%s24569_s4 + $0x44] ss:$72 sps:$4 sm:$0xff]  }
 0x3bc   : > { %4981 = vmatprep.subr.bf16.mxu0 %v17248_v22  ;;  %18741 = vmatprep.subr.bf16.mxu1 %v20405_v52  ;;  %v17259_v52 = vcombine.low %v17224_v10, %v17228_v13 }
 0x3bd   : > { %v18447_v34 = vpop.f32.mrb[72].mxu1  ;;  %7238 = vmatprep.mubr.bf16.mxu1 %v20407_v25  ;;  %5011 = vmatprep.mubr.bf16.mxu0 %v21044_v1  ;;  %v20425_v25 = vld [vmem:[%s21340_s15 + $0x430] sm:$0xff]  }
 0x3be   : > { %v18448_v46 = vpop.f32.mrb[73].mxu1 }
 0x3bf   : > { %v22764_v40 = vadd.f32 %v18448_v46, %v18447_v34  ;;  %4982 = vmatpush1.bf16.msra.mxu0 %v17247_v11  ;;  %v18450_v41 = vpop.f32.mrb[74].mxu1  ;;  %18742 = vmatpush3.bf16.msra.mxu1 %v20406_v32  ;;  %v17268_v11 = vcombine.high %v17232_v15, %v17236_v2  ;;  %v20426_v32 = vld [vmem:[%s21340_s15 + $0x478] sm:$0xff]  }
 0x3c0   : > { %v18451_v43 = vpop.f32.mrb[75].mxu1  ;;  %4983 = vmatprep.subr.bf16.mxu0 %v17256_v31  ;;  %18743 = vmatprep.subr.bf16.mxu1 %v20410_v33  ;;  %v6781_v31 = vadd.f32 %v22713_v5, %v5487_v23  ;;  %v20427_v46 = vld [vmem:[%s21340_s15 + $0x438] sm:$0xff]  }
 0x3c1   : > { %v22768_v45 = vadd.f32 %v18451_v43, %v18450_v41  ;;  %v5492_v41 = vpop.permute.xlu0 %5491 }
 0x3c2   : > { %7239 = vmatmul.mubr.bf16.gmra.mrb[180].mxu1 %v20409_v39 }
 0x3c3   : > { %4984 = vmatpush1.bf16.msra.mxu0 %v17255_v19  ;;  %18744 = vmatpush3.bf16.msra.mxu1 %v20411_v42  ;;  %v20428_v19 = vld [vmem:[%s24569_s4 + $0x40] ss:$72 sps:$4 sm:$0xff]   ;;  %v6786_v42 = vadd.f32 %v22735_v17, %v5492_v41 }
 0x3c4   : > { %4985 = vmatprep.subr.bf16.mxu0 %v17264_v3  ;;  %18745 = vmatprep.subr.bf16.mxu1 %v20412_v44  ;;  %v20431_v44 = vld [vmem:[%s24569_s4 + $0xd4] ss:$72 sps:$4 sm:$0xff]  }
 0x3c5   : > { %v18453_v6 = vpop.f32.mrb[76].mxu1  ;;  %7246 = vmatprep.mubr.bf16.mxu1 %v20414_v48  ;;  %v5497_v48 = vpop.permute.xlu1 %5496 }
 0x3c6   : > { %v18454_v9 = vpop.f32.mrb[77].mxu1  ;;  %v6789_v53 = vadd.f32 %v22739_v24, %v5497_v48 }
 0x3c7   : > { %v22790_v35 = vadd.f32 %v18454_v9, %v18453_v6  ;;  %4986 = vmatpush1.bf16.msra.mxu0 %v17263_v4  ;;  %v18456_v62 = vpop.f32.mrb[78].mxu1  ;;  %18746 = vmatpush3.bf16.msra.mxu1 %v20413_v30 }
 0x3c8   : > { %v18457_v49 = vpop.f32.mrb[79].mxu1  ;;  %5061 = vmatprep.subr.bf16.mxu0 %v17244_v54  ;;  %18747 = vmatprep.subr.bf16.mxu1 %v20417_v56  ;;  %v5502_v56 = vpop.permute.xlu0 %5501 }
 0x3c9   : > { %v22794_v47 = vadd.f32 %v18457_v49, %v18456_v62  ;;  %v6794_v59 = vadd.f32 %v22764_v40, %v5502_v56  ;;  %v20436_v40 = vld [vmem:[%s24569_s4 + $0x160] ss:$72 sps:$4 sm:$0xff]  }
 0x3ca   : > { %17270 = vmatmul.mubr.msk.bf16.vlgmr.msra.gmra.mrb[36].mxu0 %vm1718_vm1, %v21993_v38  ;;  %7247 = vmatmul.mubr.bf16.gmra.mrb[184].mxu1 %v20416_v60  ;;  %v5507_v60 = vpop.permute.xlu1 %5506 }
 0x3cb   : > { %5062 = vmatpush1.bf16.msra.mxu0 %v17243_v63  ;;  %18748 = vmatpush3.bf16.msra.mxu1 %v20418_v0  ;;  %v6797_v63 = vadd.f32 %v22768_v45, %v5507_v60  ;;  %v20437_v45 = vld [vmem:[%s24569_s4 + $0x1f4] ss:$72 sps:$4 sm:$0xff]  }
 0x3cc   : > { %5063 = vmatprep.subr.bf16.mxu0 %v17252_v27  ;;  %18749 = vmatprep.subr.bf16.mxu1 %v20419_v37 }
 0x3cd   : > { %v18475_v51 = vpop.f32.mrb[80].mxu1  ;;  %7254 = vmatprep.mubr.bf16.mxu1 %v20421_v7  ;;  %5093 = vmatprep.mubr.bf16.mxu0 %v21044_v1  ;;  %v5512_v7 = vpop.permute.xlu0 %5511 }
 0x3ce   : > { %v18476_v18 = vpop.f32.mrb[81].mxu1  ;;  %v6802_v13 = vadd.f32 %v22790_v35, %v5512_v7  ;;  %v20439_v35 = vld [vmem:[%s24569_s4 + $0x1f0] ss:$72 sps:$4 sm:$0xff]  }
 0x3cf   : > { %v18477_v21 = vadd.f32 %v18476_v18, %v18475_v51  ;;  %5064 = vmatpush1.bf16.msra.mxu0 %v17251_v28  ;;  %v18478_v22 = vpop.f32.mrb[82].mxu1  ;;  %18750 = vmatpush3.bf16.msra.mxu1 %v20420_v14 }
 0x3d0   : > { %v18479_v26 = vpop.f32.mrb[83].mxu1  ;;  %5065 = vmatprep.subr.bf16.mxu0 %v17260_v29  ;;  %18751 = vmatprep.subr.bf16.mxu1 %v20424_v55  ;;  %v5517_v29 = vpop.permute.xlu1 %5516 }
 0x3d1   : > { %v22823_v33 = vadd.f32 %v18477_v21, %v6778_v20  ;;  %v18480_v34 = vadd.f32 %v18479_v26, %v18478_v22  ;;  %v6805_v51 = vadd.f32 %v22794_v47, %v5517_v29 }
 0x3d2   : > { %7255 = vmatmul.mubr.bf16.gmra.mrb[188].mxu1 %v20423_v57 }
 0x3d3   : > { %v22828_v36 = vadd.f32 %v18480_v34, %v6781_v31  ;;  %5066 = vmatpush1.bf16.msra.mxu0 %v17259_v52  ;;  %18752 = vmatpush3.bf16.msra.mxu1 %v20425_v25 }
 0x3d4   : > { %5067 = vmatprep.subr.bf16.mxu0 %v17268_v11  ;;  %18753 = vmatprep.subr.bf16.mxu1 %v20426_v32 }
 0x3d5   : > { %v18481_v39 = vpop.f32.mrb[84].mxu1  ;;  %7295 = vmatprep.mubr.bf16.mxu1 %v20430_v61 }
 0x3d6   : > { %v18482_v5 = vpop.f32.mrb[85].mxu1 }
 0x3d7   : > { %v18483_v43 = vadd.f32 %v18482_v5, %v18481_v39  ;;  %5068 = vmatpush1.bf16.msra.mxu0 %v17267_v12  ;;  %v18484_v3 = vpop.f32.mrb[86].mxu1  ;;  %18754 = vmatpush3.bf16.msra.mxu1 %v20427_v46 }
 0x3d8   : > { %v18485_v50 = vpop.f32.mrb[87].mxu1  ;;  %19569 = vmatprep.subr.bf16.mxu1 %v21045_v8 }
 0x3d9   : > { %v6851_v4 = vadd.f32 %v18483_v43, %v6786_v42  ;;  %v18486_v30 = vadd.f32 %v18485_v50, %v18484_v3 }
 0x3da   : > { %17272 = vmatmul.mubr.msk.bf16.vlgmr.msra.gmra.mrb[40].mxu0 %vm1718_vm1, %v21993_v38  ;;  %7296 = vmatmul.mubr.bf16.vlgmr.msra.gmra.mrb[192].mxu1 %v20428_v19  ;;  %v20434_v38 = vld [vmem:[%s24569_s4 + $0x164] ss:$72 sps:$4 sm:$0xff]  }
 0x3db   : > { %v6854_v17 = vadd.f32 %v18486_v30, %v6789_v53  ;;  %7303 = vmatprep.mubr.bf16.mxu1 %v20431_v44  ;;  %7553 = vmatprep.mubr.bf16.mxu0 %v21044_v1 }
 0x3dd   : > { %v18487_v54 = vpop.f32.mrb[88].mxu1 }
 0x3de   : > { %v18488_v6 = vpop.f32.mrb[89].mxu1 }
 0x3df   : > { %v18489_v24 = vadd.f32 %v18488_v6, %v18487_v54  ;;  %v18490_v9 = vpop.f32.mrb[90].mxu1 }
 0x3e0   : > { %v18491_v62 = vpop.f32.mrb[91].mxu1 }
 0x3e1   : > { %v6859_v0 = vadd.f32 %v18489_v24, %v6794_v59  ;;  %v18492_v49 = vadd.f32 %v18491_v62, %v18490_v9 }
 0x3e2   : > { %7304 = vmatmul.mubr.bf16.gmra.mrb[196].mxu1 %v20433_v58 }
 0x3e3   : > { %v6862_v27 = vadd.f32 %v18492_v49, %v6797_v63  ;;  %7311 = vmatprep.mubr.bf16.mxu1 %v20434_v38 }
 0x3e5   : > { %v18493_v37 = vpop.f32.mrb[92].mxu1 }
 0x3e6   : > { %v18494_v10 = vpop.f32.mrb[93].mxu1 }
 0x3e7   : > { %v18495_v28 = vadd.f32 %v18494_v10, %v18493_v37  ;;  %v18496_v14 = vpop.f32.mrb[94].mxu1 }
 0x3e8   : > { %v18497_v55 = vpop.f32.mrb[95].mxu1 }
 0x3e9   : > { %v6867_v15 = vadd.f32 %v18495_v28, %v6802_v13  ;;  %v18498_v2 = vadd.f32 %v18497_v55, %v18496_v14 }
 0x3ea   : > { %7312 = vmatmul.mubr.bf16.gmra.mrb[200].mxu1 %v20436_v40 }
 0x3eb   : > { %v6870_v16 = vadd.f32 %v18498_v2, %v6805_v51  ;;  %7319 = vmatprep.mubr.bf16.mxu1 %v20437_v45 }
 0x3ed   : > { %v18515_v18 = vpop.f32.mrb[96].mxu1 }
 0x3ee   : > { %v18516_v57 = vpop.f32.mrb[97].mxu1 }
 0x3ef   : > { %v18517_v20 = vadd.f32 %v18516_v57, %v18515_v18  ;;  %v18518_v21 = vpop.f32.mrb[98].mxu1 }
 0x3f0   : > { %v18519_v22 = vpop.f32.mrb[99].mxu1 }
 0x3f1   : > { %v6908_v52 = vadd.f32 %v18517_v20, %v22823_v33  ;;  %v18520_v25 = vadd.f32 %v18519_v22, %v18518_v21 }
 0x3f2   : > { %7320 = vmatmul.mubr.bf16.gmra.mrb[204].mxu1 %v20439_v35 }
 0x3f3   : > { %v6911_v47 = vadd.f32 %v18520_v25, %v22828_v36  ;;  %19577 = vmatprep.mubr.msk.bf16.mxu1 %vm21046_vm0, %v21045_v8 }
 0x3f5   : > { %v18521_v23 = vpop.f32.mrb[100].mxu1 }
 0x3f6   : > { %v18522_v26 = vpop.f32.mrb[101].mxu1 }
 0x3f7   : > { %v18523_v11 = vadd.f32 %v18522_v26, %v18521_v23  ;;  %v18524_v32 = vpop.f32.mrb[102].mxu1 }
 0x3f8   : > { %v18525_v31 = vpop.f32.mrb[103].mxu1 }
 0x3f9   : > { %v6916_v34 = vadd.f32 %v18523_v11, %v6851_v4  ;;  %v18526_v61 = vadd.f32 %v18525_v31, %v18524_v32 }
 0x3fb   : > { %v6919_v12 = vadd.f32 %v18526_v61, %v6854_v17 }
 0x3fd   : > { %v18527_v46 = vpop.f32.mrb[104].mxu1 }
 0x3fe   : > { %v18528_v39 = vpop.f32.mrb[105].mxu1 }
 0x3ff   : > { %v18529_v41 = vadd.f32 %v18528_v39, %v18527_v46  ;;  %v18530_v5 = vpop.f32.mrb[106].mxu1 }
 0x400   : > { %v18531_v33 = vpop.f32.mrb[107].mxu1 }
 0x401   : > { %v6924_v19 = vadd.f32 %v18529_v41, %v6859_v0  ;;  %v18532_v42 = vadd.f32 %v18531_v33, %v18530_v5 }
 0x403   : > { %v6927_v43 = vadd.f32 %v18532_v42, %v6862_v27 }
 0x405   : > { %v18533_v36 = vpop.f32.mrb[108].mxu1 }
 0x406   : > { %v18534_v3 = vpop.f32.mrb[109].mxu1 }
 0x407   : > { %v18535_v44 = vadd.f32 %v18534_v3, %v18533_v36  ;;  %v18536_v48 = vpop.f32.mrb[110].mxu1 }
 0x408   : > { %v18537_v50 = vpop.f32.mrb[111].mxu1 }
 0x409   : > { %v6932_v53 = vadd.f32 %v18535_v44, %v6867_v15  ;;  %v18538_v30 = vadd.f32 %v18537_v50, %v18536_v48 }
 0x40b   : > { %v6935_v54 = vadd.f32 %v18538_v30, %v6870_v16 }
 0x40d   : > { %v18555_v56 = vpop.f32.mrb[112].mxu1 }
 0x40e   : > { %v18556_v4 = vpop.f32.mrb[113].mxu1 }
 0x40f   : > { %v18557_v6 = vadd.f32 %v18556_v4, %v18555_v56  ;;  %v18558_v17 = vpop.f32.mrb[114].mxu1 }
 0x410   : > { %v18559_v58 = vpop.f32.mrb[115].mxu1 }
 0x411   : > { %v6973_v59 = vadd.f32 %v18557_v6, %v6908_v52  ;;  %v18560_v24 = vadd.f32 %v18559_v58, %v18558_v17 }
 0x413   : > { %v6976_v9 = vadd.f32 %v18560_v24, %v6911_v47 }
 0x415   : > { %v18561_v38 = vpop.f32.mrb[116].mxu1 }
 0x416   : > { %v18562_v60 = vpop.f32.mrb[117].mxu1 }
 0x417   : > { %v18563_v62 = vadd.f32 %v18562_v60, %v18561_v38  ;;  %v18564_v63 = vpop.f32.mrb[118].mxu1 }
 0x418   : > { %v18565_v0 = vpop.f32.mrb[119].mxu1 }
 0x419   : > { %v6981_v49 = vadd.f32 %v18563_v62, %v6916_v34  ;;  %v18566_v27 = vadd.f32 %v18565_v0, %v18564_v63 }
 0x41b   : > { %v6984_v37 = vadd.f32 %v18566_v27, %v6919_v12 }
 0x41d   : > { %v18567_v7 = vpop.f32.mrb[120].mxu1 }
 0x41e   : > { %v18568_v10 = vpop.f32.mrb[121].mxu1 }
 0x41f   : > { %v18569_v40 = vadd.f32 %v18568_v10, %v18567_v7  ;;  %v18570_v13 = vpop.f32.mrb[122].mxu1 }
 0x420   : > { %v18571_v28 = vpop.f32.mrb[123].mxu1 }
 0x421   : > { %v6989_v14 = vadd.f32 %v18569_v40, %v6924_v19  ;;  %v18572_v45 = vadd.f32 %v18571_v28, %v18570_v13 }
 0x423   : > { %v6992_v29 = vadd.f32 %v18572_v45, %v6927_v43 }
 0x425   : > { %v18573_v55 = vpop.f32.mrb[124].mxu1 }
 0x426   : > { %v18574_v51 = vpop.f32.mrb[125].mxu1 }
 0x427   : > { %v18575_v15 = vadd.f32 %v18574_v51, %v18573_v55  ;;  %v18576_v2 = vpop.f32.mrb[126].mxu1 }
 0x428   : > { %v18577_v16 = vpop.f32.mrb[127].mxu1 }
 0x429   : > { %v6997_v18 = vadd.f32 %v18575_v15, %v6932_v53  ;;  %v18578_v57 = vadd.f32 %v18577_v16, %v18576_v2 }
 0x42b   : > { %v7000_v35 = vadd.f32 %v18578_v57, %v6935_v54 }
 0x42d   : > { %v18595_v20 = vpop.f32.mrb[128].mxu1 }
 0x42e   : > { %v18596_v21 = vpop.f32.mrb[129].mxu1 }
 0x42f   : > { %v18597_v22 = vadd.f32 %v18596_v21, %v18595_v20  ;;  %v18598_v52 = vpop.f32.mrb[130].mxu1 }
 0x430   : > { %v18599_v25 = vpop.f32.mrb[131].mxu1 }
 0x431   : > { %v7038_v47 = vadd.f32 %v18597_v22, %v6973_v59  ;;  %v18600_v23 = vadd.f32 %v18599_v25, %v18598_v52 }
 0x433   : > { %v7041_v26 = vadd.f32 %v18600_v23, %v6976_v9 }
 0x435   : > { %v18601_v11 = vpop.f32.mrb[132].mxu1 }
 0x436   : > { %v18602_v32 = vpop.f32.mrb[133].mxu1 }
 0x437   : > { %v18603_v31 = vadd.f32 %v18602_v32, %v18601_v11  ;;  %v18604_v34 = vpop.f32.mrb[134].mxu1 }
 0x438   : > { %v18605_v61 = vpop.f32.mrb[135].mxu1 }
 0x439   : > { %v7046_v12 = vadd.f32 %v18603_v31, %v6981_v49  ;;  %v18606_v46 = vadd.f32 %v18605_v61, %v18604_v34  ;;  %v7469_v61 = vld [vmem:[%s24574_s9] sm:$0xff] }
 0x43b   : > { %v7049_v39 = vadd.f32 %v18606_v46, %v6984_v37 }
 0x43d   : > { %v18607_v41 = vpop.f32.mrb[136].mxu1 }
 0x43e   : > { %v18608_v5 = vpop.f32.mrb[137].mxu1 }
 0x43f   : > { %v18609_v33 = vadd.f32 %v18608_v5, %v18607_v41  ;;  %v18610_v19 = vpop.f32.mrb[138].mxu1 }
 0x440   : > { %v18611_v42 = vpop.f32.mrb[139].mxu1 }
 0x441   : > { %v7054_v43 = vadd.f32 %v18609_v33, %v6989_v14  ;;  %v18612_v36 = vadd.f32 %v18611_v42, %v18610_v19 }
 0x443   : > { %v7057_v3 = vadd.f32 %v18612_v36, %v6992_v29 }
 0x445   : > { %v18613_v44 = vpop.f32.mrb[140].mxu1 }
 0x446   : > { %v18614_v48 = vpop.f32.mrb[141].mxu1 }
 0x447   : > { %v18615_v50 = vadd.f32 %v18614_v48, %v18613_v44  ;;  %v18616_v53 = vpop.f32.mrb[142].mxu1 }
 0x448   : > { %v18617_v30 = vpop.f32.mrb[143].mxu1 }
 0x449   : > { %v7062_v54 = vadd.f32 %v18615_v50, %v6997_v18  ;;  %v18618_v56 = vadd.f32 %v18617_v30, %v18616_v53 }
 0x44b   : > { %v7065_v4 = vadd.f32 %v18618_v56, %v7000_v35 }
 0x44d   : > { %v18635_v6 = vpop.f32.mrb[144].mxu1 }
 0x44e   : > { %v18636_v17 = vpop.f32.mrb[145].mxu1 }
 0x44f   : > { %v18637_v58 = vadd.f32 %v18636_v17, %v18635_v6  ;;  %v18638_v59 = vpop.f32.mrb[146].mxu1 }
 0x450   : > { %v18639_v24 = vpop.f32.mrb[147].mxu1 }
 0x451   : > { %v7103_v9 = vadd.f32 %v18637_v58, %v7038_v47  ;;  %v18640_v38 = vadd.f32 %v18639_v24, %v18638_v59 }
 0x453   : > { %v7106_v60 = vadd.f32 %v18640_v38, %v7041_v26 }
 0x455   : > { %v18641_v62 = vpop.f32.mrb[148].mxu1 }
 0x456   : > { %v18642_v63 = vpop.f32.mrb[149].mxu1 }
 0x457   : > { %v18643_v0 = vadd.f32 %v18642_v63, %v18641_v62  ;;  %v18644_v49 = vpop.f32.mrb[150].mxu1 }
 0x458   : > { %v18645_v27 = vpop.f32.mrb[151].mxu1 }
 0x459   : > { %v7111_v37 = vadd.f32 %v18643_v0, %v7046_v12  ;;  %v18646_v7 = vadd.f32 %v18645_v27, %v18644_v49 }
 0x45b   : > { %v7114_v10 = vadd.f32 %v18646_v7, %v7049_v39  ;;  %v7473_v39 = vld [vmem:[%s24574_s9 + $0x20] sm:$0xff] }
 0x45c   : > { %v17516_v5 = vcombine.low %v7469_v61, %v7473_v39  ;;  %v17517_v33 = vcombine.high %v7469_v61, %v7473_v39 }
 0x45d   : > { %v18647_v40 = vpop.f32.mrb[152].mxu1 }
 0x45e   : > { %v18648_v13 = vpop.f32.mrb[153].mxu1  ;;  %7521 = vmatprep.subr.bf16.mxu0 %v17517_v33 }
 0x45f   : > { %v18649_v28 = vadd.f32 %v18648_v13, %v18647_v40  ;;  %v18650_v14 = vpop.f32.mrb[154].mxu1  ;;  %7522 = vmatpush1.bf16.msra.mxu0 %v17516_v5 }
 0x460   : > { %v18651_v45 = vpop.f32.mrb[155].mxu1 }
 0x461   : > { %v7119_v29 = vadd.f32 %v18649_v28, %v7054_v43  ;;  %v18652_v55 = vadd.f32 %v18651_v45, %v18650_v14 }
 0x463   : > { %v7122_v51 = vadd.f32 %v18652_v55, %v7057_v3 }
 0x465   : > { %v18653_v15 = vpop.f32.mrb[156].mxu1 }
 0x466   : > { %v18654_v2 = vpop.f32.mrb[157].mxu1 }
 0x467   : > { %v18655_v16 = vadd.f32 %v18654_v2, %v18653_v15  ;;  %v18656_v18 = vpop.f32.mrb[158].mxu1 }
 0x468   : > { %v18657_v57 = vpop.f32.mrb[159].mxu1 }
 0x469   : > { %v18658_v35 = vadd.f32 %v18657_v57, %v18656_v18  ;;  %v7127_v20 = vadd.f32 %v18655_v16, %v7062_v54 }
 0x46b   : > { %v7130_v21 = vadd.f32 %v18658_v35, %v7065_v4 }
 0x46d   : > { %v18675_v22 = vpop.f32.mrb[160].mxu1 }
 0x46e   : > { %v18676_v52 = vpop.f32.mrb[161].mxu1 }
 0x46f   : > { %v18677_v25 = vadd.f32 %v18676_v52, %v18675_v22  ;;  %v18678_v47 = vpop.f32.mrb[162].mxu1 }
 0x470   : > { %v18679_v23 = vpop.f32.mrb[163].mxu1 }
 0x471   : > { %v18680_v26 = vadd.f32 %v18679_v23, %v18678_v47  ;;  %v7168_v11 = vadd.f32 %v18677_v25, %v7103_v9 }
 0x473   : > { %v7171_v32 = vadd.f32 %v18680_v26, %v7106_v60 }
 0x475   : > { %v18681_v31 = vpop.f32.mrb[164].mxu1 }
 0x476   : > { %v18682_v34 = vpop.f32.mrb[165].mxu1 }
 0x477   : > { %v18683_v12 = vadd.f32 %v18682_v34, %v18681_v31  ;;  %v18684_v46 = vpop.f32.mrb[166].mxu1 }
 0x478   : > { %v18685_v41 = vpop.f32.mrb[167].mxu1 }
 0x479   : > { %v18686_v19 = vadd.f32 %v18685_v41, %v18684_v46  ;;  %v7176_v42 = vadd.f32 %v18683_v12, %v7111_v37 }
 0x47b   : > { %v7179_v43 = vadd.f32 %v18686_v19, %v7114_v10 }
 0x47d   : > { %v18687_v36 = vpop.f32.mrb[168].mxu1 }
 0x47e   : > { %v18688_v3 = vpop.f32.mrb[169].mxu1 }
 0x47f   : > { %v18689_v44 = vadd.f32 %v18688_v3, %v18687_v36  ;;  %v18690_v48 = vpop.f32.mrb[170].mxu1 }
 0x480   : > { %v18691_v50 = vpop.f32.mrb[171].mxu1 }
 0x481   : > { %v18692_v53 = vadd.f32 %v18691_v50, %v18690_v48  ;;  %v7184_v30 = vadd.f32 %v18689_v44, %v7119_v29 }
 0x483   : > { %v7187_v54 = vadd.f32 %v18692_v53, %v7122_v51 }
 0x485   : > { %v18693_v56 = vpop.f32.mrb[172].mxu1 }
 0x486   : > { %v18694_v4 = vpop.f32.mrb[173].mxu1 }
 0x487   : > { %v18695_v6 = vadd.f32 %v18694_v4, %v18693_v56  ;;  %v18696_v17 = vpop.f32.mrb[174].mxu1 }
 0x488   : > { %v18697_v58 = vpop.f32.mrb[175].mxu1 }
 0x489   : > { %v7192_v59 = vadd.f32 %v18695_v6, %v7127_v20  ;;  %v18698_v24 = vadd.f32 %v18697_v58, %v18696_v17 }
 0x48b   : > { %v7195_v9 = vadd.f32 %v18698_v24, %v7130_v21 }
 0x48d   : > { %v18715_v38 = vpop.f32.mrb[176].mxu1 }
 0x48e   : > { %v18716_v60 = vpop.f32.mrb[177].mxu1 }
 0x48f   : > { %v18717_v62 = vadd.f32 %v18716_v60, %v18715_v38  ;;  %v18718_v63 = vpop.f32.mrb[178].mxu1 }
 0x490   : > { %v18719_v0 = vpop.f32.mrb[179].mxu1 }
 0x491   : > { %v7233_v49 = vadd.f32 %v18717_v62, %v7168_v11  ;;  %v18720_v27 = vadd.f32 %v18719_v0, %v18718_v63 }
 0x493   : > { %v7236_v37 = vadd.f32 %v18720_v27, %v7171_v32 }
 0x495   : > { %v18721_v7 = vpop.f32.mrb[180].mxu1 }
 0x496   : > { %v18722_v10 = vpop.f32.mrb[181].mxu1 }
 0x497   : > { %v18723_v40 = vadd.f32 %v18722_v10, %v18721_v7  ;;  %v18724_v13 = vpop.f32.mrb[182].mxu1 }
 0x498   : > { %v18725_v28 = vpop.f32.mrb[183].mxu1 }
 0x499   : > { %v7241_v14 = vadd.f32 %v18723_v40, %v7176_v42  ;;  %v18726_v45 = vadd.f32 %v18725_v28, %v18724_v13 }
 0x49b   : > { %v7244_v29 = vadd.f32 %v18726_v45, %v7179_v43 }
 0x49d   : > { %v18727_v55 = vpop.f32.mrb[184].mxu1 }
 0x49e   : > { %v18728_v51 = vpop.f32.mrb[185].mxu1 }
 0x49f   : > { %v18729_v15 = vadd.f32 %v18728_v51, %v18727_v55  ;;  %v18730_v2 = vpop.f32.mrb[186].mxu1 }
 0x4a0   : > { %v18731_v16 = vpop.f32.mrb[187].mxu1 }
 0x4a1   : > { %v7249_v18 = vadd.f32 %v18729_v15, %v7184_v30  ;;  %v18732_v57 = vadd.f32 %v18731_v16, %v18730_v2  ;;  %v7471_v2 = vld [vmem:[%s24574_s9 + $0x10] sm:$0xff] }
 0x4a2   : > { %v7475_v16 = vld [vmem:[%s24574_s9 + $0x30] sm:$0xff] }
 0x4a3   : > { %v7252_v35 = vadd.f32 %v18732_v57, %v7187_v54 }
 0x4a5   : > { %v18733_v20 = vpop.f32.mrb[188].mxu1 }
 0x4a6   : > { %v18734_v21 = vpop.f32.mrb[189].mxu1 }
 0x4a7   : > { %v18735_v22 = vadd.f32 %v18734_v21, %v18733_v20  ;;  %v18736_v52 = vpop.f32.mrb[190].mxu1  ;;  %v20440_v21 = vld [vmem:[%s24572_s7 + $0x24] sm:$0xff]  }
 0x4a8   : > { %v18737_v25 = vpop.f32.mrb[191].mxu1 }
 0x4a9   : > { %v7257_v47 = vadd.f32 %v18735_v22, %v7192_v59  ;;  %v18738_v23 = vadd.f32 %v18737_v25, %v18736_v52  ;;  %v17520_v22 = vcombine.low %v7471_v2, %v7475_v16  ;;  %v20441_v52 = vld [vmem:[%s24572_s7 + $0x2c] sm:$0xff]   ;;  %v20442_v25 = vld [vmem:[%s24572_s7 + $0x34] sm:$0xff]  }
 0x4ab   : > { %v7260_v26 = vadd.f32 %v18738_v23, %v7195_v9  ;;  %v20444_v23 = vld [vmem:[%s24572_s7 + $0x44] ss:$0 sps:$4 sm:$0xff]  }
 0x4ad   : > { %v18755_v11 = vpop.f32.mrb[192].mxu1 }
 0x4ae   : > { %v18756_v32 = vpop.f32.mrb[193].mxu1 }
 0x4af   : > { %v18757_v31 = vadd.f32 %v18756_v32, %v18755_v11  ;;  %v18758_v34 = vpop.f32.mrb[194].mxu1  ;;  %v7474_v11 = vld [vmem:[%s24574_s9 + $0x28] sm:$0xff]  ;;  %v17530_v32 = vld [vmem:[%s24574_s9 + $0x50] sm:$0xff] }
 0x4b0   : > { %v18759_v61 = vpop.f32.mrb[195].mxu1 }
 0x4b1   : > { %v7298_v12 = vadd.f32 %v18757_v31, %v7233_v49  ;;  %v18760_v46 = vadd.f32 %v18759_v61, %v18758_v34  ;;  %v17534_v61 = vld [vmem:[%s24574_s9 + $0x70] sm:$0xff] }
 0x4b3   : > { %v7328_v39 = vmax.f32 %v7298_v12, 0.0  ;;  %v7301_v41 = vadd.f32 %v18760_v46, %v7236_v37  ;;  %v17540_v12 = vcombine.low %v17530_v32, %v17534_v61  ;;  %v17541_v46 = vcombine.high %v17530_v32, %v17534_v61  ;;  %v17553_v61 = vld [vmem:[%s24574_s9 + $0xa8] sm:$0xff] }
 0x4b5   : > { %v7329_v5 = vmax.f32 %v7301_v41, 0.0  ;;  %v18761_v33 = vpop.f32.mrb[196].mxu1  ;;  %v7336_v42 = vmin.f32 %v7328_v39, 6.0  ;;  %v7472_v39 = vld [vmem:[%s24574_s9 + $0x18] sm:$0xff] }
 0x4b6   : > { %v18762_v19 = vpop.f32.mrb[197].mxu1  ;;  %v7476_v41 = vld [vmem:[%s24574_s9 + $0x38] sm:$0xff] }
 0x4b7   : > { %v7337_v43 = vmin.f32 %v7329_v5, 6.0  ;;  %v18763_v36 = vadd.f32 %v18762_v19, %v18761_v33  ;;  %v18764_v3 = vpop.f32.mrb[198].mxu1  ;;  %v17550_v5 = vld [vmem:[%s24574_s9 + $0x90] sm:$0xff] }
 0x4b8   : > { %v18765_v44 = vpop.f32.mrb[199].mxu1  ;;  %v17554_v33 = vld [vmem:[%s24574_s9 + $0xb0] sm:$0xff] }
 0x4b9   : > { %v7344_v48 = vpack.c.bf16 %v7337_v43, %v7336_v42  ;;  %v7306_v50 = vadd.f32 %v18763_v36, %v7241_v14  ;;  %v18766_v53 = vadd.f32 %v18765_v44, %v18764_v3  ;;  %v17523_v3 = vcombine.high %v7472_v39, %v7476_v41 }
 0x4ba   : > { %v17561_v44 = vcombine.high %v17550_v5, %v17554_v33 }
 0x4bb   : > { %v7330_v30 = vmax.f32 %v7306_v50, 0.0  ;;  %v7309_v54 = vadd.f32 %v18766_v53, %v7244_v29  ;;  %19570 = vmatpush3.bf16.msra.mxu1 %v7344_v48  ;;  %v17528_v50 = vld [vmem:[%s24574_s9 + $0x40] sm:$0xff] }
 0x4bc   : > { %19571 = vmatprep.subr.bf16.mxu1 %v21045_v8  ;;  %v17532_v53 = vld [vmem:[%s24574_s9 + $0x60] sm:$0xff] }
 0x4bd   : > { %v7331_v56 = vmax.f32 %v7309_v54, 0.0  ;;  %v18767_v4 = vpop.f32.mrb[200].mxu1  ;;  %v7338_v17 = vmin.f32 %v7330_v30, 6.0  ;;  %v17522_v30 = vcombine.low %v7472_v39, %v7476_v41  ;;  %v17551_v39 = vld [vmem:[%s24574_s9 + $0x98] sm:$0xff] }
 0x4be   : > { %v18768_v6 = vpop.f32.mrb[201].mxu1 }
 0x4bf   : > { %v7339_v58 = vmin.f32 %v7331_v56, 6.0  ;;  %v18769_v59 = vadd.f32 %v18768_v6, %v18767_v4  ;;  %v18770_v24 = vpop.f32.mrb[202].mxu1  ;;  %v17537_v4 = vcombine.high %v17528_v50, %v17532_v53 }
 0x4c0   : > { %v18771_v9 = vpop.f32.mrb[203].mxu1 }
 0x4c1   : > { %v7345_v38 = vpack.c.bf16 %v7339_v58, %v7338_v17  ;;  %v7314_v60 = vadd.f32 %v18769_v59, %v7249_v18  ;;  %v18772_v62 = vadd.f32 %v18771_v9, %v18770_v24  ;;  %v17570_v17 = vld [vmem:[%s24574_s9 + $0xd0] sm:$0xff]  ;;  %v17560_v24 = vcombine.low %v17550_v5, %v17554_v33  ;;  %v17555_v5 = vld [vmem:[%s24574_s9 + $0xb8] sm:$0xff] }
 0x4c2   : > { %v17574_v58 = vld [vmem:[%s24574_s9 + $0xf0] sm:$0xff] }
 0x4c3   : > { %v7332_v63 = vmax.f32 %v7314_v60, 0.0  ;;  %v7317_v0 = vadd.f32 %v18772_v62, %v7252_v35  ;;  %19572 = vmatpush3.bf16.msra.mxu1 %v7345_v38  ;;  %v17521_v35 = vcombine.high %v7471_v2, %v7475_v16  ;;  %v17581_v38 = vcombine.high %v17570_v17, %v17574_v58  ;;  %v17529_v60 = vld [vmem:[%s24574_s9 + $0x48] sm:$0xff]  ;;  %v17630_v33 = vld [vmem:[%s24574_s9 + $0x190] sm:$0xff] }
 0x4c4   : > { %19573 = vmatprep.subr.bf16.mxu1 %v21045_v8  ;;  %v17533_v62 = vld [vmem:[%s24574_s9 + $0x68] sm:$0xff] }
 0x4c5   : > { %v7333_v49 = vmax.f32 %v7317_v0, 0.0  ;;  %v18773_v27 = vpop.f32.mrb[204].mxu1  ;;  %v7340_v7 = vmin.f32 %v7332_v63, 6.0  ;;  %v17536_v63 = vcombine.low %v17528_v50, %v17532_v53  ;;  %v17562_v50 = vcombine.low %v17551_v39, %v17555_v5 }
 0x4c6   : > { %v18774_v37 = vpop.f32.mrb[205].mxu1 }
 0x4c7   : > { %v7341_v10 = vmin.f32 %v7333_v49, 6.0  ;;  %v18775_v40 = vadd.f32 %v18774_v37, %v18773_v27  ;;  %v18776_v13 = vpop.f32.mrb[206].mxu1  ;;  %v17539_v49 = vcombine.high %v17529_v60, %v17533_v62 }
 0x4c8   : > { %v18777_v28 = vpop.f32.mrb[207].mxu1 }
 0x4c9   : > { %v7346_v14 = vpack.c.bf16 %v7341_v10, %v7340_v7  ;;  %v7322_v45 = vadd.f32 %v18775_v40, %v7257_v47  ;;  %v18778_v29 = vadd.f32 %v18777_v28, %v18776_v13  ;;  %v20443_v47 = vld [vmem:[%s24572_s7 + $0x3c] sm:$0xff]   ;;  %v17590_v28 = vld [vmem:[%s24574_s9 + $0x110] sm:$0xff] }
 0x4ca   : > { %v17531_v10 = vld [vmem:[%s24574_s9 + $0x58] sm:$0xff] }
 0x4cb   : > { %v7334_v55 = vmax.f32 %v7322_v45, 0.0  ;;  %v7325_v51 = vadd.f32 %v18778_v29, %v7260_v26  ;;  %19574 = vmatpush3.bf16.msra.mxu1 %v7346_v14  ;;  %v7470_v26 = vld [vmem:[%s24574_s9 + $0x8] sm:$0xff]  ;;  %v17535_v13 = vld [vmem:[%s24574_s9 + $0x78] sm:$0xff]  ;;  %v17594_v14 = vld [vmem:[%s24574_s9 + $0x130] sm:$0xff]  ;;  %v17538_v45 = vcombine.low %v17529_v60, %v17533_v62  ;;  %v17580_v29 = vcombine.low %v17570_v17, %v17574_v58 }
 0x4cc   : > { %19575 = vmatprep.subr.bf16.mxu1 %v21045_v8  ;;  %v17518_v31 = vcombine.low %v7470_v26, %v7474_v11  ;;  %v17519_v34 = vcombine.high %v7470_v26, %v7474_v11  ;;  %v17601_v2 = vcombine.high %v17590_v28, %v17594_v14  ;;  %v17600_v11 = vcombine.low %v17590_v28, %v17594_v14  ;;  %v17569_v17 = vld [vmem:[%s24574_s9 + $0xc8] sm:$0xff]  ;;  %v17575_v60 = vld [vmem:[%s24574_s9 + $0xf8] sm:$0xff]  ;;  %v17670_v62 = vld [vmem:[%s24574_s9 + $0x210] sm:$0xff] }
 0x4cd   : > { %v7335_v15 = vmax.f32 %v7325_v51, 0.0  ;;  %v7342_v18 = vmin.f32 %v7334_v55, 6.0  ;;  %v17573_v58 = vld [vmem:[%s24574_s9 + $0xe8] sm:$0xff] }
 0x4ce   : > { %7562 = vmatprep.subr.bf16.mxu0 %v17519_v34  ;;  %v17549_v34 = vld [vmem:[%s24574_s9 + $0x88] sm:$0xff] }
 0x4cf   : > { %v7343_v57 = vmin.f32 %v7335_v15, 6.0  ;;  %v17543_v15 = vcombine.high %v17531_v10, %v17535_v13 }
 0x4d1   : > { %v7347_v20 = vpack.c.bf16 %v7343_v57, %v7342_v18  ;;  %v17548_v57 = vld [vmem:[%s24574_s9 + $0x80] sm:$0xff] }
 0x4d3   : > { %19576 = vmatpush3.bf16.msra.mxu1 %v7347_v20  ;;  %v17542_v20 = vcombine.low %v17531_v10, %v17535_v13  ;;  %v17592_v10 = vld [vmem:[%s24574_s9 + $0x120] sm:$0xff] }
 0x4d4   : > { %7603 = vmatprep.subr.bf16.mxu1 %v17521_v35  ;;  %v17552_v35 = vld [vmem:[%s24574_s9 + $0xa0] sm:$0xff] }
 0x4d6   : > { %19578 = vmatmul.mubr.msk.bf16.vlgmr.msra.gmra.mrb[208].mxu1 %vm1718_vm1, %v20440_v21 }
 0x4d7   : > { %19581 = vmatprep.mubr.msk.bf16.mxu1 %vm21046_vm0, %v21045_v8  ;;  %7604 = vmatpush1.bf16.msra.mxu1 %v17520_v22  ;;  %v17557_v22 = vcombine.high %v17548_v57, %v17552_v35 }
 0x4d8   : > { %7828 = vmatprep.subr.bf16.mxu1 %v17541_v46  ;;  %v17559_v46 = vcombine.high %v17549_v34, %v17553_v61 }
 0x4de   : > { %19582 = vmatmul.mubr.msk.bf16.gmra.mrb[212].mxu1 %vm1718_vm1, %v20441_v52 }
 0x4df   : > { %19585 = vmatprep.mubr.msk.bf16.mxu1 %vm21046_vm0, %v21045_v8 }
 0x4e6   : > { %19586 = vmatmul.mubr.msk.bf16.gmra.mrb[216].mxu1 %vm1718_vm1, %v20442_v25  ;;  %v17610_v25 = vld [vmem:[%s24574_s9 + $0x150] sm:$0xff] }
 0x4e7   : > { %19589 = vmatprep.mubr.msk.bf16.mxu1 %vm21046_vm0, %v21045_v8 }
 0x4ee   : > { %19590 = vmatmul.mubr.msk.bf16.gmra.mrb[220].mxu1 %vm1718_vm1, %v20443_v47  ;;  %v17614_v47 = vld [vmem:[%s24574_s9 + $0x170] sm:$0xff] }
 0x4ef   : > { %19593 = vmatprep.mubr.msk.bf16.mxu1 %vm21046_vm0, %v21045_v8 }
 0x4f6   : > { %19594 = vmatmul.mubr.msk.bf16.gmra.mrb[224].mxu1 %vm1718_vm1, %v20444_v23 }
 0x4f7   : > { %7635 = vmatprep.mubr.bf16.mxu1 %v21044_v1 }
 0x5a9   : > { %v7430_v19 = vpop.f32.mrb[208].mxu1 }
 0x5aa   : > { %v7468_v42 = vpack.c.bf16 %v7430_v19, %v7430_v19  ;;  %v19579_v43 = vpop.f32.mrb[209].mxu1  ;;  %v17634_v19 = vld [vmem:[%s24574_s9 + $0x1b0] sm:$0xff] }
 0x5ab   : > { %v7433_v36 = vpop.f32.mrb[210].mxu1  ;;  %v17620_v43 = vcombine.low %v17610_v25, %v17614_v47 }
 0x5ac   : > { %v19580_v48 = vpop.f32.mrb[211].mxu1  ;;  %17524 = vmatmul.mubr.msk.bf16.vlgmr.msra.gmra.mrb[32].mxu0 %vm7517_vm2, %v7468_v42  ;;  %17526 = vmatmul.mubr.msk.bf16.vlgmr.msra.gmra.mrb[60].mxu1 %vm7517_vm2, %v7468_v42  ;;  %v22952_v9 = vpack.c.bf16 %v7433_v36, %v7433_v36  ;;  %v17563_v36 = vcombine.high %v17551_v39, %v17555_v5  ;;  %v20454_v39 = vld [vmem:[%s21406_s14 + $0x20] sm:$0xff]  }
 0x5ad   : > { %7563 = vmatpush1.bf16.msra.mxu0 %v17518_v31  ;;  %7829 = vmatpush1.bf16.msra.mxu1 %v17540_v12  ;;  %v17621_v31 = vcombine.high %v17610_v25, %v17614_v47  ;;  %v17556_v12 = vcombine.low %v17548_v57, %v17552_v35  ;;  %v17572_v48 = vld [vmem:[%s24574_s9 + $0xe0] sm:$0xff]  ;;  %v20449_v25 = vld [vmem:[%s21406_s14 + $0x50] sm:$0xff]  }
 0x5ae   : > { %7594 = vmatprep.mubr.bf16.mxu0 %v21044_v1  ;;  %7860 = vmatprep.mubr.bf16.mxu1 %v21044_v1  ;;  %v20446_v57 = vld [vmem:[%s21406_s14] sm:$0xff]  }
 0x5af   : > { %7644 = vmatprep.subr.bf16.mxu0 %v17523_v3  ;;  %8053 = vmatprep.subr.bf16.mxu1 %v17561_v44  ;;  %v17641_v3 = vcombine.high %v17630_v33, %v17634_v19  ;;  %v17568_v44 = vld [vmem:[%s24574_s9 + $0xc0] sm:$0xff] }
 0x5b0   : > { %v17577_v53 = vcombine.high %v17568_v44, %v17572_v48  ;;  %v17608_v47 = vld [vmem:[%s24574_s9 + $0x140] sm:$0xff] }
 0x5b1   : > { %v7438_v54 = vpop.f32.mrb[212].mxu1 }
 0x5b2   : > { %v19583_v56 = vpop.f32.mrb[213].mxu1  ;;  %v22970_v40 = vpack.c.bf16 %v7438_v54, %v7438_v54  ;;  %v17654_v54 = vld [vmem:[%s24574_s9 + $0x1f0] sm:$0xff] }
 0x5b3   : > { %v7441_v6 = vpop.f32.mrb[214].mxu1  ;;  %v17640_v56 = vcombine.low %v17630_v33, %v17634_v19  ;;  %v20455_v33 = vld [vmem:[%s21406_s14 + $0x68] sm:$0xff]  }
 0x5b4   : > { %17525 = vmatmul.mubr.msk.bf16.vlgmr.msra.gmra.mrb[36].mxu0 %vm7517_vm2, %v7468_v42  ;;  %v19584_v59 = vpop.f32.mrb[215].mxu1  ;;  %v23008_v32 = vpack.c.bf16 %v7441_v6, %v7441_v6 }
 0x5b5   : > { %7645 = vmatpush1.bf16.msra.mxu0 %v17522_v30  ;;  %7676 = vmatprep.mubr.bf16.mxu0 %v21044_v1  ;;  %v17650_v30 = vld [vmem:[%s24574_s9 + $0x1d0] sm:$0xff]  ;;  %v17576_v59 = vcombine.low %v17568_v44, %v17572_v48  ;;  %v20459_v48 = vld [vmem:[%s21406_s14 + $0x78] sm:$0xff]  }
 0x5b6   : > { %7746 = vmatprep.subr.bf16.mxu0 %v17537_v4  ;;  %v17661_v6 = vcombine.high %v17650_v30, %v17654_v54 }
 0x5b8   : > { %17546 = vmatmul.mubr.msk.bf16.vlgmr.msra.gmra.mrb[60].mxu1 %vm7517_vm2, %v22952_v9 }
 0x5b9   : > { %8054 = vmatpush1.bf16.msra.mxu1 %v17560_v24  ;;  %8085 = vmatprep.mubr.bf16.mxu1 %v21044_v1  ;;  %v7446_v0 = vpop.f32.mrb[216].mxu1  ;;  %v17579_v24 = vcombine.high %v17569_v17, %v17573_v58 }
 0x5ba   : > { %8278 = vmatprep.subr.bf16.mxu1 %v17581_v38  ;;  %v19587_v27 = vpop.f32.mrb[217].mxu1  ;;  %v23025_v41 = vpack.c.bf16 %v7446_v0, %v7446_v0  ;;  %v17578_v0 = vcombine.low %v17569_v17, %v17573_v58  ;;  %v20465_v17 = vld [vmem:[%s21406_s14 + $0x80] sm:$0xff]  }
 0x5bb   : > { %v22963_v37 = vpop.f32.mrb[218].mxu1 }
 0x5bc   : > { %17527 = vmatmul.mubr.msk.bf16.vlgmr.msra.gmra.mrb[40].mxu0 %vm7517_vm2, %v7468_v42  ;;  %v19588_v7 = vpop.f32.mrb[219].mxu1  ;;  %v17558_v42 = vcombine.low %v17549_v34, %v17553_v61  ;;  %v23059_v4 = vpack.c.bf16 %v22963_v37, %v22963_v37  ;;  %v20452_v34 = vld [vmem:[%s21406_s14 + $0x18] sm:$0xff]   ;;  %v20453_v61 = vld [vmem:[%s21406_s14 + $0x60] sm:$0xff]  }
 0x5bd   : > { %7747 = vmatpush1.bf16.msra.mxu0 %v17536_v63  ;;  %7778 = vmatprep.mubr.bf16.mxu0 %v21044_v1  ;;  %v17674_v63 = vld [vmem:[%s24574_s9 + $0x230] sm:$0xff]  ;;  %v17588_v7 = vld [vmem:[%s24574_s9 + $0x100] sm:$0xff] }
 0x5be   : > { %7787 = vmatprep.subr.bf16.mxu0 %v17539_v49  ;;  %v17660_v49 = vcombine.low %v17650_v30, %v17654_v54  ;;  %v17681_v37 = vcombine.high %v17670_v62, %v17674_v63  ;;  %v17597_v13 = vcombine.high %v17588_v7, %v17592_v10  ;;  %v17680_v28 = vcombine.low %v17670_v62, %v17674_v63  ;;  %v20464_v30 = vld [vmem:[%s21406_s14 + $0xc0] sm:$0xff]   ;;  %v20471_v62 = vld [vmem:[%s21406_s14 + $0xd0] sm:$0xff]  }
 0x5bf   : > { %v20461_v54 = vld [vmem:[%s24570_s5] ss:$144 sps:$4 sm:$0xff]  }
 0x5c0   : > { %v20470_v63 = vld [vmem:[%s24570_s5 + $0x120] ss:$144 sps:$4 sm:$0xff]  }
 0x5c1   : > { %v22981_v55 = vpop.f32.mrb[220].mxu1 }
 0x5c2   : > { %v19591_v51 = vpop.f32.mrb[221].mxu1  ;;  %v23078_v38 = vpack.c.bf16 %v22981_v55, %v22981_v55  ;;  %v17593_v55 = vld [vmem:[%s24574_s9 + $0x128] sm:$0xff] }
 0x5c3   : > { %v22983_v16 = vpop.f32.mrb[222].mxu1  ;;  %v17596_v51 = vcombine.low %v17588_v7, %v17592_v10  ;;  %v20473_v7 = vld [vmem:[%s21406_s14 + $0xd8] sm:$0xff]   ;;  %v20475_v10 = vld [vmem:[%s24570_s5 + $0x244] ss:$144 sps:$4 sm:$0xff]  }
 0x5c4   : > { %17544 = vmatmul.mubr.msk.bf16.vlgmr.msra.gmra.mrb[32].mxu0 %vm7517_vm2, %v22952_v9  ;;  %17566 = vmatmul.mubr.msk.bf16.vlgmr.msra.gmra.mrb[60].mxu1 %vm7517_vm2, %v22970_v40  ;;  %v19592_v18 = vpop.f32.mrb[223].mxu1  ;;  %v23106_v14 = vpack.c.bf16 %v22983_v16, %v22983_v16  ;;  %v17591_v16 = vld [vmem:[%s24574_s9 + $0x118] sm:$0xff] }
 0x5c5   : > { %7788 = vmatpush1.bf16.msra.mxu0 %v17538_v45  ;;  %8279 = vmatpush1.bf16.msra.mxu1 %v17580_v29  ;;  %v20445_v45 = vld [vmem:[%s21406_s14 + $0x40] sm:$0xff]   ;;  %v17589_v29 = vld [vmem:[%s24574_s9 + $0x108] sm:$0xff]  ;;  %v17595_v18 = vld [vmem:[%s24574_s9 + $0x138] sm:$0xff] }
 0x5c6   : > { %7819 = vmatprep.mubr.bf16.mxu0 %v21044_v1  ;;  %8310 = vmatprep.mubr.bf16.mxu1 %v21044_v1  ;;  %v17598_v35 = vcombine.low %v17589_v29, %v17593_v55 }
 0x5c7   : > { %7869 = vmatprep.subr.bf16.mxu0 %v17543_v15  ;;  %8503 = vmatprep.subr.bf16.mxu1 %v17601_v2  ;;  %v17599_v15 = vcombine.high %v17589_v29, %v17593_v55  ;;  %v17631_v29 = vld [vmem:[%s24574_s9 + $0x198] sm:$0xff]  ;;  %v20479_v55 = vld [vmem:[%s21406_s14 + $0xa0] sm:$0xff]  }
 0x5c9   : > { %v22997_v21 = vpop.f32.mrb[224].mxu1 }
 0x5ca   : > { %v19595_v52 = vpop.f32.mrb[225].mxu1  ;;  %v23123_v2 = vpack.c.bf16 %v22997_v21, %v22997_v21  ;;  %v20448_v21 = vld [vmem:[%s21406_s14 + $0x8] sm:$0xff]  }
 0x5cb   : > { %v7465_v23 = vpop.f32.mrb[226].mxu1  ;;  %v20463_v52 = vld [vmem:[%s24570_s5 + $0x4] ss:$144 sps:$4 sm:$0xff]  }
 0x5cc   : > { %17545 = vmatmul.mubr.msk.bf16.vlgmr.msra.gmra.mrb[36].mxu0 %vm7517_vm2, %v22952_v9  ;;  %v19596_v26 = vpop.f32.mrb[227].mxu1  ;;  %v17612_v23 = vld [vmem:[%s24574_s9 + $0x160] sm:$0xff] }
 0x5cd   : > { %7870 = vmatpush1.bf16.msra.mxu0 %v17542_v20  ;;  %7901 = vmatprep.mubr.bf16.mxu0 %v21044_v1  ;;  %v20447_v20 = vld [vmem:[%s21406_s14 + $0x48] sm:$0xff]   ;;  %v20450_v26 = vld [vmem:[%s21406_s14 + $0x10] sm:$0xff]   ;;  %v17616_v5 = vcombine.low %v17608_v47, %v17612_v23 }
 0x5ce   : > { %7971 = vmatprep.subr.bf16.mxu0 %v17557_v22  ;;  %v17603_v22 = vcombine.high %v17591_v16, %v17595_v18 }
 0x5d0   : > { %17586 = vmatmul.mubr.msk.bf16.vlgmr.msra.gmra.mrb[60].mxu1 %vm7517_vm2, %v23008_v32 }
 0x5d1   : > { %8504 = vmatpush1.bf16.msra.mxu1 %v17600_v11  ;;  %8535 = vmatprep.mubr.bf16.mxu1 %v21044_v1  ;;  %v17602_v11 = vcombine.low %v17591_v16, %v17595_v18  ;;  %v20482_v16 = vld [vmem:[%s24570_s5 + $0x364] ss:$144 sps:$4 sm:$0xff]  }
 0x5d2   : > { %8728 = vmatprep.subr.bf16.mxu1 %v17621_v31  ;;  %v17617_v31 = vcombine.high %v17608_v47, %v17612_v23  ;;  %v20487_v47 = vld [vmem:[%s21406_s14 + $0xf8] sm:$0xff]  }
 0x5d3   : > { %v20491_v23 = vld [vmem:[%s24570_s5 + $0xc] ss:$144 sps:$4 sm:$0xff]  }
 0x5d4   : > { %17547 = vmatmul.mubr.msk.bf16.vlgmr.msra.gmra.mrb[40].mxu0 %vm7517_vm2, %v22952_v9  ;;  %v17571_v9 = vld [vmem:[%s24574_s9 + $0xd8] sm:$0xff] }
 0x5d5   : > { %7972 = vmatpush1.bf16.msra.mxu0 %v17556_v12  ;;  %8003 = vmatprep.mubr.bf16.mxu0 %v21044_v1  ;;  %v17583_v27 = vcombine.high %v17571_v9, %v17575_v60  ;;  %v17609_v12 = vld [vmem:[%s24574_s9 + $0x148] sm:$0xff] }
 0x5d6   : > { %8012 = vmatprep.subr.bf16.mxu0 %v17559_v46  ;;  %v17613_v46 = vld [vmem:[%s24574_s9 + $0x168] sm:$0xff] }
 0x5d7   : > { %v17619_v19 = vcombine.high %v17609_v12, %v17613_v46  ;;  %v17618_v44 = vcombine.low %v17609_v12, %v17613_v46  ;;  %v20493_v12 = vld [vmem:[%s21406_s14 + $0x100] sm:$0xff]  }
 0x5dc   : > { %17564 = vmatmul.mubr.msk.bf16.vlgmr.msra.gmra.mrb[32].mxu0 %vm7517_vm2, %v22970_v40  ;;  %17606 = vmatmul.mubr.msk.bf16.vlgmr.msra.gmra.mrb[60].mxu1 %vm7517_vm2, %v23025_v41 }
 0x5dd   : > { %8013 = vmatpush1.bf16.msra.mxu0 %v17558_v42  ;;  %8729 = vmatpush1.bf16.msra.mxu1 %v17620_v43  ;;  %v20456_v42 = vld [vmem:[%s21406_s14 + $0x28] sm:$0xff]   ;;  %v20457_v43 = vld [vmem:[%s21406_s14 + $0x70] sm:$0xff]  }
 0x5de   : > { %8044 = vmatprep.mubr.bf16.mxu0 %v21044_v1  ;;  %8760 = vmatprep.mubr.bf16.mxu1 %v21044_v1 }
 0x5df   : > { %8094 = vmatprep.subr.bf16.mxu0 %v17563_v36  ;;  %8953 = vmatprep.subr.bf16.mxu1 %v17641_v3  ;;  %v17611_v36 = vld [vmem:[%s24574_s9 + $0x158] sm:$0xff] }
 0x5e0   : > { %v17615_v3 = vld [vmem:[%s24574_s9 + $0x178] sm:$0xff] }
 0x5e1   : > { %v17622_v58 = vcombine.low %v17611_v36, %v17615_v3 }
 0x5e4   : > { %17565 = vmatmul.mubr.msk.bf16.vlgmr.msra.gmra.mrb[36].mxu0 %vm7517_vm2, %v22970_v40 }
 0x5e5   : > { %8095 = vmatpush1.bf16.msra.mxu0 %v17562_v50  ;;  %8126 = vmatprep.mubr.bf16.mxu0 %v21044_v1  ;;  %v17623_v50 = vcombine.high %v17611_v36, %v17615_v3  ;;  %v17651_v36 = vld [vmem:[%s24574_s9 + $0x1d8] sm:$0xff]  ;;  %v20500_v3 = vld [vmem:[%s21406_s14 + $0x110] sm:$0xff]  }
 0x5e6   : > { %8196 = vmatprep.subr.bf16.mxu0 %v17577_v53  ;;  %v20460_v53 = vld [vmem:[%s21406_s14 + $0x38] sm:$0xff]  }
 0x5e8   : > { %17626 = vmatmul.mubr.msk.bf16.vlgmr.msra.gmra.mrb[60].mxu1 %vm7517_vm2, %v23059_v4 }
 0x5e9   : > { %8954 = vmatpush1.bf16.msra.mxu1 %v17640_v56  ;;  %8985 = vmatprep.mubr.bf16.mxu1 %v21044_v1  ;;  %v17628_v56 = vld [vmem:[%s24574_s9 + $0x180] sm:$0xff] }
 0x5ea   : > { %9178 = vmatprep.subr.bf16.mxu1 %v17661_v6  ;;  %v17632_v6 = vld [vmem:[%s24574_s9 + $0x1a0] sm:$0xff] }
 0x5ec   : > { %17567 = vmatmul.mubr.msk.bf16.vlgmr.msra.gmra.mrb[40].mxu0 %vm7517_vm2, %v22970_v40  ;;  %v17582_v40 = vcombine.low %v17571_v9, %v17575_v60  ;;  %v17637_v9 = vcombine.high %v17628_v56, %v17632_v6  ;;  %v20467_v60 = vld [vmem:[%s21406_s14 + $0x88] sm:$0xff]  }
 0x5ed   : > { %8197 = vmatpush1.bf16.msra.mxu0 %v17576_v59  ;;  %8228 = vmatprep.mubr.bf16.mxu0 %v21044_v1  ;;  %v20466_v59 = vld [vmem:[%s21406_s14 + $0xc8] sm:$0xff]  }
 0x5ee   : > { %8237 = vmatprep.subr.bf16.mxu0 %v17579_v24  ;;  %v20468_v24 = vld [vmem:[%s24570_s5 + $0x124] ss:$144 sps:$4 sm:$0xff]  }
 0x5f4   : > { %17584 = vmatmul.mubr.msk.bf16.vlgmr.msra.gmra.mrb[32].mxu0 %vm7517_vm2, %v23008_v32  ;;  %17646 = vmatmul.mubr.msk.bf16.vlgmr.msra.gmra.mrb[60].mxu1 %vm7517_vm2, %v23078_v38 }
 0x5f5   : > { %8238 = vmatpush1.bf16.msra.mxu0 %v17578_v0  ;;  %9179 = vmatpush1.bf16.msra.mxu1 %v17660_v49  ;;  %v17629_v0 = vld [vmem:[%s24574_s9 + $0x188] sm:$0xff] }
 0x5f6   : > { %8269 = vmatprep.mubr.bf16.mxu0 %v21044_v1  ;;  %9210 = vmatprep.mubr.bf16.mxu1 %v21044_v1  ;;  %v17633_v49 = vld [vmem:[%s24574_s9 + $0x1a8] sm:$0xff] }
 0x5f7   : > { %8319 = vmatprep.subr.bf16.mxu0 %v17583_v27  ;;  %9403 = vmatprep.subr.bf16.mxu1 %v17681_v37  ;;  %v20472_v27 = vld [vmem:[%s21406_s14 + $0x90] sm:$0xff]   ;;  %v17636_v37 = vcombine.low %v17628_v56, %v17632_v6  ;;  %v17668_v56 = vld [vmem:[%s24574_s9 + $0x200] sm:$0xff] }
 0x5f8   : > { %v17672_v6 = vld [vmem:[%s24574_s9 + $0x220] sm:$0xff] }
 0x5fc   : > { %17585 = vmatmul.mubr.msk.bf16.vlgmr.msra.gmra.mrb[36].mxu0 %vm7517_vm2, %v23008_v32 }
 0x5fd   : > { %8320 = vmatpush1.bf16.msra.mxu0 %v17582_v40  ;;  %8351 = vmatprep.mubr.bf16.mxu0 %v21044_v1  ;;  %v17639_v40 = vcombine.high %v17629_v0, %v17633_v49 }
 0x5fe   : > { %8421 = vmatprep.subr.bf16.mxu0 %v17597_v13  ;;  %v20474_v13 = vld [vmem:[%s21406_s14 + $0x98] sm:$0xff]  }
 0x600   : > { %17666 = vmatmul.mubr.msk.bf16.vlgmr.msra.gmra.mrb[60].mxu1 %vm7517_vm2, %v23106_v14 }
 0x601   : > { %9404 = vmatpush1.bf16.msra.mxu1 %v17680_v28  ;;  %9435 = vmatprep.mubr.bf16.mxu1 %v21044_v1  ;;  %v20478_v28 = vld [vmem:[%s21406_s14 + $0xe0] sm:$0xff]  }
 0x602   : > { %18788 = vmatprep.subr.bf16.mxu1 %v20445_v45  ;;  %v20477_v45 = vld [vmem:[%s24570_s5 + $0x240] ss:$144 sps:$4 sm:$0xff]  }
 0x604   : > { %17587 = vmatmul.mubr.msk.bf16.vlgmr.msra.gmra.mrb[40].mxu0 %vm7517_vm2, %v23008_v32  ;;  %v20451_v32 = vld [vmem:[%s21406_s14 + $0x58] sm:$0xff]  }
 0x605   : > { %8422 = vmatpush1.bf16.msra.mxu0 %v17596_v51  ;;  %8453 = vmatprep.mubr.bf16.mxu0 %v21044_v1  ;;  %v17638_v51 = vcombine.low %v17629_v0, %v17633_v49  ;;  %v17669_v0 = vld [vmem:[%s24574_s9 + $0x208] sm:$0xff] }
 0x606   : > { %8462 = vmatprep.subr.bf16.mxu0 %v17599_v15  ;;  %v20480_v15 = vld [vmem:[%s21406_s14 + $0xe8] sm:$0xff]  }
 0x607   : > { %v17673_v49 = vld [vmem:[%s24574_s9 + $0x228] sm:$0xff] }
 0x60c   : > { %17604 = vmatmul.mubr.msk.bf16.vlgmr.msra.gmra.mrb[32].mxu0 %vm7517_vm2, %v23025_v41  ;;  %17686 = vmatmul.mubr.msk.bf16.vlgmr.msra.gmra.mrb[60].mxu1 %vm7517_vm2, %v23123_v2 }
 0x60d   : > { %18789 = vmatpush3.bf16.msra.mxu1 %v20446_v57  ;;  %8463 = vmatpush1.bf16.msra.mxu0 %v17598_v35  ;;  %v20481_v57 = vld [vmem:[%s21406_s14 + $0xa8] sm:$0xff]   ;;  %v20485_v35 = vld [vmem:[%s21406_s14 + $0xf0] sm:$0xff]  }
 0x60e   : > { %18790 = vmatprep.subr.bf16.mxu1 %v20447_v20  ;;  %8494 = vmatprep.mubr.bf16.mxu0 %v21044_v1  ;;  %v20484_v20 = vld [vmem:[%s24570_s5 + $0x360] ss:$144 sps:$4 sm:$0xff]  }
 0x60f   : > { %8544 = vmatprep.subr.bf16.mxu0 %v17603_v22  ;;  %12742 = vmatprep.mubr.bf16.mxu1 %v20463_v52  ;;  %v17648_v22 = vld [vmem:[%s24574_s9 + $0x1c0] sm:$0xff] }
 0x610   : > { %v17652_v52 = vld [vmem:[%s24574_s9 + $0x1e0] sm:$0xff] }
 0x611   : > { %18791 = vmatpush3.bf16.msra.mxu1 %v20448_v21  ;;  %v20486_v21 = vld [vmem:[%s21406_s14 + $0xb0] sm:$0xff]   ;;  %v17656_v46 = vcombine.low %v17648_v22, %v17652_v52 }
 0x612   : > { %18792 = vmatprep.subr.bf16.mxu1 %v20449_v25 }
 0x614   : > { %17605 = vmatmul.mubr.msk.bf16.vlgmr.msra.gmra.mrb[36].mxu0 %vm7517_vm2, %v23025_v41 }
 0x615   : > { %18793 = vmatpush3.bf16.msra.mxu1 %v20450_v26  ;;  %8545 = vmatpush1.bf16.msra.mxu0 %v17602_v11  ;;  %v17657_v26 = vcombine.high %v17648_v22, %v17652_v52  ;;  %v20488_v11 = vld [vmem:[%s21406_s14 + $0xb8] sm:$0xff]  }
 0x616   : > { %18794 = vmatprep.subr.bf16.mxu1 %v20451_v32  ;;  %8576 = vmatprep.mubr.bf16.mxu0 %v21044_v1  ;;  %v20492_v32 = vld [vmem:[%s21406_s14 + $0x140] sm:$0xff]   ;;  %v20529_v52 = vld [vmem:[%s21406_s14 + $0x1d8] sm:$0xff]  }
 0x617   : > { %8646 = vmatprep.subr.bf16.mxu0 %v17617_v31  ;;  %v20489_v31 = vld [vmem:[%s24570_s5 + $0x8] ss:$144 sps:$4 sm:$0xff]  }
 0x619   : > { %18795 = vmatpush3.bf16.msra.mxu1 %v20452_v34  ;;  %v17649_v34 = vld [vmem:[%s24574_s9 + $0x1c8] sm:$0xff] }
 0x61a   : > { %18796 = vmatprep.subr.bf16.mxu1 %v20453_v61  ;;  %v17653_v61 = vld [vmem:[%s24574_s9 + $0x1e8] sm:$0xff] }
 0x61c   : > { %17607 = vmatmul.mubr.msk.bf16.vlgmr.msra.gmra.mrb[40].mxu0 %vm7517_vm2, %v23025_v41  ;;  %v20458_v41 = vld [vmem:[%s21406_s14 + $0x30] sm:$0xff]  }
 0x61d   : > { %18797 = vmatpush3.bf16.msra.mxu1 %v20454_v39  ;;  %8647 = vmatpush1.bf16.msra.mxu0 %v17616_v5  ;;  %v20494_v39 = vld [vmem:[%s21406_s14 + $0x148] sm:$0xff]  }
 0x61e   : > { %18798 = vmatprep.subr.bf16.mxu1 %v20455_v33  ;;  %8678 = vmatprep.mubr.bf16.mxu0 %v21044_v1  ;;  %v20496_v5 = vld [vmem:[%s24570_s5 + $0x12c] ss:$144 sps:$4 sm:$0xff]   ;;  %v17659_v33 = vcombine.high %v17649_v34, %v17653_v61 }
 0x61f   : > { %8687 = vmatprep.subr.bf16.mxu0 %v17619_v19  ;;  %v20495_v19 = vld [vmem:[%s21406_s14 + $0x108] sm:$0xff]  }
 0x621   : > { %18799 = vmatpush3.bf16.msra.mxu1 %v20456_v42  ;;  %v20499_v42 = vld [vmem:[%s21406_s14 + $0x150] sm:$0xff]  }
 0x622   : > { %18800 = vmatprep.subr.bf16.mxu1 %v20457_v43  ;;  %v20498_v43 = vld [vmem:[%s24570_s5 + $0x128] ss:$144 sps:$4 sm:$0xff]  }
 0x624   : > { %17624 = vmatmul.mubr.msk.bf16.vlgmr.msra.gmra.mrb[32].mxu0 %vm7517_vm2, %v23059_v4 }
 0x625   : > { %18801 = vmatpush3.bf16.msra.mxu1 %v20458_v41  ;;  %8688 = vmatpush1.bf16.msra.mxu0 %v17618_v44  ;;  %v17658_v41 = vcombine.low %v17649_v34, %v17653_v61  ;;  %v20501_v44 = vld [vmem:[%s21406_s14 + $0x158] sm:$0xff]   ;;  %v20550_v34 = vld [vmem:[%s21406_s14 + $0x280] sm:$0xff]   ;;  %v20552_v61 = vld [vmem:[%s21406_s14 + $0x2c8] sm:$0xff]  }
 0x626   : > { %18802 = vmatprep.subr.bf16.mxu1 %v20459_v48  ;;  %8719 = vmatprep.mubr.bf16.mxu0 %v21044_v1  ;;  %v20503_v48 = vld [vmem:[%s24570_s5 + $0x24c] ss:$144 sps:$4 sm:$0xff]  }
 0x627   : > { %8769 = vmatprep.subr.bf16.mxu0 %v17623_v50 }
 0x629   : > { %18803 = vmatpush3.bf16.msra.mxu1 %v20460_v53  ;;  %v20502_v53 = vld [vmem:[%s21406_s14 + $0x118] sm:$0xff]  }
 0x62a   : > { %18828 = vmatprep.subr.bf16.mxu1 %v20464_v30  ;;  %v20506_v30 = vld [vmem:[%s21406_s14 + $0x160] sm:$0xff]  }
 0x62c   : > { %12743 = vmatmul.mubr.bf16.vlgmr.msra.gmra.mrb[228].mxu1 %v20461_v54  ;;  %17625 = vmatmul.mubr.msk.bf16.vlgmr.msra.gmra.mrb[36].mxu0 %vm7517_vm2, %v23059_v4  ;;  %v20505_v54 = vld [vmem:[%s24570_s5 + $0x248] ss:$144 sps:$4 sm:$0xff]  }
 0x62d   : > { %18829 = vmatpush3.bf16.msra.mxu1 %v20465_v17  ;;  %8770 = vmatpush1.bf16.msra.mxu0 %v17622_v58  ;;  %v20507_v17 = vld [vmem:[%s21406_s14 + $0x120] sm:$0xff]  }
 0x62e   : > { %18830 = vmatprep.subr.bf16.mxu1 %v20466_v59  ;;  %12750 = vmatprep.mubr.bf16.mxu1 %v20468_v24  ;;  %v20508_v59 = vld [vmem:[%s21406_s14 + $0x168] sm:$0xff]  }
 0x62f   : > { %8801 = vmatprep.mubr.bf16.mxu0 %v21044_v1  ;;  %8871 = vmatprep.subr.bf16.mxu0 %v17637_v9  ;;  %v20512_v24 = vld [vmem:[%s24570_s5 + $0x36c] ss:$144 sps:$4 sm:$0xff]   ;;  %v17677_v9 = vcombine.high %v17668_v56, %v17672_v6 }
 0x631   : > { %18831 = vmatpush3.bf16.msra.mxu1 %v20467_v60  ;;  %v20509_v60 = vld [vmem:[%s21406_s14 + $0x128] sm:$0xff]  }
 0x632   : > { %18832 = vmatprep.subr.bf16.mxu1 %v20471_v62  ;;  %v20513_v62 = vld [vmem:[%s21406_s14 + $0x170] sm:$0xff]  }
 0x634   : > { %12751 = vmatmul.mubr.bf16.gmra.mrb[232].mxu1 %v20470_v63  ;;  %17627 = vmatmul.mubr.msk.bf16.vlgmr.msra.gmra.mrb[40].mxu0 %vm7517_vm2, %v23059_v4  ;;  %v17635_v4 = vld [vmem:[%s24574_s9 + $0x1b8] sm:$0xff] }
 0x635   : > { %18833 = vmatpush3.bf16.msra.mxu1 %v20472_v27  ;;  %8872 = vmatpush1.bf16.msra.mxu0 %v17636_v37  ;;  %v17643_v18 = vcombine.high %v17631_v29, %v17635_v4  ;;  %v17642_v25 = vcombine.low %v17631_v29, %v17635_v4  ;;  %v20510_v63 = vld [vmem:[%s24570_s5 + $0x368] ss:$144 sps:$4 sm:$0xff]   ;;  %v20514_v27 = vld [vmem:[%s21406_s14 + $0x130] sm:$0xff]   ;;  %v17676_v37 = vcombine.low %v17668_v56, %v17672_v6  ;;  %v20521_v4 = vld [vmem:[%s21406_s14 + $0x180] sm:$0xff]  }
 0x636   : > { %18834 = vmatprep.subr.bf16.mxu1 %v20473_v7  ;;  %12758 = vmatprep.mubr.bf16.mxu1 %v20475_v10  ;;  %v20515_v7 = vld [vmem:[%s21406_s14 + $0x178] sm:$0xff]   ;;  %v20519_v10 = vld [vmem:[%s24570_s5 + $0x14] ss:$144 sps:$4 sm:$0xff]   ;;  %v20574_v6 = vld [vmem:[%s21406_s14 + $0x2e8] sm:$0xff]  }
 0x637   : > { %8903 = vmatprep.mubr.bf16.mxu0 %v21044_v1  ;;  %8912 = vmatprep.subr.bf16.mxu0 %v17639_v40  ;;  %v17679_v40 = vcombine.high %v17669_v0, %v17673_v49  ;;  %v17671_v29 = vld [vmem:[%s24574_s9 + $0x218] sm:$0xff]  ;;  %v20572_v56 = vld [vmem:[%s21406_s14 + $0x2a0] sm:$0xff]  }
 0x639   : > { %18835 = vmatpush3.bf16.msra.mxu1 %v20474_v13  ;;  %v20516_v13 = vld [vmem:[%s21406_s14 + $0x138] sm:$0xff]  }
 0x63a   : > { %18836 = vmatprep.subr.bf16.mxu1 %v20478_v28  ;;  %v20520_v28 = vld [vmem:[%s21406_s14 + $0x1c0] sm:$0xff]  }
 0x63c   : > { %12759 = vmatmul.mubr.bf16.gmra.mrb[236].mxu1 %v20477_v45  ;;  %17644 = vmatmul.mubr.msk.bf16.vlgmr.msra.gmra.mrb[32].mxu0 %vm7517_vm2, %v23078_v38  ;;  %v20517_v45 = vld [vmem:[%s24570_s5 + $0x10] ss:$144 sps:$4 sm:$0xff]  }
 0x63d   : > { %18837 = vmatpush3.bf16.msra.mxu1 %v20479_v55  ;;  %8913 = vmatpush1.bf16.msra.mxu0 %v17638_v51  ;;  %v17678_v55 = vcombine.low %v17669_v0, %v17673_v49  ;;  %v20522_v51 = vld [vmem:[%s21406_s14 + $0x1c8] sm:$0xff]   ;;  %v20583_v0 = vld [vmem:[%s21406_s14 + $0x2b0] sm:$0xff]   ;;  %v20585_v49 = vld [vmem:[%s21406_s14 + $0x2f8] sm:$0xff]  }
 0x63e   : > { %18838 = vmatprep.subr.bf16.mxu1 %v20480_v15  ;;  %12766 = vmatprep.mubr.bf16.mxu1 %v20482_v16  ;;  %v20526_v15 = vld [vmem:[%s24570_s5 + $0x134] ss:$144 sps:$4 sm:$0xff]  }
 0x63f   : > { %8944 = vmatprep.mubr.bf16.mxu0 %v21044_v1  ;;  %8994 = vmatprep.subr.bf16.mxu0 %v17643_v18  ;;  %v20523_v18 = vld [vmem:[%s21406_s14 + $0x188] sm:$0xff]  }
 0x641   : > { %18839 = vmatpush3.bf16.msra.mxu1 %v20481_v57  ;;  %v20527_v57 = vld [vmem:[%s21406_s14 + $0x1d0] sm:$0xff]  }
 0x642   : > { %18840 = vmatprep.subr.bf16.mxu1 %v20485_v35  ;;  %v20524_v35 = vld [vmem:[%s24570_s5 + $0x130] ss:$144 sps:$4 sm:$0xff]  }
 0x644   : > { %12767 = vmatmul.mubr.bf16.gmra.mrb[240].mxu1 %v20484_v20  ;;  %17645 = vmatmul.mubr.msk.bf16.vlgmr.msra.gmra.mrb[36].mxu0 %vm7517_vm2, %v23078_v38  ;;  %v20528_v20 = vld [vmem:[%s21406_s14 + $0x190] sm:$0xff]  }
 0x645   : > { %18841 = vmatpush3.bf16.msra.mxu1 %v20486_v21  ;;  %8995 = vmatpush1.bf16.msra.mxu0 %v17642_v25  ;;  %v20533_v21 = vld [vmem:[%s24570_s5 + $0x254] ss:$144 sps:$4 sm:$0xff]  }
 0x646   : > { %18842 = vmatprep.subr.bf16.mxu1 %v20487_v47  ;;  %12807 = vmatprep.mubr.bf16.mxu1 %v20491_v23  ;;  %v20548_v25 = vld [vmem:[%s21406_s14 + $0x2c0] sm:$0xff]   ;;  %v20530_v47 = vld [vmem:[%s21406_s14 + $0x198] sm:$0xff]  }
 0x647   : > { %9026 = vmatprep.mubr.bf16.mxu0 %v21044_v1  ;;  %9096 = vmatprep.subr.bf16.mxu0 %v17657_v26  ;;  %v20534_v23 = vld [vmem:[%s21406_s14 + $0x1e0] sm:$0xff]  }
 0x648   : > { %v20531_v26 = vld [vmem:[%s24570_s5 + $0x250] ss:$144 sps:$4 sm:$0xff]  }
 0x649   : > { %18843 = vmatpush3.bf16.msra.mxu1 %v20488_v11  ;;  %v20535_v11 = vld [vmem:[%s21406_s14 + $0x1a0] sm:$0xff]  }
 0x64a   : > { %18868 = vmatprep.subr.bf16.mxu1 %v20492_v32  ;;  %v20540_v32 = vld [vmem:[%s24570_s5 + $0x374] ss:$144 sps:$4 sm:$0xff]  }
 0x64c   : > { %12808 = vmatmul.mubr.bf16.vlgmr.msra.gmra.mrb[244].mxu1 %v20489_v31  ;;  %17647 = vmatmul.mubr.msk.bf16.vlgmr.msra.gmra.mrb[40].mxu0 %vm7517_vm2, %v23078_v38  ;;  %v17655_v38 = vld [vmem:[%s24574_s9 + $0x1f8] sm:$0xff]  ;;  %v20536_v31 = vld [vmem:[%s21406_s14 + $0x1e8] sm:$0xff]  }
 0x64d   : > { %18869 = vmatpush3.bf16.msra.mxu1 %v20493_v12  ;;  %9097 = vmatpush1.bf16.msra.mxu0 %v17656_v46  ;;  %v17663_v50 = vcombine.high %v17651_v36, %v17655_v38  ;;  %v17662_v58 = vcombine.low %v17651_v36, %v17655_v38  ;;  %v20591_v12 = vld [vmem:[%s24570_s5 + $0x2c] ss:$144 sps:$4 sm:$0xff]   ;;  %v20561_v36 = vld [vmem:[%s21406_s14 + $0x290] sm:$0xff]  }
 0x64e   : > { %18870 = vmatprep.subr.bf16.mxu1 %v20494_v39  ;;  %12815 = vmatprep.mubr.bf16.mxu1 %v20496_v5  ;;  %v20537_v46 = vld [vmem:[%s21406_s14 + $0x1a8] sm:$0xff]   ;;  %v20541_v39 = vld [vmem:[%s21406_s14 + $0x1f0] sm:$0xff]   ;;  %v20563_v38 = vld [vmem:[%s21406_s14 + $0x2d8] sm:$0xff]  }
 0x64f   : > { %9128 = vmatprep.mubr.bf16.mxu0 %v21044_v1  ;;  %9137 = vmatprep.subr.bf16.mxu0 %v17659_v33  ;;  %v20554_v5 = vld [vmem:[%s21406_s14 + $0x288] sm:$0xff]   ;;  %v20559_v33 = vld [vmem:[%s21406_s14 + $0x2d0] sm:$0xff]  }
 0x651   : > { %18871 = vmatpush3.bf16.msra.mxu1 %v20495_v19  ;;  %v20538_v19 = vld [vmem:[%s24570_s5 + $0x370] ss:$144 sps:$4 sm:$0xff]  }
 0x652   : > { %18872 = vmatprep.subr.bf16.mxu1 %v20499_v42  ;;  %v20547_v42 = vld [vmem:[%s24570_s5 + $0x1c] ss:$144 sps:$4 sm:$0xff]  }
 0x654   : > { %12816 = vmatmul.mubr.bf16.gmra.mrb[248].mxu1 %v20498_v43  ;;  %17664 = vmatmul.mubr.msk.bf16.vlgmr.msra.gmra.mrb[32].mxu0 %vm7517_vm2, %v23106_v14  ;;  %v20543_v43 = vld [vmem:[%s21406_s14 + $0x1f8] sm:$0xff]  }
 0x655   : > { %18873 = vmatpush3.bf16.msra.mxu1 %v20500_v3  ;;  %9138 = vmatpush1.bf16.msra.mxu0 %v17658_v41  ;;  %v20544_v3 = vld [vmem:[%s21406_s14 + $0x1b8] sm:$0xff]   ;;  %v20549_v41 = vld [vmem:[%s21406_s14 + $0x240] sm:$0xff]  }
 0x656   : > { %18874 = vmatprep.subr.bf16.mxu1 %v20501_v44  ;;  %12823 = vmatprep.mubr.bf16.mxu1 %v20503_v48  ;;  %v20565_v44 = vld [vmem:[%s21406_s14 + $0x298] sm:$0xff]   ;;  %v20570_v48 = vld [vmem:[%s21406_s14 + $0x2e0] sm:$0xff]  }
 0x657   : > { %9169 = vmatprep.mubr.bf16.mxu0 %v21044_v1  ;;  %9219 = vmatprep.subr.bf16.mxu0 %v17663_v50  ;;  %v20545_v50 = vld [vmem:[%s24570_s5 + $0x18] ss:$144 sps:$4 sm:$0xff]  }
 0x659   : > { %18875 = vmatpush3.bf16.msra.mxu1 %v20502_v53  ;;  %v20551_v53 = vld [vmem:[%s21406_s14 + $0x200] sm:$0xff]  }
 0x65a   : > { %18876 = vmatprep.subr.bf16.mxu1 %v20506_v30  ;;  %v20558_v30 = vld [vmem:[%s24570_s5 + $0x13c] ss:$144 sps:$4 sm:$0xff]  }
 0x65c   : > { %12824 = vmatmul.mubr.bf16.gmra.mrb[252].mxu1 %v20505_v54  ;;  %17665 = vmatmul.mubr.msk.bf16.vlgmr.msra.gmra.mrb[36].mxu0 %vm7517_vm2, %v23106_v14  ;;  %v20553_v54 = vld [vmem:[%s21406_s14 + $0x248] sm:$0xff]  }
 0x65d   : > { %18877 = vmatpush3.bf16.msra.mxu1 %v20507_v17  ;;  %9220 = vmatpush1.bf16.msra.mxu0 %v17662_v58  ;;  %v20555_v17 = vld [vmem:[%s21406_s14 + $0x208] sm:$0xff]   ;;  %v20560_v58 = vld [vmem:[%s21406_s14 + $0x250] sm:$0xff]  }
 0x65e   : > { %18878 = vmatprep.subr.bf16.mxu1 %v20508_v59  ;;  %12831 = vmatprep.mubr.bf16.mxu1 %v20512_v24  ;;  %v20576_v59 = vld [vmem:[%s21406_s14 + $0x2a8] sm:$0xff]   ;;  %v20581_v24 = vld [vmem:[%s21406_s14 + $0x2f0] sm:$0xff]  }
 0x65f   : > { %9251 = vmatprep.mubr.bf16.mxu0 %v21044_v1  ;;  %9321 = vmatprep.subr.bf16.mxu0 %v17677_v9  ;;  %v20556_v9 = vld [vmem:[%s24570_s5 + $0x138] ss:$144 sps:$4 sm:$0xff]  }
 0x661   : > { %18879 = vmatpush3.bf16.msra.mxu1 %v20509_v60  ;;  %v20562_v60 = vld [vmem:[%s21406_s14 + $0x210] sm:$0xff]  }
 0x662   : > { %18880 = vmatprep.subr.bf16.mxu1 %v20513_v62  ;;  %v20569_v62 = vld [vmem:[%s24570_s5 + $0x25c] ss:$144 sps:$4 sm:$0xff]  }
 0x664   : > { %12832 = vmatmul.mubr.bf16.gmra.mrb[0].mxu1 %v20510_v63  ;;  %17667 = vmatmul.mubr.msk.bf16.vlgmr.msra.gmra.mrb[40].mxu0 %vm7517_vm2, %v23106_v14  ;;  %v17675_v14 = vld [vmem:[%s24574_s9 + $0x238] sm:$0xff] }
 0x665   : > { %18881 = vmatpush3.bf16.msra.mxu1 %v20514_v27  ;;  %9322 = vmatpush1.bf16.msra.mxu0 %v17676_v37  ;;  %v17683_v16 = vcombine.high %v17671_v29, %v17675_v14  ;;  %v17682_v22 = vcombine.low %v17671_v29, %v17675_v14  ;;  %v20564_v63 = vld [vmem:[%s21406_s14 + $0x258] sm:$0xff]   ;;  %v20571_v37 = vld [vmem:[%s21406_s14 + $0x260] sm:$0xff]  }
 0x666   : > { %18882 = vmatprep.subr.bf16.mxu1 %v20515_v7  ;;  %12872 = vmatprep.mubr.bf16.mxu1 %v20519_v10  ;;  %v20566_v27 = vld [vmem:[%s21406_s14 + $0x218] sm:$0xff]   ;;  %v20595_v10 = vld [vmem:[%s21406_s14 + $0x3c0] sm:$0xff]  }
 0x667   : > { %9353 = vmatprep.mubr.bf16.mxu0 %v21044_v1  ;;  %9362 = vmatprep.subr.bf16.mxu0 %v17679_v40  ;;  %v20587_v7 = vld [vmem:[%s21406_s14 + $0x2b8] sm:$0xff]   ;;  %v20597_v14 = vld [vmem:[%s21406_s14 + $0x380] sm:$0xff]  }
 0x668   : > { %v20567_v40 = vld [vmem:[%s24570_s5 + $0x258] ss:$144 sps:$4 sm:$0xff]  }
 0x669   : > { %18883 = vmatpush3.bf16.msra.mxu1 %v20516_v13  ;;  %v20573_v13 = vld [vmem:[%s21406_s14 + $0x220] sm:$0xff]   ;;  %v20589_v29 = vld [vmem:[%s24570_s5 + $0x28] ss:$144 sps:$4 sm:$0xff]  }
 0x66a   : > { %18908 = vmatprep.subr.bf16.mxu1 %v20520_v28  ;;  %v20580_v28 = vld [vmem:[%s24570_s5 + $0x37c] ss:$144 sps:$4 sm:$0xff]  }
 0x66c   : > { %12873 = vmatmul.mubr.bf16.vlgmr.msra.gmra.mrb[4].mxu1 %v20517_v45  ;;  %17684 = vmatmul.mubr.msk.bf16.vlgmr.msra.gmra.mrb[32].mxu0 %vm7517_vm2, %v23123_v2  ;;  %v20575_v45 = vld [vmem:[%s21406_s14 + $0x268] sm:$0xff]  }
 0x66d   : > { %18909 = vmatpush3.bf16.msra.mxu1 %v20521_v4  ;;  %9363 = vmatpush1.bf16.msra.mxu0 %v17678_v55  ;;  %v20603_v4 = vld [vmem:[%s24570_s5 + $0x14c] ss:$144 sps:$4 sm:$0xff]  }
 0x66e   : > { %18910 = vmatprep.subr.bf16.mxu1 %v20522_v51  ;;  %12880 = vmatprep.mubr.bf16.mxu1 %v20526_v15  ;;  %v20599_v55 = vld [vmem:[%s21406_s14 + $0x3c8] sm:$0xff]   ;;  %v20582_v15 = vld [vmem:[%s21406_s14 + $0x270] sm:$0xff]  }
 0x66f   : > { %9394 = vmatprep.mubr.bf16.mxu0 %v21044_v1  ;;  %9444 = vmatprep.subr.bf16.mxu0 %v17683_v16  ;;  %v20577_v51 = vld [vmem:[%s21406_s14 + $0x228] sm:$0xff]  }
 0x670   : > { %v20601_v16 = vld [vmem:[%s21406_s14 + $0x388] sm:$0xff]  }
 0x671   : > { %18911 = vmatpush3.bf16.msra.mxu1 %v20523_v18  ;;  %v20578_v18 = vld [vmem:[%s24570_s5 + $0x378] ss:$144 sps:$4 sm:$0xff]  }
 0x672   : > { %18912 = vmatprep.subr.bf16.mxu1 %v20527_v57  ;;  %v20609_v57 = vld [vmem:[%s21406_s14 + $0x3d0] sm:$0xff]  }
 0x674   : > { %12881 = vmatmul.mubr.bf16.gmra.mrb[8].mxu1 %v20524_v35  ;;  %17685 = vmatmul.mubr.msk.bf16.vlgmr.msra.gmra.mrb[36].mxu0 %vm7517_vm2, %v23123_v2  ;;  %v20584_v35 = vld [vmem:[%s21406_s14 + $0x230] sm:$0xff]  }
 0x675   : > { %18913 = vmatpush3.bf16.msra.mxu1 %v20528_v20  ;;  %9445 = vmatpush1.bf16.msra.mxu0 %v17682_v22  ;;  %v20594_v20 = vld [vmem:[%s24570_s5 + $0x24] ss:$144 sps:$4 sm:$0xff]   ;;  %v20586_v22 = vld [vmem:[%s21406_s14 + $0x278] sm:$0xff]  }
 0x676   : > { %18914 = vmatprep.subr.bf16.mxu1 %v20529_v52  ;;  %12888 = vmatprep.mubr.bf16.mxu1 %v20533_v21  ;;  %v20608_v52 = vld [vmem:[%s24570_s5 + $0x148] ss:$144 sps:$4 sm:$0xff]   ;;  %v20611_v21 = vld [vmem:[%s21406_s14 + $0x390] sm:$0xff]  }
 0x677   : > { %9476 = vmatprep.mubr.bf16.mxu0 %v21044_v1  ;;  %18988 = vmatprep.subr.bf16.mxu0 %v20548_v25  ;;  %v20617_v25 = vld [vmem:[%s24570_s5 + $0x26c] ss:$144 sps:$4 sm:$0xff]  }
 0x679   : > { %18915 = vmatpush3.bf16.msra.mxu1 %v20530_v47  ;;  %v20613_v47 = vld [vmem:[%s21406_s14 + $0x3d8] sm:$0xff]  }
 0x67a   : > { %18916 = vmatprep.subr.bf16.mxu1 %v20534_v23  ;;  %v20588_v23 = vld [vmem:[%s21406_s14 + $0x238] sm:$0xff]  }
 0x67c   : > { %12889 = vmatmul.mubr.bf16.gmra.mrb[12].mxu1 %v20531_v26  ;;  %17687 = vmatmul.mubr.msk.bf16.vlgmr.msra.gmra.mrb[40].mxu0 %vm7517_vm2, %v23123_v2  ;;  %v20542_v2 = vld [vmem:[%s21406_s14 + $0x1b0] sm:$0xff]   ;;  %v20596_v26 = vld [vmem:[%s21406_s14 + $0x340] sm:$0xff]  }
 0x67d   : > { %18917 = vmatpush3.bf16.msra.mxu1 %v20535_v11  ;;  %12896 = vmatprep.mubr.bf16.mxu1 %v20540_v32  ;;  %v20615_v11 = vld [vmem:[%s21406_s14 + $0x398] sm:$0xff]   ;;  %v20592_v32 = vld [vmem:[%s24570_s5 + $0x20] ss:$144 sps:$4 sm:$0xff]  }
 0x67e   : > { %18918 = vmatprep.subr.bf16.mxu1 %v20536_v31  ;;  %18989 = vmatpush3.bf16.msra.mxu0 %v20550_v34  ;;  %v20623_v31 = vld [vmem:[%s21406_s14 + $0x3e0] sm:$0xff]  }
 0x67f   : > { %18990 = vmatprep.subr.bf16.mxu0 %v20552_v61  ;;  %13067 = vmatprep.mubr.bf16.mxu0 %v20591_v12  ;;  %v20598_v34 = vld [vmem:[%s21406_s14 + $0x300] sm:$0xff]   ;;  %v20600_v12 = vld [vmem:[%s21406_s14 + $0x348] sm:$0xff]  }
 0x680   : > { %v20607_v61 = vld [vmem:[%s24570_s5 + $0x144] ss:$144 sps:$4 sm:$0xff]  }
 0x681   : > { %18919 = vmatpush3.bf16.msra.mxu1 %v20537_v46  ;;  %v20622_v46 = vld [vmem:[%s24570_s5 + $0x268] ss:$144 sps:$4 sm:$0xff]  }
 0x682   : > { %18920 = vmatprep.subr.bf16.mxu1 %v20541_v39  ;;  %18991 = vmatpush3.bf16.msra.mxu0 %v20554_v5  ;;  %v20625_v39 = vld [vmem:[%s21406_s14 + $0x3a0] sm:$0xff]   ;;  %v20631_v5 = vld [vmem:[%s24570_s5 + $0x38c] ss:$144 sps:$4 sm:$0xff]  }
 0x683   : > { %18992 = vmatprep.subr.bf16.mxu0 %v20559_v33  ;;  %v20627_v33 = vld [vmem:[%s21406_s14 + $0x3e8] sm:$0xff]  }
 0x684   : > { %12897 = vmatmul.mubr.bf16.gmra.mrb[16].mxu1 %v20538_v19  ;;  %v20602_v19 = vld [vmem:[%s21406_s14 + $0x308] sm:$0xff]  }
 0x685   : > { %18921 = vmatpush3.bf16.msra.mxu1 %v20542_v2  ;;  %12937 = vmatprep.mubr.bf16.mxu1 %v20547_v42  ;;  %v20610_v2 = vld [vmem:[%s21406_s14 + $0x350] sm:$0xff]   ;;  %v20629_v42 = vld [vmem:[%s21406_s14 + $0x3a8] sm:$0xff]  }
 0x686   : > { %18922 = vmatprep.subr.bf16.mxu1 %v20543_v43  ;;  %18993 = vmatpush3.bf16.msra.mxu0 %v20561_v36  ;;  %v20605_v43 = vld [vmem:[%s24570_s5 + $0x140] ss:$144 sps:$4 sm:$0xff]  }
 0x687   : > { %18994 = vmatprep.subr.bf16.mxu0 %v20563_v38  ;;  %v20637_v36 = vld [vmem:[%s21406_s14 + $0x3f0] sm:$0xff]  }
 0x688   : > { %v20612_v38 = vld [vmem:[%s21406_s14 + $0x310] sm:$0xff]  }
 0x689   : > { %18923 = vmatpush3.bf16.msra.mxu1 %v20544_v3  ;;  %v20621_v3 = vld [vmem:[%s24570_s5 + $0x264] ss:$144 sps:$4 sm:$0xff]  }
 0x68a   : > { %18948 = vmatprep.subr.bf16.mxu1 %v20549_v41  ;;  %18995 = vmatpush3.bf16.msra.mxu0 %v20565_v44  ;;  %v20614_v41 = vld [vmem:[%s21406_s14 + $0x358] sm:$0xff]  }
 0x68b   : > { %18996 = vmatprep.subr.bf16.mxu0 %v20570_v48  ;;  %v20636_v44 = vld [vmem:[%s24570_s5 + $0x388] ss:$144 sps:$4 sm:$0xff]   ;;  %v20639_v48 = vld [vmem:[%s21406_s14 + $0x3b0] sm:$0xff]  }
 0x68c   : > { %12938 = vmatmul.mubr.bf16.vlgmr.msra.gmra.mrb[20].mxu1 %v20545_v50  ;;  %v20647_v50 = vld [vmem:[%s24570_s5 + $0x3c] ss:$144 sps:$4 sm:$0xff]  }
 0x68d   : > { %18949 = vmatpush3.bf16.msra.mxu1 %v20551_v53  ;;  %12945 = vmatprep.mubr.bf16.mxu1 %v20558_v30  ;;  %v20641_v53 = vld [vmem:[%s21406_s14 + $0x3f8] sm:$0xff]  }
 0x68e   : > { %18950 = vmatprep.subr.bf16.mxu1 %v20553_v54  ;;  %18997 = vmatpush3.bf16.msra.mxu0 %v20572_v56  ;;  %v20616_v30 = vld [vmem:[%s21406_s14 + $0x318] sm:$0xff]   ;;  %v20624_v54 = vld [vmem:[%s21406_s14 + $0x360] sm:$0xff]  }
 0x68f   : > { %18998 = vmatprep.subr.bf16.mxu0 %v20574_v6  ;;  %v20643_v56 = vld [vmem:[%s21406_s14 + $0x3b8] sm:$0xff]   ;;  %v20619_v6 = vld [vmem:[%s24570_s5 + $0x260] ss:$144 sps:$4 sm:$0xff]  }
 0x691   : > { %18951 = vmatpush3.bf16.msra.mxu1 %v20555_v17  ;;  %v20651_v17 = vld [vmem:[%s21406_s14 + $0x4c0] sm:$0xff]  }
 0x692   : > { %18952 = vmatprep.subr.bf16.mxu1 %v20560_v58  ;;  %18999 = vmatpush3.bf16.msra.mxu0 %v20576_v59  ;;  %v20626_v58 = vld [vmem:[%s21406_s14 + $0x320] sm:$0xff]  }
 0x693   : > { %19000 = vmatprep.subr.bf16.mxu0 %v20581_v24  ;;  %v20635_v59 = vld [vmem:[%s24570_s5 + $0x384] ss:$144 sps:$4 sm:$0xff]   ;;  %v20628_v24 = vld [vmem:[%s21406_s14 + $0x368] sm:$0xff]  }
 0x694   : > { %12946 = vmatmul.mubr.bf16.gmra.mrb[24].mxu1 %v20556_v9  ;;  %v20645_v9 = vld [vmem:[%s24570_s5 + $0x38] ss:$144 sps:$4 sm:$0xff]  }
 0x695   : > { %18953 = vmatpush3.bf16.msra.mxu1 %v20562_v60  ;;  %12953 = vmatprep.mubr.bf16.mxu1 %v20569_v62  ;;  %v20653_v60 = vld [vmem:[%s21406_s14 + $0x480] sm:$0xff]   ;;  %v20659_v62 = vld [vmem:[%s24570_s5 + $0x15c] ss:$144 sps:$4 sm:$0xff]  }
 0x696   : > { %18954 = vmatprep.subr.bf16.mxu1 %v20564_v63  ;;  %19001 = vmatpush3.bf16.msra.mxu0 %v20583_v0  ;;  %v20655_v63 = vld [vmem:[%s21406_s14 + $0x4c8] sm:$0xff]  }
 0x697   : > { %19002 = vmatprep.subr.bf16.mxu0 %v20585_v49  ;;  %v20630_v0 = vld [vmem:[%s21406_s14 + $0x328] sm:$0xff]   ;;  %v20638_v49 = vld [vmem:[%s21406_s14 + $0x370] sm:$0xff]  }
 0x699   : > { %18955 = vmatpush3.bf16.msra.mxu1 %v20566_v27  ;;  %v20657_v27 = vld [vmem:[%s21406_s14 + $0x488] sm:$0xff]  }
 0x69a   : > { %18956 = vmatprep.subr.bf16.mxu1 %v20571_v37  ;;  %19003 = vmatpush3.bf16.msra.mxu0 %v20587_v7  ;;  %v20633_v37 = vld [vmem:[%s24570_s5 + $0x380] ss:$144 sps:$4 sm:$0xff]  }
 0x69b   : > { %19068 = vmatprep.subr.bf16.mxu0 %v20595_v10  ;;  %v20665_v7 = vld [vmem:[%s21406_s14 + $0x4d0] sm:$0xff]  }
 0x69c   : > { %12954 = vmatmul.mubr.bf16.gmra.mrb[28].mxu1 %v20567_v40  ;;  %v20640_v10 = vld [vmem:[%s21406_s14 + $0x330] sm:$0xff]  }
 0x69d   : > { %18957 = vmatpush3.bf16.msra.mxu1 %v20573_v13  ;;  %12961 = vmatprep.mubr.bf16.mxu1 %v20580_v28  ;;  %v20650_v40 = vld [vmem:[%s24570_s5 + $0x34] ss:$144 sps:$4 sm:$0xff]   ;;  %v20642_v13 = vld [vmem:[%s21406_s14 + $0x378] sm:$0xff]  }
 0x69e   : > { %18958 = vmatprep.subr.bf16.mxu1 %v20575_v45  ;;  %13068 = vmatmul.mubr.bf16.vlgmr.msra.gmra.mrb[44].mxu0 %v20589_v29  ;;  %v20664_v28 = vld [vmem:[%s24570_s5 + $0x158] ss:$144 sps:$4 sm:$0xff]   ;;  %v20667_v45 = vld [vmem:[%s21406_s14 + $0x490] sm:$0xff]   ;;  %v20673_v29 = vld [vmem:[%s24570_s5 + $0x27c] ss:$144 sps:$4 sm:$0xff]  }
 0x69f   : > { %19069 = vmatpush3.bf16.msra.mxu0 %v20597_v14  ;;  %13075 = vmatprep.mubr.bf16.mxu0 %v20603_v4  ;;  %v20669_v14 = vld [vmem:[%s21406_s14 + $0x4d8] sm:$0xff]  }
 0x6a0   : > { %19070 = vmatprep.subr.bf16.mxu0 %v20599_v55  ;;  %v20644_v4 = vld [vmem:[%s21406_s14 + $0x338] sm:$0xff]   ;;  %v20652_v55 = vld [vmem:[%s21406_s14 + $0x440] sm:$0xff]  }
 0x6a1   : > { %18959 = vmatpush3.bf16.msra.mxu1 %v20577_v51  ;;  %v20671_v51 = vld [vmem:[%s21406_s14 + $0x498] sm:$0xff]  }
 0x6a2   : > { %18960 = vmatprep.subr.bf16.mxu1 %v20582_v15  ;;  %v20648_v15 = vld [vmem:[%s24570_s5 + $0x30] ss:$144 sps:$4 sm:$0xff]  }
 0x6a3   : > { %19071 = vmatpush3.bf16.msra.mxu0 %v20601_v16  ;;  %v20679_v16 = vld [vmem:[%s21406_s14 + $0x4e0] sm:$0xff]  }
 0x6a4   : > { %12962 = vmatmul.mubr.bf16.gmra.mrb[32].mxu1 %v20578_v18  ;;  %19072 = vmatprep.subr.bf16.mxu0 %v20609_v57  ;;  %v20654_v18 = vld [vmem:[%s21406_s14 + $0x400] sm:$0xff]  }
 0x6a5   : > { %18961 = vmatpush3.bf16.msra.mxu1 %v20584_v35  ;;  %13002 = vmatprep.mubr.bf16.mxu1 %v20594_v20  ;;  %v20663_v57 = vld [vmem:[%s24570_s5 + $0x154] ss:$144 sps:$4 sm:$0xff]   ;;  %v20656_v35 = vld [vmem:[%s21406_s14 + $0x448] sm:$0xff]  }
 0x6a6   : > { %18962 = vmatprep.subr.bf16.mxu1 %v20586_v22  ;;  %13076 = vmatmul.mubr.bf16.gmra.mrb[48].mxu0 %v20608_v52  ;;  %v20678_v20 = vld [vmem:[%s24570_s5 + $0x278] ss:$144 sps:$4 sm:$0xff]   ;;  %v20681_v22 = vld [vmem:[%s21406_s14 + $0x4a0] sm:$0xff]   ;;  %v20687_v52 = vld [vmem:[%s24570_s5 + $0x39c] ss:$144 sps:$4 sm:$0xff]  }
 0x6a7   : > { %19073 = vmatpush3.bf16.msra.mxu0 %v20611_v21  ;;  %13083 = vmatprep.mubr.bf16.mxu0 %v20617_v25  ;;  %v20683_v21 = vld [vmem:[%s21406_s14 + $0x4e8] sm:$0xff]  }
 0x6a8   : > { %19074 = vmatprep.subr.bf16.mxu0 %v20613_v47  ;;  %v20658_v25 = vld [vmem:[%s21406_s14 + $0x408] sm:$0xff]   ;;  %v20666_v47 = vld [vmem:[%s21406_s14 + $0x450] sm:$0xff]  }
 0x6a9   : > { %18963 = vmatpush3.bf16.msra.mxu1 %v20588_v23  ;;  %v20685_v23 = vld [vmem:[%s21406_s14 + $0x4a8] sm:$0xff]  }
 0x6aa   : > { %19028 = vmatprep.subr.bf16.mxu1 %v20596_v26  ;;  %v20661_v26 = vld [vmem:[%s24570_s5 + $0x150] ss:$144 sps:$4 sm:$0xff]  }
 0x6ab   : > { %19075 = vmatpush3.bf16.msra.mxu0 %v20615_v11  ;;  %v20693_v11 = vld [vmem:[%s21406_s14 + $0x4f0] sm:$0xff]  }
 0x6ac   : > { %13003 = vmatmul.mubr.bf16.vlgmr.msra.gmra.mrb[36].mxu1 %v20592_v32  ;;  %19076 = vmatprep.subr.bf16.mxu0 %v20623_v31  ;;  %v20668_v32 = vld [vmem:[%s21406_s14 + $0x410] sm:$0xff]  }
 0x6ad   : > { %19029 = vmatpush3.bf16.msra.mxu1 %v20598_v34  ;;  %13010 = vmatprep.mubr.bf16.mxu1 %v20607_v61  ;;  %v20677_v31 = vld [vmem:[%s24570_s5 + $0x274] ss:$144 sps:$4 sm:$0xff]   ;;  %v20670_v34 = vld [vmem:[%s21406_s14 + $0x458] sm:$0xff]  }
 0x6ae   : > { %19030 = vmatprep.subr.bf16.mxu1 %v20600_v12  ;;  %13084 = vmatmul.mubr.bf16.gmra.mrb[52].mxu0 %v20622_v46  ;;  %v20692_v61 = vld [vmem:[%s24570_s5 + $0x398] ss:$144 sps:$4 sm:$0xff]   ;;  %v20695_v12 = vld [vmem:[%s21406_s14 + $0x4b0] sm:$0xff]   ;;  %v20703_v46 = vld [vmem:[%s24570_s5 + $0x4c] ss:$144 sps:$4 sm:$0xff]  }
 0x6af   : > { %19077 = vmatpush3.bf16.msra.mxu0 %v20625_v39  ;;  %13091 = vmatprep.mubr.bf16.mxu0 %v20631_v5  ;;  %v20697_v39 = vld [vmem:[%s21406_s14 + $0x4f8] sm:$0xff]  }
 0x6b0   : > { %19078 = vmatprep.subr.bf16.mxu0 %v20627_v33  ;;  %v20672_v5 = vld [vmem:[%s21406_s14 + $0x418] sm:$0xff]   ;;  %v20680_v33 = vld [vmem:[%s21406_s14 + $0x460] sm:$0xff]  }
 0x6b1   : > { %19031 = vmatpush3.bf16.msra.mxu1 %v20602_v19  ;;  %v20699_v19 = vld [vmem:[%s21406_s14 + $0x4b8] sm:$0xff]  }
 0x6b2   : > { %19032 = vmatprep.subr.bf16.mxu1 %v20610_v2  ;;  %v20675_v2 = vld [vmem:[%s24570_s5 + $0x270] ss:$144 sps:$4 sm:$0xff]  }
 0x6b3   : > { %19079 = vmatpush3.bf16.msra.mxu0 %v20629_v42  ;;  %v20707_v42 = vld [vmem:[%s21406_s14 + $0x5c0] sm:$0xff]  }
 0x6b4   : > { %13011 = vmatmul.mubr.bf16.gmra.mrb[40].mxu1 %v20605_v43  ;;  %19080 = vmatprep.subr.bf16.mxu0 %v20637_v36  ;;  %v20682_v43 = vld [vmem:[%s21406_s14 + $0x420] sm:$0xff]  }
 0x6b5   : > { %19033 = vmatpush3.bf16.msra.mxu1 %v20612_v38  ;;  %13018 = vmatprep.mubr.bf16.mxu1 %v20621_v3  ;;  %v20691_v36 = vld [vmem:[%s24570_s5 + $0x394] ss:$144 sps:$4 sm:$0xff]   ;;  %v20684_v38 = vld [vmem:[%s21406_s14 + $0x468] sm:$0xff]  }
 0x6b6   : > { %19034 = vmatprep.subr.bf16.mxu1 %v20614_v41  ;;  %13092 = vmatmul.mubr.bf16.gmra.mrb[56].mxu0 %v20636_v44  ;;  %v20701_v3 = vld [vmem:[%s24570_s5 + $0x48] ss:$144 sps:$4 sm:$0xff]   ;;  %v20709_v41 = vld [vmem:[%s21406_s14 + $0x580] sm:$0xff]   ;;  %v20715_v44 = vld [vmem:[%s24570_s5 + $0x16c] ss:$144 sps:$4 sm:$0xff]  }
 0x6b7   : > { %19081 = vmatpush3.bf16.msra.mxu0 %v20639_v48  ;;  %13197 = vmatprep.mubr.bf16.mxu0 %v20647_v50  ;;  %v20711_v48 = vld [vmem:[%s21406_s14 + $0x5c8] sm:$0xff]  }
 0x6b8   : > { %19082 = vmatprep.subr.bf16.mxu0 %v20641_v53  ;;  %v20686_v50 = vld [vmem:[%s21406_s14 + $0x428] sm:$0xff]   ;;  %v20694_v53 = vld [vmem:[%s21406_s14 + $0x470] sm:$0xff]  }
 0x6b9   : > { %19035 = vmatpush3.bf16.msra.mxu1 %v20616_v30  ;;  %v20713_v30 = vld [vmem:[%s21406_s14 + $0x588] sm:$0xff]  }
 0x6ba   : > { %19036 = vmatprep.subr.bf16.mxu1 %v20624_v54  ;;  %v20689_v54 = vld [vmem:[%s24570_s5 + $0x390] ss:$144 sps:$4 sm:$0xff]  }
 0x6bb   : > { %19083 = vmatpush3.bf16.msra.mxu0 %v20643_v56  ;;  %v20721_v56 = vld [vmem:[%s21406_s14 + $0x5d0] sm:$0xff]  }
 0x6bc   : > { %13019 = vmatmul.mubr.bf16.gmra.mrb[44].mxu1 %v20619_v6  ;;  %19148 = vmatprep.subr.bf16.mxu0 %v20651_v17  ;;  %v20696_v6 = vld [vmem:[%s21406_s14 + $0x430] sm:$0xff]  }
 0x6bd   : > { %19037 = vmatpush3.bf16.msra.mxu1 %v20626_v58  ;;  %13026 = vmatprep.mubr.bf16.mxu1 %v20635_v59  ;;  %v20706_v17 = vld [vmem:[%s24570_s5 + $0x44] ss:$144 sps:$4 sm:$0xff]   ;;  %v20698_v58 = vld [vmem:[%s21406_s14 + $0x478] sm:$0xff]  }
 0x6be   : > { %19038 = vmatprep.subr.bf16.mxu1 %v20628_v24  ;;  %13198 = vmatmul.mubr.bf16.vlgmr.msra.gmra.mrb[60].mxu0 %v20645_v9  ;;  %v20720_v59 = vld [vmem:[%s24570_s5 + $0x168] ss:$144 sps:$4 sm:$0xff]   ;;  %v20723_v24 = vld [vmem:[%s21406_s14 + $0x590] sm:$0xff]   ;;  %v20729_v9 = vld [vmem:[%s24570_s5 + $0x28c] ss:$144 sps:$4 sm:$0xff]  }
 0x6bf   : > { %19149 = vmatpush3.bf16.msra.mxu0 %v20653_v60  ;;  %13205 = vmatprep.mubr.bf16.mxu0 %v20659_v62  ;;  %v20725_v60 = vld [vmem:[%s21406_s14 + $0x5d8] sm:$0xff]  }
 0x6c0   : > { %19150 = vmatprep.subr.bf16.mxu0 %v20655_v63  ;;  %v20700_v62 = vld [vmem:[%s21406_s14 + $0x438] sm:$0xff]   ;;  %v20708_v63 = vld [vmem:[%s21406_s14 + $0x540] sm:$0xff]  }
 0x6c1   : > { %19039 = vmatpush3.bf16.msra.mxu1 %v20630_v0  ;;  %v20727_v0 = vld [vmem:[%s21406_s14 + $0x598] sm:$0xff]  }
 0x6c2   : > { %19040 = vmatprep.subr.bf16.mxu1 %v20638_v49  ;;  %v20704_v49 = vld [vmem:[%s24570_s5 + $0x40] ss:$144 sps:$4 sm:$0xff]  }
 0x6c3   : > { %19151 = vmatpush3.bf16.msra.mxu0 %v20657_v27  ;;  %v20735_v27 = vld [vmem:[%s21406_s14 + $0x5e0] sm:$0xff]  }
 0x6c4   : > { %13027 = vmatmul.mubr.bf16.gmra.mrb[48].mxu1 %v20633_v37  ;;  %19152 = vmatprep.subr.bf16.mxu0 %v20665_v7  ;;  %v20710_v37 = vld [vmem:[%s21406_s14 + $0x500] sm:$0xff]  }
 0x6c5   : > { %19041 = vmatpush3.bf16.msra.mxu1 %v20640_v10  ;;  %13132 = vmatprep.mubr.bf16.mxu1 %v20650_v40  ;;  %v20719_v7 = vld [vmem:[%s24570_s5 + $0x164] ss:$144 sps:$4 sm:$0xff]   ;;  %v20712_v10 = vld [vmem:[%s21406_s14 + $0x548] sm:$0xff]  }
 0x6c6   : > { %19042 = vmatprep.subr.bf16.mxu1 %v20642_v13  ;;  %13206 = vmatmul.mubr.bf16.gmra.mrb[64].mxu0 %v20664_v28  ;;  %v20734_v40 = vld [vmem:[%s24570_s5 + $0x288] ss:$144 sps:$4 sm:$0xff]   ;;  %v20737_v13 = vld [vmem:[%s21406_s14 + $0x5a0] sm:$0xff]   ;;  %v20743_v28 = vld [vmem:[%s24570_s5 + $0x3ac] ss:$144 sps:$4 sm:$0xff]  }
 0x6c7   : > { %19153 = vmatpush3.bf16.msra.mxu0 %v20667_v45  ;;  %13213 = vmatprep.mubr.bf16.mxu0 %v20673_v29  ;;  %v20739_v45 = vld [vmem:[%s21406_s14 + $0x5e8] sm:$0xff]  }
 0x6c8   : > { %19154 = vmatprep.subr.bf16.mxu0 %v20669_v14  ;;  %v20714_v29 = vld [vmem:[%s21406_s14 + $0x508] sm:$0xff]   ;;  %v20722_v14 = vld [vmem:[%s21406_s14 + $0x550] sm:$0xff]  }
 0x6c9   : > { %19043 = vmatpush3.bf16.msra.mxu1 %v20644_v4  ;;  %v20741_v4 = vld [vmem:[%s21406_s14 + $0x5a8] sm:$0xff]  }
 0x6ca   : > { %19108 = vmatprep.subr.bf16.mxu1 %v20652_v55  ;;  %v20717_v55 = vld [vmem:[%s24570_s5 + $0x160] ss:$144 sps:$4 sm:$0xff]  }
 0x6cb   : > { %19155 = vmatpush3.bf16.msra.mxu0 %v20671_v51  ;;  %v20749_v51 = vld [vmem:[%s21406_s14 + $0x5f0] sm:$0xff]  }
 0x6cc   : > { %13133 = vmatmul.mubr.bf16.vlgmr.msra.gmra.mrb[52].mxu1 %v20648_v15  ;;  %19156 = vmatprep.subr.bf16.mxu0 %v20679_v16  ;;  %v20724_v15 = vld [vmem:[%s21406_s14 + $0x510] sm:$0xff]  }
 0x6cd   : > { %19109 = vmatpush3.bf16.msra.mxu1 %v20654_v18  ;;  %13140 = vmatprep.mubr.bf16.mxu1 %v20663_v57  ;;  %v20733_v16 = vld [vmem:[%s24570_s5 + $0x284] ss:$144 sps:$4 sm:$0xff]   ;;  %v20726_v18 = vld [vmem:[%s21406_s14 + $0x558] sm:$0xff]  }
 0x6ce   : > { %19110 = vmatprep.subr.bf16.mxu1 %v20656_v35  ;;  %13214 = vmatmul.mubr.bf16.gmra.mrb[68].mxu0 %v20678_v20  ;;  %v20748_v57 = vld [vmem:[%s24570_s5 + $0x3a8] ss:$144 sps:$4 sm:$0xff]   ;;  %v20751_v35 = vld [vmem:[%s21406_s14 + $0x5b0] sm:$0xff]   ;;  %v20759_v20 = vld [vmem:[%s24570_s5 + $0x5c] ss:$144 sps:$4 sm:$0xff]  }
 0x6cf   : > { %19157 = vmatpush3.bf16.msra.mxu0 %v20681_v22  ;;  %13221 = vmatprep.mubr.bf16.mxu0 %v20687_v52  ;;  %v20753_v22 = vld [vmem:[%s21406_s14 + $0x5f8] sm:$0xff]  }
 0x6d0   : > { %19158 = vmatprep.subr.bf16.mxu0 %v20683_v21  ;;  %v20728_v52 = vld [vmem:[%s21406_s14 + $0x518] sm:$0xff]   ;;  %v20736_v21 = vld [vmem:[%s21406_s14 + $0x560] sm:$0xff]  }
 0x6d1   : > { %19111 = vmatpush3.bf16.msra.mxu1 %v20658_v25  ;;  %v20755_v25 = vld [vmem:[%s21406_s14 + $0x5b8] sm:$0xff]  }
 0x6d2   : > { %19112 = vmatprep.subr.bf16.mxu1 %v20666_v47  ;;  %v20731_v47 = vld [vmem:[%s24570_s5 + $0x280] ss:$144 sps:$4 sm:$0xff]  }
 0x6d3   : > { %19159 = vmatpush3.bf16.msra.mxu0 %v20685_v23  ;;  %v20763_v23 = vld [vmem:[%s21406_s14 + $0x6c0] sm:$0xff]  }
 0x6d4   : > { %13141 = vmatmul.mubr.bf16.gmra.mrb[56].mxu1 %v20661_v26  ;;  %19160 = vmatprep.subr.bf16.mxu0 %v20693_v11  ;;  %v20738_v26 = vld [vmem:[%s21406_s14 + $0x520] sm:$0xff]  }
 0x6d5   : > { %19113 = vmatpush3.bf16.msra.mxu1 %v20668_v32  ;;  %13148 = vmatprep.mubr.bf16.mxu1 %v20677_v31  ;;  %v20747_v11 = vld [vmem:[%s24570_s5 + $0x3a4] ss:$144 sps:$4 sm:$0xff]   ;;  %v20740_v32 = vld [vmem:[%s21406_s14 + $0x568] sm:$0xff]  }
 0x6d6   : > { %19114 = vmatprep.subr.bf16.mxu1 %v20670_v34  ;;  %13222 = vmatmul.mubr.bf16.gmra.mrb[72].mxu0 %v20692_v61  ;;  %v20757_v31 = vld [vmem:[%s24570_s5 + $0x58] ss:$144 sps:$4 sm:$0xff]   ;;  %v20765_v34 = vld [vmem:[%s21406_s14 + $0x680] sm:$0xff]   ;;  %v20771_v61 = vld [vmem:[%s24570_s5 + $0x17c] ss:$144 sps:$4 sm:$0xff]  }
 0x6d7   : > { %19161 = vmatpush3.bf16.msra.mxu0 %v20695_v12  ;;  %13327 = vmatprep.mubr.bf16.mxu0 %v20703_v46  ;;  %v20767_v12 = vld [vmem:[%s21406_s14 + $0x6c8] sm:$0xff]  }
 0x6d8   : > { %19162 = vmatprep.subr.bf16.mxu0 %v20697_v39  ;;  %v20742_v46 = vld [vmem:[%s21406_s14 + $0x528] sm:$0xff]   ;;  %v20750_v39 = vld [vmem:[%s21406_s14 + $0x570] sm:$0xff]  }
 0x6d9   : > { %19115 = vmatpush3.bf16.msra.mxu1 %v20672_v5 }
 0x6da   : > { %19116 = vmatprep.subr.bf16.mxu1 %v20680_v33  ;;  %v20769_v33 = vld [vmem:[%s21406_s14 + $0x688] sm:$0xff]  }
 0x6db   : > { %19163 = vmatpush3.bf16.msra.mxu0 %v20699_v19 }
 0x6dc   : > { %13149 = vmatmul.mubr.bf16.gmra.mrb[64].mxu1 %v20675_v2  ;;  %19228 = vmatprep.subr.bf16.mxu0 %v20707_v42  ;;  %v20745_v2 = vld [vmem:[%s24570_s5 + $0x3a0] ss:$144 sps:$4 sm:$0xff]  }
 0x6dd   : > { %19117 = vmatpush3.bf16.msra.mxu1 %v20682_v43  ;;  %13156 = vmatprep.mubr.bf16.mxu1 %v20691_v36  ;;  %v20777_v42 = vld [vmem:[%s21406_s14 + $0x6d0] sm:$0xff]  }
 0x6de   : > { %19118 = vmatprep.subr.bf16.mxu1 %v20684_v38  ;;  %13328 = vmatmul.mubr.bf16.vlgmr.msra.gmra.mrb[76].mxu0 %v20701_v3  ;;  %v20752_v38 = vld [vmem:[%s21406_s14 + $0x530] sm:$0xff]  }
 0x6df   : > { %19229 = vmatpush3.bf16.msra.mxu0 %v20709_v41  ;;  %13335 = vmatprep.mubr.bf16.mxu0 %v20715_v44  ;;  %v20762_v3 = vld [vmem:[%s24570_s5 + $0x54] ss:$144 sps:$4 sm:$0xff]   ;;  %v20754_v44 = vld [vmem:[%s21406_s14 + $0x578] sm:$0xff]  }
 0x6e0   : > { %19230 = vmatprep.subr.bf16.mxu0 %v20711_v48  ;;  %v20776_v48 = vld [vmem:[%s24570_s5 + $0x178] ss:$144 sps:$4 sm:$0xff]  }
 0x6e1   : > { %19119 = vmatpush3.bf16.msra.mxu1 %v20686_v50 }
 0x6e2   : > { %19120 = vmatprep.subr.bf16.mxu1 %v20694_v53  ;;  %v20779_v53 = vld [vmem:[%s21406_s14 + $0x690] sm:$0xff]  }
 0x6e3   : > { %19231 = vmatpush3.bf16.msra.mxu0 %v20713_v30  ;;  %v20785_v30 = vld [vmem:[%s24570_s5 + $0x29c] ss:$144 sps:$4 sm:$0xff]  }
 0x6e4   : > { %13157 = vmatmul.mubr.bf16.gmra.mrb[68].mxu1 %v20689_v54  ;;  %19232 = vmatprep.subr.bf16.mxu0 %v20721_v56  ;;  %v20781_v54 = vld [vmem:[%s21406_s14 + $0x6d8] sm:$0xff]  }
 0x6e5   : > { %19121 = vmatpush3.bf16.msra.mxu1 %v20696_v6  ;;  %13262 = vmatprep.mubr.bf16.mxu1 %v20706_v17  ;;  %v20756_v56 = vld [vmem:[%s21406_s14 + $0x538] sm:$0xff]   ;;  %v20764_v6 = vld [vmem:[%s21406_s14 + $0x640] sm:$0xff]  }
 0x6e6   : > { %19122 = vmatprep.subr.bf16.mxu1 %v20698_v58  ;;  %13336 = vmatmul.mubr.bf16.gmra.mrb[80].mxu0 %v20720_v59  ;;  %v20783_v58 = vld [vmem:[%s21406_s14 + $0x698] sm:$0xff]  }
 0x6e7   : > { %19233 = vmatpush3.bf16.msra.mxu0 %v20723_v24  ;;  %13343 = vmatprep.mubr.bf16.mxu0 %v20729_v9  ;;  %v20760_v24 = vld [vmem:[%s24570_s5 + $0x50] ss:$144 sps:$4 sm:$0xff]  }
 0x6e8   : > { %19234 = vmatprep.subr.bf16.mxu0 %v20725_v60  ;;  %v20791_v9 = vld [vmem:[%s21406_s14 + $0x6e0] sm:$0xff]  }
 0x6e9   : > { %19123 = vmatpush3.bf16.msra.mxu1 %v20700_v62 }
 0x6ea   : > { %19188 = vmatprep.subr.bf16.mxu1 %v20708_v63  ;;  %v20766_v63 = vld [vmem:[%s21406_s14 + $0x600] sm:$0xff]  }
 0x6eb   : > { %19235 = vmatpush3.bf16.msra.mxu0 %v20727_v0  ;;  %v20775_v0 = vld [vmem:[%s24570_s5 + $0x174] ss:$144 sps:$4 sm:$0xff]  }
 0x6ec   : > { %13263 = vmatmul.mubr.bf16.vlgmr.msra.gmra.mrb[72].mxu1 %v20704_v49  ;;  %19236 = vmatprep.subr.bf16.mxu0 %v20735_v27  ;;  %v20768_v27 = vld [vmem:[%s21406_s14 + $0x648] sm:$0xff]  }
 0x6ed   : > { %19189 = vmatpush3.bf16.msra.mxu1 %v20710_v37  ;;  %13270 = vmatprep.mubr.bf16.mxu1 %v20719_v7  ;;  %v20790_v37 = vld [vmem:[%s24570_s5 + $0x298] ss:$144 sps:$4 sm:$0xff]  }
 0x6ee   : > { %19190 = vmatprep.subr.bf16.mxu1 %v20712_v10  ;;  %13344 = vmatmul.mubr.bf16.gmra.mrb[84].mxu0 %v20734_v40  ;;  %v20793_v10 = vld [vmem:[%s21406_s14 + $0x6a0] sm:$0xff]   ;;  %v20799_v40 = vld [vmem:[%s24570_s5 + $0x3bc] ss:$144 sps:$4 sm:$0xff]  }
 0x6ef   : > { %19237 = vmatpush3.bf16.msra.mxu0 %v20737_v13  ;;  %13351 = vmatprep.mubr.bf16.mxu0 %v20743_v28  ;;  %v20795_v13 = vld [vmem:[%s21406_s14 + $0x6e8] sm:$0xff]  }
 0x6f0   : > { %19238 = vmatprep.subr.bf16.mxu0 %v20739_v45  ;;  %v20770_v28 = vld [vmem:[%s21406_s14 + $0x608] sm:$0xff]   ;;  %v20778_v45 = vld [vmem:[%s21406_s14 + $0x650] sm:$0xff]  }
 0x6f1   : > { %19191 = vmatpush3.bf16.msra.mxu1 %v20714_v29 }
 0x6f2   : > { %19192 = vmatprep.subr.bf16.mxu1 %v20722_v14  ;;  %v20797_v14 = vld [vmem:[%s21406_s14 + $0x6a8] sm:$0xff]  }
 0x6f3   : > { %19239 = vmatpush3.bf16.msra.mxu0 %v20741_v4 }
 0x6f4   : > { %13271 = vmatmul.mubr.bf16.gmra.mrb[76].mxu1 %v20717_v55  ;;  %19240 = vmatprep.subr.bf16.mxu0 %v20749_v51  ;;  %v20773_v55 = vld [vmem:[%s24570_s5 + $0x170] ss:$144 sps:$4 sm:$0xff]  }
 0x6f5   : > { %19193 = vmatpush3.bf16.msra.mxu1 %v20724_v15  ;;  %13278 = vmatprep.mubr.bf16.mxu1 %v20733_v16  ;;  %v20805_v51 = vld [vmem:[%s21406_s14 + $0x6f0] sm:$0xff]  }
 0x6f6   : > { %19194 = vmatprep.subr.bf16.mxu1 %v20726_v18  ;;  %13352 = vmatmul.mubr.bf16.gmra.mrb[88].mxu0 %v20748_v57  ;;  %v20780_v18 = vld [vmem:[%s21406_s14 + $0x610] sm:$0xff]  }
 0x6f7   : > { %19241 = vmatpush3.bf16.msra.mxu0 %v20751_v35  ;;  %13457 = vmatprep.mubr.bf16.mxu0 %v20759_v20  ;;  %v20789_v57 = vld [vmem:[%s24570_s5 + $0x294] ss:$144 sps:$4 sm:$0xff]   ;;  %v20782_v20 = vld [vmem:[%s21406_s14 + $0x658] sm:$0xff]  }
 0x6f8   : > { %19242 = vmatprep.subr.bf16.mxu0 %v20753_v22  ;;  %v20804_v22 = vld [vmem:[%s24570_s5 + $0x3b8] ss:$144 sps:$4 sm:$0xff]  }
 0x6f9   : > { %19195 = vmatpush3.bf16.msra.mxu1 %v20728_v52 }
 0x6fa   : > { %19196 = vmatprep.subr.bf16.mxu1 %v20736_v21  ;;  %v20807_v21 = vld [vmem:[%s21406_s14 + $0x6b0] sm:$0xff]  }
 0x6fb   : > { %19243 = vmatpush3.bf16.msra.mxu0 %v20755_v25  ;;  %v20815_v25 = vld [vmem:[%s24570_s5 + $0x6c] ss:$144 sps:$4 sm:$0xff]  }
 0x6fc   : > { %13279 = vmatmul.mubr.bf16.gmra.mrb[80].mxu1 %v20731_v47  ;;  %19308 = vmatprep.subr.bf16.mxu0 %v20763_v23  ;;  %v20809_v47 = vld [vmem:[%s21406_s14 + $0x6f8] sm:$0xff]  }
 0x6fd   : > { %19197 = vmatpush3.bf16.msra.mxu1 %v20738_v26  ;;  %13286 = vmatprep.mubr.bf16.mxu1 %v20747_v11  ;;  %v20784_v23 = vld [vmem:[%s21406_s14 + $0x618] sm:$0xff]   ;;  %v20792_v26 = vld [vmem:[%s21406_s14 + $0x660] sm:$0xff]  }
 0x6fe   : > { %19198 = vmatprep.subr.bf16.mxu1 %v20740_v32  ;;  %13458 = vmatmul.mubr.bf16.vlgmr.msra.gmra.mrb[92].mxu0 %v20757_v31  ;;  %v20811_v32 = vld [vmem:[%s21406_s14 + $0x6b8] sm:$0xff]  }
 0x6ff   : > { %v18804_v5 = vpop.f32.mrb[228].mxu1  ;;  %19309 = vmatpush3.bf16.msra.mxu0 %v20765_v34  ;;  %13465 = vmatprep.mubr.bf16.mxu0 %v20771_v61  ;;  %v20787_v34 = vld [vmem:[%s24570_s5 + $0x290] ss:$144 sps:$4 sm:$0xff]  }
 0x700   : > { %v18805_v19 = vpop.f32.mrb[229].mxu1  ;;  %19310 = vmatprep.subr.bf16.mxu0 %v20767_v12  ;;  %v20819_v61 = vld [vmem:[%s21406_s14 + $0x7c0] sm:$0xff]  }
 0x701   : > { %v23691_v43 = vadd.f32 %v18805_v19, %v18804_v5  ;;  %v18807_v36 = vpop.f32.mrb[230].mxu1  ;;  %19199 = vmatpush3.bf16.msra.mxu1 %v20742_v46  ;;  %v20803_v5 = vld [vmem:[%s24570_s5 + $0x3b4] ss:$144 sps:$4 sm:$0xff]   ;;  %v20796_v19 = vld [vmem:[%s21406_s14 + $0x668] sm:$0xff]  }
 0x702   : > { %v18808_v41 = vpop.f32.mrb[231].mxu1  ;;  %19200 = vmatprep.subr.bf16.mxu1 %v20750_v39  ;;  %v20794_v39 = vld [vmem:[%s21406_s14 + $0x620] sm:$0xff]  }
 0x703   : > { %v23701_v50 = vadd.f32 %v18808_v41, %v18807_v36  ;;  %19311 = vmatpush3.bf16.msra.mxu0 %v20769_v33  ;;  %v20821_v36 = vld [vmem:[%s21406_s14 + $0x780] sm:$0xff]   ;;  %v20798_v41 = vld [vmem:[%s21406_s14 + $0x628] sm:$0xff]  }
 0x704   : > { %13287 = vmatmul.mubr.bf16.gmra.mrb[84].mxu1 %v20745_v2  ;;  %19312 = vmatprep.subr.bf16.mxu0 %v20777_v42  ;;  %v20813_v2 = vld [vmem:[%s24570_s5 + $0x68] ss:$144 sps:$4 sm:$0xff]  }
 0x705   : > { %19201 = vmatpush3.bf16.msra.mxu1 %v20752_v38  ;;  %13392 = vmatprep.mubr.bf16.mxu1 %v20762_v3  ;;  %v20827_v38 = vld [vmem:[%s24570_s5 + $0x18c] ss:$144 sps:$4 sm:$0xff]  }
 0x706   : > { %19202 = vmatprep.subr.bf16.mxu1 %v20754_v44  ;;  %13466 = vmatmul.mubr.bf16.gmra.mrb[96].mxu0 %v20776_v48  ;;  %v20823_v3 = vld [vmem:[%s21406_s14 + $0x7c8] sm:$0xff]   ;;  %v20806_v44 = vld [vmem:[%s21406_s14 + $0x670] sm:$0xff]  }
 0x707   : > { %v18810_v17 = vpop.f32.mrb[232].mxu1  ;;  %19313 = vmatpush3.bf16.msra.mxu0 %v20779_v53  ;;  %13473 = vmatprep.mubr.bf16.mxu0 %v20785_v30  ;;  %v20825_v53 = vld [vmem:[%s21406_s14 + $0x788] sm:$0xff]   ;;  %v10225_v30 = vpop.permute.xlu0 %10224 }
 0x708   : > { %v18811_v59 = vpop.f32.mrb[233].mxu1  ;;  %19314 = vmatprep.subr.bf16.mxu0 %v20781_v54 }
 0x709   : > { %v23715_v60 = vadd.f32 %v18811_v59, %v18810_v17  ;;  %v18813_v62 = vpop.f32.mrb[234].mxu1  ;;  %19203 = vmatpush3.bf16.msra.mxu1 %v20756_v56  ;;  %v20801_v56 = vld [vmem:[%s24570_s5 + $0x3b0] ss:$144 sps:$4 sm:$0xff]   ;;  %v12745_v17 = vadd.f32 %v23691_v43, %v10225_v30 }
 0x70a   : > { %v18814_v49 = vpop.f32.mrb[235].mxu1  ;;  %19268 = vmatprep.subr.bf16.mxu1 %v20764_v6  ;;  %v20833_v6 = vld [vmem:[%s21406_s14 + $0x7d0] sm:$0xff]  }
 0x70b   : > { %v23725_v7 = vadd.f32 %v18814_v49, %v18813_v62  ;;  %19315 = vmatpush3.bf16.msra.mxu0 %v20783_v58  ;;  %v10230_v62 = vpop.permute.xlu1 %10229  ;;  %v20832_v49 = vld [vmem:[%s24570_s5 + $0x188] ss:$144 sps:$4 sm:$0xff]  }
 0x70c   : > { %13393 = vmatmul.mubr.bf16.vlgmr.msra.gmra.mrb[88].mxu1 %v20760_v24  ;;  %19316 = vmatprep.subr.bf16.mxu0 %v20791_v9  ;;  %v20808_v24 = vld [vmem:[%s21406_s14 + $0x630] sm:$0xff]   ;;  %v12748_v43 = vadd.f32 %v23701_v50, %v10230_v62  ;;  %v20820_v50 = vld [vmem:[%s21406_s14 + $0x740] sm:$0xff]   ;;  %v20840_v62 = vld [vmem:[%s21406_s14 + $0x718] sm:$0xff]  }
 0x70d   : > { %19269 = vmatpush3.bf16.msra.mxu1 %v20766_v63  ;;  %13400 = vmatprep.mubr.bf16.mxu1 %v20775_v0  ;;  %v20818_v9 = vld [vmem:[%s24570_s5 + $0x64] ss:$144 sps:$4 sm:$0xff]   ;;  %v20810_v0 = vld [vmem:[%s21406_s14 + $0x678] sm:$0xff]  }
 0x70e   : > { %19270 = vmatprep.subr.bf16.mxu1 %v20768_v27  ;;  %13474 = vmatmul.mubr.bf16.gmra.mrb[100].mxu0 %v20790_v37 }
 0x70f   : > { %v18816_v29 = vpop.f32.mrb[236].mxu1  ;;  %19317 = vmatpush3.bf16.msra.mxu0 %v20793_v10  ;;  %13481 = vmatprep.mubr.bf16.mxu0 %v20799_v40  ;;  %v20835_v10 = vld [vmem:[%s21406_s14 + $0x790] sm:$0xff]   ;;  %v20841_v40 = vld [vmem:[%s24570_s5 + $0x2ac] ss:$144 sps:$4 sm:$0xff]  }
 0x710   : > { %v18817_v4 = vpop.f32.mrb[237].mxu1  ;;  %19318 = vmatprep.subr.bf16.mxu0 %v20795_v13  ;;  %v20837_v13 = vld [vmem:[%s21406_s14 + $0x7d8] sm:$0xff]  }
 0x711   : > { %v23739_v15 = vadd.f32 %v18817_v4, %v18816_v29  ;;  %v18819_v16 = vpop.f32.mrb[238].mxu1  ;;  %19271 = vmatpush3.bf16.msra.mxu1 %v20770_v28  ;;  %v10235_v4 = vpop.permute.xlu0 %10234 }
 0x712   : > { %v18820_v35 = vpop.f32.mrb[239].mxu1  ;;  %19272 = vmatprep.subr.bf16.mxu1 %v20778_v45  ;;  %v20812_v45 = vld [vmem:[%s21406_s14 + $0x638] sm:$0xff]  }
 0x713   : > { %v23749_v52 = vadd.f32 %v18820_v35, %v18819_v16  ;;  %19319 = vmatpush3.bf16.msra.mxu0 %v20797_v14  ;;  %v20839_v14 = vld [vmem:[%s21406_s14 + $0x798] sm:$0xff]   ;;  %v20847_v16 = vld [vmem:[%s21406_s14 + $0x7e0] sm:$0xff]  }
 0x714   : > { %13401 = vmatmul.mubr.bf16.gmra.mrb[92].mxu1 %v20773_v55  ;;  %19320 = vmatprep.subr.bf16.mxu0 %v20805_v51  ;;  %v20816_v51 = vld [vmem:[%s24570_s5 + $0x60] ss:$144 sps:$4 sm:$0xff]  }
 0x715   : > { %19273 = vmatpush3.bf16.msra.mxu1 %v20780_v18  ;;  %13408 = vmatprep.mubr.bf16.mxu1 %v20789_v57  ;;  %v12753_v18 = vadd.f32 %v23715_v60, %v10235_v4 }
 0x716   : > { %19274 = vmatprep.subr.bf16.mxu1 %v20782_v20  ;;  %13482 = vmatmul.mubr.bf16.gmra.mrb[104].mxu0 %v20804_v22  ;;  %v20822_v20 = vld [vmem:[%s21406_s14 + $0x700] sm:$0xff]  }
 0x717   : > { %v18822_v11 = vpop.f32.mrb[240].mxu1  ;;  %19321 = vmatpush3.bf16.msra.mxu0 %v20807_v21  ;;  %13587 = vmatprep.mubr.bf16.mxu0 %v20815_v25  ;;  %v20831_v22 = vld [vmem:[%s24570_s5 + $0x184] ss:$144 sps:$4 sm:$0xff]   ;;  %v10240_v21 = vpop.permute.xlu1 %10239 }
 0x718   : > { %v18823_v31 = vpop.f32.mrb[241].mxu1  ;;  %19322 = vmatprep.subr.bf16.mxu0 %v20809_v47  ;;  %v20824_v47 = vld [vmem:[%s21406_s14 + $0x748] sm:$0xff]   ;;  %v12756_v60 = vadd.f32 %v23725_v7, %v10240_v21  ;;  %v20834_v7 = vld [vmem:[%s21406_s14 + $0x750] sm:$0xff]  }
 0x719   : > { %v23763_v12 = vadd.f32 %v18823_v31, %v18822_v11  ;;  %v18825_v46 = vpop.f32.mrb[242].mxu1  ;;  %19275 = vmatpush3.bf16.msra.mxu1 %v20784_v23  ;;  %v20846_v23 = vld [vmem:[%s24570_s5 + $0x2a8] ss:$144 sps:$4 sm:$0xff]   ;;  %v20855_v31 = vld [vmem:[%s24570_s5 + $0x3cc] ss:$144 sps:$4 sm:$0xff]  }
 0x71a   : > { %v18826_v33 = vpop.f32.mrb[243].mxu1  ;;  %19276 = vmatprep.subr.bf16.mxu1 %v20792_v26  ;;  %v20854_v21 = vld [vmem:[%s21406_s14 + $0x728] sm:$0xff]  }
 0x71b   : > { %v23773_v42 = vadd.f32 %v18826_v33, %v18825_v46  ;;  %19323 = vmatpush3.bf16.msra.mxu0 %v20811_v32  ;;  %v20849_v32 = vld [vmem:[%s21406_s14 + $0x7a0] sm:$0xff]   ;;  %v20826_v46 = vld [vmem:[%s21406_s14 + $0x708] sm:$0xff]   ;;  %v10245_v33 = vpop.permute.xlu0 %10244 }
 0x71c   : > { %13409 = vmatmul.mubr.bf16.gmra.mrb[96].mxu1 %v20787_v34  ;;  %19388 = vmatprep.subr.bf16.mxu0 %v20819_v61  ;;  %v20851_v34 = vld [vmem:[%s21406_s14 + $0x7e8] sm:$0xff]  }
 0x71d   : > { %19277 = vmatpush3.bf16.msra.mxu1 %v20794_v39  ;;  %13416 = vmatprep.mubr.bf16.mxu1 %v20803_v5  ;;  %v20853_v5 = vld [vmem:[%s21406_s14 + $0x7a8] sm:$0xff]  }
 0x71e   : > { %19278 = vmatprep.subr.bf16.mxu1 %v20796_v19  ;;  %13588 = vmatmul.mubr.bf16.vlgmr.msra.gmra.mrb[108].mxu0 %v20813_v2  ;;  %v20829_v2 = vld [vmem:[%s24570_s5 + $0x180] ss:$144 sps:$4 sm:$0xff]  }
 0x71f   : > { %v18844_v48 = vpop.f32.mrb[244].mxu1  ;;  %19389 = vmatpush3.bf16.msra.mxu0 %v20821_v36  ;;  %13595 = vmatprep.mubr.bf16.mxu0 %v20827_v38  ;;  %v20861_v36 = vld [vmem:[%s21406_s14 + $0x7f0] sm:$0xff]   ;;  %v12761_v38 = vadd.f32 %v23739_v15, %v10245_v33 }
 0x720   : > { %v18845_v54 = vpop.f32.mrb[245].mxu1  ;;  %19390 = vmatprep.subr.bf16.mxu0 %v20823_v3 }
 0x721   : > { %v18846_v58 = vadd.f32 %v18845_v54, %v18844_v48  ;;  %v18847_v59 = vpop.f32.mrb[246].mxu1  ;;  %19279 = vmatpush3.bf16.msra.mxu1 %v20798_v41  ;;  %v20845_v48 = vld [vmem:[%s24570_s5 + $0x2a4] ss:$144 sps:$4 sm:$0xff]   ;;  %v20838_v54 = vld [vmem:[%s21406_s14 + $0x758] sm:$0xff]  }
 0x722   : > { %v18848_v63 = vpop.f32.mrb[247].mxu1  ;;  %19280 = vmatprep.subr.bf16.mxu1 %v20806_v44  ;;  %v20836_v44 = vld [vmem:[%s21406_s14 + $0x710] sm:$0xff]  }
 0x723   : > { %v23797_v27 = vadd.f32 %v18846_v58, %v12745_v17  ;;  %v18849_v37 = vadd.f32 %v18848_v63, %v18847_v59  ;;  %19391 = vmatpush3.bf16.msra.mxu0 %v20825_v53  ;;  %v10250_v53 = vpop.permute.xlu1 %10249  ;;  %v20863_v58 = vld [vmem:[%s21406_s14 + $0x7b0] sm:$0xff]   ;;  %v20871_v59 = vld [vmem:[%s24570_s5 + $0x7c] ss:$144 sps:$4 sm:$0xff]  }
 0x724   : > { %13417 = vmatmul.mubr.bf16.gmra.mrb[100].mxu1 %v20801_v56  ;;  %19392 = vmatprep.subr.bf16.mxu0 %v20833_v6  ;;  %v20860_v56 = vld [vmem:[%s24570_s5 + $0x3c8] ss:$144 sps:$4 sm:$0xff]   ;;  %v12764_v15 = vadd.f32 %v23749_v52, %v10250_v53  ;;  %v20848_v52 = vld [vmem:[%s21406_s14 + $0x760] sm:$0xff]  }
 0x725   : > { %v23804_v28 = vadd.f32 %v18849_v37, %v12748_v43  ;;  %19281 = vmatpush3.bf16.msra.mxu1 %v20808_v24  ;;  %13522 = vmatprep.mubr.bf16.mxu1 %v20818_v9  ;;  %v20865_v24 = vld [vmem:[%s21406_s14 + $0x7f8] sm:$0xff]   ;;  %v20843_v37 = vld [vmem:[%s24570_s5 + $0x2a0] ss:$144 sps:$4 sm:$0xff]  }
 0x726   : > { %19282 = vmatprep.subr.bf16.mxu1 %v20810_v0  ;;  %13596 = vmatmul.mubr.bf16.gmra.mrb[112].mxu0 %v20832_v49  ;;  %v20867_v0 = vld [vmem:[%s21406_s14 + $0x7b8] sm:$0xff]   ;;  %v10255_v49 = vpop.permute.xlu0 %10254 }
 0x727   : > { %v18850_v29 = vpop.f32.mrb[248].mxu1  ;;  %19393 = vmatpush3.bf16.msra.mxu0 %v20835_v10  ;;  %13603 = vmatprep.mubr.bf16.mxu0 %v20841_v40  ;;  %v20875_v10 = vld [vmem:[%s21406_s14 + $0x8c0] sm:$0xff]   ;;  %v12769_v40 = vadd.f32 %v23763_v12, %v10255_v49  ;;  %v20907_v49 = vld [vmem:[%s21406_s14 + $0x8e8] sm:$0xff]  }
 0x728   : > { %v18851_v55 = vpop.f32.mrb[249].mxu1  ;;  %19394 = vmatprep.subr.bf16.mxu0 %v20837_v13 }
 0x729   : > { %v18852_v57 = vadd.f32 %v18851_v55, %v18850_v29  ;;  %v18853_v35 = vpop.f32.mrb[250].mxu1  ;;  %19283 = vmatpush3.bf16.msra.mxu1 %v20812_v45  ;;  %v20859_v29 = vld [vmem:[%s24570_s5 + $0x3c4] ss:$144 sps:$4 sm:$0xff]   ;;  %v20852_v55 = vld [vmem:[%s21406_s14 + $0x768] sm:$0xff]  }
 0x72a   : > { %v18854_v25 = vpop.f32.mrb[251].mxu1  ;;  %19348 = vmatprep.subr.bf16.mxu1 %v20820_v50  ;;  %v20850_v50 = vld [vmem:[%s21406_s14 + $0x720] sm:$0xff]  }
 0x72b   : > { %v23823_v26 = vadd.f32 %v18852_v57, %v12753_v18  ;;  %v18855_v11 = vadd.f32 %v18854_v25, %v18853_v35  ;;  %19395 = vmatpush3.bf16.msra.mxu0 %v20839_v14  ;;  %v10260_v14 = vpop.permute.xlu1 %10259  ;;  %v20877_v57 = vld [vmem:[%s21406_s14 + $0x880] sm:$0xff]   ;;  %v20883_v35 = vld [vmem:[%s24570_s5 + $0x19c] ss:$144 sps:$4 sm:$0xff]  }
 0x72c   : > { %13523 = vmatmul.mubr.bf16.vlgmr.msra.gmra.mrb[104].mxu1 %v20816_v51  ;;  %19396 = vmatprep.subr.bf16.mxu0 %v20847_v16  ;;  %v20869_v51 = vld [vmem:[%s24570_s5 + $0x78] ss:$144 sps:$4 sm:$0xff]   ;;  %v12772_v12 = vadd.f32 %v23773_v42, %v10260_v14  ;;  %v20862_v42 = vld [vmem:[%s21406_s14 + $0x770] sm:$0xff]  }
 0x72d   : > { %v23830_v61 = vadd.f32 %v18855_v11, %v12756_v60  ;;  %19349 = vmatpush3.bf16.msra.mxu1 %v20822_v20  ;;  %13530 = vmatprep.mubr.bf16.mxu1 %v20831_v22  ;;  %v20879_v20 = vld [vmem:[%s21406_s14 + $0x8c8] sm:$0xff]   ;;  %v20857_v60 = vld [vmem:[%s24570_s5 + $0x3c0] ss:$144 sps:$4 sm:$0xff]  }
 0x72e   : > { %19350 = vmatprep.subr.bf16.mxu1 %v20824_v47  ;;  %13604 = vmatmul.mubr.bf16.gmra.mrb[116].mxu0 %v20846_v23  ;;  %v20881_v47 = vld [vmem:[%s21406_s14 + $0x888] sm:$0xff]   ;;  %v20889_v11 = vld [vmem:[%s21406_s14 + $0x8d0] sm:$0xff]  }
 0x72f   : > { %v18856_v39 = vpop.f32.mrb[252].mxu1  ;;  %19397 = vmatpush3.bf16.msra.mxu0 %v20849_v32  ;;  %13611 = vmatprep.mubr.bf16.mxu0 %v20855_v31  ;;  %v20892_v14 = vld [vmem:[%s21406_s14 + $0x810] sm:$0xff]  }
 0x730   : > { %v18857_v19 = vpop.f32.mrb[253].mxu1  ;;  %19398 = vmatprep.subr.bf16.mxu0 %v20851_v34  ;;  %v20864_v34 = vld [vmem:[%s21406_s14 + $0x730] sm:$0xff]  }
 0x731   : > { %v18858_v3 = vadd.f32 %v18857_v19, %v18856_v39  ;;  %v18859_v41 = vpop.f32.mrb[254].mxu1  ;;  %19351 = vmatpush3.bf16.msra.mxu1 %v20826_v46  ;;  %v20874_v46 = vld [vmem:[%s24570_s5 + $0x74] ss:$144 sps:$4 sm:$0xff]   ;;  %v20866_v39 = vld [vmem:[%s21406_s14 + $0x778] sm:$0xff]  }
 0x732   : > { %v18860_v30 = vpop.f32.mrb[255].mxu1  ;;  %19352 = vmatprep.subr.bf16.mxu1 %v20834_v7 }
 0x733   : > { %v23849_v6 = vadd.f32 %v18858_v3, %v12761_v38  ;;  %v18861_v17 = vadd.f32 %v18860_v30, %v18859_v41  ;;  %19399 = vmatpush3.bf16.msra.mxu0 %v20853_v5  ;;  %v20888_v5 = vld [vmem:[%s24570_s5 + $0x198] ss:$144 sps:$4 sm:$0xff]   ;;  %v20872_v30 = vld [vmem:[%s24570_s5 + $0x70] ss:$144 sps:$4 sm:$0xff]  }
 0x734   : > { %13531 = vmatmul.mubr.bf16.gmra.mrb[108].mxu1 %v20829_v2  ;;  %19400 = vmatprep.subr.bf16.mxu0 %v20861_v36  ;;  %v20891_v2 = vld [vmem:[%s21406_s14 + $0x890] sm:$0xff]   ;;  %v20897_v36 = vld [vmem:[%s24570_s5 + $0x2bc] ss:$144 sps:$4 sm:$0xff]  }
 0x735   : > { %v23856_v9 = vadd.f32 %v18861_v17, %v12764_v15  ;;  %19353 = vmatpush3.bf16.msra.mxu1 %v20836_v44  ;;  %13538 = vmatprep.mubr.bf16.mxu1 %v20845_v48  ;;  %v20893_v38 = vld [vmem:[%s21406_s14 + $0x8d8] sm:$0xff]   ;;  %v20878_v15 = vld [vmem:[%s21406_s14 + $0x800] sm:$0xff]  }
 0x736   : > { %19354 = vmatprep.subr.bf16.mxu1 %v20838_v54  ;;  %13612 = vmatmul.mubr.bf16.gmra.mrb[120].mxu0 %v20860_v56  ;;  %v20868_v41 = vld [vmem:[%s21406_s14 + $0x738] sm:$0xff]   ;;  %v20887_v17 = vld [vmem:[%s24570_s5 + $0x194] ss:$144 sps:$4 sm:$0xff]  }
 0x737   : > { %v18862_v63 = vpop.f32.mrb[0].mxu1  ;;  %19401 = vmatpush3.bf16.msra.mxu0 %v20863_v58  ;;  %13717 = vmatprep.mubr.bf16.mxu0 %v20871_v59  ;;  %v20895_v48 = vld [vmem:[%s21406_s14 + $0x898] sm:$0xff]   ;;  %v20880_v59 = vld [vmem:[%s21406_s14 + $0x848] sm:$0xff]  }
 0x738   : > { %v18863_v43 = vpop.f32.mrb[1].mxu1  ;;  %19402 = vmatprep.subr.bf16.mxu0 %v20865_v24  ;;  %v20902_v24 = vld [vmem:[%s24570_s5 + $0x2b8] ss:$144 sps:$4 sm:$0xff]  }
 0x739   : > { %v18864_v13 = vadd.f32 %v18863_v43, %v18862_v63  ;;  %v18865_v45 = vpop.f32.mrb[2].mxu1  ;;  %19355 = vmatpush3.bf16.msra.mxu1 %v20840_v62  ;;  %v20905_v63 = vld [vmem:[%s21406_s14 + $0x8a0] sm:$0xff]  }
 0x73a   : > { %v18866_v4 = vpop.f32.mrb[3].mxu1  ;;  %19356 = vmatprep.subr.bf16.mxu1 %v20848_v52 }
 0x73b   : > { %v23875_v16 = vadd.f32 %v18864_v13, %v12769_v40  ;;  %v18867_v18 = vadd.f32 %v18866_v4, %v18865_v45  ;;  %19403 = vmatpush3.bf16.msra.mxu0 %v20867_v0  ;;  %v20911_v0 = vld [vmem:[%s24570_s5 + $0x3dc] ss:$144 sps:$4 sm:$0xff]   ;;  %v20885_v45 = vld [vmem:[%s24570_s5 + $0x190] ss:$144 sps:$4 sm:$0xff]   ;;  %v20901_v4 = vld [vmem:[%s24570_s5 + $0x2b4] ss:$144 sps:$4 sm:$0xff]  }
 0x73c   : > { %13539 = vmatmul.mubr.bf16.gmra.mrb[112].mxu1 %v20843_v37  ;;  %19468 = vmatprep.subr.bf16.mxu0 %v20875_v10  ;;  %v20882_v37 = vld [vmem:[%s21406_s14 + $0x808] sm:$0xff]  }
 0x73d   : > { %v23882_v22 = vadd.f32 %v18867_v18, %v12772_v12  ;;  %19357 = vmatpush3.bf16.msra.mxu1 %v20850_v50  ;;  %13546 = vmatprep.mubr.bf16.mxu1 %v20859_v29  ;;  %v20909_v40 = vld [vmem:[%s21406_s14 + $0x8a8] sm:$0xff]  }
 0x73e   : > { %19358 = vmatprep.subr.bf16.mxu1 %v20852_v55  ;;  %13718 = vmatmul.mubr.bf16.vlgmr.msra.gmra.mrb[124].mxu0 %v20869_v51  ;;  %v20894_v51 = vld [vmem:[%s21406_s14 + $0x858] sm:$0xff]  }
 0x73f   : > { %v18884_v25 = vpop.f32.mrb[4].mxu1  ;;  %19469 = vmatpush3.bf16.msra.mxu0 %v20877_v57  ;;  %13725 = vmatprep.mubr.bf16.mxu0 %v20883_v35  ;;  %v20916_v12 = vld [vmem:[%s24570_s5 + $0x3d8] ss:$144 sps:$4 sm:$0xff]   ;;  %v20919_v35 = vld [vmem:[%s21406_s14 + $0x8b0] sm:$0xff]  }
 0x740   : > { %v18885_v23 = vpop.f32.mrb[5].mxu1  ;;  %19470 = vmatprep.subr.bf16.mxu0 %v20879_v20  ;;  %v20927_v20 = vld [vmem:[%s24570_s5 + $0x8c] ss:$144 sps:$4 sm:$0xff]  }
 0x741   : > { %v18886_v32 = vadd.f32 %v18885_v23, %v18884_v25  ;;  %v18887_v31 = vpop.f32.mrb[6].mxu1  ;;  %19359 = vmatpush3.bf16.msra.mxu1 %v20854_v21  ;;  %v20921_v21 = vld [vmem:[%s21406_s14 + $0x8f8] sm:$0xff]  }
 0x742   : > { %v18888_v7 = vpop.f32.mrb[7].mxu1  ;;  %19360 = vmatprep.subr.bf16.mxu1 %v20862_v42  ;;  %v20896_v25 = vld [vmem:[%s21406_s14 + $0x818] sm:$0xff]  }
 0x743   : > { %v23900_v33 = vadd.f32 %v18886_v32, %v23797_v27  ;;  %v18889_v19 = vadd.f32 %v18888_v7, %v18887_v31  ;;  %19471 = vmatpush3.bf16.msra.mxu0 %v20881_v47  ;;  %v20876_v27 = vld [vmem:[%s21406_s14 + $0x840] sm:$0xff]   ;;  %v20923_v23 = vld [vmem:[%s21406_s14 + $0x8b8] sm:$0xff]   ;;  %v20908_v7 = vld [vmem:[%s21406_s14 + $0x868] sm:$0xff]  }
 0x744   : > { %13547 = vmatmul.mubr.bf16.gmra.mrb[116].mxu1 %v20857_v60  ;;  %19472 = vmatprep.subr.bf16.mxu0 %v20889_v11  ;;  %v20899_v11 = vld [vmem:[%s24570_s5 + $0x2b0] ss:$144 sps:$4 sm:$0xff]  }
 0x745   : > { %v23908_v3 = vadd.f32 %v18889_v19, %v23804_v28  ;;  %19361 = vmatpush3.bf16.msra.mxu1 %v20864_v34  ;;  %13652 = vmatprep.mubr.bf16.mxu1 %v20874_v46  ;;  %v20903_v28 = vld [vmem:[%s21406_s14 + $0x8e0] sm:$0xff]  }
 0x746   : > { %19362 = vmatprep.subr.bf16.mxu1 %v20866_v39  ;;  %13726 = vmatmul.mubr.bf16.gmra.mrb[128].mxu0 %v20888_v5  ;;  %v20906_v31 = vld [vmem:[%s21406_s14 + $0x820] sm:$0xff]   ;;  %v20925_v39 = vld [vmem:[%s24570_s5 + $0x88] ss:$144 sps:$4 sm:$0xff]  }
 0x747   : > { %v18890_v44 = vpop.f32.mrb[8].mxu1  ;;  %19473 = vmatpush3.bf16.msra.mxu0 %v20891_v2  ;;  %13733 = vmatprep.mubr.bf16.mxu0 %v20897_v36  ;;  %v20915_v34 = vld [vmem:[%s24570_s5 + $0x3d4] ss:$144 sps:$4 sm:$0xff]   ;;  %v20931_v2 = vld [vmem:[%s24570_s5 + $0x1ac] ss:$144 sps:$4 sm:$0xff]  }
 0x748   : > { %v18891_v53 = vpop.f32.mrb[9].mxu1  ;;  %19474 = vmatprep.subr.bf16.mxu0 %v20893_v38  ;;  %v20910_v38 = vld [vmem:[%s21406_s14 + $0x828] sm:$0xff]  }
 0x749   : > { %v18892_v54 = vadd.f32 %v18891_v53, %v18890_v44  ;;  %v18893_v56 = vpop.f32.mrb[10].mxu1  ;;  %19363 = vmatpush3.bf16.msra.mxu1 %v20868_v41  ;;  %v20918_v41 = vld [vmem:[%s21406_s14 + $0x870] sm:$0xff]  }
 0x74a   : > { %v18894_v58 = vpop.f32.mrb[11].mxu1  ;;  %19428 = vmatprep.subr.bf16.mxu1 %v20876_v27  ;;  %v20913_v44 = vld [vmem:[%s24570_s5 + $0x3d0] ss:$144 sps:$4 sm:$0xff]  }
 0x74b   : > { %v23926_v62 = vadd.f32 %v18892_v54, %v23823_v26  ;;  %v18895_v52 = vadd.f32 %v18894_v58, %v18893_v56  ;;  %19475 = vmatpush3.bf16.msra.mxu0 %v20895_v48  ;;  %v20890_v26 = vld [vmem:[%s21406_s14 + $0x850] sm:$0xff]   ;;  %v20922_v54 = vld [vmem:[%s21406_s14 + $0x878] sm:$0xff]  }
 0x74c   : > { %13653 = vmatmul.mubr.bf16.vlgmr.msra.gmra.mrb[120].mxu1 %v20872_v30  ;;  %19476 = vmatprep.subr.bf16.mxu0 %v20903_v28  ;;  %v20930_v30 = vld [vmem:[%s24570_s5 + $0x84] ss:$144 sps:$4 sm:$0xff]   ;;  %v20936_v56 = vld [vmem:[%s24570_s5 + $0x1a8] ss:$144 sps:$4 sm:$0xff]   ;;  %v20937_v58 = vld [vmem:[%s24570_s5 + $0x2cc] ss:$144 sps:$4 sm:$0xff]  }
 0x74d   : > { %v23934_v43 = vadd.f32 %v18895_v52, %v23830_v61  ;;  %19429 = vmatpush3.bf16.msra.mxu1 %v20878_v15  ;;  %13660 = vmatprep.mubr.bf16.mxu1 %v20887_v17  ;;  %v20917_v61 = vld [vmem:[%s21406_s14 + $0x8f0] sm:$0xff]  }
 0x74e   : > { %19430 = vmatprep.subr.bf16.mxu1 %v20880_v59  ;;  %13734 = vmatmul.mubr.bf16.gmra.mrb[132].mxu0 %v20902_v24  ;;  %v20924_v24 = vld [vmem:[%s21406_s14 + $0x838] sm:$0xff]  }
 0x74f   : > { %v18896_v10 = vpop.f32.mrb[12].mxu1  ;;  %19477 = vmatpush3.bf16.msra.mxu0 %v20905_v63  ;;  %13741 = vmatprep.mubr.bf16.mxu0 %v20911_v0 }
 0x750   : > { %v18897_v13 = vpop.f32.mrb[13].mxu1  ;;  %19478 = vmatprep.subr.bf16.mxu0 %v20907_v49 }
 0x751   : > { %v18898_v50 = vadd.f32 %v18897_v13, %v18896_v10  ;;  %v18899_v29 = vpop.f32.mrb[14].mxu1  ;;  %19431 = vmatpush3.bf16.msra.mxu1 %v20882_v37  ;;  %v20943_v13 = vld [vmem:[%s24570_s5 + $0x3ec] ss:$144 sps:$4 sm:$0xff]  }
 0x752   : > { %v18900_v55 = vpop.f32.mrb[15].mxu1  ;;  %19432 = vmatprep.subr.bf16.mxu1 %v20890_v26  ;;  %v20942_v26 = vld [vmem:[%s24570_s5 + $0x2c8] ss:$144 sps:$4 sm:$0xff]  }
 0x753   : > { %v23952_v18 = vadd.f32 %v18898_v50, %v23849_v6  ;;  %v18901_v57 = vadd.f32 %v18900_v55, %v18899_v29  ;;  %19479 = vmatpush3.bf16.msra.mxu0 %v20909_v40  ;;  %v20904_v6 = vld [vmem:[%s21406_s14 + $0x860] sm:$0xff]  }
 0x754   : > { %13661 = vmatmul.mubr.bf16.gmra.mrb[124].mxu1 %v20885_v45  ;;  %19480 = vmatprep.subr.bf16.mxu0 %v20917_v61  ;;  %v20933_v29 = vld [vmem:[%s24570_s5 + $0x1a0] ss:$144 sps:$4 sm:$0xff]  }
 0x755   : > { %v23960_v42 = vadd.f32 %v18901_v57, %v23856_v9  ;;  %19433 = vmatpush3.bf16.msra.mxu1 %v20892_v14  ;;  %13668 = vmatprep.mubr.bf16.mxu1 %v20901_v4  ;;  %v20941_v4 = vld [vmem:[%s24570_s5 + $0x2c4] ss:$144 sps:$4 sm:$0xff]  }
 0x756   : > { %19434 = vmatprep.subr.bf16.mxu1 %v20894_v51  ;;  %13742 = vmatmul.mubr.bf16.gmra.mrb[136].mxu0 %v20916_v12 }
 0x757   : > { %v18902_v47 = vpop.f32.mrb[16].mxu1  ;;  %19481 = vmatpush3.bf16.msra.mxu0 %v20919_v35  ;;  %13847 = vmatprep.mubr.bf16.mxu0 %v20927_v20 }
 0x758   : > { %v18903_v60 = vpop.f32.mrb[17].mxu1  ;;  %19482 = vmatprep.subr.bf16.mxu0 %v20921_v21 }
 0x759   : > { %v18904_v9 = vadd.f32 %v18903_v60, %v18902_v47  ;;  %v18905_v32 = vpop.f32.mrb[18].mxu1  ;;  %19435 = vmatpush3.bf16.msra.mxu1 %v20896_v25 }
 0x75a   : > { %v18906_v46 = vpop.f32.mrb[19].mxu1  ;;  %19436 = vmatprep.subr.bf16.mxu1 %v20904_v6 }
 0x75b   : > { %v23977_v5 = vadd.f32 %v18904_v9, %v23875_v16  ;;  %v18907_v19 = vadd.f32 %v18906_v46, %v18905_v32  ;;  %19483 = vmatpush3.bf16.msra.mxu0 %v20923_v23  ;;  %v20947_v32 = vld [vmem:[%s24570_s5 + $0x3e4] ss:$144 sps:$4 sm:$0xff]  }
 0x75c   : > { %13669 = vmatmul.mubr.bf16.gmra.mrb[128].mxu1 %v20899_v11 }
 0x75d   : > { %v23983_v36 = vadd.f32 %v18907_v19, %v23882_v22  ;;  %19437 = vmatpush3.bf16.msra.mxu1 %v20906_v31  ;;  %13676 = vmatprep.mubr.bf16.mxu1 %v20915_v34  ;;  %v20920_v22 = vld [vmem:[%s21406_s14 + $0x830] sm:$0xff]  }
 0x75e   : > { %19438 = vmatprep.subr.bf16.mxu1 %v20908_v7  ;;  %13848 = vmatmul.mubr.bf16.vlgmr.msra.gmra.mrb[140].mxu0 %v20925_v39 }
 0x75f   : > { %v18924_v16 = vpop.f32.mrb[20].mxu1  ;;  %13855 = vmatprep.mubr.bf16.mxu0 %v20931_v2 }
 0x760   : > { %v18925_v27 = vpop.f32.mrb[21].mxu1 }
 0x761   : > { %v18926_v48 = vadd.f32 %v18925_v27, %v18924_v16  ;;  %v18927_v53 = vpop.f32.mrb[22].mxu1  ;;  %19439 = vmatpush3.bf16.msra.mxu1 %v20910_v38 }
 0x762   : > { %v18928_v28 = vpop.f32.mrb[23].mxu1  ;;  %19440 = vmatprep.subr.bf16.mxu1 %v20918_v41 }
 0x763   : > { %v23999_v15 = vadd.f32 %v18926_v48, %v23900_v33  ;;  %v18929_v17 = vadd.f32 %v18928_v28, %v18927_v53  ;;  %v20928_v33 = vld [vmem:[%s24570_s5 + $0x80] ss:$144 sps:$4 sm:$0xff]  }
 0x764   : > { %13677 = vmatmul.mubr.bf16.gmra.mrb[132].mxu1 %v20913_v44  ;;  %v20945_v44 = vld [vmem:[%s24570_s5 + $0x3e0] ss:$144 sps:$4 sm:$0xff]  }
 0x765   : > { %v24005_v59 = vadd.f32 %v18929_v17, %v23908_v3  ;;  %19441 = vmatpush3.bf16.msra.mxu1 %v20920_v22  ;;  %13782 = vmatprep.mubr.bf16.mxu1 %v20930_v30  ;;  %v20935_v3 = vld [vmem:[%s24570_s5 + $0x1a4] ss:$144 sps:$4 sm:$0xff]  }
 0x766   : > { %19442 = vmatprep.subr.bf16.mxu1 %v20922_v54  ;;  %13856 = vmatmul.mubr.bf16.gmra.mrb[144].mxu0 %v20936_v56 }
 0x767   : > { %v18930_v52 = vpop.f32.mrb[24].mxu1  ;;  %13863 = vmatprep.mubr.bf16.mxu0 %v20937_v58 }
 0x768   : > { %v18931_v63 = vpop.f32.mrb[25].mxu1 }
 0x769   : > { %v18932_v0 = vadd.f32 %v18931_v63, %v18930_v52  ;;  %v18933_v49 = vpop.f32.mrb[26].mxu1  ;;  %19443 = vmatpush3.bf16.msra.mxu1 %v20924_v24 }
 0x76a   : > { %v18934_v37 = vpop.f32.mrb[27].mxu1  ;;  %19597 = vmatprep.subr.bf16.mxu1 %v21045_v8 }
 0x76b   : > { %v24019_v10 = vadd.f32 %v18932_v0, %v23926_v62  ;;  %v18935_v40 = vadd.f32 %v18934_v37, %v18933_v49 }
 0x76c   : > { %13783 = vmatmul.mubr.bf16.vlgmr.msra.gmra.mrb[136].mxu1 %v20928_v33 }
 0x76d   : > { %v24025_v45 = vadd.f32 %v18935_v40, %v23934_v43  ;;  %13790 = vmatprep.mubr.bf16.mxu1 %v20935_v3  ;;  %v20948_v43 = vld [vmem:[%s24570_s5 + $0x3e8] ss:$144 sps:$4 sm:$0xff]  }
 0x76e   : > { %13864 = vmatmul.mubr.bf16.gmra.mrb[148].mxu0 %v20942_v26 }
 0x76f   : > { %v18936_v61 = vpop.f32.mrb[28].mxu1  ;;  %13871 = vmatprep.mubr.bf16.mxu0 %v20943_v13 }
 0x770   : > { %v18937_v50 = vpop.f32.mrb[29].mxu1 }
 0x771   : > { %v18938_v62 = vadd.f32 %v18937_v50, %v18936_v61  ;;  %v18939_v14 = vpop.f32.mrb[30].mxu1  ;;  %v19004_v55 = vpop.f32.mrb[44].mxu0 }
 0x772   : > { %v18940_v51 = vpop.f32.mrb[31].mxu1  ;;  %v19005_v12 = vpop.f32.mrb[45].mxu0 }
 0x773   : > { %v24037_v57 = vadd.f32 %v18938_v62, %v23952_v18  ;;  %v18941_v35 = vadd.f32 %v18940_v51, %v18939_v14  ;;  %v19006_v20 = vadd.f32 %v19005_v12, %v19004_v55  ;;  %v19007_v21 = vpop.f32.mrb[46].mxu0  ;;  %v20939_v18 = vld [vmem:[%s24570_s5 + $0x2c0] ss:$144 sps:$4 sm:$0xff]  }
 0x774   : > { %13791 = vmatmul.mubr.bf16.gmra.mrb[140].mxu1 %v20933_v29  ;;  %v19008_v25 = vpop.f32.mrb[47].mxu0 }
 0x775   : > { %v24040_v6 = vadd.f32 %v18941_v35, %v23960_v42  ;;  %13798 = vmatprep.mubr.bf16.mxu1 %v20941_v4  ;;  %v19009_v47 = vadd.f32 %v19008_v25, %v19007_v21 }
 0x776   : > { %13872 = vmatmul.mubr.bf16.gmra.mrb[152].mxu0 %v20948_v43 }
 0x777   : > { %v18942_v23 = vpop.f32.mrb[32].mxu1  ;;  %14120 = vmatprep.mubr.bf16.mxu0 %v21044_v1 }
 0x778   : > { %v18943_v60 = vpop.f32.mrb[33].mxu1 }
 0x779   : > { %v18944_v11 = vadd.f32 %v18943_v60, %v18942_v23  ;;  %v18945_v9 = vpop.f32.mrb[34].mxu1  ;;  %v19010_v31 = vpop.f32.mrb[48].mxu0 }
 0x77a   : > { %v18946_v42 = vpop.f32.mrb[35].mxu1  ;;  %v19011_v34 = vpop.f32.mrb[49].mxu0 }
 0x77b   : > { %v24050_v46 = vadd.f32 %v18944_v11, %v23977_v5  ;;  %v18947_v7 = vadd.f32 %v18946_v42, %v18945_v9  ;;  %v19012_v39 = vadd.f32 %v19011_v34, %v19010_v31  ;;  %v19013_v19 = vpop.f32.mrb[50].mxu0 }
 0x77c   : > { %13799 = vmatmul.mubr.bf16.gmra.mrb[144].mxu1 %v20939_v18  ;;  %v19014_v2 = vpop.f32.mrb[51].mxu0 }
 0x77d   : > { %v24053_v38 = vadd.f32 %v18947_v7, %v23983_v36  ;;  %13806 = vmatprep.mubr.bf16.mxu1 %v20947_v32  ;;  %v19015_v41 = vadd.f32 %v19014_v2, %v19013_v19 }
 0x77f   : > { %v18964_v16 = vpop.f32.mrb[36].mxu1 }
 0x780   : > { %v18965_v27 = vpop.f32.mrb[37].mxu1 }
 0x781   : > { %v18966_v48 = vadd.f32 %v18965_v27, %v18964_v16  ;;  %v18967_v53 = vpop.f32.mrb[38].mxu1  ;;  %v19016_v5 = vpop.f32.mrb[52].mxu0 }
 0x782   : > { %v18968_v22 = vpop.f32.mrb[39].mxu1  ;;  %v19017_v30 = vpop.f32.mrb[53].mxu0 }
 0x783   : > { %v13005_v28 = vadd.f32 %v18966_v48, %v23999_v15  ;;  %v18969_v54 = vadd.f32 %v18968_v22, %v18967_v53  ;;  %v19018_v56 = vadd.f32 %v19017_v30, %v19016_v5  ;;  %v19019_v17 = vpop.f32.mrb[54].mxu0 }
 0x784   : > { %13807 = vmatmul.mubr.bf16.gmra.mrb[148].mxu1 %v20945_v44  ;;  %v19020_v36 = vpop.f32.mrb[55].mxu0 }
 0x785   : > { %v13008_v58 = vadd.f32 %v18969_v54, %v24005_v59  ;;  %v19021_v24 = vadd.f32 %v19020_v36, %v19019_v17  ;;  %v13070_v52 = vadd.f32 %v19006_v20, %v13005_v28  ;;  %19605 = vmatprep.mubr.msk.bf16.mxu1 %vm21046_vm0, %v21045_v8 }
 0x787   : > { %v18970_v63 = vpop.f32.mrb[40].mxu1  ;;  %v13073_v33 = vadd.f32 %v19009_v47, %v13008_v58 }
 0x788   : > { %v18971_v0 = vpop.f32.mrb[41].mxu1 }
 0x789   : > { %v18972_v49 = vadd.f32 %v18971_v0, %v18970_v63  ;;  %v18973_v3 = vpop.f32.mrb[42].mxu1  ;;  %v19022_v37 = vpop.f32.mrb[56].mxu0 }
 0x78a   : > { %v18974_v26 = vpop.f32.mrb[43].mxu1  ;;  %v19023_v15 = vpop.f32.mrb[57].mxu0 }
 0x78b   : > { %v13013_v40 = vadd.f32 %v18972_v49, %v24019_v10  ;;  %v18975_v13 = vadd.f32 %v18974_v26, %v18973_v3  ;;  %v19024_v61 = vadd.f32 %v19023_v15, %v19022_v37  ;;  %v19025_v50 = vpop.f32.mrb[58].mxu0 }
 0x78c   : > { %v19026_v29 = vpop.f32.mrb[59].mxu0 }
 0x78d   : > { %v13016_v59 = vadd.f32 %v18975_v13, %v24025_v45  ;;  %v19027_v62 = vadd.f32 %v19026_v29, %v19025_v50  ;;  %v13078_v14 = vadd.f32 %v19012_v39, %v13013_v40 }
 0x78f   : > { %v18976_v4 = vpop.f32.mrb[44].mxu1  ;;  %v13081_v55 = vadd.f32 %v19015_v41, %v13016_v59 }
 0x790   : > { %v18977_v51 = vpop.f32.mrb[45].mxu1 }
 0x791   : > { %v18978_v12 = vadd.f32 %v18977_v51, %v18976_v4  ;;  %v18979_v43 = vpop.f32.mrb[46].mxu1  ;;  %v19084_v35 = vpop.f32.mrb[60].mxu0 }
 0x792   : > { %v18980_v20 = vpop.f32.mrb[47].mxu1  ;;  %v19085_v21 = vpop.f32.mrb[61].mxu0 }
 0x793   : > { %v13021_v25 = vadd.f32 %v18978_v12, %v24037_v57  ;;  %v18981_v47 = vadd.f32 %v18980_v20, %v18979_v43  ;;  %v19086_v10 = vadd.f32 %v19085_v21, %v19084_v35  ;;  %v19087_v23 = vpop.f32.mrb[62].mxu0 }
 0x794   : > { %v19088_v60 = vpop.f32.mrb[63].mxu0 }
 0x795   : > { %v13024_v18 = vadd.f32 %v18981_v47, %v24040_v6  ;;  %v19089_v11 = vadd.f32 %v19088_v60, %v19087_v23  ;;  %v13086_v45 = vadd.f32 %v19018_v56, %v13021_v25 }
 0x797   : > { %v18982_v9 = vpop.f32.mrb[48].mxu1  ;;  %v13089_v32 = vadd.f32 %v19021_v24, %v13024_v18 }
 0x798   : > { %v18983_v31 = vpop.f32.mrb[49].mxu1 }
 0x799   : > { %v18984_v42 = vadd.f32 %v18983_v31, %v18982_v9  ;;  %v18985_v34 = vpop.f32.mrb[50].mxu1  ;;  %v19090_v7 = vpop.f32.mrb[64].mxu0 }
 0x79a   : > { %v18986_v39 = vpop.f32.mrb[51].mxu1  ;;  %v19091_v19 = vpop.f32.mrb[65].mxu0 }
 0x79b   : > { %v13029_v2 = vadd.f32 %v18984_v42, %v24050_v46  ;;  %v18987_v41 = vadd.f32 %v18986_v39, %v18985_v34  ;;  %v19092_v57 = vadd.f32 %v19091_v19, %v19090_v7  ;;  %v19093_v16 = vpop.f32.mrb[66].mxu0 }
 0x79c   : > { %v19094_v27 = vpop.f32.mrb[67].mxu0 }
 0x79d   : > { %v13032_v44 = vadd.f32 %v18987_v41, %v24053_v38  ;;  %v19095_v48 = vadd.f32 %v19094_v27, %v19093_v16  ;;  %v13094_v6 = vadd.f32 %v19024_v61, %v13029_v2 }
 0x79f   : > { %v19044_v53 = vpop.f32.mrb[52].mxu1  ;;  %v13097_v5 = vadd.f32 %v19027_v62, %v13032_v44 }
 0x7a0   : > { %v19045_v22 = vpop.f32.mrb[53].mxu1 }
 0x7a1   : > { %v19046_v30 = vadd.f32 %v19045_v22, %v19044_v53  ;;  %v19047_v28 = vpop.f32.mrb[54].mxu1  ;;  %v19096_v54 = vpop.f32.mrb[68].mxu0 }
 0x7a2   : > { %v19048_v56 = vpop.f32.mrb[55].mxu1  ;;  %v19097_v17 = vpop.f32.mrb[69].mxu0 }
 0x7a3   : > { %v13135_v36 = vadd.f32 %v19046_v30, %v13070_v52  ;;  %v19049_v58 = vadd.f32 %v19048_v56, %v19047_v28  ;;  %v19098_v24 = vadd.f32 %v19097_v17, %v19096_v54  ;;  %v19099_v46 = vpop.f32.mrb[70].mxu0 }
 0x7a4   : > { %v19100_v63 = vpop.f32.mrb[71].mxu0 }
 0x7a5   : > { %v13138_v0 = vadd.f32 %v19049_v58, %v13073_v33  ;;  %v19101_v49 = vadd.f32 %v19100_v63, %v19099_v46  ;;  %v13200_v3 = vadd.f32 %v19086_v10, %v13135_v36 }
 0x7a7   : > { %v19050_v37 = vpop.f32.mrb[56].mxu1  ;;  %v13203_v38 = vadd.f32 %v19089_v11, %v13138_v0 }
 0x7a8   : > { %v19051_v26 = vpop.f32.mrb[57].mxu1 }
 0x7a9   : > { %v19052_v15 = vadd.f32 %v19051_v26, %v19050_v37  ;;  %v19053_v40 = vpop.f32.mrb[58].mxu1  ;;  %v19102_v13 = vpop.f32.mrb[72].mxu0 }
 0x7aa   : > { %v19054_v61 = vpop.f32.mrb[59].mxu1  ;;  %v19103_v50 = vpop.f32.mrb[73].mxu0 }
 0x7ab   : > { %v13143_v29 = vadd.f32 %v19052_v15, %v13078_v14  ;;  %v19055_v59 = vadd.f32 %v19054_v61, %v19053_v40  ;;  %v19104_v62 = vadd.f32 %v19103_v50, %v19102_v13  ;;  %v19105_v4 = vpop.f32.mrb[74].mxu0 }
 0x7ac   : > { %v19106_v52 = vpop.f32.mrb[75].mxu0 }
 0x7ad   : > { %v13146_v51 = vadd.f32 %v19055_v59, %v13081_v55  ;;  %v19107_v12 = vadd.f32 %v19106_v52, %v19105_v4  ;;  %v13208_v43 = vadd.f32 %v19092_v57, %v13143_v29 }
 0x7af   : > { %v19056_v35 = vpop.f32.mrb[64].mxu1  ;;  %v13211_v33 = vadd.f32 %v19095_v48, %v13146_v51 }
 0x7b0   : > { %v19057_v20 = vpop.f32.mrb[65].mxu1 }
 0x7b1   : > { %v19058_v21 = vadd.f32 %v19057_v20, %v19056_v35  ;;  %v19059_v25 = vpop.f32.mrb[66].mxu1  ;;  %v19164_v47 = vpop.f32.mrb[76].mxu0 }
 0x7b2   : > { %v19060_v10 = vpop.f32.mrb[67].mxu1  ;;  %v19165_v23 = vpop.f32.mrb[77].mxu0 }
 0x7b3   : > { %v13151_v60 = vadd.f32 %v19058_v21, %v13086_v45  ;;  %v19061_v18 = vadd.f32 %v19060_v10, %v19059_v25  ;;  %v19166_v11 = vadd.f32 %v19165_v23, %v19164_v47  ;;  %v19167_v9 = vpop.f32.mrb[78].mxu0 }
 0x7b4   : > { %v19168_v14 = vpop.f32.mrb[79].mxu0 }
 0x7b5   : > { %v13154_v31 = vadd.f32 %v19061_v18, %v13089_v32  ;;  %v19169_v42 = vadd.f32 %v19168_v14, %v19167_v9  ;;  %v13216_v34 = vadd.f32 %v19098_v24, %v13151_v60 }
 0x7b7   : > { %v19062_v7 = vpop.f32.mrb[68].mxu1  ;;  %v13219_v55 = vadd.f32 %v19101_v49, %v13154_v31 }
 0x7b8   : > { %v19063_v39 = vpop.f32.mrb[69].mxu1 }
 0x7b9   : > { %v19064_v19 = vadd.f32 %v19063_v39, %v19062_v7  ;;  %v19065_v2 = vpop.f32.mrb[70].mxu1  ;;  %v19170_v41 = vpop.f32.mrb[80].mxu0 }
 0x7ba   : > { %v19066_v57 = vpop.f32.mrb[71].mxu1  ;;  %v19171_v16 = vpop.f32.mrb[81].mxu0 }
 0x7bb   : > { %v13159_v27 = vadd.f32 %v19064_v19, %v13094_v6  ;;  %v19067_v44 = vadd.f32 %v19066_v57, %v19065_v2  ;;  %v19172_v48 = vadd.f32 %v19171_v16, %v19170_v41  ;;  %v19173_v53 = vpop.f32.mrb[82].mxu0 }
 0x7bc   : > { %v19174_v45 = vpop.f32.mrb[83].mxu0 }
 0x7bd   : > { %v13162_v22 = vadd.f32 %v19067_v44, %v13097_v5  ;;  %v19175_v30 = vadd.f32 %v19174_v45, %v19173_v53  ;;  %v13224_v28 = vadd.f32 %v19104_v62, %v13159_v27 }
 0x7bf   : > { %v19124_v54 = vpop.f32.mrb[72].mxu1  ;;  %v13227_v32 = vadd.f32 %v19107_v12, %v13162_v22 }
 0x7c0   : > { %v19125_v56 = vpop.f32.mrb[73].mxu1 }
 0x7c1   : > { %v19126_v17 = vadd.f32 %v19125_v56, %v19124_v54  ;;  %v19127_v36 = vpop.f32.mrb[74].mxu1  ;;  %v19176_v58 = vpop.f32.mrb[84].mxu0 }
 0x7c2   : > { %v19128_v24 = vpop.f32.mrb[75].mxu1  ;;  %v19177_v46 = vpop.f32.mrb[85].mxu0 }
 0x7c3   : > { %v13265_v63 = vadd.f32 %v19126_v17, %v13200_v3  ;;  %v19129_v0 = vadd.f32 %v19128_v24, %v19127_v36  ;;  %v19178_v49 = vadd.f32 %v19177_v46, %v19176_v58  ;;  %v19179_v37 = vpop.f32.mrb[86].mxu0 }
 0x7c4   : > { %v19180_v6 = vpop.f32.mrb[87].mxu0 }
 0x7c5   : > { %v13268_v26 = vadd.f32 %v19129_v0, %v13203_v38  ;;  %v19181_v15 = vadd.f32 %v19180_v6, %v19179_v37  ;;  %v13330_v40 = vadd.f32 %v19166_v11, %v13265_v63 }
 0x7c7   : > { %v19130_v13 = vpop.f32.mrb[76].mxu1  ;;  %v13333_v5 = vadd.f32 %v19169_v42, %v13268_v26 }
 0x7c8   : > { %v19131_v61 = vpop.f32.mrb[77].mxu1 }
 0x7c9   : > { %v19132_v50 = vadd.f32 %v19131_v61, %v19130_v13  ;;  %v19133_v29 = vpop.f32.mrb[78].mxu1  ;;  %v19182_v59 = vpop.f32.mrb[88].mxu0 }
 0x7ca   : > { %v19134_v62 = vpop.f32.mrb[79].mxu1  ;;  %v19183_v4 = vpop.f32.mrb[89].mxu0 }
 0x7cb   : > { %v13273_v52 = vadd.f32 %v19132_v50, %v13208_v43  ;;  %v19135_v51 = vadd.f32 %v19134_v62, %v19133_v29  ;;  %v19184_v12 = vadd.f32 %v19183_v4, %v19182_v59  ;;  %v19185_v35 = vpop.f32.mrb[90].mxu0 }
 0x7cc   : > { %v19186_v3 = vpop.f32.mrb[91].mxu0 }
 0x7cd   : > { %v13276_v20 = vadd.f32 %v19135_v51, %v13211_v33  ;;  %v19187_v21 = vadd.f32 %v19186_v3, %v19185_v35  ;;  %v13338_v25 = vadd.f32 %v19172_v48, %v13273_v52 }
 0x7cf   : > { %v19136_v47 = vpop.f32.mrb[80].mxu1  ;;  %v13341_v38 = vadd.f32 %v19175_v30, %v13276_v20 }
 0x7d0   : > { %v19137_v10 = vpop.f32.mrb[81].mxu1 }
 0x7d1   : > { %v19138_v23 = vadd.f32 %v19137_v10, %v19136_v47  ;;  %v19139_v60 = vpop.f32.mrb[82].mxu1  ;;  %v19244_v18 = vpop.f32.mrb[92].mxu0 }
 0x7d2   : > { %v19140_v11 = vpop.f32.mrb[83].mxu1  ;;  %v19245_v9 = vpop.f32.mrb[93].mxu0 }
 0x7d3   : > { %v13281_v14 = vadd.f32 %v19138_v23, %v13216_v34  ;;  %v19141_v31 = vadd.f32 %v19140_v11, %v19139_v60  ;;  %v19246_v42 = vadd.f32 %v19245_v9, %v19244_v18  ;;  %v19247_v7 = vpop.f32.mrb[94].mxu0 }
 0x7d4   : > { %v19248_v43 = vpop.f32.mrb[95].mxu0 }
 0x7d5   : > { %v13284_v39 = vadd.f32 %v19141_v31, %v13219_v55  ;;  %v19249_v19 = vadd.f32 %v19248_v43, %v19247_v7  ;;  %v13346_v2 = vadd.f32 %v19178_v49, %v13281_v14 }
 0x7d7   : > { %v19142_v41 = vpop.f32.mrb[84].mxu1  ;;  %v13349_v33 = vadd.f32 %v19181_v15, %v13284_v39 }
 0x7d8   : > { %v19143_v57 = vpop.f32.mrb[85].mxu1 }
 0x7d9   : > { %v19144_v16 = vadd.f32 %v19143_v57, %v19142_v41  ;;  %v19145_v27 = vpop.f32.mrb[86].mxu1  ;;  %v19250_v44 = vpop.f32.mrb[96].mxu0 }
 0x7da   : > { %v19146_v48 = vpop.f32.mrb[87].mxu1  ;;  %v19251_v53 = vpop.f32.mrb[97].mxu0 }
 0x7db   : > { %v13289_v45 = vadd.f32 %v19144_v16, %v13224_v28  ;;  %v19147_v22 = vadd.f32 %v19146_v48, %v19145_v27  ;;  %v19252_v30 = vadd.f32 %v19251_v53, %v19250_v44  ;;  %v19253_v54 = vpop.f32.mrb[98].mxu0 }
 0x7dc   : > { %v19254_v34 = vpop.f32.mrb[99].mxu0 }
 0x7dd   : > { %v13292_v56 = vadd.f32 %v19147_v22, %v13227_v32  ;;  %v19255_v17 = vadd.f32 %v19254_v34, %v19253_v54  ;;  %v13354_v36 = vadd.f32 %v19184_v12, %v13289_v45 }
 0x7df   : > { %v19204_v58 = vpop.f32.mrb[88].mxu1  ;;  %v13357_v55 = vadd.f32 %v19187_v21, %v13292_v56 }
 0x7e0   : > { %v19205_v24 = vpop.f32.mrb[89].mxu1 }
 0x7e1   : > { %v19206_v46 = vadd.f32 %v19205_v24, %v19204_v58  ;;  %v19207_v63 = vpop.f32.mrb[90].mxu1  ;;  %v19256_v0 = vpop.f32.mrb[100].mxu0 }
 0x7e2   : > { %v19208_v49 = vpop.f32.mrb[91].mxu1  ;;  %v19257_v37 = vpop.f32.mrb[101].mxu0 }
 0x7e3   : > { %v13395_v6 = vadd.f32 %v19206_v46, %v13330_v40  ;;  %v19209_v26 = vadd.f32 %v19208_v49, %v19207_v63  ;;  %v19258_v15 = vadd.f32 %v19257_v37, %v19256_v0  ;;  %v19259_v13 = vpop.f32.mrb[102].mxu0 }
 0x7e4   : > { %v19260_v28 = vpop.f32.mrb[103].mxu0 }
 0x7e5   : > { %v13398_v61 = vadd.f32 %v19209_v26, %v13333_v5  ;;  %v19261_v50 = vadd.f32 %v19260_v28, %v19259_v13  ;;  %v13460_v29 = vadd.f32 %v19246_v42, %v13395_v6 }
 0x7e7   : > { %v19210_v59 = vpop.f32.mrb[92].mxu1  ;;  %v13463_v32 = vadd.f32 %v19249_v19, %v13398_v61 }
 0x7e8   : > { %v19211_v62 = vpop.f32.mrb[93].mxu1 }
 0x7e9   : > { %v19212_v4 = vadd.f32 %v19211_v62, %v19210_v59  ;;  %v19213_v52 = vpop.f32.mrb[94].mxu1  ;;  %v19262_v51 = vpop.f32.mrb[104].mxu0 }
 0x7ea   : > { %v19214_v12 = vpop.f32.mrb[95].mxu1  ;;  %v19263_v35 = vpop.f32.mrb[105].mxu0 }
 0x7eb   : > { %v13403_v3 = vadd.f32 %v19212_v4, %v13338_v25  ;;  %v19215_v20 = vadd.f32 %v19214_v12, %v19213_v52  ;;  %v19264_v21 = vadd.f32 %v19263_v35, %v19262_v51  ;;  %v19265_v47 = vpop.f32.mrb[106].mxu0 }
 0x7ec   : > { %v19266_v40 = vpop.f32.mrb[107].mxu0 }
 0x7ed   : > { %v13406_v10 = vadd.f32 %v19215_v20, %v13341_v38  ;;  %v19267_v23 = vadd.f32 %v19266_v40, %v19265_v47  ;;  %v13468_v60 = vadd.f32 %v19252_v30, %v13403_v3  ;;  %v14029_v40 = vlaneseq }
 0x7ef   : > { %v19216_v18 = vpop.f32.mrb[96].mxu1  ;;  %v24068_v5 = vadd.f32 %v19255_v17, %v13406_v10 }
 0x7f0   : > { %v19217_v11 = vpop.f32.mrb[97].mxu1 }
 0x7f1   : > { %v19218_v9 = vadd.f32 %v19217_v11, %v19216_v18  ;;  %v19219_v14 = vpop.f32.mrb[98].mxu1  ;;  %v19324_v31 = vpop.f32.mrb[108].mxu0  ;;  %v21047_v11 = vmov 1983009808  }
 0x7f2   : > { %v19220_v42 = vpop.f32.mrb[99].mxu1  ;;  %v19325_v7 = vpop.f32.mrb[109].mxu0 }
 0x7f3   : > { %v13411_v43 = vadd.f32 %v19218_v9, %v13346_v2  ;;  %v19221_v39 = vadd.f32 %v19220_v42, %v19219_v14  ;;  %v19326_v19 = vadd.f32 %v19325_v7, %v19324_v31  ;;  %v19327_v25 = vpop.f32.mrb[110].mxu0  ;;  %v14027_v9 = vunpack.c.l.s4 %v21047_v11 }
 0x7f4   : > { %v19328_v41 = vpop.f32.mrb[111].mxu0  ;;  %v24082_v14 = vshrl.u32 %v14029_v40, 7 }
 0x7f5   : > { %v13414_v57 = vadd.f32 %v19221_v39, %v13349_v33  ;;  %v19329_v16 = vadd.f32 %v19328_v41, %v19327_v25  ;;  %v24070_v27 = vadd.f32 %v19258_v15, %v13411_v43  ;;  %v14028_v43 = vunpack.c.0.s8 %v14027_v9  ;;  %v24090_v39 = vld [vmem:[%s24575_s10] sm:$0xff] }
 0x7f7   : > { %v19222_v38 = vpop.f32.mrb[100].mxu1  ;;  %v24072_v44 = vadd.f32 %v19261_v50, %v13414_v57  ;;  %v24095_v25 = vsub.s32 %v14028_v43, %v24082_v14 }
 0x7f8   : > { %v19223_v48 = vpop.f32.mrb[101].mxu1 }
 0x7f9   : > { %v19224_v53 = vadd.f32 %v19223_v48, %v19222_v38  ;;  %v19225_v45 = vpop.f32.mrb[102].mxu1  ;;  %v19330_v22 = vpop.f32.mrb[112].mxu0 }
 0x7fa   : > { %v19226_v30 = vpop.f32.mrb[103].mxu1  ;;  %v19331_v54 = vpop.f32.mrb[113].mxu0 }
 0x7fb   : > { %v13419_v34 = vadd.f32 %v19224_v53, %v13354_v36  ;;  %v19227_v56 = vadd.f32 %v19226_v30, %v19225_v45  ;;  %v19332_v2 = vadd.f32 %v19331_v54, %v19330_v22  ;;  %v19333_v17 = vpop.f32.mrb[114].mxu0 }
 0x7fc   : > { %v19334_v58 = vpop.f32.mrb[115].mxu0 }
 0x7fd   : > { %v13422_v24 = vadd.f32 %v19227_v56, %v13357_v55  ;;  %v19335_v46 = vadd.f32 %v19334_v58, %v19333_v17  ;;  %v24074_v33 = vadd.f32 %v19264_v21, %v13419_v34 }
 0x7ff   : > { %v19284_v63 = vpop.f32.mrb[104].mxu1  ;;  %v24076_v0 = vadd.f32 %v19267_v23, %v13422_v24 }
 0x800   : > { %v19285_v49 = vpop.f32.mrb[105].mxu1 }
 0x801   : > { %v19286_v37 = vadd.f32 %v19285_v49, %v19284_v63  ;;  %v19287_v6 = vpop.f32.mrb[106].mxu1  ;;  %v19336_v26 = vpop.f32.mrb[116].mxu0 }
 0x802   : > { %v19288_v15 = vpop.f32.mrb[107].mxu1  ;;  %v19337_v13 = vpop.f32.mrb[117].mxu0 }
 0x803   : > { %v13525_v28 = vadd.f32 %v19286_v37, %v13460_v29  ;;  %v19289_v61 = vadd.f32 %v19288_v15, %v19287_v6  ;;  %v19338_v36 = vadd.f32 %v19337_v13, %v19336_v26  ;;  %v19339_v50 = vpop.f32.mrb[118].mxu0 }
 0x804   : > { %v19340_v59 = vpop.f32.mrb[119].mxu0 }
 0x805   : > { %v13528_v62 = vadd.f32 %v19289_v61, %v13463_v32  ;;  %v19341_v4 = vadd.f32 %v19340_v59, %v19339_v50  ;;  %v24078_v55 = vadd.f32 %v19326_v19, %v13525_v28 }
 0x807   : > { %v19290_v52 = vpop.f32.mrb[108].mxu1  ;;  %v24080_v51 = vadd.f32 %v19329_v16, %v13528_v62 }
 0x808   : > { %v19291_v12 = vpop.f32.mrb[109].mxu1 }
 0x809   : > { %v19292_v35 = vadd.f32 %v19291_v12, %v19290_v52  ;;  %v19293_v3 = vpop.f32.mrb[110].mxu1  ;;  %v19342_v20 = vpop.f32.mrb[120].mxu0 }
 0x80a   : > { %v19294_v21 = vpop.f32.mrb[111].mxu1  ;;  %v19343_v47 = vpop.f32.mrb[121].mxu0 }
 0x80b   : > { %v13533_v10 = vadd.f32 %v19292_v35, %v13468_v60  ;;  %v19295_v29 = vadd.f32 %v19294_v21, %v19293_v3  ;;  %v19344_v23 = vadd.f32 %v19343_v47, %v19342_v20  ;;  %v19345_v18 = vpop.f32.mrb[122].mxu0 }
 0x80c   : > { %v19346_v32 = vpop.f32.mrb[123].mxu0 }
 0x80d   : > { %v13536_v31 = vadd.f32 %v19295_v29, %v24068_v5  ;;  %v19347_v42 = vadd.f32 %v19346_v32, %v19345_v18  ;;  %v24085_v7 = vadd.f32 %v19332_v2, %v13533_v10  ;;  %v14032_v5 = vrot.slane %v24090_v39, %v24095_v25 }
 0x80f   : > { %v19296_v60 = vpop.f32.mrb[112].mxu1  ;;  %v24092_v19 = vadd.f32 %v19335_v46, %v13536_v31  ;;  %v14040_v34 = vcombine.high %v14032_v5, %v14032_v5  ;;  %v14065_v2 = vsel %vm14063_vm3, %v14032_v5, 0 }
 0x810   : > { %v19297_v41 = vpop.f32.mrb[113].mxu1 }
 0x811   : > { %v19298_v57 = vadd.f32 %v19297_v41, %v19296_v60  ;;  %v19299_v16 = vpop.f32.mrb[114].mxu1  ;;  %v19404_v38 = vpop.f32.mrb[124].mxu0  ;;  %18147 = vmatprep.subr.msk.bf16.mxu0 %vm14063_vm3, %v14040_v34 }
 0x812   : > { %v19300_v48 = vpop.f32.mrb[115].mxu1  ;;  %v19405_v53 = vpop.f32.mrb[125].mxu0  ;;  %14089 = vmatpush1.bf16.msra.mxu0 %v14065_v2 }
 0x813   : > { %v13541_v45 = vadd.f32 %v19298_v57, %v24070_v27  ;;  %v19301_v22 = vadd.f32 %v19300_v48, %v19299_v16  ;;  %v19406_v30 = vadd.f32 %v19405_v53, %v19404_v38  ;;  %v19407_v54 = vpop.f32.mrb[126].mxu0 }
 0x814   : > { %v19408_v56 = vpop.f32.mrb[127].mxu0 }
 0x815   : > { %v13544_v17 = vadd.f32 %v19301_v22, %v24072_v44  ;;  %v19409_v58 = vadd.f32 %v19408_v56, %v19407_v54  ;;  %v13606_v24 = vadd.f32 %v19338_v36, %v13541_v45 }
 0x817   : > { %v19302_v46 = vpop.f32.mrb[116].mxu1  ;;  %v13609_v63 = vadd.f32 %v19341_v4, %v13544_v17 }
 0x818   : > { %v19303_v49 = vpop.f32.mrb[117].mxu1 }
 0x819   : > { %v19304_v37 = vadd.f32 %v19303_v49, %v19302_v46  ;;  %v19305_v6 = vpop.f32.mrb[118].mxu1  ;;  %v19410_v27 = vpop.f32.mrb[128].mxu0 }
 0x81a   : > { %v19306_v26 = vpop.f32.mrb[119].mxu1  ;;  %v19411_v15 = vpop.f32.mrb[129].mxu0 }
 0x81b   : > { %v13549_v13 = vadd.f32 %v19304_v37, %v24074_v33  ;;  %v19307_v28 = vadd.f32 %v19306_v26, %v19305_v6  ;;  %v19412_v61 = vadd.f32 %v19411_v15, %v19410_v27  ;;  %v19413_v50 = vpop.f32.mrb[130].mxu0 }
 0x81c   : > { %v19414_v59 = vpop.f32.mrb[131].mxu0 }
 0x81d   : > { %v13552_v44 = vadd.f32 %v19307_v28, %v24076_v0  ;;  %v19415_v36 = vadd.f32 %v19414_v59, %v19413_v50  ;;  %v13614_v62 = vadd.f32 %v19344_v23, %v13549_v13 }
 0x81f   : > { %v19364_v52 = vpop.f32.mrb[120].mxu1  ;;  %v13617_v12 = vadd.f32 %v19347_v42, %v13552_v44 }
 0x820   : > { %v19365_v35 = vpop.f32.mrb[121].mxu1 }
 0x821   : > { %v19366_v4 = vadd.f32 %v19365_v35, %v19364_v52  ;;  %v19367_v3 = vpop.f32.mrb[122].mxu1  ;;  %v19416_v20 = vpop.f32.mrb[132].mxu0 }
 0x822   : > { %v19368_v21 = vpop.f32.mrb[123].mxu1  ;;  %v19417_v47 = vpop.f32.mrb[133].mxu0 }
 0x823   : > { %v13655_v40 = vadd.f32 %v19366_v4, %v24078_v55  ;;  %v19369_v10 = vadd.f32 %v19368_v21, %v19367_v3  ;;  %v19418_v33 = vadd.f32 %v19417_v47, %v19416_v20  ;;  %v19419_v29 = vpop.f32.mrb[134].mxu0 }
 0x824   : > { %v19420_v18 = vpop.f32.mrb[135].mxu0 }
 0x825   : > { %v13658_v11 = vadd.f32 %v19369_v10, %v24080_v51  ;;  %v19421_v9 = vadd.f32 %v19420_v18, %v19419_v29  ;;  %v13720_v0 = vadd.f32 %v19406_v30, %v13655_v40 }
 0x827   : > { %v19370_v32 = vpop.f32.mrb[124].mxu1  ;;  %v13723_v23 = vadd.f32 %v19409_v58, %v13658_v11 }
 0x828   : > { %v19371_v31 = vpop.f32.mrb[125].mxu1 }
 0x829   : > { %v19372_v42 = vadd.f32 %v19371_v31, %v19370_v32  ;;  %v19373_v43 = vpop.f32.mrb[126].mxu1  ;;  %v19422_v60 = vpop.f32.mrb[136].mxu0 }
 0x82a   : > { %v19374_v41 = vpop.f32.mrb[127].mxu1  ;;  %v19423_v57 = vpop.f32.mrb[137].mxu0 }
 0x82b   : > { %v13663_v16 = vadd.f32 %v19372_v42, %v24085_v7  ;;  %v19375_v38 = vadd.f32 %v19374_v41, %v19373_v43  ;;  %v19424_v55 = vadd.f32 %v19423_v57, %v19422_v60  ;;  %v19425_v5 = vpop.f32.mrb[138].mxu0 }
 0x82c   : > { %v19426_v48 = vpop.f32.mrb[139].mxu0 }
 0x82d   : > { %v13666_v53 = vadd.f32 %v19375_v38, %v24092_v19  ;;  %v19427_v45 = vadd.f32 %v19426_v48, %v19425_v5  ;;  %v13728_v51 = vadd.f32 %v19412_v61, %v13663_v16 }
 0x82f   : > { %v19376_v22 = vpop.f32.mrb[128].mxu1  ;;  %v24109_v30 = vadd.f32 %v19415_v36, %v13666_v53 }
 0x830   : > { %v19377_v54 = vpop.f32.mrb[129].mxu1 }
 0x831   : > { %v19378_v34 = vadd.f32 %v19377_v54, %v19376_v22  ;;  %v19379_v56 = vpop.f32.mrb[130].mxu1  ;;  %v19484_v2 = vpop.f32.mrb[140].mxu0 }
 0x832   : > { %v19380_v17 = vpop.f32.mrb[131].mxu1  ;;  %v19485_v58 = vpop.f32.mrb[141].mxu0 }
 0x833   : > { %v13671_v46 = vadd.f32 %v19378_v34, %v13606_v24  ;;  %v19381_v49 = vadd.f32 %v19380_v17, %v19379_v56  ;;  %v19486_v7 = vadd.f32 %v19485_v58, %v19484_v2  ;;  %v19487_v37 = vpop.f32.mrb[142].mxu0 }
 0x834   : > { %v19488_v6 = vpop.f32.mrb[143].mxu0 }
 0x835   : > { %v13674_v27 = vadd.f32 %v19381_v49, %v13609_v63  ;;  %v19489_v26 = vadd.f32 %v19488_v6, %v19487_v37  ;;  %v24111_v15 = vadd.f32 %v19418_v33, %v13671_v46 }
 0x837   : > { %v19382_v19 = vpop.f32.mrb[132].mxu1  ;;  %v24113_v13 = vadd.f32 %v19421_v9, %v13674_v27 }
 0x838   : > { %v19383_v28 = vpop.f32.mrb[133].mxu1 }
 0x839   : > { %v19384_v61 = vadd.f32 %v19383_v28, %v19382_v19  ;;  %v19385_v50 = vpop.f32.mrb[134].mxu1  ;;  %v19490_v59 = vpop.f32.mrb[144].mxu0 }
 0x83a   : > { %v19386_v44 = vpop.f32.mrb[135].mxu1  ;;  %v19491_v36 = vpop.f32.mrb[145].mxu0 }
 0x83b   : > { %v13679_v52 = vadd.f32 %v19384_v61, %v13614_v62  ;;  %v19387_v35 = vadd.f32 %v19386_v44, %v19385_v50  ;;  %v19492_v24 = vadd.f32 %v19491_v36, %v19490_v59  ;;  %v19493_v4 = vpop.f32.mrb[146].mxu0 }
 0x83c   : > { %v19494_v3 = vpop.f32.mrb[147].mxu0 }
 0x83d   : > { %v13682_v20 = vadd.f32 %v19387_v35, %v13617_v12  ;;  %v19495_v21 = vadd.f32 %v19494_v3, %v19493_v4  ;;  %v24115_v63 = vadd.f32 %v19424_v55, %v13679_v52 }
 0x83f   : > { %v19444_v47 = vpop.f32.mrb[136].mxu1  ;;  %v24117_v40 = vadd.f32 %v19427_v45, %v13682_v20 }
 0x840   : > { %v19445_v10 = vpop.f32.mrb[137].mxu1 }
 0x841   : > { %v19446_v33 = vadd.f32 %v19445_v10, %v19444_v47  ;;  %v19447_v29 = vpop.f32.mrb[138].mxu1  ;;  %v19496_v18 = vpop.f32.mrb[148].mxu0 }
 0x842   : > { %v19448_v11 = vpop.f32.mrb[139].mxu1  ;;  %v19497_v9 = vpop.f32.mrb[149].mxu0 }
 0x843   : > { %v13785_v32 = vadd.f32 %v19446_v33, %v13720_v0  ;;  %v19449_v31 = vadd.f32 %v19448_v11, %v19447_v29  ;;  %v19498_v62 = vadd.f32 %v19497_v9, %v19496_v18  ;;  %v19499_v42 = vpop.f32.mrb[150].mxu0 }
 0x844   : > { %v19500_v43 = vpop.f32.mrb[151].mxu0 }
 0x845   : > { %v13850_v60 = vadd.f32 %v19486_v7, %v13785_v32  ;;  %v13788_v41 = vadd.f32 %v19449_v31, %v13723_v23  ;;  %v19501_v12 = vadd.f32 %v19500_v43, %v19499_v42 }
 0x847   : > { %v13880_v57 = vmax.f32 %v13850_v60, 0.0  ;;  %v13853_v16 = vadd.f32 %v19489_v26, %v13788_v41  ;;  %v19450_v38 = vpop.f32.mrb[140].mxu1 }
 0x848   : > { %v19451_v55 = vpop.f32.mrb[141].mxu1 }
 0x849   : > { %v13881_v5 = vmax.f32 %v13853_v16, 0.0  ;;  %v19452_v48 = vadd.f32 %v19451_v55, %v19450_v38  ;;  %v19453_v53 = vpop.f32.mrb[142].mxu1  ;;  %v19502_v45 = vpop.f32.mrb[152].mxu0  ;;  %v13888_v22 = vmin.f32 %v13880_v57, 6.0  ;;  %v20950_v38 = vld [vmem:[%s24572_s7 + $0x50] sm:$0xff]   ;;  %v20951_v55 = vld [vmem:[%s24572_s7 + $0x58] sm:$0xff]  }
 0x84a   : > { %v19454_v54 = vpop.f32.mrb[143].mxu1  ;;  %v19503_v34 = vpop.f32.mrb[153].mxu0 }
 0x84b   : > { %v13889_v56 = vmin.f32 %v13881_v5, 6.0  ;;  %v13793_v0 = vadd.f32 %v19452_v48, %v13728_v51  ;;  %v19455_v2 = vadd.f32 %v19454_v54, %v19453_v53  ;;  %v19504_v17 = vadd.f32 %v19503_v34, %v19502_v45  ;;  %v19505_v58 = vpop.f32.mrb[154].mxu0  ;;  %v20952_v5 = vld [vmem:[%s24572_s7 + $0x60] sm:$0xff]   ;;  %v20953_v48 = vld [vmem:[%s24572_s7 + $0x68] ss:$0 sps:$4 sm:$0xff]  }
 0x84c   : > { %v19506_v46 = vpop.f32.mrb[155].mxu0  ;;  %v14025_v45 = vcombine.high %v24090_v39, %v24090_v39  ;;  %v24177_v39 = vld [vmem:[%s24575_s10 + $0x28] sm:$0xff] }
 0x84d   : > { %v13858_v49 = vadd.f32 %v19492_v24, %v13793_v0  ;;  %v13796_v23 = vadd.f32 %v19455_v2, %v24109_v30  ;;  %v13896_v7 = vpack.c.bf16 %v13889_v56, %v13888_v22  ;;  %v19507_v37 = vadd.f32 %v19506_v46, %v19505_v58 }
 0x84e   : > { %v14039_v22 = vrot.slane %v14025_v45, %v24095_v25 }
 0x84f   : > { %v13882_v6 = vmax.f32 %v13858_v49, 0.0  ;;  %v13861_v27 = vadd.f32 %v19495_v21, %v13796_v23  ;;  %v19456_v26 = vpop.f32.mrb[144].mxu1  ;;  %19598 = vmatpush3.bf16.msra.mxu1 %v13896_v7 }
 0x850   : > { %v19457_v19 = vpop.f32.mrb[145].mxu1  ;;  %19599 = vmatprep.subr.bf16.mxu1 %v21045_v8  ;;  %v14041_v54 = vcombine.high %v14039_v22, %v14039_v22  ;;  %v14071_v23 = vsel %vm14063_vm3, %v14039_v22, 0 }
 0x851   : > { %v13883_v28 = vmax.f32 %v13861_v27, 0.0  ;;  %v19458_v61 = vadd.f32 %v19457_v19, %v19456_v26  ;;  %v19459_v50 = vpop.f32.mrb[146].mxu1  ;;  %v13890_v59 = vmin.f32 %v13882_v6, 6.0  ;;  %v18155_v27 = vld [vmem:[%s24575_s10 + $0x10] sm:$0xff] }
 0x852   : > { %v19460_v51 = vpop.f32.mrb[147].mxu1  ;;  %18149 = vmatprep.subr.msk.bf16.mxu0 %vm14063_vm3, %v14041_v54 }
 0x853   : > { %v13891_v44 = vmin.f32 %v13883_v28, 6.0  ;;  %v13801_v36 = vadd.f32 %v19458_v61, %v24111_v15  ;;  %v19461_v52 = vadd.f32 %v19460_v51, %v19459_v50  ;;  %v14273_v28 = vrot.slane %v18155_v27, %v24095_v25  ;;  %v24197_v61 = vld [vmem:[%s24575_s10 + $0x38] sm:$0xff] }
 0x855   : > { %v13866_v35 = vadd.f32 %v19498_v62, %v13801_v36  ;;  %v13804_v30 = vadd.f32 %v19461_v52, %v24113_v13  ;;  %v13897_v24 = vpack.c.bf16 %v13891_v44, %v13890_v59  ;;  %v14022_v62 = vld [vmem:[%s24575_s10 + $0x8] sm:$0xff]  ;;  %v14281_v59 = vcombine.high %v14273_v28, %v14273_v28 }
 0x856   : > { %v14049_v60 = vrot.slane %v14022_v62, %v24095_v25  ;;  %v14042_v0 = vcombine.high %v14022_v62, %v14022_v62  ;;  %v14266_v44 = vcombine.high %v18155_v27, %v18155_v27  ;;  %v14768_v52 = vrot.slane %v24197_v61, %v24095_v25  ;;  %v18175_v27 = vld [vmem:[%s24575_s10 + $0x30] sm:$0xff] }
 0x857   : > { %v13884_v4 = vmax.f32 %v13866_v35, 0.0  ;;  %v13869_v3 = vadd.f32 %v19501_v12, %v13804_v30  ;;  %v19462_v20 = vpop.f32.mrb[148].mxu1  ;;  %19600 = vmatpush3.bf16.msra.mxu1 %v13897_v24 }
 0x858   : > { %v19463_v21 = vpop.f32.mrb[149].mxu1  ;;  %19601 = vmatprep.subr.bf16.mxu1 %v21045_v8  ;;  %v14077_v53 = vsel %vm14063_vm3, %v14049_v60, 0  ;;  %v14056_v2 = vrot.slane %v14042_v0, %v24095_v25 }
 0x859   : > { %v13885_v47 = vmax.f32 %v13869_v3, 0.0  ;;  %v19464_v10 = vadd.f32 %v19463_v21, %v19462_v20  ;;  %v19465_v33 = vpop.f32.mrb[150].mxu1  ;;  %v13892_v18 = vmin.f32 %v13884_v4, 6.0  ;;  %v14280_v3 = vrot.slane %v14266_v44, %v24095_v25 }
 0x85a   : > { %v19466_v29 = vpop.f32.mrb[151].mxu1  ;;  %v14058_v6 = vcombine.high %v14056_v2, %v14056_v2  ;;  %v14083_v51 = vsel %vm14063_vm3, %v14056_v2, 0  ;;  %v14776_v20 = vcombine.high %v14768_v52, %v14768_v52 }
 0x85b   : > { %v13893_v11 = vmin.f32 %v13885_v47, 6.0  ;;  %v13809_v15 = vadd.f32 %v19464_v10, %v24115_v63  ;;  %v19467_v9 = vadd.f32 %v19466_v29, %v19465_v33  ;;  %v14057_v63 = vcombine.high %v14049_v60, %v14049_v60 }
 0x85c   : > { %v14304_v47 = vsel %vm14063_vm3, %v14273_v28, 0  ;;  %v14282_v10 = vcombine.high %v14280_v3, %v14280_v3  ;;  %v14310_v62 = vsel %vm14063_vm3, %v14280_v3, 0  ;;  %v24309_v28 = vld [vmem:[%s24575_s10 + $0x78] sm:$0xff]  ;;  %v14761_v3 = vcombine.high %v24197_v61, %v24197_v61 }
 0x85d   : > { %v13874_v32 = vadd.f32 %v19504_v17, %v13809_v15  ;;  %v13812_v13 = vadd.f32 %v19467_v9, %v24117_v40  ;;  %v13898_v31 = vpack.c.bf16 %v13893_v11, %v13892_v18  ;;  %v20949_v40 = vld [vmem:[%s24572_s7 + $0x48] sm:$0xff]   ;;  %v14529_v17 = vrot.slane %v24177_v39, %v24095_v25 }
 0x85e   : > { %v24224_v11 = vld [vmem:[%s24575_s10 + $0x48] sm:$0xff]  ;;  %v15724_v44 = vrot.slane %v24309_v28, %v24095_v25 }
 0x85f   : > { %v13886_v42 = vmax.f32 %v13874_v32, 0.0  ;;  %v13877_v43 = vadd.f32 %v19507_v37, %v13812_v13  ;;  %19602 = vmatpush3.bf16.msra.mxu1 %v13898_v31  ;;  %v14537_v26 = vcombine.high %v14529_v17, %v14529_v17  ;;  %v14555_v4 = vsel %vm14063_vm3, %v14529_v17, 0 }
 0x860   : > { %19603 = vmatprep.subr.bf16.mxu1 %v21045_v8  ;;  %v15007_v32 = vrot.slane %v24224_v11, %v24095_v25 }
 0x861   : > { %v13887_v41 = vmax.f32 %v13877_v43, 0.0  ;;  %v13894_v12 = vmin.f32 %v13886_v42, 6.0  ;;  %v14794_v43 = vsel %vm14063_vm3, %v14768_v52, 0 }
 0x863   : > { %v13895_v57 = vmin.f32 %v13887_v41, 6.0  ;;  %v18165_v41 = vld [vmem:[%s24575_s10 + $0x20] sm:$0xff] }
 0x865   : > { %v13899_v16 = vpack.c.bf16 %v13895_v57, %v13894_v12  ;;  %v15015_v12 = vcombine.high %v15007_v32, %v15007_v32 }
 0x867   : > { %19604 = vmatpush3.bf16.msra.mxu1 %v13899_v16  ;;  %v14512_v16 = vrot.slane %v18165_v41, %v24095_v25 }
 0x868   : > { %18151 = vmatprep.subr.msk.bf16.mxu1 %vm14063_vm3, %v14057_v63 }
 0x869   : > { %v14543_v2 = vsel %vm14063_vm3, %v14512_v16, 0 }
 0x86a   : > { %19606 = vmatmul.mubr.msk.bf16.vlgmr.msra.gmra.mrb[152].mxu1 %vm1718_vm1, %v20949_v40  ;;  %v24254_v40 = vld [vmem:[%s24575_s10 + $0x58] sm:$0xff] }
 0x86b   : > { %19609 = vmatprep.mubr.msk.bf16.mxu1 %vm21046_vm0, %v21045_v8  ;;  %14171 = vmatpush1.bf16.msra.mxu1 %v14077_v53  ;;  %v15246_v53 = vrot.slane %v24254_v40, %v24095_v25 }
 0x86d   : > { %v15254_v0 = vcombine.high %v15246_v53, %v15246_v53 }
 0x872   : > { %19610 = vmatmul.mubr.msk.bf16.gmra.mrb[156].mxu1 %vm1718_vm1, %v20950_v38 }
 0x873   : > { %19613 = vmatprep.mubr.msk.bf16.mxu1 %vm21046_vm0, %v21045_v8 }
 0x87a   : > { %19614 = vmatmul.mubr.msk.bf16.gmra.mrb[160].mxu1 %vm1718_vm1, %v20951_v55 }
 0x87b   : > { %19617 = vmatprep.mubr.msk.bf16.mxu1 %vm21046_vm0, %v21045_v8 }
 0x882   : > { %19618 = vmatmul.mubr.msk.bf16.gmra.mrb[164].mxu1 %vm1718_vm1, %v20952_v5  ;;  %v14520_v5 = vcombine.high %v14512_v16, %v14512_v16 }
 0x883   : > { %19621 = vmatprep.mubr.msk.bf16.mxu1 %vm21046_vm0, %v21045_v8  ;;  %v24168_v8 = vld [vmem:[%s24575_s10 + $0x18] sm:$0xff] }
 0x884   : > { %v14290_v34 = vrot.slane %v24168_v8, %v24095_v25  ;;  %v14283_v29 = vcombine.high %v24168_v8, %v24168_v8 }
 0x886   : > { %v14298_v56 = vcombine.high %v14290_v34, %v14290_v34  ;;  %v14316_v37 = vsel %vm14063_vm3, %v14290_v34, 0  ;;  %v14297_v9 = vrot.slane %v14283_v29, %v24095_v25  ;;  %v15033_v34 = vsel %vm14063_vm3, %v15007_v32, 0 }
 0x888   : > { %18161 = vmatprep.subr.msk.bf16.mxu1 %vm14063_vm3, %v14298_v56  ;;  %v14299_v60 = vcombine.high %v14297_v9, %v14297_v9  ;;  %v14322_v55 = vsel %vm14063_vm3, %v14297_v9, 0 }
 0x88a   : > { %19622 = vmatmul.mubr.msk.bf16.gmra.mrb[168].mxu1 %vm1718_vm1, %v20953_v48  ;;  %v14505_v48 = vcombine.high %v18165_v41, %v18165_v41 }
 0x88b   : > { %14202 = vmatprep.mubr.bf16.mxu1 %v21044_v1 }
 0x88c   : > { %v14519_v56 = vrot.slane %v14505_v48, %v24095_v25 }
 0x88e   : > { %v14521_v17 = vcombine.high %v14519_v56, %v14519_v56 }
 0x93d   : > { %v13982_v58 = vpop.f32.mrb[152].mxu1 }
 0x93e   : > { %v14020_v46 = vpack.c.bf16 %v13982_v58, %v13982_v58  ;;  %v19607_v49 = vpop.f32.mrb[153].mxu1  ;;  %v14522_v58 = vcombine.high %v24177_v39, %v24177_v39 }
 0x93f   : > { %v13985_v7 = vpop.f32.mrb[154].mxu1 }
 0x940   : > { %18148 = vmatmul.mubr.msk.bf16.vlgmr.msra.gmra.mrb[32].mxu0 %vm14059_vm4, %v14020_v46  ;;  %18152 = vmatmul.mubr.msk.bf16.vlgmr.msra.gmra.mrb[60].mxu1 %vm14059_vm4, %v14020_v46  ;;  %v19608_v19 = vpop.f32.mrb[155].mxu1  ;;  %v24204_v24 = vpack.c.bf16 %v13985_v7, %v13985_v7  ;;  %v14536_v49 = vrot.slane %v14522_v58, %v24095_v25  ;;  %v14549_v7 = vsel %vm14063_vm3, %v14519_v56, 0 }
 0x941   : > { %14130 = vmatpush1.bf16.msra.mxu0 %v14071_v23  ;;  %14161 = vmatprep.mubr.bf16.mxu0 %v21044_v1  ;;  %v14751_v19 = vrot.slane %v18175_v27, %v24095_v25 }
 0x942   : > { %14410 = vmatpush1.bf16.msra.mxu1 %v14316_v37  ;;  %14441 = vmatprep.mubr.bf16.mxu1 %v21044_v1  ;;  %v15272_v37 = vsel %vm14063_vm3, %v15246_v53, 0 }
 0x943   : > { %18153 = vmatprep.subr.msk.bf16.mxu0 %vm14063_vm3, %v14058_v6  ;;  %18171 = vmatprep.subr.msk.bf16.mxu1 %vm14063_vm3, %v14537_v26  ;;  %v14538_v6 = vcombine.high %v14536_v49, %v14536_v49 }
 0x945   : > { %v13990_v50 = vpop.f32.mrb[156].mxu1 }
 0x946   : > { %v19611_v36 = vpop.f32.mrb[157].mxu1  ;;  %v24231_v13 = vpack.c.bf16 %v13990_v50, %v13990_v50  ;;  %v14561_v50 = vsel %vm14063_vm3, %v14536_v49, 0 }
 0x947   : > { %v13993_v35 = vpop.f32.mrb[158].mxu1 }
 0x948   : > { %18150 = vmatmul.mubr.msk.bf16.vlgmr.msra.gmra.mrb[36].mxu0 %vm14059_vm4, %v14020_v46  ;;  %v19612_v30 = vpop.f32.mrb[159].mxu1  ;;  %v24263_v54 = vpack.c.bf16 %v13993_v35, %v13993_v35 }
 0x949   : > { %14212 = vmatpush1.bf16.msra.mxu0 %v14083_v51  ;;  %14243 = vmatprep.mubr.bf16.mxu0 %v21044_v1  ;;  %v14759_v51 = vcombine.high %v14751_v19, %v14751_v19  ;;  %v15732_v30 = vcombine.high %v15724_v44, %v15724_v44 }
 0x94a   : > { %18157 = vmatprep.subr.msk.bf16.mxu0 %vm14063_vm3, %v14281_v59  ;;  %v14744_v59 = vcombine.high %v18175_v27, %v18175_v27 }
 0x94c   : > { %18162 = vmatmul.mubr.msk.bf16.vlgmr.msra.gmra.mrb[60].mxu1 %vm14059_vm4, %v24204_v24  ;;  %v14758_v35 = vrot.slane %v14744_v59, %v24095_v25 }
 0x94d   : > { %14649 = vmatpush1.bf16.msra.mxu1 %v14555_v4  ;;  %14680 = vmatprep.mubr.bf16.mxu1 %v21044_v1  ;;  %v24212_v21 = vpop.f32.mrb[160].mxu1 }
 0x94e   : > { %18181 = vmatprep.subr.msk.bf16.mxu1 %vm14063_vm3, %v14776_v20  ;;  %v19615_v33 = vpop.f32.mrb[161].mxu1  ;;  %v24290_v39 = vpack.c.bf16 %v24212_v21, %v24212_v21  ;;  %v14760_v4 = vcombine.high %v14758_v35, %v14758_v35  ;;  %v24336_v20 = vld [vmem:[%s24575_s10 + $0x88] sm:$0xff]  ;;  %v14775_v21 = vrot.slane %v14761_v3, %v24095_v25  ;;  %v18225_v3 = vld [vmem:[%s24575_s10 + $0x80] sm:$0xff] }
 0x94f   : > { %v24218_v18 = vpop.f32.mrb[162].mxu1  ;;  %v15750_v33 = vsel %vm14063_vm3, %v15724_v44, 0 }
 0x950   : > { %18154 = vmatmul.mubr.msk.bf16.vlgmr.msra.gmra.mrb[40].mxu0 %vm14059_vm4, %v14020_v46  ;;  %v19616_v15 = vpop.f32.mrb[163].mxu1  ;;  %v24281_v46 = vld [vmem:[%s24575_s10 + $0x68] sm:$0xff]  ;;  %v24318_v36 = vpack.c.bf16 %v24218_v18, %v24218_v18  ;;  %v14777_v29 = vcombine.high %v14775_v21, %v14775_v21  ;;  %v18185_v18 = vld [vmem:[%s24575_s10 + $0x40] sm:$0xff]  ;;  %v14800_v32 = vsel %vm14063_vm3, %v14775_v21, 0 }
 0x951   : > { %14328 = vmatpush1.bf16.msra.mxu0 %v14304_v47  ;;  %14359 = vmatprep.mubr.bf16.mxu0 %v21044_v1  ;;  %v15485_v23 = vrot.slane %v24281_v46, %v24095_v25  ;;  %v15963_v47 = vrot.slane %v24336_v20, %v24095_v25  ;;  %v14990_v9 = vrot.slane %v18185_v18, %v24095_v25 }
 0x952   : > { %18159 = vmatprep.subr.msk.bf16.mxu0 %vm14063_vm3, %v14282_v10  ;;  %v14788_v10 = vsel %vm14063_vm3, %v14758_v35, 0  ;;  %v15717_v35 = vcombine.high %v24309_v28, %v24309_v28  ;;  %v15946_v28 = vrot.slane %v18225_v3, %v24095_v25 }
 0x953   : > { %v15493_v26 = vcombine.high %v15485_v23, %v15485_v23  ;;  %v15511_v52 = vsel %vm14063_vm3, %v15485_v23, 0  ;;  %v15971_v15 = vcombine.high %v15963_v47, %v15963_v47 }
 0x955   : > { %v24233_v31 = vpop.f32.mrb[164].mxu1 }
 0x956   : > { %v19619_v42 = vpop.f32.mrb[165].mxu1  ;;  %v24345_v61 = vpack.c.bf16 %v24233_v31, %v24233_v31  ;;  %v14983_v31 = vcombine.high %v18185_v18, %v18185_v18  ;;  %v15956_v18 = vcombine.high %v24336_v20, %v24336_v20 }
 0x957   : > { %v24240_v57 = vpop.f32.mrb[166].mxu1  ;;  %v15989_v42 = vsel %vm14063_vm3, %v15963_v47, 0  ;;  %v15954_v47 = vcombine.high %v15946_v28, %v15946_v28 }
 0x958   : > { %18158 = vmatmul.mubr.msk.bf16.vlgmr.msra.gmra.mrb[32].mxu0 %vm14059_vm4, %v24204_v24  ;;  %18172 = vmatmul.mubr.msk.bf16.vlgmr.msra.gmra.mrb[60].mxu1 %vm14059_vm4, %v24231_v13  ;;  %v19620_v63 = vpop.f32.mrb[167].mxu1 }
 0x959   : > { %14369 = vmatpush1.bf16.msra.mxu0 %v14310_v62  ;;  %14400 = vmatprep.mubr.bf16.mxu0 %v21044_v1  ;;  %v24366_v62 = vpack.c.bf16 %v24240_v57, %v24240_v57 }
 0x95a   : > { %14888 = vmatpush1.bf16.msra.mxu1 %v14794_v43  ;;  %14919 = vmatprep.mubr.bf16.mxu1 %v21044_v1  ;;  %v14997_v43 = vrot.slane %v14983_v31, %v24095_v25 }
 0x95b   : > { %18163 = vmatprep.subr.msk.bf16.mxu0 %vm14063_vm3, %v14299_v60  ;;  %18191 = vmatprep.subr.msk.bf16.mxu1 %vm14063_vm3, %v15015_v12  ;;  %v15021_v60 = vsel %vm14063_vm3, %v14990_v9, 0  ;;  %v15000_v12 = vcombine.high %v24224_v11, %v24224_v11  ;;  %v18195_v11 = vld [vmem:[%s24575_s10 + $0x50] sm:$0xff] }
 0x95c   : > { %v14999_v41 = vcombine.high %v14997_v43, %v14997_v43  ;;  %v15027_v16 = vsel %vm14063_vm3, %v14997_v43, 0  ;;  %v15222_v53 = vcombine.high %v18195_v11, %v18195_v11 }
 0x95d   : > { %v24256_v38 = vpop.f32.mrb[168].mxu1  ;;  %v15014_v57 = vrot.slane %v15000_v12, %v24095_v25 }
 0x95e   : > { %v19623_v45 = vpop.f32.mrb[169].mxu1  ;;  %v24385_v63 = vpack.c.bf16 %v24256_v38, %v24256_v38  ;;  %v15229_v38 = vrot.slane %v18195_v11, %v24095_v25 }
 0x95f   : > { %v14017_v22 = vpop.f32.mrb[170].mxu1  ;;  %v15236_v45 = vrot.slane %v15222_v53, %v24095_v25 }
 0x960   : > { %18160 = vmatmul.mubr.msk.bf16.vlgmr.msra.gmra.mrb[36].mxu0 %vm14059_vm4, %v24204_v24  ;;  %v19624_v8 = vpop.f32.mrb[171].mxu1  ;;  %v15237_v48 = vcombine.high %v15229_v38, %v15229_v38  ;;  %v15260_v22 = vsel %vm14063_vm3, %v15229_v38, 0 }
 0x961   : > { %14451 = vmatpush1.bf16.msra.mxu0 %v14322_v55  ;;  %14482 = vmatprep.mubr.bf16.mxu0 %v21044_v1  ;;  %v15016_v55 = vcombine.high %v15014_v57, %v15014_v57  ;;  %v15239_v8 = vcombine.high %v24254_v40, %v24254_v40  ;;  %v15266_v56 = vsel %vm14063_vm3, %v15236_v45, 0 }
 0x962   : > { %18167 = vmatprep.subr.msk.bf16.mxu0 %vm14063_vm3, %v14520_v5  ;;  %v15039_v5 = vsel %vm14063_vm3, %v15014_v57, 0 }
 0x964   : > { %18182 = vmatmul.mubr.msk.bf16.vlgmr.msra.gmra.mrb[60].mxu1 %vm14059_vm4, %v24263_v54 }
 0x965   : > { %15127 = vmatpush1.bf16.msra.mxu1 %v15033_v34  ;;  %15158 = vmatprep.mubr.bf16.mxu1 %v21044_v1  ;;  %v15253_v34 = vrot.slane %v15239_v8, %v24095_v25 }
 0x966   : > { %18201 = vmatprep.subr.msk.bf16.mxu1 %vm14063_vm3, %v15254_v0 }
 0x967   : > { %v15255_v0 = vcombine.high %v15253_v34, %v15253_v34 }
 0x968   : > { %18164 = vmatmul.mubr.msk.bf16.vlgmr.msra.gmra.mrb[40].mxu0 %vm14059_vm4, %v24204_v24  ;;  %v14782_v24 = vsel %vm14063_vm3, %v14751_v19, 0  ;;  %v18215_v19 = vld [vmem:[%s24575_s10 + $0x70] sm:$0xff] }
 0x969   : > { %14567 = vmatpush1.bf16.msra.mxu0 %v14543_v2  ;;  %14598 = vmatprep.mubr.bf16.mxu0 %v21044_v1  ;;  %v18205_v2 = vld [vmem:[%s24575_s10 + $0x60] sm:$0xff]  ;;  %v15700_v59 = vcombine.high %v18215_v19, %v18215_v19 }
 0x96a   : > { %18169 = vmatprep.subr.msk.bf16.mxu0 %vm14063_vm3, %v14521_v17  ;;  %v15468_v40 = vrot.slane %v18205_v2, %v24095_v25  ;;  %v15278_v17 = vsel %vm14063_vm3, %v15253_v34, 0  ;;  %v15461_v49 = vcombine.high %v18205_v2, %v18205_v2 }
 0x96b   : > { %v15714_v44 = vrot.slane %v15700_v59, %v24095_v25 }
 0x96c   : > { %v15476_v58 = vcombine.high %v15468_v40, %v15468_v40  ;;  %v15475_v23 = vrot.slane %v15461_v49, %v24095_v25 }
 0x96e   : > { %v15505_v27 = vsel %vm14063_vm3, %v15475_v23, 0 }
 0x970   : > { %18168 = vmatmul.mubr.msk.bf16.vlgmr.msra.gmra.mrb[32].mxu0 %vm14059_vm4, %v24231_v13  ;;  %18192 = vmatmul.mubr.msk.bf16.vlgmr.msra.gmra.mrb[60].mxu1 %vm14059_vm4, %v24290_v39 }
 0x971   : > { %14608 = vmatpush1.bf16.msra.mxu0 %v14549_v7  ;;  %14639 = vmatprep.mubr.bf16.mxu0 %v21044_v1  ;;  %v15477_v7 = vcombine.high %v15475_v23, %v15475_v23 }
 0x972   : > { %15366 = vmatpush1.bf16.msra.mxu1 %v15272_v37  ;;  %15397 = vmatprep.mubr.bf16.mxu1 %v21044_v1  ;;  %v15478_v37 = vcombine.high %v24281_v46, %v24281_v46  ;;  %v15707_v46 = vrot.slane %v18215_v19, %v24095_v25 }
 0x973   : > { %18173 = vmatprep.subr.msk.bf16.mxu0 %vm14063_vm3, %v14538_v6  ;;  %18211 = vmatprep.subr.msk.bf16.mxu1 %vm14063_vm3, %v15493_v26 }
 0x974   : > { %v15492_v6 = vrot.slane %v15478_v37, %v24095_v25 }
 0x976   : > { %v15494_v26 = vcombine.high %v15492_v6, %v15492_v6 }
 0x978   : > { %18170 = vmatmul.mubr.msk.bf16.vlgmr.msra.gmra.mrb[36].mxu0 %vm14059_vm4, %v24231_v13 }
 0x979   : > { %14690 = vmatpush1.bf16.msra.mxu0 %v14561_v50  ;;  %14721 = vmatprep.mubr.bf16.mxu0 %v21044_v1  ;;  %v15517_v50 = vsel %vm14063_vm3, %v15492_v6, 0 }
 0x97a   : > { %18177 = vmatprep.subr.msk.bf16.mxu0 %vm14063_vm3, %v14759_v51  ;;  %v15715_v51 = vcombine.high %v15707_v46, %v15707_v46 }
 0x97c   : > { %18202 = vmatmul.mubr.msk.bf16.vlgmr.msra.gmra.mrb[60].mxu1 %vm14059_vm4, %v24318_v36 }
 0x97d   : > { %15605 = vmatpush1.bf16.msra.mxu1 %v15511_v52  ;;  %15636 = vmatprep.mubr.bf16.mxu1 %v21044_v1  ;;  %v15716_v52 = vcombine.high %v15714_v44, %v15714_v44 }
 0x97e   : > { %18221 = vmatprep.subr.msk.bf16.mxu1 %vm14063_vm3, %v15732_v30  ;;  %v15731_v30 = vrot.slane %v15717_v35, %v24095_v25 }
 0x980   : > { %18174 = vmatmul.mubr.msk.bf16.vlgmr.msra.gmra.mrb[40].mxu0 %vm14059_vm4, %v24231_v13  ;;  %v14998_v13 = vcombine.high %v14990_v9, %v14990_v9  ;;  %v15756_v21 = vsel %vm14063_vm3, %v15731_v30, 0 }
 0x981   : > { %14806 = vmatpush1.bf16.msra.mxu0 %v14782_v24  ;;  %14837 = vmatprep.mubr.bf16.mxu0 %v21044_v1  ;;  %v15744_v24 = vsel %vm14063_vm3, %v15714_v44, 0 }
 0x982   : > { %18179 = vmatprep.subr.msk.bf16.mxu0 %vm14063_vm3, %v14760_v4  ;;  %v15733_v4 = vcombine.high %v15731_v30, %v15731_v30 }
 0x988   : > { %18178 = vmatmul.mubr.msk.bf16.vlgmr.msra.gmra.mrb[32].mxu0 %vm14059_vm4, %v24263_v54  ;;  %18212 = vmatmul.mubr.msk.bf16.vlgmr.msra.gmra.mrb[60].mxu1 %vm14059_vm4, %v24345_v61 }
 0x989   : > { %14847 = vmatpush1.bf16.msra.mxu0 %v14788_v10  ;;  %14878 = vmatprep.mubr.bf16.mxu0 %v21044_v1 }
 0x98a   : > { %15844 = vmatpush1.bf16.msra.mxu1 %v15750_v33  ;;  %15875 = vmatprep.mubr.bf16.mxu1 %v21044_v1  ;;  %v15977_v33 = vsel %vm14063_vm3, %v15946_v28, 0 }
 0x98b   : > { %18183 = vmatprep.subr.msk.bf16.mxu0 %vm14063_vm3, %v14777_v29  ;;  %18231 = vmatprep.subr.msk.bf16.mxu1 %vm14063_vm3, %v15971_v15  ;;  %v15970_v15 = vrot.slane %v15956_v18, %v24095_v25 }
 0x98d   : > { %v15995_v20 = vsel %vm14063_vm3, %v15970_v15, 0 }
 0x990   : > { %18180 = vmatmul.mubr.msk.bf16.vlgmr.msra.gmra.mrb[36].mxu0 %vm14059_vm4, %v24263_v54 }
 0x991   : > { %14929 = vmatpush1.bf16.msra.mxu0 %v14800_v32  ;;  %14960 = vmatprep.mubr.bf16.mxu0 %v21044_v1  ;;  %v15972_v32 = vcombine.high %v15970_v15, %v15970_v15 }
 0x992   : > { %18187 = vmatprep.subr.msk.bf16.mxu0 %vm14063_vm3, %v14998_v13 }
 0x994   : > { %18222 = vmatmul.mubr.msk.bf16.vlgmr.msra.gmra.mrb[60].mxu1 %vm14059_vm4, %v24366_v62 }
 0x995   : > { %16083 = vmatpush1.bf16.msra.mxu1 %v15989_v42  ;;  %16114 = vmatprep.mubr.bf16.mxu1 %v21044_v1 }
 0x998   : > { %18184 = vmatmul.mubr.msk.bf16.vlgmr.msra.gmra.mrb[40].mxu0 %vm14059_vm4, %v24263_v54  ;;  %v15238_v54 = vcombine.high %v15236_v45, %v15236_v45  ;;  %v24498_v45 = vpop.permute.xlu0 %16255 }
 0x999   : > { %15045 = vmatpush1.bf16.msra.mxu0 %v15021_v60  ;;  %15076 = vmatprep.mubr.bf16.mxu0 %v21044_v1 }
 0x99a   : > { %18189 = vmatprep.subr.msk.bf16.mxu0 %vm14063_vm3, %v14999_v41 }
 0x9a0   : > { %18188 = vmatmul.mubr.msk.bf16.vlgmr.msra.gmra.mrb[32].mxu0 %vm14059_vm4, %v24290_v39  ;;  %18232 = vmatmul.mubr.msk.bf16.vlgmr.msra.gmra.mrb[60].mxu1 %vm14059_vm4, %v24385_v63 }
 0x9a1   : > { %15086 = vmatpush1.bf16.msra.mxu0 %v15027_v16  ;;  %15117 = vmatprep.mubr.bf16.mxu0 %v21044_v1 }
 0x9a2   : > { %18193 = vmatprep.subr.msk.bf16.mxu0 %vm14063_vm3, %v15016_v55 }
 0x9a8   : > { %18190 = vmatmul.mubr.msk.bf16.vlgmr.msra.gmra.mrb[36].mxu0 %vm14059_vm4, %v24290_v39 }
 0x9a9   : > { %15168 = vmatpush1.bf16.msra.mxu0 %v15039_v5  ;;  %15199 = vmatprep.mubr.bf16.mxu0 %v21044_v1 }
 0x9aa   : > { %18197 = vmatprep.subr.msk.bf16.mxu0 %vm14063_vm3, %v15237_v48 }
 0x9b0   : > { %18194 = vmatmul.mubr.msk.bf16.vlgmr.msra.gmra.mrb[40].mxu0 %vm14059_vm4, %v24290_v39  ;;  %v15499_v39 = vsel %vm14063_vm3, %v15468_v40, 0 }
 0x9b1   : > { %15284 = vmatpush1.bf16.msra.mxu0 %v15260_v22  ;;  %15315 = vmatprep.mubr.bf16.mxu0 %v21044_v1 }
 0x9b2   : > { %18199 = vmatprep.subr.msk.bf16.mxu0 %vm14063_vm3, %v15238_v54 }
 0x9b8   : > { %18198 = vmatmul.mubr.msk.bf16.vlgmr.msra.gmra.mrb[32].mxu0 %vm14059_vm4, %v24318_v36 }
 0x9b9   : > { %15325 = vmatpush1.bf16.msra.mxu0 %v15266_v56  ;;  %15356 = vmatprep.mubr.bf16.mxu0 %v21044_v1 }
 0x9ba   : > { %18203 = vmatprep.subr.msk.bf16.mxu0 %vm14063_vm3, %v15255_v0 }
 0x9c0   : > { %18200 = vmatmul.mubr.msk.bf16.vlgmr.msra.gmra.mrb[36].mxu0 %vm14059_vm4, %v24318_v36 }
 0x9c1   : > { %15407 = vmatpush1.bf16.msra.mxu0 %v15278_v17  ;;  %15438 = vmatprep.mubr.bf16.mxu0 %v21044_v1 }
 0x9c2   : > { %18207 = vmatprep.subr.msk.bf16.mxu0 %vm14063_vm3, %v15476_v58 }
 0x9c8   : > { %18204 = vmatmul.mubr.msk.bf16.vlgmr.msra.gmra.mrb[40].mxu0 %vm14059_vm4, %v24318_v36  ;;  %v15738_v36 = vsel %vm14063_vm3, %v15707_v46, 0 }
 0x9c9   : > { %15523 = vmatpush1.bf16.msra.mxu0 %v15499_v39  ;;  %15554 = vmatprep.mubr.bf16.mxu0 %v21044_v1 }
 0x9ca   : > { %18209 = vmatprep.subr.msk.bf16.mxu0 %vm14063_vm3, %v15477_v7 }
 0x9d0   : > { %18208 = vmatmul.mubr.msk.bf16.vlgmr.msra.gmra.mrb[32].mxu0 %vm14059_vm4, %v24345_v61 }
 0x9d1   : > { %15564 = vmatpush1.bf16.msra.mxu0 %v15505_v27  ;;  %15595 = vmatprep.mubr.bf16.mxu0 %v21044_v1 }
 0x9d2   : > { %18213 = vmatprep.subr.msk.bf16.mxu0 %vm14063_vm3, %v15494_v26 }
 0x9d8   : > { %18210 = vmatmul.mubr.msk.bf16.vlgmr.msra.gmra.mrb[36].mxu0 %vm14059_vm4, %v24345_v61 }
 0x9d9   : > { %15646 = vmatpush1.bf16.msra.mxu0 %v15517_v50  ;;  %15677 = vmatprep.mubr.bf16.mxu0 %v21044_v1 }
 0x9da   : > { %18217 = vmatprep.subr.msk.bf16.mxu0 %vm14063_vm3, %v15715_v51 }
 0x9e0   : > { %18214 = vmatmul.mubr.msk.bf16.vlgmr.msra.gmra.mrb[40].mxu0 %vm14059_vm4, %v24345_v61  ;;  %v15939_v61 = vcombine.high %v18225_v3, %v18225_v3 }
 0x9e1   : > { %15762 = vmatpush1.bf16.msra.mxu0 %v15738_v36  ;;  %15793 = vmatprep.mubr.bf16.mxu0 %v21044_v1 }
 0x9e2   : > { %18219 = vmatprep.subr.msk.bf16.mxu0 %vm14063_vm3, %v15716_v52  ;;  %v15953_v10 = vrot.slane %v15939_v61, %v24095_v25 }
 0x9e4   : > { %v15955_v29 = vcombine.high %v15953_v10, %v15953_v10  ;;  %v15983_v9 = vsel %vm14063_vm3, %v15953_v10, 0 }
 0x9e8   : > { %18218 = vmatmul.mubr.msk.bf16.vlgmr.msra.gmra.mrb[32].mxu0 %vm14059_vm4, %v24366_v62 }
 0x9e9   : > { %15803 = vmatpush1.bf16.msra.mxu0 %v15744_v24  ;;  %15834 = vmatprep.mubr.bf16.mxu0 %v21044_v1 }
 0x9ea   : > { %18223 = vmatprep.subr.msk.bf16.mxu0 %vm14063_vm3, %v15733_v4 }
 0x9f0   : > { %18220 = vmatmul.mubr.msk.bf16.vlgmr.msra.gmra.mrb[36].mxu0 %vm14059_vm4, %v24366_v62 }
 0x9f1   : > { %15885 = vmatpush1.bf16.msra.mxu0 %v15756_v21  ;;  %15916 = vmatprep.mubr.bf16.mxu0 %v21044_v1 }
 0x9f2   : > { %18227 = vmatprep.subr.msk.bf16.mxu0 %vm14063_vm3, %v15954_v47 }
 0x9f8   : > { %18224 = vmatmul.mubr.msk.bf16.vlgmr.msra.gmra.mrb[40].mxu0 %vm14059_vm4, %v24366_v62 }
 0x9f9   : > { %16001 = vmatpush1.bf16.msra.mxu0 %v15977_v33  ;;  %16032 = vmatprep.mubr.bf16.mxu0 %v21044_v1 }
 0x9fa   : > { %18229 = vmatprep.subr.msk.bf16.mxu0 %vm14063_vm3, %v15955_v29 }
 0xa00   : > { %18228 = vmatmul.mubr.msk.bf16.vlgmr.msra.gmra.mrb[32].mxu0 %vm14059_vm4, %v24385_v63 }
 0xa01   : > { %16042 = vmatpush1.bf16.msra.mxu0 %v15983_v9  ;;  %16073 = vmatprep.mubr.bf16.mxu0 %v21044_v1 }
 0xa02   : > { %18233 = vmatprep.subr.msk.bf16.mxu0 %vm14063_vm3, %v15972_v32 }
 0xa08   : > { %18230 = vmatmul.mubr.msk.bf16.vlgmr.msra.gmra.mrb[36].mxu0 %vm14059_vm4, %v24385_v63 }
 0xa09   : > { %16124 = vmatpush1.bf16.msra.mxu0 %v15995_v20  ;;  %16155 = vmatprep.mubr.bf16.mxu0 %v21044_v1 }
 0xa10   : > { %18234 = vmatmul.mubr.msk.bf16.vlgmr.msra.gmra.mrb[40].mxu0 %vm14059_vm4, %v24385_v63 }
 0xa73   : > { %v16116_v25 = vpop.f32.mrb[60].mxu1 }
 0xa74   : > { %v16176_v13 = vand.u32 2147483647, %v16116_v25  ;;  %v16118_v31 = vpop.f32.mrb[61].mxu1  ;;  %vm16208_vm5 = vcmp.ge.f32.partialorder %v16116_v25, 0.0 }
 0xa75   : > { %v16177_v62 = vand.u32 2147483647, %v16118_v31  ;;  %v16120_v42 = vpop.f32.mrb[62].mxu1  ;;  %vm16209_vm6 = vcmp.ge.f32.partialorder %v16118_v31, 0.0 }
 0xa76   : > { %v16184_v43 = vsub.f32 0.0, %v16176_v13  ;;  %v16121_v60 = vpop.f32.mrb[63].mxu1 }
 0xa77   : > { %v16185_v41 = vsub.f32 0.0, %v16177_v62 }
 0xa78   : > { %v16196_v12 = vmul.f32 1.442695, %v16184_v43 }
 0xa79   : > { %v16198_v57 = vmul.f32 1.442695, %v16185_v41 }
 0xa7a   : > { %20972 = vpow2.f32 %v16196_v12 }
 0xa7b   : > { %20974 = vpow2.f32 %v16198_v57 }
 0xa84   : > { %v20973_v16 = vpop.eup %20972 }
 0xa85   : > { %v20975_v55 = vpop.eup %20974  ;;  %v16224_v11 = vadd.f32 1.0, %v20973_v16  ;;  %v16216_v38 = vsel %vm16208_vm5, 1.0, %v20973_v16 }
 0xa86   : > { %v16225_v1 = vadd.f32 1.0, %v20975_v55  ;;  %v16217_v53 = vsel %vm16209_vm6, 1.0, %v20975_v55 }
 0xa87   : > { %20976 = vrcp.f32 %v16224_v11 }
 0xa88   : > { %20978 = vrcp.f32 %v16225_v1 }
 0xa91   : > { %v20977_v63 = vpop.eup %20976 }
 0xa92   : > { %v20979_v5 = vpop.eup %20978  ;;  %v16237_v48 = vmul.f32 %v20977_v63, %v16216_v38 }
 0xa93   : > { %v16239_v22 = vmul.f32 %v20979_v5, %v16217_v53 }
 0xa94   : > { %16248 = vst [vmem:[%s24496_s28 + $0x20] sm:$0x3f] %v16237_v48  ;;  %v16262_v54 = vmul.f32 %v24498_v45, %v16237_v48 }
 0xa95   : > { %16249 = vst [vmem:[%s24496_s28 + $0x28] sm:$0x3f] %v16239_v22  ;;  %v16263_v8 = vmul.f32 %v24498_v45, %v16239_v22 }
 0xa96   : > { %v16295_v34 = vsel %vm16266_vm7, %v16262_v54, 0.0 }
 0xa97   : > { %v16296_v56 = vrot.slane %v16295_v34, 4  ;;  %v16302_v0 = vsel %vm16266_vm7, %v16263_v8, 0.0 }
 0xa98   : > { %v16303_v2 = vrot.slane %v16302_v0, 4 }
 0xa99   : > { %v16297_v40 = vadd.f32 %v16296_v56, %v16295_v34 }
 0xa9a   : > { %v16304_v17 = vadd.f32 %v16303_v2, %v16302_v0 }
 0xa9b   : > { %v16298_v58 = vrot.slane %v16297_v40, 2 }
 0xa9c   : > { %v16305_v49 = vrot.slane %v16304_v17, 2 }
 0xa9d   : > { %v16299_v23 = vadd.f32 %v16298_v58, %v16297_v40 }
 0xa9e   : > { %v16306_v39 = vadd.f32 %v16305_v49, %v16304_v17 }
 0xa9f   : > { %v16300_v7 = vrot.slane %v16299_v23, 1 }
 0xaa0   : > { %v16307_v37 = vrot.slane %v16306_v39, 1 }
 0xaa1   : > { %v16301_v6 = vadd.f32 %v16300_v7, %v16299_v23 }
 0xaa2   : > { %v16308_v27 = vadd.f32 %v16307_v37, %v16306_v39 }
 0xaa3   : > { %v16327_v26 = vand.u32 2147483647, %v16301_v6  ;;  %vm16359_vm8 = vcmp.ge.f32.partialorder %v16301_v6, 0.0 }
 0xaa4   : > { %v16328_v19 = vand.u32 2147483647, %v16308_v27  ;;  %vm16360_vm9 = vcmp.ge.f32.partialorder %v16308_v27, 0.0 }
 0xaa5   : > { %v16335_v46 = vsub.f32 0.0, %v16327_v26 }
 0xaa6   : > { %v16336_v50 = vsub.f32 0.0, %v16328_v19 }
 0xaa7   : > { %v16347_v51 = vmul.f32 1.442695, %v16335_v46 }
 0xaa8   : > { %v16349_v59 = vmul.f32 1.442695, %v16336_v50 }
 0xaa9   : > { %20980 = vpow2.f32 %v16347_v51 }
 0xaaa   : > { %20982 = vpow2.f32 %v16349_v59 }
 0xab3   : > { %v20981_v44 = vpop.eup %20980 }
 0xab4   : > { %v20983_v36 = vpop.eup %20982  ;;  %v16375_v52 = vadd.f32 1.0, %v20981_v44  ;;  %v16367_v24 = vsel %vm16359_vm8, 1.0, %v20981_v44 }
 0xab5   : > { %v16376_v35 = vadd.f32 1.0, %v20983_v36  ;;  %v16368_v28 = vsel %vm16360_vm9, 1.0, %v20983_v36 }
 0xab6   : > { %20984 = vrcp.f32 %v16375_v52 }
 0xab7   : > { %20986 = vrcp.f32 %v16376_v35 }
 0xac0   : > { %v20985_v30 = vpop.eup %20984 }
 0xac1   : > { %v20987_v4 = vpop.eup %20986  ;;  %v24506_v3 = vmul.f32 %v20985_v30, %v16367_v24 }
 0xac2   : > { %v24508_v21 = vmul.f32 %v20987_v4, %v16368_v28 }
 0xac4   : > { %v16405_v47 = vcombine.low %v24506_v3, %v24508_v21 }
 0xad3   : > { %v16034_v61 = vpop.f32.mrb[32].mxu0 }
 0xad4   : > { %v16172_v10 = vand.u32 2147483647, %v16034_v61  ;;  %v16036_v33 = vpop.f32.mrb[33].mxu0  ;;  %vm16204_vm10 = vcmp.ge.f32.partialorder %v16034_v61, 0.0 }
 0xad5   : > { %v16173_v29 = vand.u32 2147483647, %v16036_v33  ;;  %v16038_v18 = vpop.f32.mrb[34].mxu0  ;;  %vm16205_vm11 = vcmp.ge.f32.partialorder %v16036_v33, 0.0 }
 0xad6   : > { %v16180_v15 = vsub.f32 0.0, %v16172_v10  ;;  %v16039_v9 = vpop.f32.mrb[35].mxu0 }
 0xad7   : > { %v16181_v32 = vsub.f32 0.0, %v16173_v29 }
 0xad8   : > { %v16188_v20 = vmul.f32 1.442695, %v16180_v15 }
 0xad9   : > { %v16190_v25 = vmul.f32 1.442695, %v16181_v32 }
 0xada   : > { %20988 = vpow2.f32 %v16188_v20 }
 0xadb   : > { %20990 = vpow2.f32 %v16190_v25  ;;  %v16075_v13 = vpop.f32.mrb[36].mxu0 }
 0xadc   : > { %v16174_v31 = vand.u32 2147483647, %v16075_v13  ;;  %v24512_v62 = vpop.f32.mrb[37].mxu0  ;;  %vm16206_vm12 = vcmp.ge.f32.partialorder %v16075_v13, 0.0 }
 0xadd   : > { %v16175_v42 = vand.u32 2147483647, %v24512_v62  ;;  %v16079_v43 = vpop.f32.mrb[38].mxu0  ;;  %vm16207_vm13 = vcmp.ge.f32.partialorder %v24512_v62, 0.0 }
 0xade   : > { %v16182_v60 = vsub.f32 0.0, %v16174_v31  ;;  %v16080_v41 = vpop.f32.mrb[39].mxu0 }
 0xadf   : > { %v16183_v12 = vsub.f32 0.0, %v16175_v42 }
 0xae0   : > { %v16192_v57 = vmul.f32 1.442695, %v16182_v60 }
 0xae1   : > { %v16194_v16 = vmul.f32 1.442695, %v16183_v12 }
 0xae2   : > { %20992 = vpow2.f32 %v16192_v57 }
 0xae3   : > { %20994 = vpow2.f32 %v16194_v16  ;;  %v24515_v55 = vpop.f32.mrb[40].mxu0 }
 0xae4   : > { %v20989_v11 = vpop.eup %20988  ;;  %v16178_v1 = vand.u32 2147483647, %v24515_v55  ;;  %v24518_v63 = vpop.f32.mrb[41].mxu0  ;;  %vm16210_vm14 = vcmp.ge.f32.partialorder %v24515_v55, 0.0 }
 0xae5   : > { %v20991_v38 = vpop.eup %20990  ;;  %v16220_v5 = vadd.f32 1.0, %v20989_v11  ;;  %v16179_v48 = vand.u32 2147483647, %v24518_v63  ;;  %v16161_v53 = vpop.f32.mrb[42].mxu0  ;;  %v16212_v23 = vsel %vm16204_vm10, 1.0, %v20989_v11  ;;  %vm16211_vm15 = vcmp.ge.f32.partialorder %v24518_v63, 0.0 }
 0xae6   : > { %v16221_v22 = vadd.f32 1.0, %v20991_v38  ;;  %v16186_v54 = vsub.f32 0.0, %v16178_v1  ;;  %v16162_v8 = vpop.f32.mrb[43].mxu0  ;;  %v16213_v37 = vsel %vm16205_vm11, 1.0, %v20991_v38 }
 0xae7   : > { %20996 = vrcp.f32 %v16220_v5  ;;  %v16187_v34 = vsub.f32 0.0, %v16179_v48 }
 0xae8   : > { %20998 = vrcp.f32 %v16221_v22  ;;  %v16200_v56 = vmul.f32 1.442695, %v16186_v54 }
 0xae9   : > { %v16202_v0 = vmul.f32 1.442695, %v16187_v34 }
 0xaea   : > { %21000 = vpow2.f32 %v16200_v56 }
 0xaeb   : > { %21002 = vpow2.f32 %v16202_v0 }
 0xaec   : > { %v20993_v2 = vpop.eup %20992 }
 0xaed   : > { %v20995_v40 = vpop.eup %20994  ;;  %v16222_v17 = vadd.f32 1.0, %v20993_v2  ;;  %v16214_v24 = vsel %vm16206_vm12, 1.0, %v20993_v2 }
 0xaee   : > { %v16223_v58 = vadd.f32 1.0, %v20995_v40  ;;  %v16215_v10 = vsel %vm16207_vm13, 1.0, %v20995_v40 }
 0xaef   : > { %21004 = vrcp.f32 %v16222_v17 }
 0xaf0   : > { %21006 = vrcp.f32 %v16223_v58 }
 0xaf1   : > { %v20997_v49 = vpop.eup %20996 }
 0xaf2   : > { %v20999_v39 = vpop.eup %20998  ;;  %v16229_v7 = vmul.f32 %v20997_v49, %v16212_v23 }
 0xaf3   : > { %v16231_v6 = vmul.f32 %v20999_v39, %v16213_v37 }
 0xaf4   : > { %v21001_v27 = vpop.eup %21000  ;;  %16244 = vst [vmem:[%s24496_s28] sm:$0x3f] %v16229_v7  ;;  %v16258_v26 = vmul.f32 %v24498_v45, %v16229_v7 }
 0xaf5   : > { %v21003_v19 = vpop.eup %21002  ;;  %16245 = vst [vmem:[%s24496_s28 + $0x8] sm:$0x3f] %v16231_v6  ;;  %v16259_v46 = vmul.f32 %v24498_v45, %v16231_v6  ;;  %v16226_v50 = vadd.f32 1.0, %v21001_v27  ;;  %v16218_v57 = vsel %vm16210_vm14, 1.0, %v21001_v27 }
 0xaf6   : > { %v16267_v51 = vsel %vm16266_vm7, %v16258_v26, 0.0  ;;  %v16227_v59 = vadd.f32 1.0, %v21003_v19  ;;  %v16219_v5 = vsel %vm16211_vm15, 1.0, %v21003_v19 }
 0xaf7   : > { %v16268_v44 = vrot.slane %v16267_v51, 4  ;;  %v16274_v36 = vsel %vm16266_vm7, %v16259_v46, 0.0  ;;  %21008 = vrcp.f32 %v16226_v50 }
 0xaf8   : > { %v16275_v52 = vrot.slane %v16274_v36, 4  ;;  %21010 = vrcp.f32 %v16227_v59 }
 0xaf9   : > { %v21005_v35 = vpop.eup %21004  ;;  %v16269_v30 = vadd.f32 %v16268_v44, %v16267_v51 }
 0xafa   : > { %v21007_v4 = vpop.eup %21006  ;;  %v16276_v28 = vadd.f32 %v16275_v52, %v16274_v36  ;;  %v16233_v61 = vmul.f32 %v21005_v35, %v16214_v24 }
 0xafb   : > { %v16270_v33 = vrot.slane %v16269_v30, 2  ;;  %v16235_v29 = vmul.f32 %v21007_v4, %v16215_v10 }
 0xafc   : > { %v16277_v18 = vrot.slane %v16276_v28, 2  ;;  %16246 = vst [vmem:[%s24496_s28 + $0x10] sm:$0x3f] %v16233_v61  ;;  %v16260_v15 = vmul.f32 %v24498_v45, %v16233_v61 }
 0xafd   : > { %v16271_v9 = vadd.f32 %v16270_v33, %v16269_v30  ;;  %16247 = vst [vmem:[%s24496_s28 + $0x18] sm:$0x3f] %v16235_v29  ;;  %v16261_v32 = vmul.f32 %v24498_v45, %v16235_v29 }
 0xafe   : > { %v16278_v20 = vadd.f32 %v16277_v18, %v16276_v28  ;;  %v16281_v25 = vsel %vm16266_vm7, %v16260_v15, 0.0 }
 0xaff   : > { %v16272_v13 = vrot.slane %v16271_v9, 1  ;;  %v16282_v31 = vrot.slane %v16281_v25, 4  ;;  %v16288_v62 = vsel %vm16266_vm7, %v16261_v32, 0.0 }
 0xb00   : > { %v16279_v42 = vrot.slane %v16278_v20, 1  ;;  %v16289_v43 = vrot.slane %v16288_v62, 4 }
 0xb01   : > { %v21009_v60 = vpop.eup %21008  ;;  %v24535_v41 = vadd.f32 %v16272_v13, %v16271_v9  ;;  %v16283_v12 = vadd.f32 %v16282_v31, %v16281_v25 }
 0xb02   : > { %v21011_v16 = vpop.eup %21010  ;;  %v24538_v11 = vadd.f32 %v16279_v42, %v16278_v20  ;;  %v16290_v1 = vadd.f32 %v16289_v43, %v16288_v62  ;;  %v16241_v38 = vmul.f32 %v21009_v60, %v16218_v57 }
 0xb03   : > { %v16323_v48 = vand.u32 2147483647, %v24535_v41  ;;  %v16284_v53 = vrot.slane %v16283_v12, 2  ;;  %v16243_v22 = vmul.f32 %v21011_v16, %v16219_v5  ;;  %vm16355_vm0 = vcmp.ge.f32.partialorder %v24535_v41, 0.0 }
 0xb04   : > { %v16324_v55 = vand.u32 2147483647, %v24538_v11  ;;  %v16291_v54 = vrot.slane %v16290_v1, 2  ;;  %16250 = vst [vmem:[%s24496_s28 + $0x30] sm:$0x3f] %v16241_v38  ;;  %v16264_v8 = vmul.f32 %v24498_v45, %v16241_v38  ;;  %vm16356_vm1 = vcmp.ge.f32.partialorder %v24538_v11, 0.0 }
 0xb05   : > { %v16331_v34 = vsub.f32 0.0, %v16323_v48  ;;  %v16285_v56 = vadd.f32 %v16284_v53, %v16283_v12  ;;  %16251 = vst [vmem:[%s24496_s28 + $0x38] sm:$0x3f] %v16243_v22  ;;  %v16265_v63 = vmul.f32 %v24498_v45, %v16243_v22  ;;  %v21048_v53 = vmov 1966171168  }
 0xb06   : > { %v16332_v0 = vsub.f32 0.0, %v16324_v55  ;;  %v16292_v2 = vadd.f32 %v16291_v54, %v16290_v1  ;;  %v16309_v40 = vsel %vm16266_vm7, %v16264_v8, 0.0  ;;  %v16408_v22 = vunpack.c.l.s4 %v21048_v53 }
 0xb07   : > { %v16339_v17 = vmul.f32 1.442695, %v16331_v34  ;;  %v16286_v58 = vrot.slane %v16285_v56, 1  ;;  %v16310_v49 = vrot.slane %v16309_v40, 4  ;;  %v16316_v23 = vsel %vm16266_vm7, %v16265_v63, 0.0 }
 0xb08   : > { %v16341_v39 = vmul.f32 1.442695, %v16332_v0  ;;  %v16293_v7 = vrot.slane %v16292_v2, 1  ;;  %v16317_v37 = vrot.slane %v16316_v23, 4  ;;  %v16409_v34 = vunpack.c.0.s8 %v16408_v22 }
 0xb09   : > { %21012 = vpow2.f32 %v16339_v17  ;;  %v16287_v6 = vadd.f32 %v16286_v58, %v16285_v56  ;;  %v16311_v27 = vadd.f32 %v16310_v49, %v16309_v40 }
 0xb0a   : > { %21014 = vpow2.f32 %v16341_v39  ;;  %v24548_v26 = vadd.f32 %v16293_v7, %v16292_v2  ;;  %v16318_v19 = vadd.f32 %v16317_v37, %v16316_v23  ;;  %v16412_v40 = vsub.s32 %v16409_v34, %v24082_v14 }
 0xb0b   : > { %v16325_v45 = vand.u32 2147483647, %v16287_v6  ;;  %v16312_v46 = vrot.slane %v16311_v27, 2  ;;  %vm16357_vm2 = vcmp.ge.f32.partialorder %v16287_v6, 0.0 }
 0xb0c   : > { %v16326_v50 = vand.u32 2147483647, %v24548_v26  ;;  %v16319_v51 = vrot.slane %v16318_v19, 2  ;;  %vm16358_vm3 = vcmp.ge.f32.partialorder %v24548_v26, 0.0 }
 0xb0d   : > { %v16333_v59 = vsub.f32 0.0, %v16325_v45  ;;  %v16313_v44 = vadd.f32 %v16312_v46, %v16311_v27  ;;  %v16427_v45 = vrot.slane %v16405_v47, %v16412_v40 }
 0xb0e   : > { %v16334_v36 = vsub.f32 0.0, %v16326_v50  ;;  %v16320_v52 = vadd.f32 %v16319_v51, %v16318_v19 }
 0xb0f   : > { %v16343_v35 = vmul.f32 1.442695, %v16333_v59  ;;  %v16314_v30 = vrot.slane %v16313_v44, 1 }
 0xb10   : > { %v16345_v24 = vmul.f32 1.442695, %v16334_v36  ;;  %v16321_v4 = vrot.slane %v16320_v52, 1 }
 0xb11   : > { %21016 = vpow2.f32 %v16343_v35  ;;  %v16315_v28 = vadd.f32 %v16314_v30, %v16313_v44 }
 0xb12   : > { %21018 = vpow2.f32 %v16345_v24  ;;  %v16322_v61 = vadd.f32 %v16321_v4, %v16320_v52 }
 0xb13   : > { %v21013_v10 = vpop.eup %21012  ;;  %v16329_v33 = vand.u32 2147483647, %v16315_v28  ;;  %vm16361_vm4 = vcmp.ge.f32.partialorder %v16315_v28, 0.0 }
 0xb14   : > { %v21015_v29 = vpop.eup %21014  ;;  %v16371_v18 = vadd.f32 1.0, %v21013_v10  ;;  %v16330_v15 = vand.u32 2147483647, %v16322_v61  ;;  %v16363_v12 = vsel %vm16355_vm0, 1.0, %v21013_v10  ;;  %vm16362_vm5 = vcmp.ge.f32.partialorder %v16322_v61, 0.0 }
 0xb15   : > { %v16372_v9 = vadd.f32 1.0, %v21015_v29  ;;  %v16337_v32 = vsub.f32 0.0, %v16329_v33  ;;  %v16364_v1 = vsel %vm16356_vm1, 1.0, %v21015_v29 }
 0xb16   : > { %21020 = vrcp.f32 %v16371_v18  ;;  %v16338_v20 = vsub.f32 0.0, %v16330_v15 }
 0xb17   : > { %21022 = vrcp.f32 %v16372_v9  ;;  %v16351_v25 = vmul.f32 1.442695, %v16337_v32 }
 0xb18   : > { %v16353_v13 = vmul.f32 1.442695, %v16338_v20 }
 0xb19   : > { %21024 = vpow2.f32 %v16351_v25 }
 0xb1a   : > { %21026 = vpow2.f32 %v16353_v13 }
 0xb1b   : > { %v21017_v31 = vpop.eup %21016 }
 0xb1c   : > { %v21019_v62 = vpop.eup %21018  ;;  %v16373_v42 = vadd.f32 1.0, %v21017_v31  ;;  %v16365_v56 = vsel %vm16357_vm2, 1.0, %v21017_v31 }
 0xb1d   : > { %v16374_v43 = vadd.f32 1.0, %v21019_v62  ;;  %v16366_v0 = vsel %vm16358_vm3, 1.0, %v21019_v62 }
 0xb1e   : > { %21028 = vrcp.f32 %v16373_v42 }
 0xb1f   : > { %21030 = vrcp.f32 %v16374_v43 }
 0xb20   : > { %v21021_v60 = vpop.eup %21020 }
 0xb21   : > { %v21023_v57 = vpop.eup %21022  ;;  %v16380_v16 = vmul.f32 %v21021_v60, %v16363_v12 }
 0xb22   : > { %v16382_v38 = vmul.f32 %v21023_v57, %v16364_v1 }
 0xb23   : > { %v21025_v5 = vpop.eup %21024 }
 0xb24   : > { %v21027_v48 = vpop.eup %21026  ;;  %v16403_v55 = vcombine.low %v16380_v16, %v16382_v38  ;;  %v16377_v54 = vadd.f32 1.0, %v21025_v5  ;;  %v16369_v7 = vsel %vm16361_vm4, 1.0, %v21025_v5 }
 0xb25   : > { %v16378_v8 = vadd.f32 1.0, %v21027_v48  ;;  %v16370_v27 = vsel %vm16362_vm5, 1.0, %v21027_v48 }
 0xb26   : > { %21032 = vrcp.f32 %v16377_v54  ;;  %v16413_v58 = vrot.slane %v16403_v55, %v16412_v40 }
 0xb27   : > { %21034 = vrcp.f32 %v16378_v8 }
 0xb28   : > { %v21029_v41 = vpop.eup %21028 }
 0xb29   : > { %v21031_v11 = vpop.eup %21030  ;;  %v16384_v63 = vmul.f32 %v21029_v41, %v16365_v56 }
 0xb2a   : > { %v16386_v2 = vmul.f32 %v21031_v11, %v16366_v0 }
 0xb2c   : > { %v16404_v17 = vcombine.low %v16384_v63, %v16386_v2 }
 0xb2e   : > { %v16420_v49 = vrot.slane %v16404_v17, %v16412_v40 }
 0xb30   : > { %v21033_v23 = vpop.eup %21032  ;;  %v16435_v39 = vcombine.low %v16413_v58, %v16420_v49 }
 0xb31   : > { %v21035_v37 = vpop.eup %21034  ;;  %v16392_v6 = vmul.f32 %v21033_v23, %v16369_v7 }
 0xb32   : > { %v16394_v19 = vmul.f32 %v21035_v37, %v16370_v27  ;;  %v16443_v50 = vrot.slane %v16435_v39, %v16412_v40 }
 0xb34   : > { %v16406_v26 = vcombine.low %v16392_v6, %v16394_v19 }
 0xb36   : > { %v16434_v46 = vrot.slane %v16406_v26, %v16412_v40 }
 0xb38   : > { %v16436_v14 = vcombine.low %v16427_v45, %v16434_v46 }
 0xb3a   : > { %v16450_v51 = vrot.slane %v16436_v14, %v16412_v40 }
 0xb3c   : > { %v16451_v59 = vcombine.low %v16443_v50, %v16450_v51 }
 0xb3e   : > { %16453 = vst [vmem:[%s491_s19] sm:$0xff] %v16451_v59 }
 0xb3f PF: > { %s24_s25 = sadd.s32 1, %s21042_s25  }
 0xb40   : > { %p21_p4 = scmp.ge.s32.totalorder %s24_s25, 4  }
 0xb42   :  { %23 = sbr.rel (!%p21_p4) target bundleno = 1 (0x1), region = 144 }

</bundles_post_ra>
